<compile_context>
chip_gen: v7x
topology: tpu7x:2x2x1
jax: 0.10.0
libtpu: 0.0.40
codegen_flags: <defaults>
</compile_context>

<pallas_src>
import functools

import jax
import jax.numpy as jnp
from jax.experimental import pallas as pl
from jax.experimental.pallas import tpu as pltpu


_DEF_TM = 1024   # row tile for the 1x1x1-conv matmul kernels


# ---------------------------------------------------------------------------
# Kernel bodies
# ---------------------------------------------------------------------------

def _expand_split_bn_relu_kernel(x_ref, w_ref, sh_ref, od_ref, or_ref, *, dc):
    """1x1x1 conv (BN scale folded into w) + shift + ReLU, channel-split output."""
    y = jnp.dot(x_ref[...], w_ref[...], preferred_element_type=jnp.float32)
    y = jnp.maximum(y + sh_ref[...], 0.0)
    od_ref[...] = y[:, :dc].astype(od_ref.dtype)     # depthwise-branch channels
    or_ref[...] = y[:, dc:].astype(or_ref.dtype)     # bypass ("rest") channels


def _dw_bn_relu_kernel(*refs, k, D):
    """Depthwise KxKxK conv + BN1 shift + ReLU for one (n, d) output plane.

    refs = (x_plane_0 .. x_plane_{k-1}, w_ref, sh_ref, o_ref, acc_ref).
    x_plane_kd is the input D-plane at clamp(d + kd - pad); taps whose source
    plane falls outside [0, D) are skipped (zero 'same' padding in D).  H/W
    'same' padding is handled by static sub-region accumulation into the f32
    VMEM scratch, so no padded activation copy is needed in HBM.
    """
    xs = refs[:k]
    w_ref, sh_ref, o_ref, acc_ref = refs[k:]
    d = pl.program_id(1)
    pad = k // 2
    _, _, H, W, C = acc_ref.shape

    acc_ref[...] = jnp.zeros_like(acc_ref)
    w = w_ref[...]                                    # (k, k, k, C) f32

    def accumulate(kd):
        x = xs[kd][...].astype(jnp.float32)           # (1, 1, H, W, C)
        for kh in range(k):
            dh = kh - pad
            oh0, oh1 = max(0, -dh), min(H, H - dh)
            if oh1 <= oh0:
                continue
            for kw in range(k):
                dw = kw - pad
                ow0, ow1 = max(0, -dw), min(W, W - dw)
                if ow1 <= ow0:
                    continue
                tap = w[kd:kd + 1, kh, kw, :]         # (1, C)
                acc_ref[:, :, oh0:oh1, ow0:ow1, :] = (
                    acc_ref[:, :, oh0:oh1, ow0:ow1, :]
                    + x[:, :, oh0 + dh:oh1 + dh, ow0 + dw:ow1 + dw, :] * tap)

    for kd in range(k):
        src_d = d + kd - pad
        if kd == pad:
            accumulate(kd)                            # center tap: always valid
        elif kd < pad:
            pl.when(src_d >= 0)(functools.partial(accumulate, kd))
        else:
            pl.when(src_d < D)(functools.partial(accumulate, kd))

    y = acc_ref[...] + sh_ref[...]
    o_ref[...] = jnp.maximum(y, 0.0).astype(o_ref.dtype)


def _project_bn_kernel(rest_ref, dx_ref, w2_ref, w1_ref, sh_ref, o_ref):
    """Both projection 1x1x1 convs (weights zero-padded to full ouc) + BN shift."""
    y = jnp.dot(rest_ref[...].astype(jnp.float32), w2_ref[...],
                preferred_element_type=jnp.float32)
    y = y + jnp.dot(dx_ref[...].astype(jnp.float32), w1_ref[...],
                    preferred_element_type=jnp.float32)
    o_ref[...] = (y + sh_ref[...]).astype(o_ref.dtype)


def _project_bn_res_kernel(rest_ref, dx_ref, w2_ref, w1_ref, sh_ref, res_ref,
                           o_ref):
    """Same as above plus the fused residual add."""
    y = jnp.dot(rest_ref[...].astype(jnp.float32), w2_ref[...],
                preferred_element_type=jnp.float32)
    y = y + jnp.dot(dx_ref[...].astype(jnp.float32), w1_ref[...],
                    preferred_element_type=jnp.float32)
    y = y + sh_ref[...] + res_ref[...].astype(jnp.float32)
    o_ref[...] = y.astype(o_ref.dtype)


# ---------------------------------------------------------------------------
# pallas_call wrappers
# ---------------------------------------------------------------------------

def _round_up(v, m):
    return (v + m - 1) // m * m


def _pad_rows(a, rows):
    return a if rows == 0 else jnp.pad(a, ((0, rows), (0, 0)))


def expand_split_bn_relu(x2d, w, shift, dc, *, tm=_DEF_TM,
                         out_dtype=jnp.bfloat16):
    """x2d: (M, Cin) f32; w: (Cin, Cout) with BN scale folded; shift: (Cout,).

    Returns (h_depth (M, dc), h_rest (M, Cout - dc)) in out_dtype.
    """
    M, Cin = x2d.shape
    Cout = w.shape[1]
    tm = min(tm, _round_up(M, 8))
    Mp = pl.cdiv(M, tm) * tm
    xs = _pad_rows(x2d, Mp - M)
    sh = shift.reshape(1, Cout).astype(jnp.float32)

    h_depth, h_rest = pl.pallas_call(
        functools.partial(_expand_split_bn_relu_kernel, dc=dc),
        out_shape=(jax.ShapeDtypeStruct((Mp, dc), out_dtype),
                   jax.ShapeDtypeStruct((Mp, Cout - dc), out_dtype)),
        grid=(Mp // tm,),
        in_specs=[pl.BlockSpec((tm, Cin), lambda i: (i, 0)),
                  pl.BlockSpec((Cin, Cout), lambda i: (0, 0)),
                  pl.BlockSpec((1, Cout), lambda i: (0, 0))],
        out_specs=(pl.BlockSpec((tm, dc), lambda i: (i, 0)),
                   pl.BlockSpec((tm, Cout - dc), lambda i: (i, 0))),
        compiler_params=pltpu.CompilerParams(dimension_semantics=("parallel",)),
    )(xs, w.astype(jnp.float32), sh)
    if Mp != M:
        h_depth, h_rest = h_depth[:M], h_rest[:M]
    return h_depth, h_rest


def depthwise_conv_bn_relu(x, w, shift, *, out_dtype=jnp.bfloat16):
    """x: (N, D, H, W, C); w: (k, k, k, C) with BN scale folded; shift: (C,).

    stride == 1, 'same' (k // 2) zero padding handled in-kernel (no HBM pad).
    Grid (N, D): one output D-plane per step; the k source planes arrive as k
    halo-shifted BlockSpec views of the same input array.
    """
    N, D, H, W, C = x.shape
    k = w.shape[0]
    assert k % 2 == 1, "even kernel_size padding would not match the PyTorch conv"
    pad = k // 2
    sh = shift.reshape(1, C).astype(jnp.float32)

    def plane_spec(kd):
        def imap(n, d):
            src = jnp.maximum(jnp.minimum(d + kd - pad, D - 1), 0)
            return (n, src, 0, 0, 0)
        return pl.BlockSpec((1, 1, H, W, C), imap)

    in_specs = [plane_spec(kd) for kd in range(k)]
    in_specs.append(pl.BlockSpec((k, k, k, C), lambda n, d: (0, 0, 0, 0)))
    in_specs.append(pl.BlockSpec((1, C), lambda n, d: (0, 0)))

    return pl.pallas_call(
        functools.partial(_dw_bn_relu_kernel, k=k, D=D),
        out_shape=jax.ShapeDtypeStruct((N, D, H, W, C), out_dtype),
        grid=(N, D),
        in_specs=in_specs,
        out_specs=pl.BlockSpec((1, 1, H, W, C), lambda n, d: (n, d, 0, 0, 0)),
        scratch_shapes=[pltpu.VMEM((1, 1, H, W, C), jnp.float32)],
        compiler_params=pltpu.CompilerParams(
            dimension_semantics=("parallel", "parallel")),
    )(*([x] * k), w.astype(jnp.float32), sh)


def project_concat_bn(rest2d, dx2d, w2, w1, shift, *, residual=None,
                      tm=_DEF_TM, out_dtype=jnp.float32):
    """Fused `concat(proj2(rest), proj1(dx))` + BN2 shift (+ residual).

    rest2d: (M, c_rest); dx2d: (M, c_dep); w2: (c_rest, nonproj);
    w1: (c_dep, proj); shift: (ouc,); residual: optional (M, ouc).
    """
    M = rest2d.shape[0]
    nonproj, proj = w2.shape[1], w1.shape[1]
    ouc = nonproj + proj
    tm = min(tm, _round_up(M, 8))
    Mp = pl.cdiv(M, tm) * tm
    rest2d = _pad_rows(rest2d, Mp - M)
    dx2d = _pad_rows(dx2d, Mp - M)
    if residual is not None:
        residual = _pad_rows(residual, Mp - M)

    # Zero-pad both projection weights to full output width so the two matmuls
    # accumulate straight into one lane-contiguous (tm, ouc) tile.
    w2f = jnp.pad(w2.astype(jnp.float32), ((0, 0), (0, proj)))
    w1f = jnp.pad(w1.astype(jnp.float32), ((0, 0), (nonproj, 0)))
    sh = shift.reshape(1, ouc).astype(jnp.float32)

    row = lambda c: pl.BlockSpec((tm, c), lambda i: (i, 0))
    full = lambda a: pl.BlockSpec(a.shape, lambda i: (0, 0))
    common = dict(
        out_shape=jax.ShapeDtypeStruct((Mp, ouc), out_dtype),
        grid=(Mp // tm,),
        out_specs=row(ouc),
        compiler_params=pltpu.CompilerParams(dimension_semantics=("parallel",)),
    )
    if residual is not None:
        out = pl.pallas_call(
            _project_bn_res_kernel,
            in_specs=[row(rest2d.shape[1]), row(dx2d.shape[1]),
                      full(w2f), full(w1f), full(sh), row(ouc)],
            **common,
        )(rest2d, dx2d, w2f, w1f, sh, residual)
    else:
        out = pl.pallas_call(
            _project_bn_kernel,
            in_specs=[row(rest2d.shape[1]), row(dx2d.shape[1]),
                      full(w2f), full(w1f), full(sh)],
            **common,
        )(rest2d, dx2d, w2f, w1f, sh)
    return out[:M] if Mp != M else out


# ---------------------------------------------------------------------------
# Parameter construction (deterministic, synthetic)
# ---------------------------------------------------------------------------

def init_params(key, inc, ouc, kernel_size, stride, expand_ratio, min_ratio=2,
                bn_eps=1e-3):
    expc = int(round(ouc * expand_ratio))
    depth_chann = int(round(ouc * min_ratio))
    nondepth_chann = expc - depth_chann
    project_chann = int(round(min_ratio / expand_ratio * ouc))
    nonproject_chann = ouc - project_chann
    assert expand_ratio != 1 and nondepth_chann > 0 and nonproject_chann > 0

    ks = jax.random.split(key, 16)

    def bn_fold(kg, kb, km, kv, c):
        gamma = 1.0 + 0.1 * jax.random.normal(kg, (c,), jnp.float32)
        beta = 0.1 * jax.random.normal(kb, (c,), jnp.float32)
        mean = 0.1 * jax.random.normal(km, (c,), jnp.float32)
        var = 1.0 + 0.5 * jax.random.uniform(kv, (c,), jnp.float32)
        scale = gamma * jax.lax.rsqrt(var + bn_eps)
        shift = beta - mean * scale
        return scale, shift

    w_expand = 0.2 * jax.random.normal(ks[0], (inc, expc), jnp.float32)
    bn0_scale, bn0_shift = bn_fold(ks[1], ks[2], ks[3], ks[4], expc)
    w_dw = 0.2 * jax.random.normal(
        ks[5], (kernel_size, kernel_size, kernel_size, depth_chann), jnp.float32)
    bn1_scale, bn1_shift = bn_fold(ks[6], ks[7], ks[8], ks[9], depth_chann)
    w_proj1 = 0.2 * jax.random.normal(ks[10], (depth_chann, project_chann), jnp.float32)
    w_proj2 = 0.2 * jax.random.normal(
        ks[11], (nondepth_chann, nonproject_chann), jnp.float32)
    bn2_scale, bn2_shift = bn_fold(ks[12], ks[13], ks[14], ks[15], ouc)

    cfg = dict(inc=inc, ouc=ouc, stride=stride, depth_chann=depth_chann,
               nondepth_chann=nondepth_chann, project_chann=project_chann,
               nonproject_chann=nonproject_chann, expc=expc)
    return dict(cfg=cfg, w_expand=w_expand, bn0_scale=bn0_scale, bn0_shift=bn0_shift,
                w_dw=w_dw, bn1_scale=bn1_scale, bn1_shift=bn1_shift,
                w_proj1=w_proj1, w_proj2=w_proj2,
                bn2_scale=bn2_scale, bn2_shift=bn2_shift)


# ---------------------------------------------------------------------------
# X3DTransform forward (Pallas)
# ---------------------------------------------------------------------------

def x3d_transform_forward(inputs_ncdhw, p, *, tm=_DEF_TM):
    """inputs: (N, inc, D, H, W) like the PyTorch module; returns (N, ouc, D, H, W)."""
    cfg = p["cfg"]
    assert cfg["stride"] == 1          # TODO(synk): stride != 1 / avg-pool bypass
    assert cfg["nondepth_chann"] > 0 and cfg["nonproject_chann"] > 0

    x = jnp.transpose(inputs_ncdhw, (0, 2, 3, 4, 1)).astype(jnp.float32)  # NDHWC
    N, D, H, W, Cin = x.shape
    M = N * D * H * W
    x2d = x.reshape(M, Cin)

    dc = cfg["depth_chann"]
    nonproj = cfg["nonproject_chann"]

    # Fold the BN scales into the conv weights (compile-time constants under
    # jit); only the per-channel shift add remains inside the kernels.
    w_exp = p["w_expand"] * p["bn0_scale"][None, :]
    w_dw = p["w_dw"] * p["bn1_scale"]
    w_p2 = p["w_proj2"] * p["bn2_scale"][:nonproj][None, :]
    w_p1 = p["w_proj1"] * p["bn2_scale"][nonproj:][None, :]

    # 1) _expand_conv + _bn0 + ReLU; channel-split at the source (bf16 outputs).
    h_depth2d, h_rest2d = expand_split_bn_relu(x2d, w_exp, p["bn0_shift"], dc, tm=tm)

    # 2) _depthwise_conv + _bn1 + ReLU (bf16 output, padding fused in-kernel).
    dx = depthwise_conv_bn_relu(h_depth2d.reshape(N, D, H, W, dc),
                                w_dw, p["bn1_shift"])

    # 3) _project_conv2 / _project_conv1 + _bn2 (+ residual) in one kernel.
    use_res = (cfg["inc"] == cfg["ouc"]) and (cfg["stride"] == 1)
    out2d = project_concat_bn(h_rest2d, dx.reshape(M, dc), w_p2, w_p1,
                              p["bn2_shift"],
                              residual=x2d if use_res else None,
                              tm=tm, out_dtype=inputs_ncdhw.dtype)
    out = out2d.reshape(N, D, H, W, cfg["ouc"])
    return jnp.transpose(out, (0, 4, 1, 2, 3))  # back to NCDHW


# ---------------------------------------------------------------------------
# Pure-JAX reference (same semantics, no Pallas) for verification
# ---------------------------------------------------------------------------

def reference_forward(inputs_ncdhw, p):
    cfg = p["cfg"]
    x = jnp.transpose(inputs_ncdhw, (0, 2, 3, 4, 1)).astype(jnp.float32)
    h = jnp.einsum("ndhwc,ce->ndhwe", x, p["w_expand"])
    h = jnp.maximum(h * p["bn0_scale"] + p["bn0_shift"], 0.0)

    dc = cfg["depth_chann"]
    depth_x, rest = h[..., :dc], h[..., dc:]

    k = p["w_dw"].shape[0]
    pad = k // 2
    s = cfg["stride"]
    N, D, H, W, _ = depth_x.shape
    Do = (D + 2 * pad - k) // s + 1
    Ho = (H + 2 * pad - k) // s + 1
    Wo = (W + 2 * pad - k) // s + 1
    xp = jnp.pad(depth_x, ((0, 0), (pad, pad), (pad, pad), (pad, pad), (0, 0)))
    acc = jnp.zeros((N, Do, Ho, Wo, dc), jnp.float32)
    for kd in range(k):
        for kh in range(k):
            for kw in range(k):
                acc = acc + xp[:, kd:kd + s * Do:s, kh:kh + s * Ho:s,
                               kw:kw + s * Wo:s, :] * p["w_dw"][kd, kh, kw]
    dx = jnp.maximum(acc * p["bn1_scale"] + p["bn1_shift"], 0.0)

    y2 = jnp.einsum("ndhwc,co->ndhwo", rest, p["w_proj2"])
    y1 = jnp.einsum("ndhwc,co->ndhwo", dx, p["w_proj1"])
    y = jnp.concatenate([y2, y1], axis=-1)
    y = y * p["bn2_scale"] + p["bn2_shift"]
    if cfg["inc"] == cfg["ouc"] and cfg["stride"] == 1:
        y = y + x
    return jnp.transpose(y, (0, 4, 1, 2, 3))


# ---------------------------------------------------------------------------

if __name__ == "__main__":
    # Module config: inc == ouc and stride == 1 -> residual path active.
    # inc=ouc=32, expand_ratio=4, min_ratio=2 -> expc=128, depth=64, rest=64:
    # small but lane-friendly channel widths for the TPU kernels.
    inc, ouc = 32, 32
    kernel_size, stride = 3, 1
    expand_ratio, min_ratio = 4, 2
    N, D, H, W = 2, 8, 8, 8   # M = N*D*H*W = 1024 matmul rows

    x = jax.random.normal(jax.random.PRNGKey(0), (N, inc, D, H, W), jnp.float32)
    params = init_params(jax.random.PRNGKey(1), inc, ouc, kernel_size, stride,
                         expand_ratio, min_ratio)

    fwd = jax.jit(lambda a: x3d_transform_forward(a, params))
    out = jax.block_until_ready(fwd(x))

    ref = jax.block_until_ready(reference_forward(x, params))
    assert out.shape == (N, ouc, D, H, W)
    assert bool(jnp.all(jnp.isfinite(out)))
    # bf16 intermediates between kernels -> modest tolerance vs. all-f32 ref.
    assert bool(jnp.allclose(out, ref, atol=1e-1, rtol=1e-2)), float(
        jnp.max(jnp.abs(out - ref)))

    print("KERNEL_OK")
</pallas_src>

<mosaic_0001>
module attributes {stable_mosaic.version = 11 : i64} {
  func.func @_expand_split_bn_relu_kernel(%arg0: i32, %arg1: memref<1024x32xf32, #tpu.memory_space<vmem>>, %arg2: memref<32x128xf32, #tpu.memory_space<vmem>>, %arg3: memref<1x128xf32, #tpu.memory_space<vmem>>, %arg4: memref<1024x64xbf16, #tpu.memory_space<vmem>>, %arg5: memref<1024x64xbf16, #tpu.memory_space<vmem>>) attributes {dimension_semantics = [#tpu.dimension_semantics<parallel>], iteration_bounds = array<i64: 1>, scalar_prefetch = 0 : i64, scratch_operands = 0 : i64, tpu.core_type = #tpu.core_type<tc>, window_params = [{transform_indices = @transform_0, window_bounds = array<i64: 1024, 32>}, {pipeline_mode = #tpu.pipeline_mode<synchronous>, transform_indices = @transform_1, window_bounds = array<i64: 32, 128>}, {pipeline_mode = #tpu.pipeline_mode<synchronous>, transform_indices = @transform_2, window_bounds = array<i64: 1, 128>}, {transform_indices = @transform_3, window_bounds = array<i64: 1024, 64>}, {transform_indices = @transform_4, window_bounds = array<i64: 1024, 64>}]} {
    %c0 = arith.constant 0 : index
    %c0_0 = arith.constant 0 : index
    %0 = vector.load %arg1[%c0, %c0_0] : memref<1024x32xf32, #tpu.memory_space<vmem>>, vector<1024x32xf32>
    %c0_1 = arith.constant 0 : index
    %c0_2 = arith.constant 0 : index
    %1 = vector.load %arg2[%c0_1, %c0_2] : memref<32x128xf32, #tpu.memory_space<vmem>>, vector<32x128xf32>
    %cst = arith.constant dense<0.000000e+00> : vector<1024x128xf32>
    %2 = tpu.matmul %0, %1, %cst {dimension_numbers = #tpu.dot_dimension_numbers<[1], [0], [0], [1], [0, 0, 1, 1], [], []>} : vector<1024x32xf32>, vector<32x128xf32>, vector<1024x128xf32> -> vector<1024x128xf32>
    %c0_3 = arith.constant 0 : index
    %c0_4 = arith.constant 0 : index
    %3 = vector.load %arg3[%c0_3, %c0_4] : memref<1x128xf32, #tpu.memory_space<vmem>>, vector<1x128xf32>
    %4 = vector.broadcast %3 : vector<1x128xf32> to vector<1024x128xf32>
    %5 = arith.addf %2, %4 : vector<1024x128xf32>
    %cst_5 = arith.constant 0.000000e+00 : f32
    %6 = vector.broadcast %cst_5 : f32 to vector<1024x128xf32>
    %7 = arith.maximumf %5, %6 : vector<1024x128xf32>
    %8 = vector.extract_strided_slice %7 {offsets = [0, 0], sizes = [1024, 64], strides = [1, 1]} : vector<1024x128xf32> to vector<1024x64xf32>
    %9 = arith.truncf %8 : vector<1024x64xf32> to vector<1024x64xbf16>
    %c0_6 = arith.constant 0 : index
    %c0_7 = arith.constant 0 : index
    %10 = vector.load %arg4[%c0_6, %c0_7] : memref<1024x64xbf16, #tpu.memory_space<vmem>>, vector<1024x64xbf16>
    tpu.vector_store %arg4[%c0_6, %c0_7], %9 {strides = array<i32>} : memref<1024x64xbf16, #tpu.memory_space<vmem>>, vector<1024x64xbf16>,
    %11 = vector.extract_strided_slice %7 {offsets = [0, 64], sizes = [1024, 64], strides = [1, 1]} : vector<1024x128xf32> to vector<1024x64xf32>
    %12 = arith.truncf %11 : vector<1024x64xf32> to vector<1024x64xbf16>
    %c0_8 = arith.constant 0 : index
    %c0_9 = arith.constant 0 : index
    %13 = vector.load %arg5[%c0_8, %c0_9] : memref<1024x64xbf16, #tpu.memory_space<vmem>>, vector<1024x64xbf16>
    tpu.vector_store %arg5[%c0_8, %c0_9], %12 {strides = array<i32>} : memref<1024x64xbf16, #tpu.memory_space<vmem>>, vector<1024x64xbf16>,
    return
  }
  func.func @transform_0(%arg0: i32) -> (i32, i32) {
    %c0_i32 = arith.constant 0 : i32
    %c0_i32_0 = arith.constant 0 : i32
    return %arg0, %c0_i32 : i32, i32
  }
  func.func @transform_1(%arg0: i32) -> (i32, i32) {
    %c0_i32 = arith.constant 0 : i32
    %c0_i32_0 = arith.constant 0 : i32
    %c0_i32_1 = arith.constant 0 : i32
    return %c0_i32, %c0_i32_0 : i32, i32
  }
  func.func @transform_2(%arg0: i32) -> (i32, i32) {
    %c0_i32 = arith.constant 0 : i32
    %c0_i32_0 = arith.constant 0 : i32
    %c0_i32_1 = arith.constant 0 : i32
    return %c0_i32, %c0_i32_0 : i32, i32
  }
  func.func @transform_3(%arg0: i32) -> (i32, i32) {
    %c0_i32 = arith.constant 0 : i32
    %c0_i32_0 = arith.constant 0 : i32
    return %arg0, %c0_i32 : i32, i32
  }
  func.func @transform_4(%arg0: i32) -> (i32, i32) {
    %c0_i32 = arith.constant 0 : i32
    %c0_i32_0 = arith.constant 0 : i32
    return %arg0, %c0_i32 : i32, i32
  }
}

module attributes {stable_mosaic.version = 11 : i64} {
  func.func @_dw_bn_relu_kernel(%arg0: i32, %arg1: i32, %arg2: memref<1x1x8x8x64xbf16, #tpu.memory_space<vmem>>, %arg3: memref<1x1x8x8x64xbf16, #tpu.memory_space<vmem>>, %arg4: memref<1x1x8x8x64xbf16, #tpu.memory_space<vmem>>, %arg5: memref<3x3x3x64xf32, #tpu.memory_space<vmem>>, %arg6: memref<1x64xf32, #tpu.memory_space<vmem>>, %arg7: memref<1x1x8x8x64xbf16, #tpu.memory_space<vmem>>, %arg8: memref<1x1x8x8x64xf32, #tpu.memory_space<vmem>>) attributes {dimension_semantics = [#tpu.dimension_semantics<parallel>, #tpu.dimension_semantics<parallel>], iteration_bounds = array<i64: 2, 8>, scalar_prefetch = 0 : i64, scratch_operands = 1 : i64, tpu.core_type = #tpu.core_type<tc>, window_params = [{transform_indices = @transform_0, window_bounds = array<i64: 1, 1, 8, 8, 64>}, {transform_indices = @transform_1, window_bounds = array<i64: 1, 1, 8, 8, 64>}, {transform_indices = @transform_2, window_bounds = array<i64: 1, 1, 8, 8, 64>}, {pipeline_mode = #tpu.pipeline_mode<synchronous>, transform_indices = @transform_3, window_bounds = array<i64: 3, 3, 3, 64>}, {pipeline_mode = #tpu.pipeline_mode<synchronous>, transform_indices = @transform_4, window_bounds = array<i64: 1, 64>}, {transform_indices = @transform_5, window_bounds = array<i64: 1, 1, 8, 8, 64>}]} {
    %cst = arith.constant 0.000000e+00 : f32
    %0 = vector.broadcast %cst : f32 to vector<1x1x8x8x64xf32>
    %c0 = arith.constant 0 : index
    %c0_0 = arith.constant 0 : index
    %c0_1 = arith.constant 0 : index
    %c0_2 = arith.constant 0 : index
    %c0_3 = arith.constant 0 : index
    %1 = vector.load %arg8[%c0, %c0_0, %c0_1, %c0_2, %c0_3] : memref<1x1x8x8x64xf32, #tpu.memory_space<vmem>>, vector<1x1x8x8x64xf32>
    tpu.vector_store %arg8[%c0, %c0_0, %c0_1, %c0_2, %c0_3], %0 {strides = array<i32>} : memref<1x1x8x8x64xf32, #tpu.memory_space<vmem>>, vector<1x1x8x8x64xf32>,
    %c0_4 = arith.constant 0 : index
    %c0_5 = arith.constant 0 : index
    %c0_6 = arith.constant 0 : index
    %c0_7 = arith.constant 0 : index
    %2 = vector.load %arg5[%c0_4, %c0_5, %c0_6, %c0_7] : memref<3x3x3x64xf32, #tpu.memory_space<vmem>>, vector<3x3x3x64xf32>
    %c0_i32 = arith.constant 0 : i32
    %3 = arith.addi %arg1, %c0_i32 : i32
    %c1_i32 = arith.constant 1 : i32
    %4 = arith.subi %3, %c1_i32 : i32
    %c0_i32_8 = arith.constant 0 : i32
    %5 = arith.cmpi sge, %4, %c0_i32_8 : i32
    %6 = arith.extui %5 : i1 to i32
    %c0_i32_9 = arith.constant 0 : i32
    %7 = arith.cmpi ne, %6, %c0_i32_9 : i32
    scf.if %7 {
      %c0_119 = arith.constant 0 : index
      %c0_120 = arith.constant 0 : index
      %c0_121 = arith.constant 0 : index
      %c0_122 = arith.constant 0 : index
      %c0_123 = arith.constant 0 : index
      %104 = vector.load %arg2[%c0_119, %c0_120, %c0_121, %c0_122, %c0_123] : memref<1x1x8x8x64xbf16, #tpu.memory_space<vmem>>, vector<1x1x8x8x64xbf16>
      %105 = arith.extf %104 : vector<1x1x8x8x64xbf16> to vector<1x1x8x8x64xf32>
      %106 = vector.extract_strided_slice %2 {offsets = [0, 0, 0, 0], sizes = [1, 1, 1, 64], strides = [1, 1, 1, 1]} : vector<3x3x3x64xf32> to vector<1x1x1x64xf32>
      %107 = vector.shape_cast %106 : vector<1x1x1x64xf32> to vector<1x64xf32>
      %c0_124 = arith.constant 0 : index
      %c0_125 = arith.constant 0 : index
      %c1_126 = arith.constant 1 : index
      %c1_127 = arith.constant 1 : index
      %c0_128 = arith.constant 0 : index
      %108 = vector.load %arg8[%c0_124, %c0_125, %c1_126, %c1_127, %c0_128] : memref<1x1x8x8x64xf32, #tpu.memory_space<vmem>>, vector<1x1x7x7x64xf32>
      %109 = vector.extract_strided_slice %105 {offsets = [0, 0, 0, 0, 0], sizes = [1, 1, 7, 7, 64], strides = [1, 1, 1, 1, 1]} : vector<1x1x8x8x64xf32> to vector<1x1x7x7x64xf32>
      %110 = vector.shape_cast %107 : vector<1x64xf32> to vector<1x1x1x1x64xf32>
      %111 = vector.broadcast %110 : vector<1x1x1x1x64xf32> to vector<1x1x7x7x64xf32>
      %112 = arith.mulf %109, %111 : vector<1x1x7x7x64xf32>
      %113 = arith.addf %108, %112 : vector<1x1x7x7x64xf32>
      %c0_129 = arith.constant 0 : index
      %c0_130 = arith.constant 0 : index
      %c1_131 = arith.constant 1 : index
      %c1_132 = arith.constant 1 : index
      %c0_133 = arith.constant 0 : index
      %114 = vector.load %arg8[%c0_129, %c0_130, %c1_131, %c1_132, %c0_133] : memref<1x1x8x8x64xf32, #tpu.memory_space<vmem>>, vector<1x1x7x7x64xf32>
      tpu.vector_store %arg8[%c0_129, %c0_130, %c1_131, %c1_132, %c0_133], %113 {strides = array<i32>} : memref<1x1x8x8x64xf32, #tpu.memory_space<vmem>>, vector<1x1x7x7x64xf32>,
      %115 = vector.extract_strided_slice %2 {offsets = [0, 0, 1, 0], sizes = [1, 1, 1, 64], strides = [1, 1, 1, 1]} : vector<3x3x3x64xf32> to vector<1x1x1x64xf32>
      %116 = vector.shape_cast %115 : vector<1x1x1x64xf32> to vector<1x64xf32>
      %c0_134 = arith.constant 0 : index
      %c0_135 = arith.constant 0 : index
      %c1_136 = arith.constant 1 : index
      %c0_137 = arith.constant 0 : index
      %c0_138 = arith.constant 0 : index
      %117 = vector.load %arg8[%c0_134, %c0_135, %c1_136, %c0_137, %c0_138] : memref<1x1x8x8x64xf32, #tpu.memory_space<vmem>>, vector<1x1x7x8x64xf32>
      %118 = vector.extract_strided_slice %105 {offsets = [0, 0, 0, 0, 0], sizes = [1, 1, 7, 8, 64], strides = [1, 1, 1, 1, 1]} : vector<1x1x8x8x64xf32> to vector<1x1x7x8x64xf32>
      %119 = vector.shape_cast %116 : vector<1x64xf32> to vector<1x1x1x1x64xf32>
      %120 = vector.broadcast %119 : vector<1x1x1x1x64xf32> to vector<1x1x7x8x64xf32>
      %121 = arith.mulf %118, %120 : vector<1x1x7x8x64xf32>
      %122 = arith.addf %117, %121 : vector<1x1x7x8x64xf32>
      %c0_139 = arith.constant 0 : index
      %c0_140 = arith.constant 0 : index
      %c1_141 = arith.constant 1 : index
      %c0_142 = arith.constant 0 : index
      %c0_143 = arith.constant 0 : index
      %123 = vector.load %arg8[%c0_139, %c0_140, %c1_141, %c0_142, %c0_143] : memref<1x1x8x8x64xf32, #tpu.memory_space<vmem>>, vector<1x1x7x8x64xf32>
      tpu.vector_store %arg8[%c0_139, %c0_140, %c1_141, %c0_142, %c0_143], %122 {strides = array<i32>} : memref<1x1x8x8x64xf32, #tpu.memory_space<vmem>>, vector<1x1x7x8x64xf32>,
      %124 = vector.extract_strided_slice %2 {offsets = [0, 0, 2, 0], sizes = [1, 1, 1, 64], strides = [1, 1, 1, 1]} : vector<3x3x3x64xf32> to vector<1x1x1x64xf32>
      %125 = vector.shape_cast %124 : vector<1x1x1x64xf32> to vector<1x64xf32>
      %c0_144 = arith.constant 0 : index
      %c0_145 = arith.constant 0 : index
      %c1_146 = arith.constant 1 : index
      %c0_147 = arith.constant 0 : index
      %c0_148 = arith.constant 0 : index
      %126 = vector.load %arg8[%c0_144, %c0_145, %c1_146, %c0_147, %c0_148] : memref<1x1x8x8x64xf32, #tpu.memory_space<vmem>>, vector<1x1x7x7x64xf32>
      %127 = vector.extract_strided_slice %105 {offsets = [0, 0, 0, 1, 0], sizes = [1, 1, 7, 7, 64], strides = [1, 1, 1, 1, 1]} : vector<1x1x8x8x64xf32> to vector<1x1x7x7x64xf32>
      %128 = vector.shape_cast %125 : vector<1x64xf32> to vector<1x1x1x1x64xf32>
      %129 = vector.broadcast %128 : vector<1x1x1x1x64xf32> to vector<1x1x7x7x64xf32>
      %130 = arith.mulf %127, %129 : vector<1x1x7x7x64xf32>
      %131 = arith.addf %126, %130 : vector<1x1x7x7x64xf32>
      %c0_149 = arith.constant 0 : index
      %c0_150 = arith.constant 0 : index
      %c1_151 = arith.constant 1 : index
      %c0_152 = arith.constant 0 : index
      %c0_153 = arith.constant 0 : index
      %132 = vector.load %arg8[%c0_149, %c0_150, %c1_151, %c0_152, %c0_153] : memref<1x1x8x8x64xf32, #tpu.memory_space<vmem>>, vector<1x1x7x7x64xf32>
      tpu.vector_store %arg8[%c0_149, %c0_150, %c1_151, %c0_152, %c0_153], %131 {strides = array<i32>} : memref<1x1x8x8x64xf32, #tpu.memory_space<vmem>>, vector<1x1x7x7x64xf32>,
      %133 = vector.extract_strided_slice %2 {offsets = [0, 1, 0, 0], sizes = [1, 1, 1, 64], strides = [1, 1, 1, 1]} : vector<3x3x3x64xf32> to vector<1x1x1x64xf32>
      %134 = vector.shape_cast %133 : vector<1x1x1x64xf32> to vector<1x64xf32>
      %c0_154 = arith.constant 0 : index
      %c0_155 = arith.constant 0 : index
      %c0_156 = arith.constant 0 : index
      %c1_157 = arith.constant 1 : index
      %c0_158 = arith.constant 0 : index
      %135 = vector.load %arg8[%c0_154, %c0_155, %c0_156, %c1_157, %c0_158] : memref<1x1x8x8x64xf32, #tpu.memory_space<vmem>>, vector<1x1x8x7x64xf32>
      %136 = vector.extract_strided_slice %105 {offsets = [0, 0, 0, 0, 0], sizes = [1, 1, 8, 7, 64], strides = [1, 1, 1, 1, 1]} : vector<1x1x8x8x64xf32> to vector<1x1x8x7x64xf32>
      %137 = vector.shape_cast %134 : vector<1x64xf32> to vector<1x1x1x1x64xf32>
      %138 = vector.broadcast %137 : vector<1x1x1x1x64xf32> to vector<1x1x8x7x64xf32>
      %139 = arith.mulf %136, %138 : vector<1x1x8x7x64xf32>
      %140 = arith.addf %135, %139 : vector<1x1x8x7x64xf32>
      %c0_159 = arith.constant 0 : index
      %c0_160 = arith.constant 0 : index
      %c0_161 = arith.constant 0 : index
      %c1_162 = arith.constant 1 : index
      %c0_163 = arith.constant 0 : index
      %141 = vector.load %arg8[%c0_159, %c0_160, %c0_161, %c1_162, %c0_163] : memref<1x1x8x8x64xf32, #tpu.memory_space<vmem>>, vector<1x1x8x7x64xf32>
      tpu.vector_store %arg8[%c0_159, %c0_160, %c0_161, %c1_162, %c0_163], %140 {strides = array<i32>} : memref<1x1x8x8x64xf32, #tpu.memory_space<vmem>>, vector<1x1x8x7x64xf32>,
      %142 = vector.extract_strided_slice %2 {offsets = [0, 1, 1, 0], sizes = [1, 1, 1, 64], strides = [1, 1, 1, 1]} : vector<3x3x3x64xf32> to vector<1x1x1x64xf32>
      %143 = vector.shape_cast %142 : vector<1x1x1x64xf32> to vector<1x64xf32>
      %c0_164 = arith.constant 0 : index
      %c0_165 = arith.constant 0 : index
      %c0_166 = arith.constant 0 : index
      %c0_167 = arith.constant 0 : index
      %c0_168 = arith.constant 0 : index
      %144 = vector.load %arg8[%c0_164, %c0_165, %c0_166, %c0_167, %c0_168] : memref<1x1x8x8x64xf32, #tpu.memory_space<vmem>>, vector<1x1x8x8x64xf32>
      %145 = vector.shape_cast %143 : vector<1x64xf32> to vector<1x1x1x1x64xf32>
      %146 = vector.broadcast %145 : vector<1x1x1x1x64xf32> to vector<1x1x8x8x64xf32>
      %147 = arith.mulf %105, %146 : vector<1x1x8x8x64xf32>
      %148 = arith.addf %144, %147 : vector<1x1x8x8x64xf32>
      %c0_169 = arith.constant 0 : index
      %c0_170 = arith.constant 0 : index
      %c0_171 = arith.constant 0 : index
      %c0_172 = arith.constant 0 : index
      %c0_173 = arith.constant 0 : index
      %149 = vector.load %arg8[%c0_169, %c0_170, %c0_171, %c0_172, %c0_173] : memref<1x1x8x8x64xf32, #tpu.memory_space<vmem>>, vector<1x1x8x8x64xf32>
      tpu.vector_store %arg8[%c0_169, %c0_170, %c0_171, %c0_172, %c0_173], %148 {strides = array<i32>} : memref<1x1x8x8x64xf32, #tpu.memory_space<vmem>>, vector<1x1x8x8x64xf32>,
      %150 = vector.extract_strided_slice %2 {offsets = [0, 1, 2, 0], sizes = [1, 1, 1, 64], strides = [1, 1, 1, 1]} : vector<3x3x3x64xf32> to vector<1x1x1x64xf32>
      %151 = vector.shape_cast %150 : vector<1x1x1x64xf32> to vector<1x64xf32>
      %c0_174 = arith.constant 0 : index
      %c0_175 = arith.constant 0 : index
      %c0_176 = arith.constant 0 : index
      %c0_177 = arith.constant 0 : index
      %c0_178 = arith.constant 0 : index
      %152 = vector.load %arg8[%c0_174, %c0_175, %c0_176, %c0_177, %c0_178] : memref<1x1x8x8x64xf32, #tpu.memory_space<vmem>>, vector<1x1x8x7x64xf32>
      %153 = vector.extract_strided_slice %105 {offsets = [0, 0, 0, 1, 0], sizes = [1, 1, 8, 7, 64], strides = [1, 1, 1, 1, 1]} : vector<1x1x8x8x64xf32> to vector<1x1x8x7x64xf32>
      %154 = vector.shape_cast %151 : vector<1x64xf32> to vector<1x1x1x1x64xf32>
      %155 = vector.broadcast %154 : vector<1x1x1x1x64xf32> to vector<1x1x8x7x64xf32>
      %156 = arith.mulf %153, %155 : vector<1x1x8x7x64xf32>
      %157 = arith.addf %152, %156 : vector<1x1x8x7x64xf32>
      %c0_179 = arith.constant 0 : index
      %c0_180 = arith.constant 0 : index
      %c0_181 = arith.constant 0 : index
      %c0_182 = arith.constant 0 : index
      %c0_183 = arith.constant 0 : index
      %158 = vector.load %arg8[%c0_179, %c0_180, %c0_181, %c0_182, %c0_183] : memref<1x1x8x8x64xf32, #tpu.memory_space<vmem>>, vector<1x1x8x7x64xf32>
      tpu.vector_store %arg8[%c0_179, %c0_180, %c0_181, %c0_182, %c0_183], %157 {strides = array<i32>} : memref<1x1x8x8x64xf32, #tpu.memory_space<vmem>>, vector<1x1x8x7x64xf32>,
      %159 = vector.extract_strided_slice %2 {offsets = [0, 2, 0, 0], sizes = [1, 1, 1, 64], strides = [1, 1, 1, 1]} : vector<3x3x3x64xf32> to vector<1x1x1x64xf32>
      %160 = vector.shape_cast %159 : vector<1x1x1x64xf32> to vector<1x64xf32>
      %c0_184 = arith.constant 0 : index
      %c0_185 = arith.constant 0 : index
      %c0_186 = arith.constant 0 : index
      %c1_187 = arith.constant 1 : index
      %c0_188 = arith.constant 0 : index
      %161 = vector.load %arg8[%c0_184, %c0_185, %c0_186, %c1_187, %c0_188] : memref<1x1x8x8x64xf32, #tpu.memory_space<vmem>>, vector<1x1x7x7x64xf32>
      %162 = vector.extract_strided_slice %105 {offsets = [0, 0, 1, 0, 0], sizes = [1, 1, 7, 7, 64], strides = [1, 1, 1, 1, 1]} : vector<1x1x8x8x64xf32> to vector<1x1x7x7x64xf32>
      %163 = vector.shape_cast %160 : vector<1x64xf32> to vector<1x1x1x1x64xf32>
      %164 = vector.broadcast %163 : vector<1x1x1x1x64xf32> to vector<1x1x7x7x64xf32>
      %165 = arith.mulf %162, %164 : vector<1x1x7x7x64xf32>
      %166 = arith.addf %161, %165 : vector<1x1x7x7x64xf32>
      %c0_189 = arith.constant 0 : index
      %c0_190 = arith.constant 0 : index
      %c0_191 = arith.constant 0 : index
      %c1_192 = arith.constant 1 : index
      %c0_193 = arith.constant 0 : index
      %167 = vector.load %arg8[%c0_189, %c0_190, %c0_191, %c1_192, %c0_193] : memref<1x1x8x8x64xf32, #tpu.memory_space<vmem>>, vector<1x1x7x7x64xf32>
      tpu.vector_store %arg8[%c0_189, %c0_190, %c0_191, %c1_192, %c0_193], %166 {strides = array<i32>} : memref<1x1x8x8x64xf32, #tpu.memory_space<vmem>>, vector<1x1x7x7x64xf32>,
      %168 = vector.extract_strided_slice %2 {offsets = [0, 2, 1, 0], sizes = [1, 1, 1, 64], strides = [1, 1, 1, 1]} : vector<3x3x3x64xf32> to vector<1x1x1x64xf32>
      %169 = vector.shape_cast %168 : vector<1x1x1x64xf32> to vector<1x64xf32>
      %c0_194 = arith.constant 0 : index
      %c0_195 = arith.constant 0 : index
      %c0_196 = arith.constant 0 : index
      %c0_197 = arith.constant 0 : index
      %c0_198 = arith.constant 0 : index
      %170 = vector.load %arg8[%c0_194, %c0_195, %c0_196, %c0_197, %c0_198] : memref<1x1x8x8x64xf32, #tpu.memory_space<vmem>>, vector<1x1x7x8x64xf32>
      %171 = vector.extract_strided_slice %105 {offsets = [0, 0, 1, 0, 0], sizes = [1, 1, 7, 8, 64], strides = [1, 1, 1, 1, 1]} : vector<1x1x8x8x64xf32> to vector<1x1x7x8x64xf32>
      %172 = vector.shape_cast %169 : vector<1x64xf32> to vector<1x1x1x1x64xf32>
      %173 = vector.broadcast %172 : vector<1x1x1x1x64xf32> to vector<1x1x7x8x64xf32>
      %174 = arith.mulf %171, %173 : vector<1x1x7x8x64xf32>
      %175 = arith.addf %170, %174 : vector<1x1x7x8x64xf32>
      %c0_199 = arith.constant 0 : index
      %c0_200 = arith.constant 0 : index
      %c0_201 = arith.constant 0 : index
      %c0_202 = arith.constant 0 : index
      %c0_203 = arith.constant 0 : index
      %176 = vector.load %arg8[%c0_199, %c0_200, %c0_201, %c0_202, %c0_203] : memref<1x1x8x8x64xf32, #tpu.memory_space<vmem>>, vector<1x1x7x8x64xf32>
      tpu.vector_store %arg8[%c0_199, %c0_200, %c0_201, %c0_202, %c0_203], %175 {strides = array<i32>} : memref<1x1x8x8x64xf32, #tpu.memory_space<vmem>>, vector<1x1x7x8x64xf32>,
      %177 = vector.extract_strided_slice %2 {offsets = [0, 2, 2, 0], sizes = [1, 1, 1, 64], strides = [1, 1, 1, 1]} : vector<3x3x3x64xf32> to vector<1x1x1x64xf32>
      %178 = vector.shape_cast %177 : vector<1x1x1x64xf32> to vector<1x64xf32>
      %c0_204 = arith.constant 0 : index
      %c0_205 = arith.constant 0 : index
      %c0_206 = arith.constant 0 : index
      %c0_207 = arith.constant 0 : index
      %c0_208 = arith.constant 0 : index
      %179 = vector.load %arg8[%c0_204, %c0_205, %c0_206, %c0_207, %c0_208] : memref<1x1x8x8x64xf32, #tpu.memory_space<vmem>>, vector<1x1x7x7x64xf32>
      %180 = vector.extract_strided_slice %105 {offsets = [0, 0, 1, 1, 0], sizes = [1, 1, 7, 7, 64], strides = [1, 1, 1, 1, 1]} : vector<1x1x8x8x64xf32> to vector<1x1x7x7x64xf32>
      %181 = vector.shape_cast %178 : vector<1x64xf32> to vector<1x1x1x1x64xf32>
      %182 = vector.broadcast %181 : vector<1x1x1x1x64xf32> to vector<1x1x7x7x64xf32>
      %183 = arith.mulf %180, %182 : vector<1x1x7x7x64xf32>
      %184 = arith.addf %179, %183 : vector<1x1x7x7x64xf32>
      %c0_209 = arith.constant 0 : index
      %c0_210 = arith.constant 0 : index
      %c0_211 = arith.constant 0 : index
      %c0_212 = arith.constant 0 : index
      %c0_213 = arith.constant 0 : index
      %185 = vector.load %arg8[%c0_209, %c0_210, %c0_211, %c0_212, %c0_213] : memref<1x1x8x8x64xf32, #tpu.memory_space<vmem>>, vector<1x1x7x7x64xf32>
      tpu.vector_store %arg8[%c0_209, %c0_210, %c0_211, %c0_212, %c0_213], %184 {strides = array<i32>} : memref<1x1x8x8x64xf32, #tpu.memory_space<vmem>>, vector<1x1x7x7x64xf32>,
    } else {
    }
    %c0_10 = arith.constant 0 : index
    %c0_11 = arith.constant 0 : index
    %c0_12 = arith.constant 0 : index
    %c0_13 = arith.constant 0 : index
    %c0_14 = arith.constant 0 : index
    %8 = vector.load %arg3[%c0_10, %c0_11, %c0_12, %c0_13, %c0_14] : memref<1x1x8x8x64xbf16, #tpu.memory_space<vmem>>, vector<1x1x8x8x64xbf16>
    %9 = arith.extf %8 : vector<1x1x8x8x64xbf16> to vector<1x1x8x8x64xf32>
    %10 = vector.extract_strided_slice %2 {offsets = [1, 0, 0, 0], sizes = [1, 1, 1, 64], strides = [1, 1, 1, 1]} : vector<3x3x3x64xf32> to vector<1x1x1x64xf32>
    %11 = vector.shape_cast %10 : vector<1x1x1x64xf32> to vector<1x64xf32>
    %c0_15 = arith.constant 0 : index
    %c0_16 = arith.constant 0 : index
    %c1 = arith.constant 1 : index
    %c1_17 = arith.constant 1 : index
    %c0_18 = arith.constant 0 : index
    %12 = vector.load %arg8[%c0_15, %c0_16, %c1, %c1_17, %c0_18] : memref<1x1x8x8x64xf32, #tpu.memory_space<vmem>>, vector<1x1x7x7x64xf32>
    %13 = vector.extract_strided_slice %9 {offsets = [0, 0, 0, 0, 0], sizes = [1, 1, 7, 7, 64], strides = [1, 1, 1, 1, 1]} : vector<1x1x8x8x64xf32> to vector<1x1x7x7x64xf32>
    %14 = vector.shape_cast %11 : vector<1x64xf32> to vector<1x1x1x1x64xf32>
    %15 = vector.broadcast %14 : vector<1x1x1x1x64xf32> to vector<1x1x7x7x64xf32>
    %16 = arith.mulf %13, %15 : vector<1x1x7x7x64xf32>
    %17 = arith.addf %12, %16 : vector<1x1x7x7x64xf32>
    %c0_19 = arith.constant 0 : index
    %c0_20 = arith.constant 0 : index
    %c1_21 = arith.constant 1 : index
    %c1_22 = arith.constant 1 : index
    %c0_23 = arith.constant 0 : index
    %18 = vector.load %arg8[%c0_19, %c0_20, %c1_21, %c1_22, %c0_23] : memref<1x1x8x8x64xf32, #tpu.memory_space<vmem>>, vector<1x1x7x7x64xf32>
    tpu.vector_store %arg8[%c0_19, %c0_20, %c1_21, %c1_22, %c0_23], %17 {strides = array<i32>} : memref<1x1x8x8x64xf32, #tpu.memory_space<vmem>>, vector<1x1x7x7x64xf32>,
    %19 = vector.extract_strided_slice %2 {offsets = [1, 0, 1, 0], sizes = [1, 1, 1, 64], strides = [1, 1, 1, 1]} : vector<3x3x3x64xf32> to vector<1x1x1x64xf32>
    %20 = vector.shape_cast %19 : vector<1x1x1x64xf32> to vector<1x64xf32>
    %c0_24 = arith.constant 0 : index
    %c0_25 = arith.constant 0 : index
    %c1_26 = arith.constant 1 : index
    %c0_27 = arith.constant 0 : index
    %c0_28 = arith.constant 0 : index
    %21 = vector.load %arg8[%c0_24, %c0_25, %c1_26, %c0_27, %c0_28] : memref<1x1x8x8x64xf32, #tpu.memory_space<vmem>>, vector<1x1x7x8x64xf32>
    %22 = vector.extract_strided_slice %9 {offsets = [0, 0, 0, 0, 0], sizes = [1, 1, 7, 8, 64], strides = [1, 1, 1, 1, 1]} : vector<1x1x8x8x64xf32> to vector<1x1x7x8x64xf32>
    %23 = vector.shape_cast %20 : vector<1x64xf32> to vector<1x1x1x1x64xf32>
    %24 = vector.broadcast %23 : vector<1x1x1x1x64xf32> to vector<1x1x7x8x64xf32>
    %25 = arith.mulf %22, %24 : vector<1x1x7x8x64xf32>
    %26 = arith.addf %21, %25 : vector<1x1x7x8x64xf32>
    %c0_29 = arith.constant 0 : index
    %c0_30 = arith.constant 0 : index
    %c1_31 = arith.constant 1 : index
    %c0_32 = arith.constant 0 : index
    %c0_33 = arith.constant 0 : index
    %27 = vector.load %arg8[%c0_29, %c0_30, %c1_31, %c0_32, %c0_33] : memref<1x1x8x8x64xf32, #tpu.memory_space<vmem>>, vector<1x1x7x8x64xf32>
    tpu.vector_store %arg8[%c0_29, %c0_30, %c1_31, %c0_32, %c0_33], %26 {strides = array<i32>} : memref<1x1x8x8x64xf32, #tpu.memory_space<vmem>>, vector<1x1x7x8x64xf32>,
    %28 = vector.extract_strided_slice %2 {offsets = [1, 0, 2, 0], sizes = [1, 1, 1, 64], strides = [1, 1, 1, 1]} : vector<3x3x3x64xf32> to vector<1x1x1x64xf32>
    %29 = vector.shape_cast %28 : vector<1x1x1x64xf32> to vector<1x64xf32>
    %c0_34 = arith.constant 0 : index
    %c0_35 = arith.constant 0 : index
    %c1_36 = arith.constant 1 : index
    %c0_37 = arith.constant 0 : index
    %c0_38 = arith.constant 0 : index
    %30 = vector.load %arg8[%c0_34, %c0_35, %c1_36, %c0_37, %c0_38] : memref<1x1x8x8x64xf32, #tpu.memory_space<vmem>>, vector<1x1x7x7x64xf32>
    %31 = vector.extract_strided_slice %9 {offsets = [0, 0, 0, 1, 0], sizes = [1, 1, 7, 7, 64], strides = [1, 1, 1, 1, 1]} : vector<1x1x8x8x64xf32> to vector<1x1x7x7x64xf32>
    %32 = vector.shape_cast %29 : vector<1x64xf32> to vector<1x1x1x1x64xf32>
    %33 = vector.broadcast %32 : vector<1x1x1x1x64xf32> to vector<1x1x7x7x64xf32>
    %34 = arith.mulf %31, %33 : vector<1x1x7x7x64xf32>
    %35 = arith.addf %30, %34 : vector<1x1x7x7x64xf32>
    %c0_39 = arith.constant 0 : index
    %c0_40 = arith.constant 0 : index
    %c1_41 = arith.constant 1 : index
    %c0_42 = arith.constant 0 : index
    %c0_43 = arith.constant 0 : index
    %36 = vector.load %arg8[%c0_39, %c0_40, %c1_41, %c0_42, %c0_43] : memref<1x1x8x8x64xf32, #tpu.memory_space<vmem>>, vector<1x1x7x7x64xf32>
    tpu.vector_store %arg8[%c0_39, %c0_40, %c1_41, %c0_42, %c0_43], %35 {strides = array<i32>} : memref<1x1x8x8x64xf32, #tpu.memory_space<vmem>>, vector<1x1x7x7x64xf32>,
    %37 = vector.extract_strided_slice %2 {offsets = [1, 1, 0, 0], sizes = [1, 1, 1, 64], strides = [1, 1, 1, 1]} : vector<3x3x3x64xf32> to vector<1x1x1x64xf32>
    %38 = vector.shape_cast %37 : vector<1x1x1x64xf32> to vector<1x64xf32>
    %c0_44 = arith.constant 0 : index
    %c0_45 = arith.constant 0 : index
    %c0_46 = arith.constant 0 : index
    %c1_47 = arith.constant 1 : index
    %c0_48 = arith.constant 0 : index
    %39 = vector.load %arg8[%c0_44, %c0_45, %c0_46, %c1_47, %c0_48] : memref<1x1x8x8x64xf32, #tpu.memory_space<vmem>>, vector<1x1x8x7x64xf32>
    %40 = vector.extract_strided_slice %9 {offsets = [0, 0, 0, 0, 0], sizes = [1, 1, 8, 7, 64], strides = [1, 1, 1, 1, 1]} : vector<1x1x8x8x64xf32> to vector<1x1x8x7x64xf32>
    %41 = vector.shape_cast %38 : vector<1x64xf32> to vector<1x1x1x1x64xf32>
    %42 = vector.broadcast %41 : vector<1x1x1x1x64xf32> to vector<1x1x8x7x64xf32>
    %43 = arith.mulf %40, %42 : vector<1x1x8x7x64xf32>
    %44 = arith.addf %39, %43 : vector<1x1x8x7x64xf32>
    %c0_49 = arith.constant 0 : index
    %c0_50 = arith.constant 0 : index
    %c0_51 = arith.constant 0 : index
    %c1_52 = arith.constant 1 : index
    %c0_53 = arith.constant 0 : index
    %45 = vector.load %arg8[%c0_49, %c0_50, %c0_51, %c1_52, %c0_53] : memref<1x1x8x8x64xf32, #tpu.memory_space<vmem>>, vector<1x1x8x7x64xf32>
    tpu.vector_store %arg8[%c0_49, %c0_50, %c0_51, %c1_52, %c0_53], %44 {strides = array<i32>} : memref<1x1x8x8x64xf32, #tpu.memory_space<vmem>>, vector<1x1x8x7x64xf32>,
    %46 = vector.extract_strided_slice %2 {offsets = [1, 1, 1, 0], sizes = [1, 1, 1, 64], strides = [1, 1, 1, 1]} : vector<3x3x3x64xf32> to vector<1x1x1x64xf32>
    %47 = vector.shape_cast %46 : vector<1x1x1x64xf32> to vector<1x64xf32>
    %c0_54 = arith.constant 0 : index
    %c0_55 = arith.constant 0 : index
    %c0_56 = arith.constant 0 : index
    %c0_57 = arith.constant 0 : index
    %c0_58 = arith.constant 0 : index
    %48 = vector.load %arg8[%c0_54, %c0_55, %c0_56, %c0_57, %c0_58] : memref<1x1x8x8x64xf32, #tpu.memory_space<vmem>>, vector<1x1x8x8x64xf32>
    %49 = vector.shape_cast %47 : vector<1x64xf32> to vector<1x1x1x1x64xf32>
    %50 = vector.broadcast %49 : vector<1x1x1x1x64xf32> to vector<1x1x8x8x64xf32>
    %51 = arith.mulf %9, %50 : vector<1x1x8x8x64xf32>
    %52 = arith.addf %48, %51 : vector<1x1x8x8x64xf32>
    %c0_59 = arith.constant 0 : index
    %c0_60 = arith.constant 0 : index
    %c0_61 = arith.constant 0 : index
    %c0_62 = arith.constant 0 : index
    %c0_63 = arith.constant 0 : index
    %53 = vector.load %arg8[%c0_59, %c0_60, %c0_61, %c0_62, %c0_63] : memref<1x1x8x8x64xf32, #tpu.memory_space<vmem>>, vector<1x1x8x8x64xf32>
    tpu.vector_store %arg8[%c0_59, %c0_60, %c0_61, %c0_62, %c0_63], %52 {strides = array<i32>} : memref<1x1x8x8x64xf32, #tpu.memory_space<vmem>>, vector<1x1x8x8x64xf32>,
    %54 = vector.extract_strided_slice %2 {offsets = [1, 1, 2, 0], sizes = [1, 1, 1, 64], strides = [1, 1, 1, 1]} : vector<3x3x3x64xf32> to vector<1x1x1x64xf32>
    %55 = vector.shape_cast %54 : vector<1x1x1x64xf32> to vector<1x64xf32>
    %c0_64 = arith.constant 0 : index
    %c0_65 = arith.constant 0 : index
    %c0_66 = arith.constant 0 : index
    %c0_67 = arith.constant 0 : index
    %c0_68 = arith.constant 0 : index
    %56 = vector.load %arg8[%c0_64, %c0_65, %c0_66, %c0_67, %c0_68] : memref<1x1x8x8x64xf32, #tpu.memory_space<vmem>>, vector<1x1x8x7x64xf32>
    %57 = vector.extract_strided_slice %9 {offsets = [0, 0, 0, 1, 0], sizes = [1, 1, 8, 7, 64], strides = [1, 1, 1, 1, 1]} : vector<1x1x8x8x64xf32> to vector<1x1x8x7x64xf32>
    %58 = vector.shape_cast %55 : vector<1x64xf32> to vector<1x1x1x1x64xf32>
    %59 = vector.broadcast %58 : vector<1x1x1x1x64xf32> to vector<1x1x8x7x64xf32>
    %60 = arith.mulf %57, %59 : vector<1x1x8x7x64xf32>
    %61 = arith.addf %56, %60 : vector<1x1x8x7x64xf32>
    %c0_69 = arith.constant 0 : index
    %c0_70 = arith.constant 0 : index
    %c0_71 = arith.constant 0 : index
    %c0_72 = arith.constant 0 : index
    %c0_73 = arith.constant 0 : index
    %62 = vector.load %arg8[%c0_69, %c0_70, %c0_71, %c0_72, %c0_73] : memref<1x1x8x8x64xf32, #tpu.memory_space<vmem>>, vector<1x1x8x7x64xf32>
    tpu.vector_store %arg8[%c0_69, %c0_70, %c0_71, %c0_72, %c0_73], %61 {strides = array<i32>} : memref<1x1x8x8x64xf32, #tpu.memory_space<vmem>>, vector<1x1x8x7x64xf32>,
    %63 = vector.extract_strided_slice %2 {offsets = [1, 2, 0, 0], sizes = [1, 1, 1, 64], strides = [1, 1, 1, 1]} : vector<3x3x3x64xf32> to vector<1x1x1x64xf32>
    %64 = vector.shape_cast %63 : vector<1x1x1x64xf32> to vector<1x64xf32>
    %c0_74 = arith.constant 0 : index
    %c0_75 = arith.constant 0 : index
    %c0_76 = arith.constant 0 : index
    %c1_77 = arith.constant 1 : index
    %c0_78 = arith.constant 0 : index
    %65 = vector.load %arg8[%c0_74, %c0_75, %c0_76, %c1_77, %c0_78] : memref<1x1x8x8x64xf32, #tpu.memory_space<vmem>>, vector<1x1x7x7x64xf32>
    %66 = vector.extract_strided_slice %9 {offsets = [0, 0, 1, 0, 0], sizes = [1, 1, 7, 7, 64], strides = [1, 1, 1, 1, 1]} : vector<1x1x8x8x64xf32> to vector<1x1x7x7x64xf32>
    %67 = vector.shape_cast %64 : vector<1x64xf32> to vector<1x1x1x1x64xf32>
    %68 = vector.broadcast %67 : vector<1x1x1x1x64xf32> to vector<1x1x7x7x64xf32>
    %69 = arith.mulf %66, %68 : vector<1x1x7x7x64xf32>
    %70 = arith.addf %65, %69 : vector<1x1x7x7x64xf32>
    %c0_79 = arith.constant 0 : index
    %c0_80 = arith.constant 0 : index
    %c0_81 = arith.constant 0 : index
    %c1_82 = arith.constant 1 : index
    %c0_83 = arith.constant 0 : index
    %71 = vector.load %arg8[%c0_79, %c0_80, %c0_81, %c1_82, %c0_83] : memref<1x1x8x8x64xf32, #tpu.memory_space<vmem>>, vector<1x1x7x7x64xf32>
    tpu.vector_store %arg8[%c0_79, %c0_80, %c0_81, %c1_82, %c0_83], %70 {strides = array<i32>} : memref<1x1x8x8x64xf32, #tpu.memory_space<vmem>>, vector<1x1x7x7x64xf32>,
    %72 = vector.extract_strided_slice %2 {offsets = [1, 2, 1, 0], sizes = [1, 1, 1, 64], strides = [1, 1, 1, 1]} : vector<3x3x3x64xf32> to vector<1x1x1x64xf32>
    %73 = vector.shape_cast %72 : vector<1x1x1x64xf32> to vector<1x64xf32>
    %c0_84 = arith.constant 0 : index
    %c0_85 = arith.constant 0 : index
    %c0_86 = arith.constant 0 : index
    %c0_87 = arith.constant 0 : index
    %c0_88 = arith.constant 0 : index
    %74 = vector.load %arg8[%c0_84, %c0_85, %c0_86, %c0_87, %c0_88] : memref<1x1x8x8x64xf32, #tpu.memory_space<vmem>>, vector<1x1x7x8x64xf32>
    %75 = vector.extract_strided_slice %9 {offsets = [0, 0, 1, 0, 0], sizes = [1, 1, 7, 8, 64], strides = [1, 1, 1, 1, 1]} : vector<1x1x8x8x64xf32> to vector<1x1x7x8x64xf32>
    %76 = vector.shape_cast %73 : vector<1x64xf32> to vector<1x1x1x1x64xf32>
    %77 = vector.broadcast %76 : vector<1x1x1x1x64xf32> to vector<1x1x7x8x64xf32>
    %78 = arith.mulf %75, %77 : vector<1x1x7x8x64xf32>
    %79 = arith.addf %74, %78 : vector<1x1x7x8x64xf32>
    %c0_89 = arith.constant 0 : index
    %c0_90 = arith.constant 0 : index
    %c0_91 = arith.constant 0 : index
    %c0_92 = arith.constant 0 : index
    %c0_93 = arith.constant 0 : index
    %80 = vector.load %arg8[%c0_89, %c0_90, %c0_91, %c0_92, %c0_93] : memref<1x1x8x8x64xf32, #tpu.memory_space<vmem>>, vector<1x1x7x8x64xf32>
    tpu.vector_store %arg8[%c0_89, %c0_90, %c0_91, %c0_92, %c0_93], %79 {strides = array<i32>} : memref<1x1x8x8x64xf32, #tpu.memory_space<vmem>>, vector<1x1x7x8x64xf32>,
    %81 = vector.extract_strided_slice %2 {offsets = [1, 2, 2, 0], sizes = [1, 1, 1, 64], strides = [1, 1, 1, 1]} : vector<3x3x3x64xf32> to vector<1x1x1x64xf32>
    %82 = vector.shape_cast %81 : vector<1x1x1x64xf32> to vector<1x64xf32>
    %c0_94 = arith.constant 0 : index
    %c0_95 = arith.constant 0 : index
    %c0_96 = arith.constant 0 : index
    %c0_97 = arith.constant 0 : index
    %c0_98 = arith.constant 0 : index
    %83 = vector.load %arg8[%c0_94, %c0_95, %c0_96, %c0_97, %c0_98] : memref<1x1x8x8x64xf32, #tpu.memory_space<vmem>>, vector<1x1x7x7x64xf32>
    %84 = vector.extract_strided_slice %9 {offsets = [0, 0, 1, 1, 0], sizes = [1, 1, 7, 7, 64], strides = [1, 1, 1, 1, 1]} : vector<1x1x8x8x64xf32> to vector<1x1x7x7x64xf32>
    %85 = vector.shape_cast %82 : vector<1x64xf32> to vector<1x1x1x1x64xf32>
    %86 = vector.broadcast %85 : vector<1x1x1x1x64xf32> to vector<1x1x7x7x64xf32>
    %87 = arith.mulf %84, %86 : vector<1x1x7x7x64xf32>
    %88 = arith.addf %83, %87 : vector<1x1x7x7x64xf32>
    %c0_99 = arith.constant 0 : index
    %c0_100 = arith.constant 0 : index
    %c0_101 = arith.constant 0 : index
    %c0_102 = arith.constant 0 : index
    %c0_103 = arith.constant 0 : index
    %89 = vector.load %arg8[%c0_99, %c0_100, %c0_101, %c0_102, %c0_103] : memref<1x1x8x8x64xf32, #tpu.memory_space<vmem>>, vector<1x1x7x7x64xf32>
    tpu.vector_store %arg8[%c0_99, %c0_100, %c0_101, %c0_102, %c0_103], %88 {strides = array<i32>} : memref<1x1x8x8x64xf32, #tpu.memory_space<vmem>>, vector<1x1x7x7x64xf32>,
    %c2_i32 = arith.constant 2 : i32
    %90 = arith.addi %arg1, %c2_i32 : i32
    %c1_i32_104 = arith.constant 1 : i32
    %91 = arith.subi %90, %c1_i32_104 : i32
    %c8_i32 = arith.constant 8 : i32
    %92 = arith.cmpi slt, %91, %c8_i32 : i32
    %93 = arith.extui %92 : i1 to i32
    %c0_i32_105 = arith.constant 0 : i32
    %94 = arith.cmpi ne, %93, %c0_i32_105 : i32
    scf.if %94 {
      %c0_119 = arith.constant 0 : index
      %c0_120 = arith.constant 0 : index
      %c0_121 = arith.constant 0 : index
      %c0_122 = arith.constant 0 : index
      %c0_123 = arith.constant 0 : index
      %104 = vector.load %arg4[%c0_119, %c0_120, %c0_121, %c0_122, %c0_123] : memref<1x1x8x8x64xbf16, #tpu.memory_space<vmem>>, vector<1x1x8x8x64xbf16>
      %105 = arith.extf %104 : vector<1x1x8x8x64xbf16> to vector<1x1x8x8x64xf32>
      %106 = vector.extract_strided_slice %2 {offsets = [2, 0, 0, 0], sizes = [1, 1, 1, 64], strides = [1, 1, 1, 1]} : vector<3x3x3x64xf32> to vector<1x1x1x64xf32>
      %107 = vector.shape_cast %106 : vector<1x1x1x64xf32> to vector<1x64xf32>
      %c0_124 = arith.constant 0 : index
      %c0_125 = arith.constant 0 : index
      %c1_126 = arith.constant 1 : index
      %c1_127 = arith.constant 1 : index
      %c0_128 = arith.constant 0 : index
      %108 = vector.load %arg8[%c0_124, %c0_125, %c1_126, %c1_127, %c0_128] : memref<1x1x8x8x64xf32, #tpu.memory_space<vmem>>, vector<1x1x7x7x64xf32>
      %109 = vector.extract_strided_slice %105 {offsets = [0, 0, 0, 0, 0], sizes = [1, 1, 7, 7, 64], strides = [1, 1, 1, 1, 1]} : vector<1x1x8x8x64xf32> to vector<1x1x7x7x64xf32>
      %110 = vector.shape_cast %107 : vector<1x64xf32> to vector<1x1x1x1x64xf32>
      %111 = vector.broadcast %110 : vector<1x1x1x1x64xf32> to vector<1x1x7x7x64xf32>
      %112 = arith.mulf %109, %111 : vector<1x1x7x7x64xf32>
      %113 = arith.addf %108, %112 : vector<1x1x7x7x64xf32>
      %c0_129 = arith.constant 0 : index
      %c0_130 = arith.constant 0 : index
      %c1_131 = arith.constant 1 : index
      %c1_132 = arith.constant 1 : index
      %c0_133 = arith.constant 0 : index
      %114 = vector.load %arg8[%c0_129, %c0_130, %c1_131, %c1_132, %c0_133] : memref<1x1x8x8x64xf32, #tpu.memory_space<vmem>>, vector<1x1x7x7x64xf32>
      tpu.vector_store %arg8[%c0_129, %c0_130, %c1_131, %c1_132, %c0_133], %113 {strides = array<i32>} : memref<1x1x8x8x64xf32, #tpu.memory_space<vmem>>, vector<1x1x7x7x64xf32>,
      %115 = vector.extract_strided_slice %2 {offsets = [2, 0, 1, 0], sizes = [1, 1, 1, 64], strides = [1, 1, 1, 1]} : vector<3x3x3x64xf32> to vector<1x1x1x64xf32>
      %116 = vector.shape_cast %115 : vector<1x1x1x64xf32> to vector<1x64xf32>
      %c0_134 = arith.constant 0 : index
      %c0_135 = arith.constant 0 : index
      %c1_136 = arith.constant 1 : index
      %c0_137 = arith.constant 0 : index
      %c0_138 = arith.constant 0 : index
      %117 = vector.load %arg8[%c0_134, %c0_135, %c1_136, %c0_137, %c0_138] : memref<1x1x8x8x64xf32, #tpu.memory_space<vmem>>, vector<1x1x7x8x64xf32>
      %118 = vector.extract_strided_slice %105 {offsets = [0, 0, 0, 0, 0], sizes = [1, 1, 7, 8, 64], strides = [1, 1, 1, 1, 1]} : vector<1x1x8x8x64xf32> to vector<1x1x7x8x64xf32>
      %119 = vector.shape_cast %116 : vector<1x64xf32> to vector<1x1x1x1x64xf32>
      %120 = vector.broadcast %119 : vector<1x1x1x1x64xf32> to vector<1x1x7x8x64xf32>
      %121 = arith.mulf %118, %120 : vector<1x1x7x8x64xf32>
      %122 = arith.addf %117, %121 : vector<1x1x7x8x64xf32>
      %c0_139 = arith.constant 0 : index
      %c0_140 = arith.constant 0 : index
      %c1_141 = arith.constant 1 : index
      %c0_142 = arith.constant 0 : index
      %c0_143 = arith.constant 0 : index
      %123 = vector.load %arg8[%c0_139, %c0_140, %c1_141, %c0_142, %c0_143] : memref<1x1x8x8x64xf32, #tpu.memory_space<vmem>>, vector<1x1x7x8x64xf32>
      tpu.vector_store %arg8[%c0_139, %c0_140, %c1_141, %c0_142, %c0_143], %122 {strides = array<i32>} : memref<1x1x8x8x64xf32, #tpu.memory_space<vmem>>, vector<1x1x7x8x64xf32>,
      %124 = vector.extract_strided_slice %2 {offsets = [2, 0, 2, 0], sizes = [1, 1, 1, 64], strides = [1, 1, 1, 1]} : vector<3x3x3x64xf32> to vector<1x1x1x64xf32>
      %125 = vector.shape_cast %124 : vector<1x1x1x64xf32> to vector<1x64xf32>
      %c0_144 = arith.constant 0 : index
      %c0_145 = arith.constant 0 : index
      %c1_146 = arith.constant 1 : index
      %c0_147 = arith.constant 0 : index
      %c0_148 = arith.constant 0 : index
      %126 = vector.load %arg8[%c0_144, %c0_145, %c1_146, %c0_147, %c0_148] : memref<1x1x8x8x64xf32, #tpu.memory_space<vmem>>, vector<1x1x7x7x64xf32>
      %127 = vector.extract_strided_slice %105 {offsets = [0, 0, 0, 1, 0], sizes = [1, 1, 7, 7, 64], strides = [1, 1, 1, 1, 1]} : vector<1x1x8x8x64xf32> to vector<1x1x7x7x64xf32>
      %128 = vector.shape_cast %125 : vector<1x64xf32> to vector<1x1x1x1x64xf32>
      %129 = vector.broadcast %128 : vector<1x1x1x1x64xf32> to vector<1x1x7x7x64xf32>
      %130 = arith.mulf %127, %129 : vector<1x1x7x7x64xf32>
      %131 = arith.addf %126, %130 : vector<1x1x7x7x64xf32>
      %c0_149 = arith.constant 0 : index
      %c0_150 = arith.constant 0 : index
      %c1_151 = arith.constant 1 : index
      %c0_152 = arith.constant 0 : index
      %c0_153 = arith.constant 0 : index
      %132 = vector.load %arg8[%c0_149, %c0_150, %c1_151, %c0_152, %c0_153] : memref<1x1x8x8x64xf32, #tpu.memory_space<vmem>>, vector<1x1x7x7x64xf32>
      tpu.vector_store %arg8[%c0_149, %c0_150, %c1_151, %c0_152, %c0_153], %131 {strides = array<i32>} : memref<1x1x8x8x64xf32, #tpu.memory_space<vmem>>, vector<1x1x7x7x64xf32>,
      %133 = vector.extract_strided_slice %2 {offsets = [2, 1, 0, 0], sizes = [1, 1, 1, 64], strides = [1, 1, 1, 1]} : vector<3x3x3x64xf32> to vector<1x1x1x64xf32>
      %134 = vector.shape_cast %133 : vector<1x1x1x64xf32> to vector<1x64xf32>
      %c0_154 = arith.constant 0 : index
      %c0_155 = arith.constant 0 : index
      %c0_156 = arith.constant 0 : index
      %c1_157 = arith.constant 1 : index
      %c0_158 = arith.constant 0 : index
      %135 = vector.load %arg8[%c0_154, %c0_155, %c0_156, %c1_157, %c0_158] : memref<1x1x8x8x64xf32, #tpu.memory_space<vmem>>, vector<1x1x8x7x64xf32>
      %136 = vector.extract_strided_slice %105 {offsets = [0, 0, 0, 0, 0], sizes = [1, 1, 8, 7, 64], strides = [1, 1, 1, 1, 1]} : vector<1x1x8x8x64xf32> to vector<1x1x8x7x64xf32>
      %137 = vector.shape_cast %134 : vector<1x64xf32> to vector<1x1x1x1x64xf32>
      %138 = vector.broadcast %137 : vector<1x1x1x1x64xf32> to vector<1x1x8x7x64xf32>
      %139 = arith.mulf %136, %138 : vector<1x1x8x7x64xf32>
      %140 = arith.addf %135, %139 : vector<1x1x8x7x64xf32>
      %c0_159 = arith.constant 0 : index
      %c0_160 = arith.constant 0 : index
      %c0_161 = arith.constant 0 : index
      %c1_162 = arith.constant 1 : index
      %c0_163 = arith.constant 0 : index
      %141 = vector.load %arg8[%c0_159, %c0_160, %c0_161, %c1_162, %c0_163] : memref<1x1x8x8x64xf32, #tpu.memory_space<vmem>>, vector<1x1x8x7x64xf32>
      tpu.vector_store %arg8[%c0_159, %c0_160, %c0_161, %c1_162, %c0_163], %140 {strides = array<i32>} : memref<1x1x8x8x64xf32, #tpu.memory_space<vmem>>, vector<1x1x8x7x64xf32>,
      %142 = vector.extract_strided_slice %2 {offsets = [2, 1, 1, 0], sizes = [1, 1, 1, 64], strides = [1, 1, 1, 1]} : vector<3x3x3x64xf32> to vector<1x1x1x64xf32>
      %143 = vector.shape_cast %142 : vector<1x1x1x64xf32> to vector<1x64xf32>
      %c0_164 = arith.constant 0 : index
      %c0_165 = arith.constant 0 : index
      %c0_166 = arith.constant 0 : index
      %c0_167 = arith.constant 0 : index
      %c0_168 = arith.constant 0 : index
      %144 = vector.load %arg8[%c0_164, %c0_165, %c0_166, %c0_167, %c0_168] : memref<1x1x8x8x64xf32, #tpu.memory_space<vmem>>, vector<1x1x8x8x64xf32>
      %145 = vector.shape_cast %143 : vector<1x64xf32> to vector<1x1x1x1x64xf32>
      %146 = vector.broadcast %145 : vector<1x1x1x1x64xf32> to vector<1x1x8x8x64xf32>
      %147 = arith.mulf %105, %146 : vector<1x1x8x8x64xf32>
      %148 = arith.addf %144, %147 : vector<1x1x8x8x64xf32>
      %c0_169 = arith.constant 0 : index
      %c0_170 = arith.constant 0 : index
      %c0_171 = arith.constant 0 : index
      %c0_172 = arith.constant 0 : index
      %c0_173 = arith.constant 0 : index
      %149 = vector.load %arg8[%c0_169, %c0_170, %c0_171, %c0_172, %c0_173] : memref<1x1x8x8x64xf32, #tpu.memory_space<vmem>>, vector<1x1x8x8x64xf32>
      tpu.vector_store %arg8[%c0_169, %c0_170, %c0_171, %c0_172, %c0_173], %148 {strides = array<i32>} : memref<1x1x8x8x64xf32, #tpu.memory_space<vmem>>, vector<1x1x8x8x64xf32>,
      %150 = vector.extract_strided_slice %2 {offsets = [2, 1, 2, 0], sizes = [1, 1, 1, 64], strides = [1, 1, 1, 1]} : vector<3x3x3x64xf32> to vector<1x1x1x64xf32>
      %151 = vector.shape_cast %150 : vector<1x1x1x64xf32> to vector<1x64xf32>
      %c0_174 = arith.constant 0 : index
      %c0_175 = arith.constant 0 : index
      %c0_176 = arith.constant 0 : index
      %c0_177 = arith.constant 0 : index
      %c0_178 = arith.constant 0 : index
      %152 = vector.load %arg8[%c0_174, %c0_175, %c0_176, %c0_177, %c0_178] : memref<1x1x8x8x64xf32, #tpu.memory_space<vmem>>, vector<1x1x8x7x64xf32>
      %153 = vector.extract_strided_slice %105 {offsets = [0, 0, 0, 1, 0], sizes = [1, 1, 8, 7, 64], strides = [1, 1, 1, 1, 1]} : vector<1x1x8x8x64xf32> to vector<1x1x8x7x64xf32>
      %154 = vector.shape_cast %151 : vector<1x64xf32> to vector<1x1x1x1x64xf32>
      %155 = vector.broadcast %154 : vector<1x1x1x1x64xf32> to vector<1x1x8x7x64xf32>
      %156 = arith.mulf %153, %155 : vector<1x1x8x7x64xf32>
      %157 = arith.addf %152, %156 : vector<1x1x8x7x64xf32>
      %c0_179 = arith.constant 0 : index
      %c0_180 = arith.constant 0 : index
      %c0_181 = arith.constant 0 : index
      %c0_182 = arith.constant 0 : index
      %c0_183 = arith.constant 0 : index
      %158 = vector.load %arg8[%c0_179, %c0_180, %c0_181, %c0_182, %c0_183] : memref<1x1x8x8x64xf32, #tpu.memory_space<vmem>>, vector<1x1x8x7x64xf32>
      tpu.vector_store %arg8[%c0_179, %c0_180, %c0_181, %c0_182, %c0_183], %157 {strides = array<i32>} : memref<1x1x8x8x64xf32, #tpu.memory_space<vmem>>, vector<1x1x8x7x64xf32>,
      %159 = vector.extract_strided_slice %2 {offsets = [2, 2, 0, 0], sizes = [1, 1, 1, 64], strides = [1, 1, 1, 1]} : vector<3x3x3x64xf32> to vector<1x1x1x64xf32>
      %160 = vector.shape_cast %159 : vector<1x1x1x64xf32> to vector<1x64xf32>
      %c0_184 = arith.constant 0 : index
      %c0_185 = arith.constant 0 : index
      %c0_186 = arith.constant 0 : index
      %c1_187 = arith.constant 1 : index
      %c0_188 = arith.constant 0 : index
      %161 = vector.load %arg8[%c0_184, %c0_185, %c0_186, %c1_187, %c0_188] : memref<1x1x8x8x64xf32, #tpu.memory_space<vmem>>, vector<1x1x7x7x64xf32>
      %162 = vector.extract_strided_slice %105 {offsets = [0, 0, 1, 0, 0], sizes = [1, 1, 7, 7, 64], strides = [1, 1, 1, 1, 1]} : vector<1x1x8x8x64xf32> to vector<1x1x7x7x64xf32>
      %163 = vector.shape_cast %160 : vector<1x64xf32> to vector<1x1x1x1x64xf32>
      %164 = vector.broadcast %163 : vector<1x1x1x1x64xf32> to vector<1x1x7x7x64xf32>
      %165 = arith.mulf %162, %164 : vector<1x1x7x7x64xf32>
      %166 = arith.addf %161, %165 : vector<1x1x7x7x64xf32>
      %c0_189 = arith.constant 0 : index
      %c0_190 = arith.constant 0 : index
      %c0_191 = arith.constant 0 : index
      %c1_192 = arith.constant 1 : index
      %c0_193 = arith.constant 0 : index
      %167 = vector.load %arg8[%c0_189, %c0_190, %c0_191, %c1_192, %c0_193] : memref<1x1x8x8x64xf32, #tpu.memory_space<vmem>>, vector<1x1x7x7x64xf32>
      tpu.vector_store %arg8[%c0_189, %c0_190, %c0_191, %c1_192, %c0_193], %166 {strides = array<i32>} : memref<1x1x8x8x64xf32, #tpu.memory_space<vmem>>, vector<1x1x7x7x64xf32>,
      %168 = vector.extract_strided_slice %2 {offsets = [2, 2, 1, 0], sizes = [1, 1, 1, 64], strides = [1, 1, 1, 1]} : vector<3x3x3x64xf32> to vector<1x1x1x64xf32>
      %169 = vector.shape_cast %168 : vector<1x1x1x64xf32> to vector<1x64xf32>
      %c0_194 = arith.constant 0 : index
      %c0_195 = arith.constant 0 : index
      %c0_196 = arith.constant 0 : index
      %c0_197 = arith.constant 0 : index
      %c0_198 = arith.constant 0 : index
      %170 = vector.load %arg8[%c0_194, %c0_195, %c0_196, %c0_197, %c0_198] : memref<1x1x8x8x64xf32, #tpu.memory_space<vmem>>, vector<1x1x7x8x64xf32>
      %171 = vector.extract_strided_slice %105 {offsets = [0, 0, 1, 0, 0], sizes = [1, 1, 7, 8, 64], strides = [1, 1, 1, 1, 1]} : vector<1x1x8x8x64xf32> to vector<1x1x7x8x64xf32>
      %172 = vector.shape_cast %169 : vector<1x64xf32> to vector<1x1x1x1x64xf32>
      %173 = vector.broadcast %172 : vector<1x1x1x1x64xf32> to vector<1x1x7x8x64xf32>
      %174 = arith.mulf %171, %173 : vector<1x1x7x8x64xf32>
      %175 = arith.addf %170, %174 : vector<1x1x7x8x64xf32>
      %c0_199 = arith.constant 0 : index
      %c0_200 = arith.constant 0 : index
      %c0_201 = arith.constant 0 : index
      %c0_202 = arith.constant 0 : index
      %c0_203 = arith.constant 0 : index
      %176 = vector.load %arg8[%c0_199, %c0_200, %c0_201, %c0_202, %c0_203] : memref<1x1x8x8x64xf32, #tpu.memory_space<vmem>>, vector<1x1x7x8x64xf32>
      tpu.vector_store %arg8[%c0_199, %c0_200, %c0_201, %c0_202, %c0_203], %175 {strides = array<i32>} : memref<1x1x8x8x64xf32, #tpu.memory_space<vmem>>, vector<1x1x7x8x64xf32>,
      %177 = vector.extract_strided_slice %2 {offsets = [2, 2, 2, 0], sizes = [1, 1, 1, 64], strides = [1, 1, 1, 1]} : vector<3x3x3x64xf32> to vector<1x1x1x64xf32>
      %178 = vector.shape_cast %177 : vector<1x1x1x64xf32> to vector<1x64xf32>
      %c0_204 = arith.constant 0 : index
      %c0_205 = arith.constant 0 : index
      %c0_206 = arith.constant 0 : index
      %c0_207 = arith.constant 0 : index
      %c0_208 = arith.constant 0 : index
      %179 = vector.load %arg8[%c0_204, %c0_205, %c0_206, %c0_207, %c0_208] : memref<1x1x8x8x64xf32, #tpu.memory_space<vmem>>, vector<1x1x7x7x64xf32>
      %180 = vector.extract_strided_slice %105 {offsets = [0, 0, 1, 1, 0], sizes = [1, 1, 7, 7, 64], strides = [1, 1, 1, 1, 1]} : vector<1x1x8x8x64xf32> to vector<1x1x7x7x64xf32>
      %181 = vector.shape_cast %178 : vector<1x64xf32> to vector<1x1x1x1x64xf32>
      %182 = vector.broadcast %181 : vector<1x1x1x1x64xf32> to vector<1x1x7x7x64xf32>
      %183 = arith.mulf %180, %182 : vector<1x1x7x7x64xf32>
      %184 = arith.addf %179, %183 : vector<1x1x7x7x64xf32>
      %c0_209 = arith.constant 0 : index
      %c0_210 = arith.constant 0 : index
      %c0_211 = arith.constant 0 : index
      %c0_212 = arith.constant 0 : index
      %c0_213 = arith.constant 0 : index
      %185 = vector.load %arg8[%c0_209, %c0_210, %c0_211, %c0_212, %c0_213] : memref<1x1x8x8x64xf32, #tpu.memory_space<vmem>>, vector<1x1x7x7x64xf32>
      tpu.vector_store %arg8[%c0_209, %c0_210, %c0_211, %c0_212, %c0_213], %184 {strides = array<i32>} : memref<1x1x8x8x64xf32, #tpu.memory_space<vmem>>, vector<1x1x7x7x64xf32>,
    } else {
    }
    %c0_106 = arith.constant 0 : index
    %c0_107 = arith.constant 0 : index
    %c0_108 = arith.constant 0 : index
    %c0_109 = arith.constant 0 : index
    %c0_110 = arith.constant 0 : index
    %95 = vector.load %arg8[%c0_106, %c0_107, %c0_108, %c0_109, %c0_110] : memref<1x1x8x8x64xf32, #tpu.memory_space<vmem>>, vector<1x1x8x8x64xf32>
    %c0_111 = arith.constant 0 : index
    %c0_112 = arith.constant 0 : index
    %96 = vector.load %arg6[%c0_111, %c0_112] : memref<1x64xf32, #tpu.memory_space<vmem>>, vector<1x64xf32>
    %97 = vector.shape_cast %96 : vector<1x64xf32> to vector<1x1x1x1x64xf32>
    %98 = vector.broadcast %97 : vector<1x1x1x1x64xf32> to vector<1x1x8x8x64xf32>
    %99 = arith.addf %95, %98 : vector<1x1x8x8x64xf32>
    %cst_113 = arith.constant 0.000000e+00 : f32
    %100 = vector.broadcast %cst_113 : f32 to vector<1x1x8x8x64xf32>
    %101 = arith.maximumf %99, %100 : vector<1x1x8x8x64xf32>
    %102 = arith.truncf %101 : vector<1x1x8x8x64xf32> to vector<1x1x8x8x64xbf16>
    %c0_114 = arith.constant 0 : index
    %c0_115 = arith.constant 0 : index
    %c0_116 = arith.constant 0 : index
    %c0_117 = arith.constant 0 : index
    %c0_118 = arith.constant 0 : index
    %103 = vector.load %arg7[%c0_114, %c0_115, %c0_116, %c0_117, %c0_118] : memref<1x1x8x8x64xbf16, #tpu.memory_space<vmem>>, vector<1x1x8x8x64xbf16>
    tpu.vector_store %arg7[%c0_114, %c0_115, %c0_116, %c0_117, %c0_118], %102 {strides = array<i32>} : memref<1x1x8x8x64xbf16, #tpu.memory_space<vmem>>, vector<1x1x8x8x64xbf16>,
    return
  }
  func.func @transform_0(%arg0: i32, %arg1: i32) -> (i32, i32, i32, i32, i32) {
    %c0_i32 = arith.constant 0 : i32
    %0 = arith.addi %arg1, %c0_i32 : i32
    %c1_i32 = arith.constant 1 : i32
    %1 = arith.subi %0, %c1_i32 : i32
    %c7_i32 = arith.constant 7 : i32
    %2 = arith.minsi %1, %c7_i32 : i32
    %c0_i32_0 = arith.constant 0 : i32
    %3 = arith.maxsi %2, %c0_i32_0 : i32
    %c0_i32_1 = arith.constant 0 : i32
    %c0_i32_2 = arith.constant 0 : i32
    %c0_i32_3 = arith.constant 0 : i32
    %c0_i32_4 = arith.constant 0 : i32
    return %arg0, %3, %c0_i32_1, %c0_i32_2, %c0_i32_3 : i32, i32, i32, i32, i32
  }
  func.func @transform_1(%arg0: i32, %arg1: i32) -> (i32, i32, i32, i32, i32) {
    %c1_i32 = arith.constant 1 : i32
    %0 = arith.addi %arg1, %c1_i32 : i32
    %c1_i32_0 = arith.constant 1 : i32
    %1 = arith.subi %0, %c1_i32_0 : i32
    %c7_i32 = arith.constant 7 : i32
    %2 = arith.minsi %1, %c7_i32 : i32
    %c0_i32 = arith.constant 0 : i32
    %3 = arith.maxsi %2, %c0_i32 : i32
    %c0_i32_1 = arith.constant 0 : i32
    %c0_i32_2 = arith.constant 0 : i32
    %c0_i32_3 = arith.constant 0 : i32
    %c0_i32_4 = arith.constant 0 : i32
    return %arg0, %3, %c0_i32_1, %c0_i32_2, %c0_i32_3 : i32, i32, i32, i32, i32
  }
  func.func @transform_2(%arg0: i32, %arg1: i32) -> (i32, i32, i32, i32, i32) {
    %c2_i32 = arith.constant 2 : i32
    %0 = arith.addi %arg1, %c2_i32 : i32
    %c1_i32 = arith.constant 1 : i32
    %1 = arith.subi %0, %c1_i32 : i32
    %c7_i32 = arith.constant 7 : i32
    %2 = arith.minsi %1, %c7_i32 : i32
    %c0_i32 = arith.constant 0 : i32
    %3 = arith.maxsi %2, %c0_i32 : i32
    %c0_i32_0 = arith.constant 0 : i32
    %c0_i32_1 = arith.constant 0 : i32
    %c0_i32_2 = arith.constant 0 : i32
    %c0_i32_3 = arith.constant 0 : i32
    return %arg0, %3, %c0_i32_0, %c0_i32_1, %c0_i32_2 : i32, i32, i32, i32, i32
  }
  func.func @transform_3(%arg0: i32, %arg1: i32) -> (i32, i32, i32, i32) {
    %c0_i32 = arith.constant 0 : i32
    %c0_i32_0 = arith.constant 0 : i32
    %c0_i32_1 = arith.constant 0 : i32
    %c0_i32_2 = arith.constant 0 : i32
    %c0_i32_3 = arith.constant 0 : i32
    return %c0_i32, %c0_i32_0, %c0_i32_1, %c0_i32_2 : i32, i32, i32, i32
  }
  func.func @transform_4(%arg0: i32, %arg1: i32) -> (i32, i32) {
    %c0_i32 = arith.constant 0 : i32
    %c0_i32_0 = arith.constant 0 : i32
    %c0_i32_1 = arith.constant 0 : i32
    return %c0_i32, %c0_i32_0 : i32, i32
  }
  func.func @transform_5(%arg0: i32, %arg1: i32) -> (i32, i32, i32, i32, i32) {
    %c0_i32 = arith.constant 0 : i32
    %c0_i32_0 = arith.constant 0 : i32
    %c0_i32_1 = arith.constant 0 : i32
    %c0_i32_2 = arith.constant 0 : i32
    return %arg0, %arg1, %c0_i32, %c0_i32_0, %c0_i32_1 : i32, i32, i32, i32, i32
  }
}

module attributes {stable_mosaic.version = 11 : i64} {
  func.func @_project_bn_res_kernel(%arg0: i32, %arg1: memref<1024x64xbf16, #tpu.memory_space<vmem>>, %arg2: memref<1024x64xbf16, #tpu.memory_space<vmem>>, %arg3: memref<64x32xf32, #tpu.memory_space<vmem>>, %arg4: memref<64x32xf32, #tpu.memory_space<vmem>>, %arg5: memref<1x32xf32, #tpu.memory_space<vmem>>, %arg6: memref<1024x32xf32, #tpu.memory_space<vmem>>, %arg7: memref<1024x32xf32, #tpu.memory_space<vmem>>) attributes {dimension_semantics = [#tpu.dimension_semantics<parallel>], iteration_bounds = array<i64: 1>, scalar_prefetch = 0 : i64, scratch_operands = 0 : i64, tpu.core_type = #tpu.core_type<tc>, window_params = [{transform_indices = @transform_0, window_bounds = array<i64: 1024, 64>}, {transform_indices = @transform_1, window_bounds = array<i64: 1024, 64>}, {pipeline_mode = #tpu.pipeline_mode<synchronous>, transform_indices = @transform_2, window_bounds = array<i64: 64, 32>}, {pipeline_mode = #tpu.pipeline_mode<synchronous>, transform_indices = @transform_3, window_bounds = array<i64: 64, 32>}, {pipeline_mode = #tpu.pipeline_mode<synchronous>, transform_indices = @transform_4, window_bounds = array<i64: 1, 32>}, {transform_indices = @transform_5, window_bounds = array<i64: 1024, 32>}, {transform_indices = @transform_6, window_bounds = array<i64: 1024, 32>}]} {
    %c0 = arith.constant 0 : index
    %c0_0 = arith.constant 0 : index
    %0 = vector.load %arg1[%c0, %c0_0] : memref<1024x64xbf16, #tpu.memory_space<vmem>>, vector<1024x64xbf16>
    %1 = arith.extf %0 : vector<1024x64xbf16> to vector<1024x64xf32>
    %c0_1 = arith.constant 0 : index
    %c0_2 = arith.constant 0 : index
    %2 = vector.load %arg3[%c0_1, %c0_2] : memref<64x32xf32, #tpu.memory_space<vmem>>, vector<64x32xf32>
    %cst = arith.constant dense<0.000000e+00> : vector<1024x32xf32>
    %3 = tpu.matmul %1, %2, %cst {dimension_numbers = #tpu.dot_dimension_numbers<[1], [0], [0], [1], [0, 0, 1, 1], [], []>} : vector<1024x64xf32>, vector<64x32xf32>, vector<1024x32xf32> -> vector<1024x32xf32>
    %c0_3 = arith.constant 0 : index
    %c0_4 = arith.constant 0 : index
    %4 = vector.load %arg2[%c0_3, %c0_4] : memref<1024x64xbf16, #tpu.memory_space<vmem>>, vector<1024x64xbf16>
    %5 = arith.extf %4 : vector<1024x64xbf16> to vector<1024x64xf32>
    %c0_5 = arith.constant 0 : index
    %c0_6 = arith.constant 0 : index
    %6 = vector.load %arg4[%c0_5, %c0_6] : memref<64x32xf32, #tpu.memory_space<vmem>>, vector<64x32xf32>
    %cst_7 = arith.constant dense<0.000000e+00> : vector<1024x32xf32>
    %7 = tpu.matmul %5, %6, %cst_7 {dimension_numbers = #tpu.dot_dimension_numbers<[1], [0], [0], [1], [0, 0, 1, 1], [], []>} : vector<1024x64xf32>, vector<64x32xf32>, vector<1024x32xf32> -> vector<1024x32xf32>
    %8 = arith.addf %3, %7 : vector<1024x32xf32>
    %c0_8 = arith.constant 0 : index
    %c0_9 = arith.constant 0 : index
    %9 = vector.load %arg5[%c0_8, %c0_9] : memref<1x32xf32, #tpu.memory_space<vmem>>, vector<1x32xf32>
    %10 = vector.broadcast %9 : vector<1x32xf32> to vector<1024x32xf32>
    %11 = arith.addf %8, %10 : vector<1024x32xf32>
    %c0_10 = arith.constant 0 : index
    %c0_11 = arith.constant 0 : index
    %12 = vector.load %arg6[%c0_10, %c0_11] : memref<1024x32xf32, #tpu.memory_space<vmem>>, vector<1024x32xf32>
    %13 = arith.addf %11, %12 : vector<1024x32xf32>
    %c0_12 = arith.constant 0 : index
    %c0_13 = arith.constant 0 : index
    %14 = vector.load %arg7[%c0_12, %c0_13] : memref<1024x32xf32, #tpu.memory_space<vmem>>, vector<1024x32xf32>
    tpu.vector_store %arg7[%c0_12, %c0_13], %13 {strides = array<i32>} : memref<1024x32xf32, #tpu.memory_space<vmem>>, vector<1024x32xf32>,
    return
  }
  func.func @transform_0(%arg0: i32) -> (i32, i32) {
    %c0_i32 = arith.constant 0 : i32
    %c0_i32_0 = arith.constant 0 : i32
    return %arg0, %c0_i32 : i32, i32
  }
  func.func @transform_1(%arg0: i32) -> (i32, i32) {
    %c0_i32 = arith.constant 0 : i32
    %c0_i32_0 = arith.constant 0 : i32
    return %arg0, %c0_i32 : i32, i32
  }
  func.func @transform_2(%arg0: i32) -> (i32, i32) {
    %c0_i32 = arith.constant 0 : i32
    %c0_i32_0 = arith.constant 0 : i32
    %c0_i32_1 = arith.constant 0 : i32
    return %c0_i32, %c0_i32_0 : i32, i32
  }
  func.func @transform_3(%arg0: i32) -> (i32, i32) {
    %c0_i32 = arith.constant 0 : i32
    %c0_i32_0 = arith.constant 0 : i32
    %c0_i32_1 = arith.constant 0 : i32
    return %c0_i32, %c0_i32_0 : i32, i32
  }
  func.func @transform_4(%arg0: i32) -> (i32, i32) {
    %c0_i32 = arith.constant 0 : i32
    %c0_i32_0 = arith.constant 0 : i32
    %c0_i32_1 = arith.constant 0 : i32
    return %c0_i32, %c0_i32_0 : i32, i32
  }
  func.func @transform_5(%arg0: i32) -> (i32, i32) {
    %c0_i32 = arith.constant 0 : i32
    %c0_i32_0 = arith.constant 0 : i32
    return %arg0, %c0_i32 : i32, i32
  }
  func.func @transform_6(%arg0: i32) -> (i32, i32) {
    %c0_i32 = arith.constant 0 : i32
    %c0_i32_0 = arith.constant 0 : i32
    return %arg0, %c0_i32 : i32, i32
  }
}

</mosaic_0001>

<bundles_post_ra>
// kernel: _lambda_.4
= control target key start
LH: loop header
LB: loop body
LE: loop exit
PB: predicated region body
PF: predicated region fallthrough
CT: control target
= control target key end

     0   :  { %s2044_s18 = smov 0   ;;  %s2046_s19 = smov 0   ;;  %s2915_s0 = inlined_call_operand.vmem [shape: bf16[2,8,8,8,64], index: 0, kind: input, shape index: {}, may-alias: {0,1,2}]   ;;  %s2916_s1 = inlined_call_operand.vmem [shape: bf16[2,8,8,8,64], index: 1, kind: input, shape index: {}, may-alias: {0,1,2}]   ;;  %s2917_s2 = inlined_call_operand.vmem [shape: bf16[2,8,8,8,64], index: 2, kind: input, shape index: {}, may-alias: {0,1,2}]   ;;  %s2918_s3 = inlined_call_operand.vmem [shape: f32[3,3,3,64], index: 3, kind: input, shape index: {}]   ;;  %s2919_s4 = inlined_call_operand.vmem [shape: f32[1,64], index: 4, kind: input, shape index: {}]   ;;  %s2920_s5 = inlined_call_operand.vmem [shape: bf16[2,8,8,8,64], index: 5, kind: output, shape index: {}]  }
   0x1   :  { %2921 = sst [smem:[#allocation3_spill]] %s2918_s3  ;;  %s2048_s20 = smov 0  }
   0x2   :  { %s2050_s21 = smov 0   ;;  %s2052_s22 = smov 0  }
   0x3 LB: > { %s24_s23 = sadd.s32 1, %s2003_s20  ;;  %s27_s24 = sadd.s32 1, %s2007_s21  ;;  %s2011_s22 = sphi %s2052_s22, %s15_s22   ;;  %s2007_s21 = sphi %s2050_s21, %s2926_s21   ;;  %s2003_s20 = sphi %s2048_s20, %s2925_s20   ;;  %s1999_s19 = sphi %s2046_s19, %s2924_s19   ;;  %s1995_s18 = sphi %s2044_s18, %s2923_s18  }
   0x4   : > { %p25_p0 = scmp.ge.s32.totalorder %s24_s23, 8  ;;  %p1824_p1 = scmp.ge.s32.totalorder %s2011_s22, 1 }
   0x5   : > { %p295_p2 = scmp.lt.s32.totalorder %s2011_s22, 17 }
   0x6   : > { %s2928_s23 = smov (%p25_p0, %s24_s23), 0  ;;  %s2930_s24 = smov (!%p25_p0, %s27_s24), %s2007_s21 }
   0x7   : > { %p296_p3 = pnand %p1824_p1, %p295_p2  ;;  %p29_p4 = scmp.ge.s32.totalorder %s2930_s24, 2 }
   0x8   : > { %s2079_s25 = sadd.s32 (!%p296_p3), 4294967295, %s1995_s18  ;;  %p368_p5 = scmp.lt.s32.totalorder (!%p296_p3), %s1999_s19, 1  ;;  %vm427_vm0 = vcmask (!%p296_p3), 523264   ;;  %v2013_v1 = vmov (!%p296_p3), 0.0  }
   0x9   : > { %s2932_s24 = smov (%p29_p4, %s2930_s24), 0  ;;  %299 = sbr.rel (%p296_p3) target bundleno = 320 (0x140), region = 40 }
   0xa   : > { %s2922_s3 = sld [smem:[#allocation3_spill]] (!%p296_p3)  ;;  %p364_p6 = scmp.lt.s32.totalorder (!%p296_p3), %s2079_s25, 7  ;;  %428 = vst.msk [vmem:[#allocation2] sm:$0xff] (!%p296_p3), %vm427_vm0, %v2013_v1  ;;  %429 = vst.msk [vmem:[#allocation2 + $0x8] sm:$0xff] (!%p296_p3), %vm427_vm0, %v2013_v1 }
   0xb   : > { %p1825_p7 = scmp.gt.s32.totalorder (!%p296_p3), %s2079_s25, 0  ;;  %430 = vst.msk [vmem:[#allocation2 + $0x10] sm:$0xff] (!%p296_p3), %vm427_vm0, %v2013_v1  ;;  %431 = vst.msk [vmem:[#allocation2 + $0x18] sm:$0xff] (!%p296_p3), %vm427_vm0, %v2013_v1  ;;  %p382_p8 = scmp.lt.s32.totalorder (!%p296_p3), %s1995_s18, 7 }
   0xc   : > { %432 = vst.msk [vmem:[#allocation2 + $0x20] sm:$0xff] (!%p296_p3), %vm427_vm0, %v2013_v1  ;;  %433 = vst.msk [vmem:[#allocation2 + $0x28] sm:$0xff] (!%p296_p3), %vm427_vm0, %v2013_v1  ;;  %p1833_p10 = scmp.gt.s32.totalorder (!%p296_p3), %s1995_s18, 0  ;;  %p1852_p1 = scmp.lt.s32.totalorder (!%p296_p3), %s2079_s25, 0 }
   0xd   : > { %434 = vst.msk [vmem:[#allocation2 + $0x30] sm:$0xff] (!%p296_p3), %vm427_vm0, %v2013_v1  ;;  %435 = vst.msk [vmem:[#allocation2 + $0x38] sm:$0xff] (!%p296_p3), %vm427_vm0, %v2013_v1 }
  0x10   : > { %v2085_v0 = vld [vmem:[%s2922_s3] sm:$0x7]  ;;  %v2100_v2 = vld [vmem:[%s2922_s3 + $0x4] sm:$0x7]  ;;  %v2105_v3 = vld [vmem:[%s2922_s3 + $0x8] sm:$0x7]  ;;  %v474_v11 = vlaneseq (!%p1852_p1) }
  0x11   : > { %s2934_s19 = smov (!%p368_p5, %s1999_s19), 1  ;;  %v2113_v4 = vld [vmem:[%s2922_s3 + $0xc] sm:$0x7]  ;;  %v2118_v5 = vld [vmem:[%s2922_s3 + $0x10] sm:$0x7]  ;;  %vm492_vm1 = vcmask (!%p1852_p1), 522240  }
  0x12   : > { %s365_s11 = scalar_select %p364_p6, %s2079_s25, 7  ;;  %v2126_v6 = vld [vmem:[%s2922_s3 + $0x14] sm:$0x7]  ;;  %v2131_v7 = vld [vmem:[%s2922_s3 + $0x18] sm:$0x7] }
  0x13   : > { %s2133_s16 = sshll.u32 %s2934_s19, 6  ;;  %v2139_v8 = vld [vmem:[%s2922_s3 + $0x1c] sm:$0x7]  ;;  %v2144_v9 = vld [vmem:[%s2922_s3 + $0x20] sm:$0x7]  ;;  %s2151_s19 = sadd.s32 1, %s1995_s18 }
  0x14   : > { %s2936_s11 = smov (!%p1825_p7, %s365_s11), 0  ;;  %p400_p11 = scmp.lt.s32.totalorder %s2151_s19, 7  ;;  %v475_v13 = vshrl.u32 (!%p1852_p1), %v474_v11, 7  ;;  %v467_v23 = vld [vmem:[#allocation2 + $0x9] sm:$0x7f] (!%p1852_p1) }
  0x15   : > { %s383_s29 = scalar_select %p382_p8, %s1995_s18, 7 }
  0x16   : > { %p370_p9 = scmp.lt.s32.totalorder %s2936_s11, 7  ;;  %p1841_p13 = scmp.gt.s32.totalorder %s2151_s19, 0  ;;  %v2183_v17 = vsub.s32 (!%p1852_p1), 0, %v475_v13  ;;  %v468_v25 = vld [vmem:[#allocation2 + $0x11] sm:$0x7f] (!%p1852_p1)  ;;  %v2197_v28 = vsub.s32 (!%p1852_p1), 1, %v475_v13 }
  0x17   : > { %s1849_s30 = sshll.u32 %s383_s29, 3  ;;  %s2940_s29 = smov (!%p1833_p10, %s383_s29), 0  ;;  %v469_v26 = vld [vmem:[#allocation2 + $0x19] sm:$0x7f] (!%p1852_p1)  ;;  %v470_v27 = vld [vmem:[#allocation2 + $0x21] sm:$0x7f] (!%p1852_p1) }
  0x18   : > { %s2938_s11 = smov (!%p370_p9, %s2936_s11), 7  ;;  %p388_p12 = scmp.lt.s32.totalorder %s2940_s29, 7  ;;  %v477_v24 = vrot.slane (!%p1852_p1), %v2085_v0, %v2183_v17  ;;  %v471_v34 = vld [vmem:[#allocation2 + $0x29] sm:$0x7f] (!%p1852_p1)  ;;  %v472_v35 = vld [vmem:[#allocation2 + $0x31] sm:$0x7f] (!%p1852_p1)  ;;  %v2210_v38 = vrot.slane (!%p1852_p1), %v2100_v2, %v2183_v17  ;;  %v510_v46 = vrot.slane (!%p1852_p1), %v2085_v0, %v2197_v28  ;;  %v2237_v60 = vrot.slane (!%p1852_p1), %v2100_v2, %v2197_v28 }
  0x19   : > { %s1830_s6 = sshll.u32 %s2938_s11, 3  ;;  %s424_s18 = sadd.s32 %s1849_s30, %s2133_s16  ;;  %v473_v45 = vld [vmem:[#allocation2 + $0x39] sm:$0x7f] (!%p1852_p1)  ;;  %v585_v48 = vld [vmem:[#allocation2 + $0x1] sm:$0x7f] (!%p1852_p1)  ;;  %v2221_v50 = vsub.s32 (!%p1852_p1), 2, %v475_v13 }
  0x1a   : > { %s374_s7 = sadd.s32 %s2133_s16, %s1830_s6  ;;  %s2942_s29 = smov (!%p388_p12, %s2940_s29), 7 }
  0x1b   : > { %s1832_s8 = sshll.u32 %s374_s7, 2  ;;  %s1838_s14 = sshll.u32 %s2942_s29, 3  ;;  %v542_v59 = vrot.slane (!%p1852_p1), %v2085_v0, %v2221_v50 }
  0x1c   : > { %s376_s12 = scalar_lea.vmem %s2915_s0, %s1832_s8  ;;  %s1851_s15 = sshll.u32 %s424_s18, 2 }
  0x1d   : > { %s401_s13 = scalar_select %p400_p11, %s2151_s19, 7 }
  0x1e   : > { %s392_s17 = sadd.s32 %s1838_s14, %s2133_s16  ;;  %s2165_s11 = scalar_lea.vmem %s2920_s5, %s1851_s15  ;;  %v1876_v10 = vld [vmem:[%s376_s12] sm:$0xff] (!%p1852_p1)   ;;  %v1923_v12 = vld [vmem:[%s376_s12 + $0x8] sm:$0xff] (!%p1852_p1)   ;;  %v1924_v14 = vld [vmem:[%s376_s12 + $0x10] sm:$0xff] (!%p1852_p1)  }
  0x1f   : > { %s1840_s28 = sshll.u32 %s392_s17, 2  ;;  %s2944_s13 = smov (!%p1841_p13, %s401_s13), 0  ;;  %v2179_v15 = vunpack.c.l.bf16 (!%p1852_p1), %v1876_v10  ;;  %v2181_v16 = vunpack.c.h.bf16 (!%p1852_p1), %v1876_v10  ;;  %v2185_v18 = vunpack.c.l.bf16 (!%p1852_p1), %v1923_v12  ;;  %v2187_v19 = vunpack.c.h.bf16 (!%p1852_p1), %v1923_v12  ;;  %v2189_v20 = vld [vmem:[%s376_s12 + $0x18] sm:$0xff] (!%p1852_p1)  }
  0x20   : > { %s2170_s3 = scalar_lea.vmem %s2916_s1, %s1840_s28  ;;  %p406_p0 = scmp.lt.s32.totalorder %s2944_s13, 7  ;;  %v2191_v21 = vunpack.c.l.bf16 (!%p1852_p1), %v1924_v14  ;;  %v2193_v22 = vunpack.c.h.bf16 (!%p1852_p1), %v1924_v14  ;;  %v2200_v29 = vunpack.c.l.bf16 (!%p1852_p1), %v2189_v20 }
  0x21   : > { %449 = sbr.rel (%p1852_p1) target bundleno = 120 (0x78), region = 44  ;;  %v478_v30 = vmul.f32 (!%p1852_p1), %v2179_v15, %v477_v24  ;;  %v479_v31 = vmul.f32 (!%p1852_p1), %v2181_v16, %v477_v24  ;;  %v480_v32 = vmul.f32 (!%p1852_p1), %v2185_v18, %v477_v24  ;;  %v481_v33 = vmul.f32 (!%p1852_p1), %v2187_v19, %v477_v24 }
  0x22   : > { %s2946_s13 = smov (!%p406_p0, %s2944_s13), 7  ;;  %v482_v36 = vmul.f32 (!%p1852_p1), %v2191_v21, %v477_v24  ;;  %v483_v37 = vmul.f32 (!%p1852_p1), %v2193_v22, %v477_v24  ;;  %v484_v47 = vmul.f32 (!%p1852_p1), %v2200_v29, %v477_v24  ;;  %v597_v51 = vmul.f32 (!%p1852_p1), %v2179_v15, %v2210_v38 }
  0x23   : > { %s1846_s30 = sshll.u32 %s2946_s13, 3  ;;  %v485_v39 = vadd.f32 (!%p1852_p1), %v478_v30, %v467_v23  ;;  %v486_v40 = vadd.f32 (!%p1852_p1), %v479_v31, %v468_v25  ;;  %v487_v41 = vadd.f32 (!%p1852_p1), %v480_v32, %v469_v26  ;;  %v488_v42 = vadd.f32 (!%p1852_p1), %v481_v33, %v470_v27 }
  0x24   : > { %s410_s8 = sadd.s32 %s1846_s30, %s2133_s16  ;;  %v489_v43 = vadd.f32 (!%p1852_p1), %v482_v36, %v471_v34  ;;  %v490_v44 = vadd.f32 (!%p1852_p1), %v483_v37, %v472_v35  ;;  %v491_v49 = vadd.f32 (!%p1852_p1), %v484_v47, %v473_v45  ;;  %v511_v52 = vmul.f32 (!%p1852_p1), %v2179_v15, %v510_v46 }
  0x25   : > { %s1848_s9 = sshll.u32 %s410_s8, 2  ;;  %493 = vst.msk [vmem:[#allocation2 + $0x9] sm:$0x7f] (!%p1852_p1), %vm492_vm1, %v485_v39  ;;  %494 = vst.msk [vmem:[#allocation2 + $0x11] sm:$0x7f] (!%p1852_p1), %vm492_vm1, %v486_v40  ;;  %v512_v53 = vmul.f32 (!%p1852_p1), %v2181_v16, %v510_v46  ;;  %v513_v54 = vmul.f32 (!%p1852_p1), %v2185_v18, %v510_v46  ;;  %v605_v55 = vadd.f32 (!%p1852_p1), %v597_v51, %v585_v48 }
  0x26   : > { %s2176_s18 = scalar_lea.vmem %s2917_s2, %s1848_s9  ;;  %495 = vst.msk [vmem:[#allocation2 + $0x19] sm:$0x7f] (!%p1852_p1), %vm492_vm1, %v487_v41  ;;  %496 = vst.msk [vmem:[#allocation2 + $0x21] sm:$0x7f] (!%p1852_p1), %vm492_vm1, %v488_v42  ;;  %v514_v56 = vmul.f32 (!%p1852_p1), %v2187_v19, %v510_v46  ;;  %v515_v57 = vmul.f32 (!%p1852_p1), %v2191_v21, %v510_v46  ;;  %v516_v58 = vmul.f32 (!%p1852_p1), %v2193_v22, %v510_v46 }
  0x27   : > { %497 = vst.msk [vmem:[#allocation2 + $0x29] sm:$0x7f] (!%p1852_p1), %vm492_vm1, %v489_v43  ;;  %498 = vst.msk [vmem:[#allocation2 + $0x31] sm:$0x7f] (!%p1852_p1), %vm492_vm1, %v490_v44  ;;  %v517_v23 = vmul.f32 (!%p1852_p1), %v2200_v29, %v510_v46  ;;  %v543_v26 = vmul.f32 (!%p1852_p1), %v2179_v15, %v542_v59  ;;  %v544_v27 = vmul.f32 (!%p1852_p1), %v2181_v16, %v542_v59 }
  0x28   : > { %499 = vst.msk [vmem:[#allocation2 + $0x39] sm:$0x7f] %vm492_vm1, %v491_v49  ;;  %613 = vst.msk [vmem:[#allocation2 + $0x1] sm:$0x7f] %vm492_vm1, %v605_v55  ;;  %v545_v30 = vmul.f32 %v2185_v18, %v542_v59  ;;  %v633_v31 = vmul.f32 %v2179_v15, %v2237_v60  ;;  %v546_v32 = vmul.f32 %v2187_v19, %v542_v59 }
  0x29   : > { %v547_v33 = vmul.f32 %v2191_v21, %v542_v59  ;;  %v548_v34 = vmul.f32 %v2193_v22, %v542_v59  ;;  %v549_v37 = vmul.f32 %v2200_v29, %v542_v59  ;;  %v2257_v39 = vrot.slane %v2100_v2, %v2221_v50 }
  0x2a   : > { %v557_v41 = vrot.slane %v543_v26, 1  ;;  %v558_v42 = vrot.slane %v544_v27, 1  ;;  %v559_v43 = vrot.slane %v545_v30, 1  ;;  %v560_v45 = vrot.slane %v546_v32, 1 }
  0x2b   : > { %v561_v46 = vrot.slane %v547_v33, 1  ;;  %v562_v47 = vrot.slane %v548_v34, 1  ;;  %v563_v48 = vrot.slane %v549_v37, 1  ;;  %v669_v49 = vmul.f32 %v2179_v15, %v2257_v39 }
  0x2c   : > { %v500_v61 = vld [vmem:[#allocation2 + $0x8] sm:$0xff]  ;;  %v501_v62 = vld [vmem:[#allocation2 + $0x10] sm:$0xff] }
  0x2d   : > { %v502_v63 = vld [vmem:[#allocation2 + $0x18] sm:$0xff]  ;;  %v518_v1 = vadd.f32 %v511_v52, %v500_v61  ;;  %v519_v10 = vadd.f32 %v512_v53, %v501_v62  ;;  %v503_v12 = vld [vmem:[#allocation2 + $0x20] sm:$0xff] }
  0x2e   : > { %v520_v11 = vadd.f32 %v513_v54, %v502_v63  ;;  %v504_v13 = vld [vmem:[#allocation2 + $0x28] sm:$0xff]  ;;  %v505_v14 = vld [vmem:[#allocation2 + $0x30] sm:$0xff]  ;;  %v521_v24 = vadd.f32 %v514_v56, %v503_v12  ;;  %v685_v63 = vrot.slane %v669_v49, 1  ;;  %v598_v12 = vmul.f32 %v2181_v16, %v2210_v38 }
  0x2f   : > { %v522_v25 = vadd.f32 %v515_v57, %v504_v13  ;;  %v523_v0 = vadd.f32 %v516_v58, %v505_v14  ;;  %525 = vst.msk [vmem:[#allocation2 + $0x8] sm:$0xff] %vm427_vm0, %v518_v1  ;;  %526 = vst.msk [vmem:[#allocation2 + $0x10] sm:$0xff] %vm427_vm0, %v519_v10  ;;  %v506_v35 = vld [vmem:[#allocation2 + $0x38] sm:$0xff]  ;;  %v621_v40 = vld [vmem:[#allocation2] sm:$0xff]  ;;  %v599_v13 = vmul.f32 %v2185_v18, %v2210_v38 }
  0x30   : > { %527 = vst.msk [vmem:[#allocation2 + $0x18] sm:$0xff] %vm427_vm0, %v520_v11  ;;  %528 = vst.msk [vmem:[#allocation2 + $0x20] sm:$0xff] %vm427_vm0, %v521_v24  ;;  %v524_v36 = vadd.f32 %v517_v23, %v506_v35  ;;  %v641_v44 = vadd.f32 %v633_v31, %v621_v40  ;;  %v2270_v11 = vunpack.c.h.bf16 %v2189_v20  ;;  %v600_v14 = vmul.f32 %v2187_v19, %v2210_v38 }
  0x31   : > { %529 = vst.msk [vmem:[#allocation2 + $0x28] sm:$0xff] %vm427_vm0, %v522_v25  ;;  %530 = vst.msk [vmem:[#allocation2 + $0x30] sm:$0xff] %vm427_vm0, %v523_v0  ;;  %v601_v24 = vmul.f32 %v2191_v21, %v2210_v38  ;;  %v602_v25 = vmul.f32 %v2193_v22, %v2210_v38  ;;  %v603_v20 = vmul.f32 %v2200_v29, %v2210_v38 }
  0x32   : > { %531 = vst.msk [vmem:[#allocation2 + $0x38] sm:$0xff] %vm427_vm0, %v524_v36  ;;  %649 = vst.msk [vmem:[#allocation2] sm:$0xff] %vm427_vm0, %v641_v44  ;;  %v2287_v0 = vrot.slane %v2105_v3, %v2183_v17  ;;  %v604_v37 = vmul.f32 %v2270_v11, %v2210_v38  ;;  %v637_v49 = vmul.f32 %v2191_v21, %v2237_v60 }
  0x34   : > { %v728_v17 = vmul.f32 %v2181_v16, %v2287_v0 }
  0x36   : > { %v532_v51 = vld [vmem:[#allocation2 + $0x8] sm:$0x7f]  ;;  %v533_v52 = vld [vmem:[#allocation2 + $0x10] sm:$0x7f] }
  0x37   : > { %v534_v2 = vld [vmem:[#allocation2 + $0x18] sm:$0x7f]  ;;  %v571_v53 = vadd.f32 %v557_v41, %v532_v51  ;;  %v572_v54 = vadd.f32 %v558_v42, %v533_v52  ;;  %v535_v56 = vld [vmem:[#allocation2 + $0x20] sm:$0x7f]  ;;  %v638_v51 = vmul.f32 %v2193_v22, %v2237_v60  ;;  %v639_v52 = vmul.f32 %v2200_v29, %v2237_v60 }
  0x38   : > { %v573_v55 = vadd.f32 %v559_v43, %v534_v2  ;;  %v536_v57 = vld [vmem:[#allocation2 + $0x28] sm:$0x7f]  ;;  %v537_v58 = vld [vmem:[#allocation2 + $0x30] sm:$0x7f]  ;;  %v574_v59 = vadd.f32 %v560_v45, %v535_v56  ;;  %v634_v45 = vmul.f32 %v2181_v16, %v2237_v60  ;;  %v2316_v2 = vrot.slane %v2105_v3, %v2197_v28 }
  0x39   : > { %v575_v61 = vadd.f32 %v561_v46, %v536_v57  ;;  %v576_v62 = vadd.f32 %v562_v47, %v537_v58  ;;  %578 = vst.msk [vmem:[#allocation2 + $0x8] sm:$0x7f] %vm492_vm1, %v571_v53  ;;  %579 = vst.msk [vmem:[#allocation2 + $0x10] sm:$0x7f] %vm492_vm1, %v572_v54  ;;  %v538_v15 = vld [vmem:[#allocation2 + $0x38] sm:$0x7f]  ;;  %v635_v46 = vmul.f32 %v2185_v18, %v2237_v60 }
  0x3a   : > { %580 = vst.msk [vmem:[#allocation2 + $0x18] sm:$0x7f] %vm492_vm1, %v573_v55  ;;  %581 = vst.msk [vmem:[#allocation2 + $0x20] sm:$0x7f] %vm492_vm1, %v574_v59  ;;  %v577_v1 = vadd.f32 %v563_v48, %v538_v15  ;;  %v657_v10 = vld [vmem:[#allocation2] sm:$0x7f]  ;;  %v636_v47 = vmul.f32 %v2187_v19, %v2237_v60  ;;  %v670_v28 = vmul.f32 %v2181_v16, %v2257_v39 }
  0x3b   : > { %582 = vst.msk [vmem:[#allocation2 + $0x28] sm:$0x7f] %vm492_vm1, %v575_v61  ;;  %583 = vst.msk [vmem:[#allocation2 + $0x30] sm:$0x7f] %vm492_vm1, %v576_v62  ;;  %v701_v23 = vadd.f32 %v685_v63, %v657_v10  ;;  %v640_v63 = vmul.f32 %v2270_v11, %v2237_v60  ;;  %v760_v60 = vmul.f32 %v2181_v16, %v2316_v2 }
  0x3c   : > { %584 = vst.msk [vmem:[#allocation2 + $0x38] sm:$0x7f] %vm492_vm1, %v577_v1 }
  0x3d   : > { %709 = vst.msk [vmem:[#allocation2] sm:$0x7f] %vm492_vm1, %v701_v23  ;;  %v674_v23 = vmul.f32 %v2193_v22, %v2257_v39 }
  0x40   : > { %v586_v26 = vld [vmem:[#allocation2 + $0x9] sm:$0x7f]  ;;  %v587_v27 = vld [vmem:[#allocation2 + $0x11] sm:$0x7f] }
  0x41   : > { %v588_v30 = vld [vmem:[#allocation2 + $0x19] sm:$0x7f]  ;;  %v606_v31 = vadd.f32 %v598_v12, %v586_v26  ;;  %v607_v32 = vadd.f32 %v599_v13, %v587_v27  ;;  %v589_v34 = vld [vmem:[#allocation2 + $0x21] sm:$0x7f]  ;;  %v671_v12 = vmul.f32 %v2185_v18, %v2257_v39  ;;  %v672_v13 = vmul.f32 %v2187_v19, %v2257_v39 }
  0x42   : > { %v608_v33 = vadd.f32 %v600_v14, %v588_v30  ;;  %v590_v35 = vld [vmem:[#allocation2 + $0x29] sm:$0x7f]  ;;  %v591_v36 = vld [vmem:[#allocation2 + $0x31] sm:$0x7f]  ;;  %v609_v40 = vadd.f32 %v601_v24, %v589_v34  ;;  %v673_v14 = vmul.f32 %v2191_v21, %v2257_v39  ;;  %v675_v24 = vmul.f32 %v2200_v29, %v2257_v39 }
  0x43   : > { %v610_v41 = vadd.f32 %v602_v25, %v590_v35  ;;  %v611_v42 = vadd.f32 %v603_v20, %v591_v36  ;;  %614 = vst.msk [vmem:[#allocation2 + $0x9] sm:$0x7f] %vm492_vm1, %v606_v31  ;;  %615 = vst.msk [vmem:[#allocation2 + $0x11] sm:$0x7f] %vm492_vm1, %v607_v32  ;;  %v592_v43 = vld [vmem:[#allocation2 + $0x39] sm:$0x7f]  ;;  %v676_v26 = vmul.f32 %v2270_v11, %v2257_v39 }
  0x44   : > { %616 = vst.msk [vmem:[#allocation2 + $0x19] sm:$0x7f] %vm492_vm1, %v608_v33  ;;  %617 = vst.msk [vmem:[#allocation2 + $0x21] sm:$0x7f] %vm492_vm1, %v609_v40  ;;  %v612_v38 = vadd.f32 %v604_v37, %v592_v43  ;;  %v717_v44 = vld [vmem:[#allocation2 + $0x1] sm:$0x7f]  ;;  %v2344_v27 = vrot.slane %v2105_v3, %v2221_v50 }
  0x45   : > { %618 = vst.msk [vmem:[#allocation2 + $0x29] sm:$0x7f] %vm492_vm1, %v610_v41  ;;  %619 = vst.msk [vmem:[#allocation2 + $0x31] sm:$0x7f] %vm492_vm1, %v611_v42  ;;  %v735_v48 = vadd.f32 %v728_v17, %v717_v44  ;;  %v686_v31 = vrot.slane %v670_v28, 1  ;;  %v687_v32 = vrot.slane %v671_v12, 1 }
  0x46   : > { %620 = vst.msk [vmem:[#allocation2 + $0x39] sm:$0x7f] %vm492_vm1, %v612_v38  ;;  %v688_v33 = vrot.slane %v672_v13, 1  ;;  %v689_v35 = vrot.slane %v673_v14, 1  ;;  %v690_v36 = vrot.slane %v674_v23, 1  ;;  %v691_v37 = vrot.slane %v675_v24, 1 }
  0x47   : > { %742 = vst.msk [vmem:[#allocation2 + $0x1] sm:$0x7f] %vm492_vm1, %v735_v48  ;;  %v692_v40 = vrot.slane %v676_v26, 1  ;;  %v792_v39 = vmul.f32 %v2181_v16, %v2344_v27  ;;  %v762_v24 = vmul.f32 %v2187_v19, %v2316_v2  ;;  %v765_v26 = vmul.f32 %v2200_v29, %v2316_v2 }
  0x4a   : > { %v622_v53 = vld [vmem:[#allocation2 + $0x8] sm:$0xff]  ;;  %v623_v54 = vld [vmem:[#allocation2 + $0x10] sm:$0xff] }
  0x4b   : > { %v624_v55 = vld [vmem:[#allocation2 + $0x18] sm:$0xff]  ;;  %v642_v56 = vadd.f32 %v634_v45, %v622_v53  ;;  %v643_v57 = vadd.f32 %v635_v46, %v623_v54  ;;  %v625_v59 = vld [vmem:[#allocation2 + $0x20] sm:$0xff]  ;;  %v729_v53 = vmul.f32 %v2185_v18, %v2287_v0  ;;  %v730_v54 = vmul.f32 %v2187_v19, %v2287_v0 }
  0x4c   : > { %v644_v58 = vadd.f32 %v636_v47, %v624_v55  ;;  %v626_v61 = vld [vmem:[#allocation2 + $0x28] sm:$0xff]  ;;  %v627_v62 = vld [vmem:[#allocation2 + $0x30] sm:$0xff]  ;;  %v645_v15 = vadd.f32 %v637_v49, %v625_v59  ;;  %v806_v49 = vrot.slane %v792_v39, 1  ;;  %v731_v55 = vmul.f32 %v2191_v21, %v2287_v0 }
  0x4d   : > { %v646_v1 = vadd.f32 %v638_v51, %v626_v61  ;;  %v647_v10 = vadd.f32 %v639_v52, %v627_v62  ;;  %650 = vst.msk [vmem:[#allocation2 + $0x8] sm:$0xff] %vm427_vm0, %v642_v56  ;;  %651 = vst.msk [vmem:[#allocation2 + $0x10] sm:$0xff] %vm427_vm0, %v643_v57  ;;  %v628_v25 = vld [vmem:[#allocation2 + $0x38] sm:$0xff]  ;;  %v732_v57 = vmul.f32 %v2193_v22, %v2287_v0 }
  0x4e   : > { %652 = vst.msk [vmem:[#allocation2 + $0x18] sm:$0xff] %vm427_vm0, %v644_v58  ;;  %653 = vst.msk [vmem:[#allocation2 + $0x20] sm:$0xff] %vm427_vm0, %v645_v15  ;;  %v648_v20 = vadd.f32 %v640_v63, %v628_v25  ;;  %v749_v30 = vld [vmem:[#allocation2] sm:$0xff]  ;;  %v733_v58 = vmul.f32 %v2200_v29, %v2287_v0  ;;  %v734_v59 = vmul.f32 %v2270_v11, %v2287_v0 }
  0x4f   : > { %654 = vst.msk [vmem:[#allocation2 + $0x28] sm:$0xff] %vm427_vm0, %v646_v1  ;;  %655 = vst.msk [vmem:[#allocation2 + $0x30] sm:$0xff] %vm427_vm0, %v647_v10  ;;  %v767_v34 = vadd.f32 %v760_v60, %v749_v30  ;;  %v761_v0 = vmul.f32 %v2185_v18, %v2316_v2  ;;  %v763_v25 = vmul.f32 %v2191_v21, %v2316_v2 }
  0x50   : > { %656 = vst.msk [vmem:[#allocation2 + $0x38] sm:$0xff] %vm427_vm0, %v648_v20  ;;  %v764_v20 = vmul.f32 %v2193_v22, %v2316_v2  ;;  %v766_v30 = vmul.f32 %v2270_v11, %v2316_v2  ;;  %v793_v2 = vmul.f32 %v2185_v18, %v2344_v27  ;;  %v798_v18 = vmul.f32 %v2270_v11, %v2344_v27 }
  0x51   : > { %774 = vst.msk [vmem:[#allocation2] sm:$0xff] %vm427_vm0, %v767_v34 }
  0x54   : > { %v658_v41 = vld [vmem:[#allocation2 + $0x8] sm:$0x7f]  ;;  %v659_v42 = vld [vmem:[#allocation2 + $0x10] sm:$0x7f] }
  0x55   : > { %v660_v3 = vld [vmem:[#allocation2 + $0x18] sm:$0x7f]  ;;  %v702_v50 = vadd.f32 %v686_v31, %v658_v41  ;;  %v703_v17 = vadd.f32 %v687_v32, %v659_v42  ;;  %v661_v38 = vld [vmem:[#allocation2 + $0x20] sm:$0x7f] }
  0x56   : > { %v704_v43 = vadd.f32 %v688_v33, %v660_v3  ;;  %v662_v44 = vld [vmem:[#allocation2 + $0x28] sm:$0x7f]  ;;  %v663_v45 = vld [vmem:[#allocation2 + $0x30] sm:$0x7f]  ;;  %v705_v46 = vadd.f32 %v689_v35, %v661_v38  ;;  %v797_v38 = vmul.f32 %v2200_v29, %v2344_v27 }
  0x57   : > { %v706_v47 = vadd.f32 %v690_v36, %v662_v44  ;;  %v707_v48 = vadd.f32 %v691_v37, %v663_v45  ;;  %710 = vst.msk [vmem:[#allocation2 + $0x8] sm:$0x7f] %vm492_vm1, %v702_v50  ;;  %711 = vst.msk [vmem:[#allocation2 + $0x10] sm:$0x7f] %vm492_vm1, %v703_v17  ;;  %v664_v16 = vld [vmem:[#allocation2 + $0x38] sm:$0x7f]  ;;  %v794_v50 = vmul.f32 %v2187_v19, %v2344_v27 }
  0x58   : > { %712 = vst.msk [vmem:[#allocation2 + $0x18] sm:$0x7f] %vm492_vm1, %v704_v43  ;;  %713 = vst.msk [vmem:[#allocation2 + $0x20] sm:$0x7f] %vm492_vm1, %v705_v46  ;;  %v708_v51 = vadd.f32 %v692_v40, %v664_v16  ;;  %v781_v52 = vld [vmem:[#allocation2] sm:$0x7f]  ;;  %v795_v17 = vmul.f32 %v2191_v21, %v2344_v27  ;;  %v796_v43 = vmul.f32 %v2193_v22, %v2344_v27 }
  0x59   : > { %714 = vst.msk [vmem:[#allocation2 + $0x28] sm:$0x7f] %vm492_vm1, %v706_v47  ;;  %715 = vst.msk [vmem:[#allocation2 + $0x30] sm:$0x7f] %vm492_vm1, %v707_v48  ;;  %v820_v56 = vadd.f32 %v806_v49, %v781_v52  ;;  %v807_v44 = vrot.slane %v793_v2, 1  ;;  %v808_v19 = vrot.slane %v794_v50, 1 }
  0x5a   : > { %716 = vst.msk [vmem:[#allocation2 + $0x38] sm:$0x7f] %vm492_vm1, %v708_v51  ;;  %v809_v45 = vrot.slane %v795_v17, 1  ;;  %v810_v46 = vrot.slane %v796_v43, 1  ;;  %v811_v21 = vrot.slane %v797_v38, 1  ;;  %v812_v47 = vrot.slane %v798_v18, 1 }
  0x5b   : > { %827 = vst.msk [vmem:[#allocation2] sm:$0x7f] %vm492_vm1, %v820_v56 }
  0x5e   : > { %v718_v61 = vld [vmem:[#allocation2 + $0x9] sm:$0x7f]  ;;  %v719_v62 = vld [vmem:[#allocation2 + $0x11] sm:$0x7f] }
  0x5f   : > { %v720_v63 = vld [vmem:[#allocation2 + $0x19] sm:$0x7f]  ;;  %v736_v15 = vadd.f32 %v729_v53, %v718_v61  ;;  %v737_v1 = vadd.f32 %v730_v54, %v719_v62  ;;  %v721_v28 = vld [vmem:[#allocation2 + $0x21] sm:$0x7f] }
  0x60   : > { %v738_v10 = vadd.f32 %v731_v55, %v720_v63  ;;  %v722_v12 = vld [vmem:[#allocation2 + $0x29] sm:$0x7f]  ;;  %v723_v13 = vld [vmem:[#allocation2 + $0x31] sm:$0x7f]  ;;  %v739_v60 = vadd.f32 %v732_v57, %v721_v28 }
  0x61   : > { %v740_v14 = vadd.f32 %v733_v58, %v722_v12  ;;  %v741_v23 = vadd.f32 %v734_v59, %v723_v13  ;;  %743 = vst.msk [vmem:[#allocation2 + $0x9] sm:$0x7f] %vm492_vm1, %v736_v15  ;;  %744 = vst.msk [vmem:[#allocation2 + $0x11] sm:$0x7f] %vm492_vm1, %v737_v1 }
  0x62   : > { %745 = vst.msk [vmem:[#allocation2 + $0x19] sm:$0x7f] %vm492_vm1, %v738_v10  ;;  %746 = vst.msk [vmem:[#allocation2 + $0x21] sm:$0x7f] %vm492_vm1, %v739_v60 }
  0x63   : > { %747 = vst.msk [vmem:[#allocation2 + $0x29] sm:$0x7f] %vm492_vm1, %v740_v14  ;;  %748 = vst.msk [vmem:[#allocation2 + $0x31] sm:$0x7f] %vm492_vm1, %v741_v23 }
  0x68   : > { %v750_v31 = vld [vmem:[#allocation2 + $0x8] sm:$0xff]  ;;  %v751_v32 = vld [vmem:[#allocation2 + $0x10] sm:$0xff] }
  0x69   : > { %v752_v33 = vld [vmem:[#allocation2 + $0x18] sm:$0xff]  ;;  %v768_v34 = vadd.f32 %v761_v0, %v750_v31  ;;  %v769_v35 = vadd.f32 %v762_v24, %v751_v32  ;;  %v753_v37 = vld [vmem:[#allocation2 + $0x20] sm:$0xff] }
  0x6a   : > { %v770_v36 = vadd.f32 %v763_v25, %v752_v33  ;;  %v754_v40 = vld [vmem:[#allocation2 + $0x28] sm:$0xff]  ;;  %v755_v39 = vld [vmem:[#allocation2 + $0x30] sm:$0xff]  ;;  %v771_v41 = vadd.f32 %v764_v20, %v753_v37 }
  0x6b   : > { %v772_v42 = vadd.f32 %v765_v26, %v754_v40  ;;  %v773_v3 = vadd.f32 %v766_v30, %v755_v39  ;;  %775 = vst.msk [vmem:[#allocation2 + $0x8] sm:$0xff] %vm427_vm0, %v768_v34  ;;  %776 = vst.msk [vmem:[#allocation2 + $0x10] sm:$0xff] %vm427_vm0, %v769_v35 }
  0x6c   : > { %777 = vst.msk [vmem:[#allocation2 + $0x18] sm:$0xff] %vm427_vm0, %v770_v36  ;;  %778 = vst.msk [vmem:[#allocation2 + $0x20] sm:$0xff] %vm427_vm0, %v771_v41 }
  0x6d   : > { %779 = vst.msk [vmem:[#allocation2 + $0x28] sm:$0xff] %vm427_vm0, %v772_v42  ;;  %780 = vst.msk [vmem:[#allocation2 + $0x30] sm:$0xff] %vm427_vm0, %v773_v3 }
  0x72   : > { %v782_v48 = vld [vmem:[#allocation2 + $0x8] sm:$0x7f]  ;;  %v783_v49 = vld [vmem:[#allocation2 + $0x10] sm:$0x7f] }
  0x73   : > { %v784_v16 = vld [vmem:[#allocation2 + $0x18] sm:$0x7f]  ;;  %v821_v51 = vadd.f32 %v807_v44, %v782_v48  ;;  %v822_v52 = vadd.f32 %v808_v19, %v783_v49  ;;  %v785_v54 = vld [vmem:[#allocation2 + $0x20] sm:$0x7f] }
  0x74   : > { %v823_v53 = vadd.f32 %v809_v45, %v784_v16  ;;  %v786_v22 = vld [vmem:[#allocation2 + $0x28] sm:$0x7f]  ;;  %v787_v55 = vld [vmem:[#allocation2 + $0x30] sm:$0x7f]  ;;  %v824_v56 = vadd.f32 %v810_v46, %v785_v54 }
  0x75   : > { %v825_v29 = vadd.f32 %v811_v21, %v786_v22  ;;  %v826_v57 = vadd.f32 %v812_v47, %v787_v55  ;;  %828 = vst.msk [vmem:[#allocation2 + $0x8] sm:$0x7f] %vm492_vm1, %v821_v51  ;;  %829 = vst.msk [vmem:[#allocation2 + $0x10] sm:$0x7f] %vm492_vm1, %v822_v52 }
  0x76   : > { %830 = vst.msk [vmem:[#allocation2 + $0x18] sm:$0x7f] %vm492_vm1, %v823_v53  ;;  %831 = vst.msk [vmem:[#allocation2 + $0x20] sm:$0x7f] %vm492_vm1, %v824_v56 }
  0x77   : > { %832 = vst.msk [vmem:[#allocation2 + $0x28] sm:$0x7f] %vm492_vm1, %v825_v29  ;;  %833 = vst.msk [vmem:[#allocation2 + $0x30] sm:$0x7f] %vm492_vm1, %v826_v57 }
  0x78 PF: > { %v1892_v11 = vld [vmem:[%s2170_s3] sm:$0xff]   ;;  %v858_v27 = vlaneseq  ;;  %v1926_v58 = vld [vmem:[%s2170_s3 + $0x8] sm:$0xff]   ;;  %v1927_v61 = vld [vmem:[%s2170_s3 + $0x10] sm:$0xff]   ;;  %vm876_vm2 = vcmask 522240   ;;  %p1853_p2 = scmp.ge.s32.totalorder %s2151_s19, 8 }
  0x79   : > { %v2415_v62 = vunpack.c.l.bf16 %v1892_v11  ;;  %v2417_v63 = vunpack.c.h.bf16 %v1892_v11  ;;  %v2421_v1 = vunpack.c.l.bf16 %v1926_v58  ;;  %v2423_v10 = vunpack.c.h.bf16 %v1926_v58  ;;  %v2426_v28 = vld [vmem:[%s2170_s3 + $0x18] sm:$0xff]  }
  0x7a   : > { %v859_v59 = vshrl.u32 %v858_v27, 7  ;;  %v2428_v12 = vunpack.c.l.bf16 %v1927_v61  ;;  %v2430_v13 = vunpack.c.h.bf16 %v1927_v61  ;;  %v2437_v20 = vunpack.c.l.bf16 %v2426_v28 }
  0x7c   : > { %v2419_v15 = vsub.s32 0, %v859_v59  ;;  %v851_v60 = vld [vmem:[#allocation2 + $0x9] sm:$0x7f]  ;;  %v852_v23 = vld [vmem:[#allocation2 + $0x11] sm:$0x7f]  ;;  %v2434_v25 = vsub.s32 1, %v859_v59 }
  0x7d   : > { %v853_v0 = vld [vmem:[#allocation2 + $0x19] sm:$0x7f]  ;;  %v854_v24 = vld [vmem:[#allocation2 + $0x21] sm:$0x7f]  ;;  %v2458_v44 = vsub.s32 2, %v859_v59 }
  0x7e   : > { %v861_v14 = vrot.slane %v2113_v4, %v2419_v15  ;;  %v855_v33 = vld [vmem:[#allocation2 + $0x29] sm:$0x7f]  ;;  %v856_v34 = vld [vmem:[#allocation2 + $0x31] sm:$0x7f]  ;;  %v2447_v37 = vrot.slane %v2118_v5, %v2419_v15  ;;  %v894_v17 = vrot.slane %v2113_v4, %v2434_v25  ;;  %v2474_v52 = vrot.slane %v2118_v5, %v2434_v25 }
  0x7f   : > { %v857_v50 = vld [vmem:[#allocation2 + $0x39] sm:$0x7f]  ;;  %v969_v38 = vld [vmem:[#allocation2 + $0x1] sm:$0x7f]  ;;  %v926_v51 = vrot.slane %v2113_v4, %v2458_v44 }
  0x80   : > { %v862_v26 = vmul.f32 %v2415_v62, %v861_v14  ;;  %v863_v30 = vmul.f32 %v2417_v63, %v861_v14  ;;  %v864_v31 = vmul.f32 %v2421_v1, %v861_v14  ;;  %v865_v32 = vmul.f32 %v2423_v10, %v861_v14 }
  0x81   : > { %v866_v35 = vmul.f32 %v2428_v12, %v861_v14  ;;  %v867_v36 = vmul.f32 %v2430_v13, %v861_v14  ;;  %v868_v43 = vmul.f32 %v2437_v20, %v861_v14  ;;  %v981_v19 = vmul.f32 %v2415_v62, %v2447_v37 }
  0x82   : > { %v869_v40 = vadd.f32 %v862_v26, %v851_v60  ;;  %v870_v39 = vadd.f32 %v863_v30, %v852_v23  ;;  %v871_v41 = vadd.f32 %v864_v31, %v853_v0  ;;  %v872_v42 = vadd.f32 %v865_v32, %v854_v24 }
  0x83   : > { %v873_v3 = vadd.f32 %v866_v35, %v855_v33  ;;  %v874_v2 = vadd.f32 %v867_v36, %v856_v34  ;;  %v875_v18 = vadd.f32 %v868_v43, %v857_v50  ;;  %v895_v45 = vmul.f32 %v2415_v62, %v894_v17 }
  0x84   : > { %877 = vst.msk [vmem:[#allocation2 + $0x9] sm:$0x7f] %vm876_vm2, %v869_v40  ;;  %878 = vst.msk [vmem:[#allocation2 + $0x11] sm:$0x7f] %vm876_vm2, %v870_v39  ;;  %v896_v46 = vmul.f32 %v2417_v63, %v894_v17  ;;  %v897_v21 = vmul.f32 %v2421_v1, %v894_v17  ;;  %v989_v47 = vadd.f32 %v981_v19, %v969_v38 }
  0x85   : > { %879 = vst.msk [vmem:[#allocation2 + $0x19] sm:$0x7f] %vm876_vm2, %v871_v41  ;;  %880 = vst.msk [vmem:[#allocation2 + $0x21] sm:$0x7f] %vm876_vm2, %v872_v42  ;;  %v898_v48 = vmul.f32 %v2423_v10, %v894_v17  ;;  %v899_v49 = vmul.f32 %v2428_v12, %v894_v17  ;;  %v900_v16 = vmul.f32 %v2430_v13, %v894_v17 }
  0x86   : > { %881 = vst.msk [vmem:[#allocation2 + $0x29] sm:$0x7f] %vm876_vm2, %v873_v3  ;;  %882 = vst.msk [vmem:[#allocation2 + $0x31] sm:$0x7f] %vm876_vm2, %v874_v2  ;;  %v901_v58 = vmul.f32 %v2437_v20, %v894_v17  ;;  %v927_v60 = vmul.f32 %v2415_v62, %v926_v51  ;;  %v928_v14 = vmul.f32 %v2417_v63, %v926_v51 }
  0x87   : > { %883 = vst.msk [vmem:[#allocation2 + $0x39] sm:$0x7f] %vm876_vm2, %v875_v18  ;;  %997 = vst.msk [vmem:[#allocation2 + $0x1] sm:$0x7f] %vm876_vm2, %v989_v47  ;;  %v929_v23 = vmul.f32 %v2421_v1, %v926_v51  ;;  %v1017_v0 = vmul.f32 %v2415_v62, %v2474_v52  ;;  %v930_v24 = vmul.f32 %v2423_v10, %v926_v51 }
  0x88   : > { %v931_v26 = vmul.f32 %v2428_v12, %v926_v51  ;;  %v932_v30 = vmul.f32 %v2430_v13, %v926_v51  ;;  %v933_v33 = vmul.f32 %v2437_v20, %v926_v51  ;;  %v2494_v34 = vrot.slane %v2118_v5, %v2458_v44 }
  0x89   : > { %v941_v36 = vrot.slane %v927_v60, 1  ;;  %v942_v40 = vrot.slane %v928_v14, 1  ;;  %v943_v39 = vrot.slane %v929_v23, 1  ;;  %v944_v42 = vrot.slane %v930_v24, 1 }
  0x8a   : > { %v945_v3 = vrot.slane %v931_v26, 1  ;;  %v946_v2 = vrot.slane %v932_v30, 1  ;;  %v947_v50 = vrot.slane %v933_v33, 1  ;;  %v1053_v17 = vmul.f32 %v2415_v62, %v2494_v34 }
  0x8b   : > { %v884_v53 = vld [vmem:[#allocation2 + $0x8] sm:$0xff]  ;;  %v885_v54 = vld [vmem:[#allocation2 + $0x10] sm:$0xff] }
  0x8c   : > { %v886_v22 = vld [vmem:[#allocation2 + $0x18] sm:$0xff]  ;;  %v902_v55 = vadd.f32 %v895_v45, %v884_v53  ;;  %v903_v56 = vadd.f32 %v896_v46, %v885_v54  ;;  %v887_v57 = vld [vmem:[#allocation2 + $0x20] sm:$0xff]  ;;  %v1069_v51 = vrot.slane %v1053_v17, 1  ;;  %v1023_v17 = vmul.f32 %v2437_v20, %v2474_v52 }
  0x8d   : > { %v904_v29 = vadd.f32 %v897_v21, %v886_v22  ;;  %v888_v11 = vld [vmem:[#allocation2 + $0x28] sm:$0xff]  ;;  %v889_v27 = vld [vmem:[#allocation2 + $0x30] sm:$0xff]  ;;  %v905_v59 = vadd.f32 %v898_v48, %v887_v57  ;;  %v2507_v22 = vunpack.c.h.bf16 %v2426_v28  ;;  %v987_v28 = vmul.f32 %v2437_v20, %v2447_v37 }
  0x8e   : > { %v906_v61 = vadd.f32 %v899_v49, %v888_v11  ;;  %v907_v4 = vadd.f32 %v900_v16, %v889_v27  ;;  %909 = vst.msk [vmem:[#allocation2 + $0x8] sm:$0xff] %vm427_vm0, %v902_v55  ;;  %910 = vst.msk [vmem:[#allocation2 + $0x10] sm:$0xff] %vm427_vm0, %v903_v56  ;;  %v890_v31 = vld [vmem:[#allocation2 + $0x38] sm:$0xff]  ;;  %v1005_v35 = vld [vmem:[#allocation2] sm:$0xff]  ;;  %v982_v55 = vmul.f32 %v2417_v63, %v2447_v37 }
  0x8f   : > { %911 = vst.msk [vmem:[#allocation2 + $0x18] sm:$0xff] %vm427_vm0, %v904_v29  ;;  %912 = vst.msk [vmem:[#allocation2 + $0x20] sm:$0xff] %vm427_vm0, %v905_v59  ;;  %v908_v32 = vadd.f32 %v901_v58, %v890_v31  ;;  %v1025_v41 = vadd.f32 %v1017_v0, %v1005_v35  ;;  %v983_v56 = vmul.f32 %v2421_v1, %v2447_v37 }
  0x90   : > { %913 = vst.msk [vmem:[#allocation2 + $0x28] sm:$0xff] %vm427_vm0, %v906_v61  ;;  %914 = vst.msk [vmem:[#allocation2 + $0x30] sm:$0xff] %vm427_vm0, %v907_v4  ;;  %v984_v29 = vmul.f32 %v2423_v10, %v2447_v37  ;;  %v985_v11 = vmul.f32 %v2428_v12, %v2447_v37  ;;  %v986_v27 = vmul.f32 %v2430_v13, %v2447_v37 }
  0x91   : > { %915 = vst.msk [vmem:[#allocation2 + $0x38] sm:$0xff] %vm427_vm0, %v908_v32  ;;  %1033 = vst.msk [vmem:[#allocation2] sm:$0xff] %vm427_vm0, %v1025_v41  ;;  %v2524_v58 = vrot.slane %v2126_v6, %v2419_v15  ;;  %v988_v30 = vmul.f32 %v2507_v22, %v2447_v37  ;;  %v1019_v41 = vmul.f32 %v2421_v1, %v2474_v52 }
  0x93   : > { %v1112_v35 = vmul.f32 %v2417_v63, %v2524_v58 }
  0x95   : > { %v916_v43 = vld [vmem:[#allocation2 + $0x8] sm:$0x7f]  ;;  %v917_v38 = vld [vmem:[#allocation2 + $0x10] sm:$0x7f] }
  0x96   : > { %v918_v5 = vld [vmem:[#allocation2 + $0x18] sm:$0x7f]  ;;  %v955_v18 = vadd.f32 %v941_v36, %v916_v43  ;;  %v956_v19 = vadd.f32 %v942_v40, %v917_v38  ;;  %v919_v46 = vld [vmem:[#allocation2 + $0x20] sm:$0x7f]  ;;  %v2553_v43 = vrot.slane %v2126_v6, %v2434_v25 }
  0x97   : > { %v957_v45 = vadd.f32 %v943_v39, %v918_v5  ;;  %v920_v21 = vld [vmem:[#allocation2 + $0x28] sm:$0x7f]  ;;  %v921_v47 = vld [vmem:[#allocation2 + $0x30] sm:$0x7f]  ;;  %v958_v48 = vadd.f32 %v944_v42, %v919_v46  ;;  %v1018_v39 = vmul.f32 %v2417_v63, %v2474_v52  ;;  %v1020_v42 = vmul.f32 %v2423_v10, %v2474_v52 }
  0x98   : > { %v959_v49 = vadd.f32 %v945_v3, %v920_v21  ;;  %v960_v16 = vadd.f32 %v946_v2, %v921_v47  ;;  %962 = vst.msk [vmem:[#allocation2 + $0x8] sm:$0x7f] %vm876_vm2, %v955_v18  ;;  %963 = vst.msk [vmem:[#allocation2 + $0x10] sm:$0x7f] %vm876_vm2, %v956_v19  ;;  %v922_v62 = vld [vmem:[#allocation2 + $0x38] sm:$0x7f]  ;;  %v1021_v2 = vmul.f32 %v2428_v12, %v2474_v52 }
  0x99   : > { %964 = vst.msk [vmem:[#allocation2 + $0x18] sm:$0x7f] %vm876_vm2, %v957_v45  ;;  %965 = vst.msk [vmem:[#allocation2 + $0x20] sm:$0x7f] %vm876_vm2, %v958_v48  ;;  %v961_v53 = vadd.f32 %v947_v50, %v922_v62  ;;  %v1041_v54 = vld [vmem:[#allocation2] sm:$0x7f]  ;;  %v1022_v50 = vmul.f32 %v2430_v13, %v2474_v52 }
  0x9a   : > { %966 = vst.msk [vmem:[#allocation2 + $0x28] sm:$0x7f] %vm876_vm2, %v959_v49  ;;  %967 = vst.msk [vmem:[#allocation2 + $0x30] sm:$0x7f] %vm876_vm2, %v960_v16  ;;  %v1085_v57 = vadd.f32 %v1069_v51, %v1041_v54  ;;  %v1024_v49 = vmul.f32 %v2507_v22, %v2474_v52  ;;  %v1055_v54 = vmul.f32 %v2421_v1, %v2494_v34 }
  0x9b   : > { %968 = vst.msk [vmem:[#allocation2 + $0x38] sm:$0x7f] %vm876_vm2, %v961_v53  ;;  %v1054_v53 = vmul.f32 %v2417_v63, %v2494_v34  ;;  %v1144_v52 = vmul.f32 %v2417_v63, %v2553_v43 }
  0x9c   : > { %1093 = vst.msk [vmem:[#allocation2] sm:$0x7f] %vm876_vm2, %v1085_v57  ;;  %v1059_v57 = vmul.f32 %v2437_v20, %v2494_v34 }
  0x9f   : > { %v970_v59 = vld [vmem:[#allocation2 + $0x9] sm:$0x7f]  ;;  %v971_v61 = vld [vmem:[#allocation2 + $0x11] sm:$0x7f] }
  0xa0   : > { %v972_v4 = vld [vmem:[#allocation2 + $0x19] sm:$0x7f]  ;;  %v990_v60 = vadd.f32 %v982_v55, %v970_v59  ;;  %v991_v14 = vadd.f32 %v983_v56, %v971_v61  ;;  %v973_v0 = vld [vmem:[#allocation2 + $0x21] sm:$0x7f]  ;;  %v1056_v55 = vmul.f32 %v2423_v10, %v2494_v34  ;;  %v1057_v56 = vmul.f32 %v2428_v12, %v2494_v34 }
  0xa1   : > { %v992_v23 = vadd.f32 %v984_v29, %v972_v4  ;;  %v974_v24 = vld [vmem:[#allocation2 + $0x29] sm:$0x7f]  ;;  %v975_v26 = vld [vmem:[#allocation2 + $0x31] sm:$0x7f]  ;;  %v993_v31 = vadd.f32 %v985_v11, %v973_v0  ;;  %v1058_v29 = vmul.f32 %v2430_v13, %v2494_v34  ;;  %v2581_v59 = vrot.slane %v2126_v6, %v2458_v44 }
  0xa2   : > { %v994_v32 = vadd.f32 %v986_v27, %v974_v24  ;;  %v995_v33 = vadd.f32 %v987_v28, %v975_v26  ;;  %998 = vst.msk [vmem:[#allocation2 + $0x9] sm:$0x7f] %vm876_vm2, %v990_v60  ;;  %999 = vst.msk [vmem:[#allocation2 + $0x11] sm:$0x7f] %vm876_vm2, %v991_v14  ;;  %v976_v36 = vld [vmem:[#allocation2 + $0x39] sm:$0x7f]  ;;  %v1060_v28 = vmul.f32 %v2507_v22, %v2494_v34 }
  0xa3   : > { %1000 = vst.msk [vmem:[#allocation2 + $0x19] sm:$0x7f] %vm876_vm2, %v992_v23  ;;  %1001 = vst.msk [vmem:[#allocation2 + $0x21] sm:$0x7f] %vm876_vm2, %v993_v31  ;;  %v996_v37 = vadd.f32 %v988_v30, %v976_v36  ;;  %v1101_v40 = vld [vmem:[#allocation2 + $0x1] sm:$0x7f]  ;;  %v1176_v34 = vmul.f32 %v2417_v63, %v2581_v59 }
  0xa4   : > { %1002 = vst.msk [vmem:[#allocation2 + $0x29] sm:$0x7f] %vm876_vm2, %v994_v32  ;;  %1003 = vst.msk [vmem:[#allocation2 + $0x31] sm:$0x7f] %vm876_vm2, %v995_v33  ;;  %v1119_v3 = vadd.f32 %v1112_v35, %v1101_v40  ;;  %v1070_v4 = vrot.slane %v1054_v53, 1  ;;  %v1071_v60 = vrot.slane %v1055_v54, 1 }
  0xa5   : > { %1004 = vst.msk [vmem:[#allocation2 + $0x39] sm:$0x7f] %vm876_vm2, %v996_v37  ;;  %v1072_v14 = vrot.slane %v1056_v55, 1  ;;  %v1073_v0 = vrot.slane %v1057_v56, 1  ;;  %v1074_v24 = vrot.slane %v1058_v29, 1  ;;  %v1075_v26 = vrot.slane %v1059_v57, 1 }
  0xa6   : > { %1126 = vst.msk [vmem:[#allocation2 + $0x1] sm:$0x7f] %vm876_vm2, %v1119_v3  ;;  %v1076_v30 = vrot.slane %v1060_v28, 1  ;;  %v1146_v57 = vmul.f32 %v2423_v10, %v2553_v43  ;;  %v1149_v28 = vmul.f32 %v2437_v20, %v2553_v43 }
  0xa9   : > { %v1006_v38 = vld [vmem:[#allocation2 + $0x8] sm:$0xff]  ;;  %v1007_v5 = vld [vmem:[#allocation2 + $0x10] sm:$0xff] }
  0xaa   : > { %v1008_v18 = vld [vmem:[#allocation2 + $0x18] sm:$0xff]  ;;  %v1026_v19 = vadd.f32 %v1018_v39, %v1006_v38  ;;  %v1027_v45 = vadd.f32 %v1019_v41, %v1007_v5  ;;  %v1009_v21 = vld [vmem:[#allocation2 + $0x20] sm:$0xff]  ;;  %v1113_v38 = vmul.f32 %v2421_v1, %v2524_v58  ;;  %v1114_v5 = vmul.f32 %v2423_v10, %v2524_v58 }
  0xab   : > { %v1028_v46 = vadd.f32 %v1020_v42, %v1008_v18  ;;  %v1010_v47 = vld [vmem:[#allocation2 + $0x28] sm:$0xff]  ;;  %v1011_v48 = vld [vmem:[#allocation2 + $0x30] sm:$0xff]  ;;  %v1029_v16 = vadd.f32 %v1021_v2, %v1009_v21  ;;  %v1190_v2 = vrot.slane %v1176_v34, 1  ;;  %v1115_v18 = vmul.f32 %v2428_v12, %v2524_v58 }
  0xac   : > { %v1030_v51 = vadd.f32 %v1022_v50, %v1010_v47  ;;  %v1031_v62 = vadd.f32 %v1023_v17, %v1011_v48  ;;  %1034 = vst.msk [vmem:[#allocation2 + $0x8] sm:$0xff] %vm427_vm0, %v1026_v19  ;;  %1035 = vst.msk [vmem:[#allocation2 + $0x10] sm:$0xff] %vm427_vm0, %v1027_v45  ;;  %v1012_v11 = vld [vmem:[#allocation2 + $0x38] sm:$0xff]  ;;  %v1116_v45 = vmul.f32 %v2430_v13, %v2524_v58 }
  0xad   : > { %1036 = vst.msk [vmem:[#allocation2 + $0x18] sm:$0xff] %vm427_vm0, %v1028_v46  ;;  %1037 = vst.msk [vmem:[#allocation2 + $0x20] sm:$0xff] %vm427_vm0, %v1029_v16  ;;  %v1032_v27 = vadd.f32 %v1024_v49, %v1012_v11  ;;  %v1133_v61 = vld [vmem:[#allocation2] sm:$0xff]  ;;  %v1117_v46 = vmul.f32 %v2437_v20, %v2524_v58  ;;  %v1118_v21 = vmul.f32 %v2507_v22, %v2524_v58 }
  0xae   : > { %1038 = vst.msk [vmem:[#allocation2 + $0x28] sm:$0xff] %vm427_vm0, %v1030_v51  ;;  %1039 = vst.msk [vmem:[#allocation2 + $0x30] sm:$0xff] %vm427_vm0, %v1031_v62  ;;  %v1151_v23 = vadd.f32 %v1144_v52, %v1133_v61  ;;  %v1145_v58 = vmul.f32 %v2421_v1, %v2553_v43  ;;  %v1147_v11 = vmul.f32 %v2428_v12, %v2553_v43 }
  0xaf   : > { %1040 = vst.msk [vmem:[#allocation2 + $0x38] sm:$0xff] %vm427_vm0, %v1032_v27  ;;  %v1148_v27 = vmul.f32 %v2430_v13, %v2553_v43  ;;  %v1150_v61 = vmul.f32 %v2507_v22, %v2553_v43  ;;  %v1177_v43 = vmul.f32 %v2421_v1, %v2581_v59  ;;  %v1182_v1 = vmul.f32 %v2507_v22, %v2581_v59  ;;  %v1908_v22 = vld [vmem:[%s2176_s18] sm:$0xff] (!%p1853_p2)  }
  0xb0   : > { %1158 = vst.msk [vmem:[#allocation2] sm:$0xff] %vm427_vm0, %v1151_v23 }
  0xb3   : > { %v1042_v31 = vld [vmem:[#allocation2 + $0x8] sm:$0x7f]  ;;  %v1043_v32 = vld [vmem:[#allocation2 + $0x10] sm:$0x7f] }
  0xb4   : > { %v1044_v6 = vld [vmem:[#allocation2 + $0x18] sm:$0x7f]  ;;  %v1086_v33 = vadd.f32 %v1070_v4, %v1042_v31  ;;  %v1087_v35 = vadd.f32 %v1071_v60, %v1043_v32  ;;  %v1045_v37 = vld [vmem:[#allocation2 + $0x20] sm:$0x7f] }
  0xb5   : > { %v1088_v36 = vadd.f32 %v1072_v14, %v1044_v6  ;;  %v1046_v40 = vld [vmem:[#allocation2 + $0x28] sm:$0x7f]  ;;  %v1047_v39 = vld [vmem:[#allocation2 + $0x30] sm:$0x7f]  ;;  %v1089_v41 = vadd.f32 %v1073_v0, %v1045_v37  ;;  %v1181_v37 = vmul.f32 %v2437_v20, %v2581_v59 }
  0xb6   : > { %v1090_v42 = vadd.f32 %v1074_v24, %v1046_v40  ;;  %v1091_v3 = vadd.f32 %v1075_v26, %v1047_v39  ;;  %1094 = vst.msk [vmem:[#allocation2 + $0x8] sm:$0x7f] %vm876_vm2, %v1086_v33  ;;  %1095 = vst.msk [vmem:[#allocation2 + $0x10] sm:$0x7f] %vm876_vm2, %v1087_v35  ;;  %v1048_v63 = vld [vmem:[#allocation2 + $0x38] sm:$0x7f]  ;;  %v1178_v33 = vmul.f32 %v2423_v10, %v2581_v59 }
  0xb7   : > { %1096 = vst.msk [vmem:[#allocation2 + $0x18] sm:$0x7f] %vm876_vm2, %v1088_v36  ;;  %1097 = vst.msk [vmem:[#allocation2 + $0x20] sm:$0x7f] %vm876_vm2, %v1089_v41  ;;  %v1092_v50 = vadd.f32 %v1076_v30, %v1048_v63  ;;  %v1165_v17 = vld [vmem:[#allocation2] sm:$0x7f]  ;;  %v1179_v35 = vmul.f32 %v2428_v12, %v2581_v59  ;;  %v1180_v36 = vmul.f32 %v2430_v13, %v2581_v59 }
  0xb8   : > { %1098 = vst.msk [vmem:[#allocation2 + $0x28] sm:$0x7f] %vm876_vm2, %v1090_v42  ;;  %1099 = vst.msk [vmem:[#allocation2 + $0x30] sm:$0x7f] %vm876_vm2, %v1091_v3  ;;  %v1204_v19 = vadd.f32 %v1190_v2, %v1165_v17  ;;  %v1191_v40 = vrot.slane %v1177_v43, 1  ;;  %v1192_v10 = vrot.slane %v1178_v33, 1  ;;  %v1249_v59 = vrot.slane (!%p1853_p2), %v2131_v7, %v2419_v15 }
  0xb9   : > { %1100 = vst.msk [vmem:[#allocation2 + $0x38] sm:$0x7f] %vm876_vm2, %v1092_v50  ;;  %v1193_v39 = vrot.slane %v1179_v35, 1  ;;  %v1194_v41 = vrot.slane %v1180_v36, 1  ;;  %v1195_v12 = vrot.slane %v1181_v37, 1  ;;  %v1196_v42 = vrot.slane %v1182_v1, 1 }
  0xba   : > { %1211 = vst.msk [vmem:[#allocation2] sm:$0x7f] %vm876_vm2, %v1204_v19 }
  0xbd   : > { %v1102_v47 = vld [vmem:[#allocation2 + $0x9] sm:$0x7f]  ;;  %v1103_v48 = vld [vmem:[#allocation2 + $0x11] sm:$0x7f] }
  0xbe   : > { %v1104_v49 = vld [vmem:[#allocation2 + $0x19] sm:$0x7f]  ;;  %v1120_v16 = vadd.f32 %v1113_v38, %v1102_v47  ;;  %v1121_v51 = vadd.f32 %v1114_v5, %v1103_v48  ;;  %v1105_v53 = vld [vmem:[#allocation2 + $0x21] sm:$0x7f]  ;;  %v1929_v47 = vld [vmem:[%s2176_s18 + $0x8] sm:$0xff] (!%p1853_p2)  }
  0xbf   : > { %v1122_v62 = vadd.f32 %v1115_v18, %v1104_v49  ;;  %v1106_v54 = vld [vmem:[#allocation2 + $0x29] sm:$0x7f]  ;;  %v1107_v55 = vld [vmem:[#allocation2 + $0x31] sm:$0x7f]  ;;  %v1123_v52 = vadd.f32 %v1116_v45, %v1105_v53 }
  0xc0   : > { %v1124_v56 = vadd.f32 %v1117_v46, %v1106_v54  ;;  %v1125_v29 = vadd.f32 %v1118_v21, %v1107_v55  ;;  %1127 = vst.msk [vmem:[#allocation2 + $0x9] sm:$0x7f] %vm876_vm2, %v1120_v16  ;;  %1128 = vst.msk [vmem:[#allocation2 + $0x11] sm:$0x7f] %vm876_vm2, %v1121_v51  ;;  %v2653_v46 = vunpack.c.l.bf16 (!%p1853_p2), %v1908_v22  ;;  %v2655_v21 = vunpack.c.h.bf16 (!%p1853_p2), %v1908_v22 }
  0xc1   : > { %1129 = vst.msk [vmem:[#allocation2 + $0x19] sm:$0x7f] %vm876_vm2, %v1122_v62  ;;  %1130 = vst.msk [vmem:[#allocation2 + $0x21] sm:$0x7f] %vm876_vm2, %v1123_v52  ;;  %v2658_v16 = vunpack.c.l.bf16 (!%p1853_p2), %v1929_v47  ;;  %v2660_v51 = vunpack.c.h.bf16 (!%p1853_p2), %v1929_v47  ;;  %v1930_v62 = vld [vmem:[%s2176_s18 + $0x10] sm:$0xff] (!%p1853_p2)  }
  0xc2   : > { %1131 = vst.msk [vmem:[#allocation2 + $0x29] sm:$0x7f] %vm876_vm2, %v1124_v56  ;;  %1132 = vst.msk [vmem:[#allocation2 + $0x31] sm:$0x7f] %vm876_vm2, %v1125_v29  ;;  %v1250_v53 = vmul.f32 (!%p1853_p2), %v2653_v46, %v1249_v59  ;;  %v1251_v54 = vmul.f32 (!%p1853_p2), %v2655_v21, %v1249_v59  ;;  %v2665_v56 = vunpack.c.l.bf16 (!%p1853_p2), %v1930_v62  ;;  %v2667_v29 = vunpack.c.h.bf16 (!%p1853_p2), %v1930_v62 }
  0xc7   : > { %v1134_v4 = vld [vmem:[#allocation2 + $0x8] sm:$0xff]  ;;  %v1135_v60 = vld [vmem:[#allocation2 + $0x10] sm:$0xff] }
  0xc8   : > { %v1136_v14 = vld [vmem:[#allocation2 + $0x18] sm:$0xff]  ;;  %v1152_v23 = vadd.f32 %v1145_v58, %v1134_v4  ;;  %v1153_v0 = vadd.f32 %v1146_v57, %v1135_v60  ;;  %v1137_v26 = vld [vmem:[#allocation2 + $0x20] sm:$0xff]  ;;  %v1252_v58 = vmul.f32 (!%p1853_p2), %v2658_v16, %v1249_v59  ;;  %v1253_v57 = vmul.f32 (!%p1853_p2), %v2660_v51, %v1249_v59 }
  0xc9   : > { %v1154_v24 = vadd.f32 %v1147_v11, %v1136_v14  ;;  %v1138_v30 = vld [vmem:[#allocation2 + $0x28] sm:$0xff]  ;;  %v1139_v34 = vld [vmem:[#allocation2 + $0x30] sm:$0xff]  ;;  %v1155_v31 = vadd.f32 %v1148_v27, %v1137_v26  ;;  %v1254_v60 = vmul.f32 (!%p1853_p2), %v2665_v56, %v1249_v59  ;;  %v1255_v14 = vmul.f32 (!%p1853_p2), %v2667_v29, %v1249_v59 }
  0xca   : > { %v1156_v32 = vadd.f32 %v1149_v28, %v1138_v30  ;;  %v1157_v6 = vadd.f32 %v1150_v61, %v1139_v34  ;;  %1159 = vst.msk [vmem:[#allocation2 + $0x8] sm:$0xff] %vm427_vm0, %v1152_v23  ;;  %1160 = vst.msk [vmem:[#allocation2 + $0x10] sm:$0xff] %vm427_vm0, %v1153_v0  ;;  %v2673_v28 = vrot.slane (!%p1853_p2), %v2139_v8, %v2419_v15  ;;  %v2678_v23 = vld [vmem:[%s2176_s18 + $0x18] sm:$0xff] (!%p1853_p2)  }
  0xcb   : > { %1161 = vst.msk [vmem:[#allocation2 + $0x18] sm:$0xff] %vm427_vm0, %v1154_v24  ;;  %1162 = vst.msk [vmem:[#allocation2 + $0x20] sm:$0xff] %vm427_vm0, %v1155_v31  ;;  %v1281_v34 = vrot.slane (!%p1853_p2), %v2131_v7, %v2434_v25  ;;  %v2687_v31 = vunpack.c.l.bf16 (!%p1853_p2), %v2678_v23 }
  0xcc   : > { %1163 = vst.msk [vmem:[#allocation2 + $0x28] sm:$0xff] %vm427_vm0, %v1156_v32  ;;  %1164 = vst.msk [vmem:[#allocation2 + $0x30] sm:$0xff] %vm427_vm0, %v1157_v6  ;;  %v1356_v32 = vld [vmem:[#allocation2 + $0x1] sm:$0x7f] (!%p1853_p2)  ;;  %v1245_v6 = vld [vmem:[#allocation2 + $0x39] sm:$0x7f] (!%p1853_p2)  ;;  %v1368_v43 = vmul.f32 (!%p1853_p2), %v2653_v46, %v2673_v28 }
  0xcd   : > { %v1256_v33 = vmul.f32 (!%p1853_p2), %v2687_v31, %v1249_v59  ;;  %v1282_v35 = vmul.f32 (!%p1853_p2), %v2653_v46, %v1281_v34  ;;  %v1283_v36 = vmul.f32 (!%p1853_p2), %v2655_v21, %v1281_v34  ;;  %v1284_v1 = vmul.f32 (!%p1853_p2), %v2658_v16, %v1281_v34 }
  0xce   : > { %v1376_v37 = vadd.f32 (!%p1853_p2), %v1368_v43, %v1356_v32 }
  0xd0   : > { %1222 = sbr.rel (%p1853_p2) target bundleno = 305 (0x131), region = 48  ;;  %1384 = vst.msk [vmem:[#allocation2 + $0x1] sm:$0x7f] (!%p1853_p2), %vm876_vm2, %v1376_v37 }
  0xd1   : > { %v1166_v3 = vld [vmem:[#allocation2 + $0x8] sm:$0x7f]  ;;  %v1167_v2 = vld [vmem:[#allocation2 + $0x10] sm:$0x7f] }
  0xd2   : > { %v1168_v63 = vld [vmem:[#allocation2 + $0x18] sm:$0x7f]  ;;  %v1205_v50 = vadd.f32 %v1191_v40, %v1166_v3  ;;  %v1206_v17 = vadd.f32 %v1192_v10, %v1167_v2  ;;  %v1169_v5 = vld [vmem:[#allocation2 + $0x20] sm:$0x7f]  ;;  %v1285_v40 = vmul.f32 (!%p1853_p2), %v2660_v51, %v1281_v34  ;;  %v1263_v10 = vadd.f32 (!%p1853_p2), %v1256_v33, %v1245_v6 }
  0xd3   : > { %v1207_v38 = vadd.f32 %v1193_v39, %v1168_v63  ;;  %v1170_v13 = vld [vmem:[#allocation2 + $0x28] sm:$0x7f]  ;;  %v1171_v18 = vld [vmem:[#allocation2 + $0x30] sm:$0x7f]  ;;  %v1208_v19 = vadd.f32 %v1194_v41, %v1169_v5  ;;  %v1313_v39 = vrot.slane (!%p1853_p2), %v2131_v7, %v2458_v44  ;;  %v1286_v41 = vmul.f32 (!%p1853_p2), %v2665_v56, %v1281_v34 }
  0xd4   : > { %v1209_v20 = vadd.f32 %v1195_v12, %v1170_v13  ;;  %v1210_v45 = vadd.f32 %v1196_v42, %v1171_v18  ;;  %1212 = vst.msk [vmem:[#allocation2 + $0x8] sm:$0x7f] %vm876_vm2, %v1205_v50  ;;  %1213 = vst.msk [vmem:[#allocation2 + $0x10] sm:$0x7f] %vm876_vm2, %v1206_v17  ;;  %v1287_v12 = vmul.f32 (!%p1853_p2), %v2667_v29, %v1281_v34 }
  0xd5   : > { %1214 = vst.msk [vmem:[#allocation2 + $0x18] sm:$0x7f] %vm876_vm2, %v1207_v38  ;;  %1215 = vst.msk [vmem:[#allocation2 + $0x20] sm:$0x7f] %vm876_vm2, %v1208_v19  ;;  %v2705_v42 = vrot.slane (!%p1853_p2), %v2139_v8, %v2434_v25  ;;  %v1314_v19 = vmul.f32 (!%p1853_p2), %v2653_v46, %v1313_v39  ;;  %v1315_v22 = vmul.f32 (!%p1853_p2), %v2655_v21, %v1313_v39 }
  0xd6   : > { %1216 = vst.msk [vmem:[#allocation2 + $0x28] sm:$0x7f] %vm876_vm2, %v1209_v20  ;;  %1217 = vst.msk [vmem:[#allocation2 + $0x30] sm:$0x7f] %vm876_vm2, %v1210_v45  ;;  %v1316_v47 = vmul.f32 (!%p1853_p2), %v2658_v16, %v1313_v39  ;;  %v1318_v62 = vmul.f32 (!%p1853_p2), %v2665_v56, %v1313_v39 }
  0xd7   : > { %1270 = vst.msk [vmem:[#allocation2 + $0x39] sm:$0x7f] %vm876_vm2, %v1263_v10  ;;  %v1404_v59 = vmul.f32 %v2653_v46, %v2705_v42 }
  0xdb   : > { %v1239_v48 = vld [vmem:[#allocation2 + $0x9] sm:$0x7f]  ;;  %v1240_v49 = vld [vmem:[#allocation2 + $0x11] sm:$0x7f] }
  0xdc   : > { %v1241_v55 = vld [vmem:[#allocation2 + $0x19] sm:$0x7f]  ;;  %v1242_v52 = vld [vmem:[#allocation2 + $0x21] sm:$0x7f]  ;;  %v1257_v61 = vadd.f32 %v1250_v53, %v1239_v48  ;;  %v1258_v4 = vadd.f32 %v1251_v54, %v1240_v49  ;;  %v1317_v48 = vmul.f32 %v2660_v51, %v1313_v39  ;;  %v1288_v49 = vmul.f32 %v2687_v31, %v1281_v34 }
  0xdd   : > { %v1243_v11 = vld [vmem:[#allocation2 + $0x29] sm:$0x7f]  ;;  %v1244_v27 = vld [vmem:[#allocation2 + $0x31] sm:$0x7f]  ;;  %v1259_v0 = vadd.f32 %v1252_v58, %v1241_v55  ;;  %v1260_v24 = vadd.f32 %v1253_v57, %v1242_v52  ;;  %v1319_v53 = vmul.f32 %v2667_v29, %v1313_v39  ;;  %v2725_v54 = vrot.slane %v2139_v8, %v2458_v44  ;;  %v1392_v55 = vld [vmem:[#allocation2] sm:$0xff] }
  0xde   : > { %1264 = vst.msk [vmem:[#allocation2 + $0x9] sm:$0x7f] %vm876_vm2, %v1257_v61  ;;  %1265 = vst.msk [vmem:[#allocation2 + $0x11] sm:$0x7f] %vm876_vm2, %v1258_v4  ;;  %v1261_v26 = vadd.f32 %v1254_v60, %v1243_v11  ;;  %v1262_v30 = vadd.f32 %v1255_v14, %v1244_v27  ;;  %v1328_v52 = vrot.slane %v1314_v19, 1  ;;  %v1329_v58 = vrot.slane %v1315_v22, 1 }
  0xdf   : > { %1266 = vst.msk [vmem:[#allocation2 + $0x19] sm:$0x7f] %vm876_vm2, %v1259_v0  ;;  %1267 = vst.msk [vmem:[#allocation2 + $0x21] sm:$0x7f] %vm876_vm2, %v1260_v24  ;;  %v1277_v57 = vld [vmem:[#allocation2 + $0x38] sm:$0xff]  ;;  %v1412_v11 = vadd.f32 %v1404_v59, %v1392_v55  ;;  %v1330_v27 = vrot.slane %v1316_v47, 1  ;;  %v1440_v0 = vmul.f32 %v2653_v46, %v2725_v54  ;;  %v1320_v8 = vmul.f32 %v2687_v31, %v1313_v39 }
  0xe0   : > { %1268 = vst.msk [vmem:[#allocation2 + $0x29] sm:$0x7f] %vm876_vm2, %v1261_v26  ;;  %1269 = vst.msk [vmem:[#allocation2 + $0x31] sm:$0x7f] %vm876_vm2, %v1262_v30  ;;  %v1331_v61 = vrot.slane %v1317_v48, 1  ;;  %v1295_v4 = vadd.f32 %v1288_v49, %v1277_v57  ;;  %v1332_v60 = vrot.slane %v1318_v62, 1  ;;  %v1369_v39 = vmul.f32 %v2655_v21, %v2673_v28 }
  0xe1   : > { %v1333_v14 = vrot.slane %v1319_v53, 1  ;;  %1420 = vst.msk [vmem:[#allocation2] sm:$0xff] %vm427_vm0, %v1412_v11 }
  0xe2   : > { %1302 = vst.msk [vmem:[#allocation2 + $0x38] sm:$0xff] %vm427_vm0, %v1295_v4  ;;  %v1409_v4 = vmul.f32 %v2667_v29, %v2705_v42 }
  0xe5   : > { %v1271_v3 = vld [vmem:[#allocation2 + $0x8] sm:$0xff]  ;;  %v1272_v2 = vld [vmem:[#allocation2 + $0x10] sm:$0xff] }
  0xe6   : > { %v1289_v63 = vadd.f32 %v1282_v35, %v1271_v3  ;;  %v1290_v50 = vadd.f32 %v1283_v36, %v1272_v2  ;;  %v1273_v17 = vld [vmem:[#allocation2 + $0x18] sm:$0xff]  ;;  %v1274_v38 = vld [vmem:[#allocation2 + $0x20] sm:$0xff]  ;;  %v1371_v2 = vmul.f32 %v2660_v51, %v2673_v28 }
  0xe7   : > { %v1291_v5 = vadd.f32 %v1284_v1, %v1273_v17  ;;  %v1292_v7 = vadd.f32 %v1285_v40, %v1274_v38  ;;  %v1275_v13 = vld [vmem:[#allocation2 + $0x28] sm:$0xff]  ;;  %v1276_v18 = vld [vmem:[#allocation2 + $0x30] sm:$0xff]  ;;  %v1456_v1 = vrot.slane %v1440_v0, 1  ;;  %v1334_v40 = vrot.slane %v1320_v8, 1 }
  0xe8   : > { %1296 = vst.msk [vmem:[#allocation2 + $0x8] sm:$0xff] %vm427_vm0, %v1289_v63  ;;  %1297 = vst.msk [vmem:[#allocation2 + $0x10] sm:$0xff] %vm427_vm0, %v1290_v50  ;;  %v1293_v20 = vadd.f32 %v1286_v41, %v1275_v13  ;;  %v1294_v45 = vadd.f32 %v1287_v12, %v1276_v18  ;;  %v1428_v10 = vld [vmem:[#allocation2] sm:$0x7f]  ;;  %v1370_v41 = vmul.f32 %v2658_v16, %v2673_v28  ;;  %v2757_v18 = vunpack.c.h.bf16 %v2678_v23 }
  0xe9   : > { %1298 = vst.msk [vmem:[#allocation2 + $0x18] sm:$0xff] %vm427_vm0, %v1291_v5  ;;  %1299 = vst.msk [vmem:[#allocation2 + $0x20] sm:$0xff] %vm427_vm0, %v1292_v7  ;;  %v1309_v12 = vld [vmem:[#allocation2 + $0x38] sm:$0x7f]  ;;  %v1472_v3 = vadd.f32 %v1456_v1, %v1428_v10  ;;  %v1372_v63 = vmul.f32 %v2665_v56, %v2673_v28  ;;  %v1373_v17 = vmul.f32 %v2667_v29, %v2673_v28 }
  0xea   : > { %1300 = vst.msk [vmem:[#allocation2 + $0x28] sm:$0xff] %vm427_vm0, %v1293_v20  ;;  %1301 = vst.msk [vmem:[#allocation2 + $0x30] sm:$0xff] %vm427_vm0, %v1294_v45  ;;  %v1348_v50 = vadd.f32 %v1334_v40, %v1309_v12  ;;  %v1374_v38 = vmul.f32 %v2687_v31, %v2673_v28  ;;  %v2753_v5 = vrot.slane %v2144_v9, %v2419_v15 }
  0xeb   : > { %1480 = vst.msk [vmem:[#allocation2] sm:$0x7f] %vm876_vm2, %v1472_v3  ;;  %v1375_v23 = vmul.f32 %v2757_v18, %v2673_v28  ;;  %v1443_v1 = vmul.f32 %v2660_v51, %v2725_v54  ;;  %v1444_v40 = vmul.f32 %v2665_v56, %v2725_v54  ;;  %v1411_v10 = vmul.f32 %v2757_v18, %v2705_v42 }
  0xec   : > { %1355 = vst.msk [vmem:[#allocation2 + $0x38] sm:$0x7f] %vm876_vm2, %v1348_v50  ;;  %v1499_v53 = vmul.f32 %v2655_v21, %v2753_v5  ;;  %v2811_v12 = vrot.slane %v2144_v9, %v2458_v44 }
  0xef   : > { %v1303_v24 = vld [vmem:[#allocation2 + $0x8] sm:$0x7f]  ;;  %v1304_v26 = vld [vmem:[#allocation2 + $0x10] sm:$0x7f] }
  0xf0   : > { %v1342_v30 = vadd.f32 %v1328_v52, %v1303_v24  ;;  %v1343_v34 = vadd.f32 %v1329_v58, %v1304_v26  ;;  %v1305_v32 = vld [vmem:[#allocation2 + $0x18] sm:$0x7f]  ;;  %v1306_v6 = vld [vmem:[#allocation2 + $0x20] sm:$0x7f]  ;;  %v1405_v52 = vmul.f32 %v2655_v21, %v2705_v42  ;;  %v1406_v58 = vmul.f32 %v2658_v16, %v2705_v42 }
  0xf1   : > { %v1344_v43 = vadd.f32 %v1330_v27, %v1305_v32  ;;  %v1345_v33 = vadd.f32 %v1331_v61, %v1306_v6  ;;  %v1307_v35 = vld [vmem:[#allocation2 + $0x28] sm:$0x7f]  ;;  %v1308_v36 = vld [vmem:[#allocation2 + $0x30] sm:$0x7f]  ;;  %v1407_v27 = vmul.f32 %v2660_v51, %v2705_v42  ;;  %v1408_v61 = vmul.f32 %v2665_v56, %v2705_v42 }
  0xf2   : > { %1349 = vst.msk [vmem:[#allocation2 + $0x8] sm:$0x7f] %vm876_vm2, %v1342_v30  ;;  %1350 = vst.msk [vmem:[#allocation2 + $0x10] sm:$0x7f] %vm876_vm2, %v1343_v34  ;;  %v1346_v37 = vadd.f32 %v1332_v60, %v1307_v35  ;;  %v1347_v46 = vadd.f32 %v1333_v14, %v1308_v36  ;;  %v1488_v55 = vld [vmem:[#allocation2 + $0x1] sm:$0x7f]  ;;  %v1410_v60 = vmul.f32 %v2687_v31, %v2705_v42 }
  0xf3   : > { %1351 = vst.msk [vmem:[#allocation2 + $0x18] sm:$0x7f] %vm876_vm2, %v1344_v43  ;;  %1352 = vst.msk [vmem:[#allocation2 + $0x20] sm:$0x7f] %vm876_vm2, %v1345_v33  ;;  %v1363_v57 = vld [vmem:[#allocation2 + $0x39] sm:$0x7f]  ;;  %v1506_v11 = vadd.f32 %v1499_v53, %v1488_v55  ;;  %v2784_v14 = vrot.slane %v2144_v9, %v2434_v25  ;;  %v1441_v35 = vmul.f32 %v2655_v21, %v2725_v54 }
  0xf4   : > { %1353 = vst.msk [vmem:[#allocation2 + $0x28] sm:$0x7f] %vm876_vm2, %v1346_v37  ;;  %1354 = vst.msk [vmem:[#allocation2 + $0x30] sm:$0x7f] %vm876_vm2, %v1347_v46  ;;  %v1383_v28 = vadd.f32 %v1375_v23, %v1363_v57  ;;  %v1442_v37 = vmul.f32 %v2658_v16, %v2725_v54  ;;  %v1459_v42 = vrot.slane %v1443_v1, 1  ;;  %v1447_v9 = vmul.f32 %v2757_v18, %v2725_v54 }
  0xf5   : > { %1513 = vst.msk [vmem:[#allocation2 + $0x1] sm:$0x7f] %vm876_vm2, %v1506_v11  ;;  %v1531_v46 = vmul.f32 %v2655_v21, %v2784_v14  ;;  %v1501_v57 = vmul.f32 %v2660_v51, %v2753_v5  ;;  %v1535_v1 = vmul.f32 %v2667_v29, %v2784_v14 }
  0xf6   : > { %1391 = vst.msk [vmem:[#allocation2 + $0x39] sm:$0x7f] %vm876_vm2, %v1383_v28  ;;  %v1503_v28 = vmul.f32 %v2667_v29, %v2753_v5 }
  0xf9   : > { %v1357_v7 = vld [vmem:[#allocation2 + $0x9] sm:$0x7f]  ;;  %v1358_v13 = vld [vmem:[#allocation2 + $0x11] sm:$0x7f] }
  0xfa   : > { %v1377_v19 = vadd.f32 %v1369_v39, %v1357_v7  ;;  %v1378_v20 = vadd.f32 %v1370_v41, %v1358_v13  ;;  %v1359_v45 = vld [vmem:[#allocation2 + $0x19] sm:$0x7f]  ;;  %v1360_v22 = vld [vmem:[#allocation2 + $0x21] sm:$0x7f]  ;;  %v1445_v39 = vmul.f32 %v2667_v29, %v2725_v54  ;;  %v1446_v41 = vmul.f32 %v2687_v31, %v2725_v54 }
  0xfb   : > { %v1379_v59 = vadd.f32 %v1371_v2, %v1359_v45  ;;  %v1380_v47 = vadd.f32 %v1372_v63, %v1360_v22  ;;  %v1361_v48 = vld [vmem:[#allocation2 + $0x29] sm:$0x7f]  ;;  %v1362_v49 = vld [vmem:[#allocation2 + $0x31] sm:$0x7f]  ;;  %v1457_v2 = vrot.slane %v1441_v35, 1  ;;  %v1458_v63 = vrot.slane %v1442_v37, 1 }
  0xfc   : > { %1385 = vst.msk [vmem:[#allocation2 + $0x9] sm:$0x7f] %vm876_vm2, %v1377_v19  ;;  %1386 = vst.msk [vmem:[#allocation2 + $0x11] sm:$0x7f] %vm876_vm2, %v1378_v20  ;;  %v1381_v15 = vadd.f32 %v1373_v17, %v1361_v48  ;;  %v1382_v62 = vadd.f32 %v1374_v38, %v1362_v49  ;;  %v1520_v3 = vld [vmem:[#allocation2] sm:$0xff]  ;;  %v1460_v38 = vrot.slane %v1444_v40, 1  ;;  %v1563_v20 = vmul.f32 %v2655_v21, %v2811_v12 }
  0xfd   : > { %1387 = vst.msk [vmem:[#allocation2 + $0x19] sm:$0x7f] %vm876_vm2, %v1379_v59  ;;  %1388 = vst.msk [vmem:[#allocation2 + $0x21] sm:$0x7f] %vm876_vm2, %v1380_v47  ;;  %v1399_v50 = vld [vmem:[#allocation2 + $0x38] sm:$0xff]  ;;  %v1538_v17 = vadd.f32 %v1531_v46, %v1520_v3  ;;  %v1461_v13 = vrot.slane %v1445_v39, 1  ;;  %v1533_v37 = vmul.f32 %v2660_v51, %v2784_v14  ;;  %v1534_v46 = vmul.f32 %v2665_v56, %v2784_v14 }
  0xfe   : > { %1389 = vst.msk [vmem:[#allocation2 + $0x29] sm:$0x7f] %vm876_vm2, %v1381_v15  ;;  %1390 = vst.msk [vmem:[#allocation2 + $0x31] sm:$0x7f] %vm876_vm2, %v1382_v62  ;;  %v1419_v7 = vadd.f32 %v1411_v10, %v1399_v50  ;;  %v1462_v19 = vrot.slane %v1446_v41, 1  ;;  %v1577_v55 = vrot.slane %v1563_v20, 1  ;;  %v1536_v40 = vmul.f32 %v2687_v31, %v2784_v14 }
  0xff   : > { %1545 = vst.msk [vmem:[#allocation2] sm:$0xff] %vm427_vm0, %v1538_v17  ;;  %v1463_v54 = vrot.slane %v1447_v9, 1  ;;  %v1537_v10 = vmul.f32 %v2757_v18, %v2784_v14  ;;  %v1564_v20 = vmul.f32 %v2658_v16, %v2811_v12 }
 0x100   : > { %1427 = vst.msk [vmem:[#allocation2 + $0x38] sm:$0xff] %vm427_vm0, %v1419_v7 }
 0x101   : > { %v1578_v9 = vrot.slane %v1564_v20, 1 }
 0x103   : > { %v1393_v0 = vld [vmem:[#allocation2 + $0x8] sm:$0xff]  ;;  %v1394_v24 = vld [vmem:[#allocation2 + $0x10] sm:$0xff] }
 0x104   : > { %v1413_v26 = vadd.f32 %v1405_v52, %v1393_v0  ;;  %v1414_v8 = vadd.f32 %v1406_v58, %v1394_v24  ;;  %v1395_v30 = vld [vmem:[#allocation2 + $0x18] sm:$0xff]  ;;  %v1396_v34 = vld [vmem:[#allocation2 + $0x20] sm:$0xff]  ;;  %v1500_v58 = vmul.f32 %v2658_v16, %v2753_v5  ;;  %v1505_v0 = vmul.f32 %v2757_v18, %v2753_v5 }
 0x105   : > { %v1415_v32 = vadd.f32 %v1407_v27, %v1395_v30  ;;  %v1416_v6 = vadd.f32 %v1408_v61, %v1396_v34  ;;  %v1397_v43 = vld [vmem:[#allocation2 + $0x28] sm:$0xff]  ;;  %v1398_v33 = vld [vmem:[#allocation2 + $0x30] sm:$0xff]  ;;  %v1502_v61 = vmul.f32 %v2665_v56, %v2753_v5 }
 0x106   : > { %1421 = vst.msk [vmem:[#allocation2 + $0x8] sm:$0xff] %vm427_vm0, %v1413_v26  ;;  %1422 = vst.msk [vmem:[#allocation2 + $0x10] sm:$0xff] %vm427_vm0, %v1414_v8  ;;  %v1417_v25 = vadd.f32 %v1409_v4, %v1397_v43  ;;  %v1418_v36 = vadd.f32 %v1410_v60, %v1398_v33  ;;  %v1552_v52 = vld [vmem:[#allocation2] sm:$0x7f]  ;;  %v1504_v60 = vmul.f32 %v2687_v31, %v2753_v5 }
 0x107   : > { %1423 = vst.msk [vmem:[#allocation2 + $0x18] sm:$0xff] %vm427_vm0, %v1415_v32  ;;  %1424 = vst.msk [vmem:[#allocation2 + $0x20] sm:$0xff] %vm427_vm0, %v1416_v6  ;;  %v1435_v11 = vld [vmem:[#allocation2 + $0x38] sm:$0x7f]  ;;  %v1591_v27 = vadd.f32 %v1577_v55, %v1552_v52 }
 0x108   : > { %1425 = vst.msk [vmem:[#allocation2 + $0x28] sm:$0xff] %vm427_vm0, %v1417_v25  ;;  %1426 = vst.msk [vmem:[#allocation2 + $0x30] sm:$0xff] %vm427_vm0, %v1418_v36  ;;  %v1479_v4 = vadd.f32 %v1463_v54, %v1435_v11  ;;  %v1532_v36 = vmul.f32 %v2658_v16, %v2784_v14  ;;  %v1565_v14 = vmul.f32 %v2660_v51, %v2811_v12 }
 0x109   : > { %1598 = vst.msk [vmem:[#allocation2] sm:$0x7f] %vm876_vm2, %v1591_v27  ;;  %v1568_v16 = vmul.f32 %v2687_v31, %v2811_v12  ;;  %v1569_v51 = vmul.f32 %v2757_v18, %v2811_v12 }
 0x10a   : > { %1487 = vst.msk [vmem:[#allocation2 + $0x38] sm:$0x7f] %vm876_vm2, %v1479_v4 }
 0x10d   : > { %v1429_v45 = vld [vmem:[#allocation2 + $0x8] sm:$0x7f]  ;;  %v1430_v22 = vld [vmem:[#allocation2 + $0x10] sm:$0x7f] }
 0x10e   : > { %v1473_v44 = vadd.f32 %v1457_v2, %v1429_v45  ;;  %v1474_v59 = vadd.f32 %v1458_v63, %v1430_v22  ;;  %v1431_v47 = vld [vmem:[#allocation2 + $0x18] sm:$0x7f]  ;;  %v1432_v48 = vld [vmem:[#allocation2 + $0x20] sm:$0x7f]  ;;  %v1566_v45 = vmul.f32 %v2665_v56, %v2811_v12  ;;  %v1567_v22 = vmul.f32 %v2667_v29, %v2811_v12 }
 0x10f   : > { %v1475_v49 = vadd.f32 %v1459_v42, %v1431_v47  ;;  %v1476_v15 = vadd.f32 %v1460_v38, %v1432_v48  ;;  %v1433_v62 = vld [vmem:[#allocation2 + $0x28] sm:$0x7f]  ;;  %v1434_v53 = vld [vmem:[#allocation2 + $0x30] sm:$0x7f]  ;;  %v1582_v48 = vrot.slane %v1568_v16, 1 }
 0x110   : > { %1481 = vst.msk [vmem:[#allocation2 + $0x8] sm:$0x7f] %vm876_vm2, %v1473_v44  ;;  %1482 = vst.msk [vmem:[#allocation2 + $0x10] sm:$0x7f] %vm876_vm2, %v1474_v59  ;;  %v1477_v21 = vadd.f32 %v1461_v13, %v1433_v62  ;;  %v1478_v23 = vadd.f32 %v1462_v19, %v1434_v53  ;;  %v1579_v44 = vrot.slane %v1565_v14, 1  ;;  %v1580_v59 = vrot.slane %v1566_v45, 1 }
 0x111   : > { %1483 = vst.msk [vmem:[#allocation2 + $0x18] sm:$0x7f] %vm876_vm2, %v1475_v49  ;;  %1484 = vst.msk [vmem:[#allocation2 + $0x20] sm:$0x7f] %vm876_vm2, %v1476_v15  ;;  %v1581_v47 = vrot.slane %v1567_v22, 1  ;;  %v1583_v49 = vrot.slane %v1569_v51, 1 }
 0x112   : > { %1485 = vst.msk [vmem:[#allocation2 + $0x28] sm:$0x7f] %vm876_vm2, %v1477_v21  ;;  %1486 = vst.msk [vmem:[#allocation2 + $0x30] sm:$0x7f] %vm876_vm2, %v1478_v23 }
 0x117   : > { %v1489_v24 = vld [vmem:[#allocation2 + $0x9] sm:$0x7f]  ;;  %v1490_v26 = vld [vmem:[#allocation2 + $0x11] sm:$0x7f] }
 0x118   : > { %v1507_v8 = vadd.f32 %v1500_v58, %v1489_v24  ;;  %v1508_v30 = vadd.f32 %v1501_v57, %v1490_v26  ;;  %v1491_v34 = vld [vmem:[#allocation2 + $0x19] sm:$0x7f]  ;;  %v1492_v32 = vld [vmem:[#allocation2 + $0x21] sm:$0x7f] }
 0x119   : > { %v1509_v6 = vadd.f32 %v1502_v61, %v1491_v34  ;;  %v1510_v43 = vadd.f32 %v1503_v28, %v1492_v32  ;;  %v1493_v33 = vld [vmem:[#allocation2 + $0x29] sm:$0x7f]  ;;  %v1494_v35 = vld [vmem:[#allocation2 + $0x31] sm:$0x7f] }
 0x11a   : > { %1514 = vst.msk [vmem:[#allocation2 + $0x9] sm:$0x7f] %vm876_vm2, %v1507_v8  ;;  %1515 = vst.msk [vmem:[#allocation2 + $0x11] sm:$0x7f] %vm876_vm2, %v1508_v30  ;;  %v1511_v25 = vadd.f32 %v1504_v60, %v1493_v33  ;;  %v1512_v5 = vadd.f32 %v1505_v0, %v1494_v35 }
 0x11b   : > { %1516 = vst.msk [vmem:[#allocation2 + $0x19] sm:$0x7f] %vm876_vm2, %v1509_v6  ;;  %1517 = vst.msk [vmem:[#allocation2 + $0x21] sm:$0x7f] %vm876_vm2, %v1510_v43 }
 0x11c   : > { %1518 = vst.msk [vmem:[#allocation2 + $0x29] sm:$0x7f] %vm876_vm2, %v1511_v25  ;;  %1519 = vst.msk [vmem:[#allocation2 + $0x31] sm:$0x7f] %vm876_vm2, %v1512_v5 }
 0x121   : > { %v1521_v39 = vld [vmem:[#allocation2 + $0x8] sm:$0xff]  ;;  %v1522_v41 = vld [vmem:[#allocation2 + $0x10] sm:$0xff] }
 0x122   : > { %v1539_v3 = vadd.f32 %v1532_v36, %v1521_v39  ;;  %v1540_v2 = vadd.f32 %v1533_v37, %v1522_v41  ;;  %v1523_v63 = vld [vmem:[#allocation2 + $0x18] sm:$0xff]  ;;  %v1524_v50 = vld [vmem:[#allocation2 + $0x20] sm:$0xff] }
 0x123   : > { %v1541_v17 = vadd.f32 %v1534_v46, %v1523_v63  ;;  %v1542_v42 = vadd.f32 %v1535_v1, %v1524_v50  ;;  %v1525_v38 = vld [vmem:[#allocation2 + $0x28] sm:$0xff]  ;;  %v1526_v7 = vld [vmem:[#allocation2 + $0x30] sm:$0xff] }
 0x124   : > { %1546 = vst.msk [vmem:[#allocation2 + $0x8] sm:$0xff] %vm427_vm0, %v1539_v3  ;;  %1547 = vst.msk [vmem:[#allocation2 + $0x10] sm:$0xff] %vm427_vm0, %v1540_v2  ;;  %v1543_v13 = vadd.f32 %v1536_v40, %v1525_v38  ;;  %v1544_v19 = vadd.f32 %v1537_v10, %v1526_v7 }
 0x125   : > { %1548 = vst.msk [vmem:[#allocation2 + $0x18] sm:$0xff] %vm427_vm0, %v1541_v17  ;;  %1549 = vst.msk [vmem:[#allocation2 + $0x20] sm:$0xff] %vm427_vm0, %v1542_v42 }
 0x126   : > { %1550 = vst.msk [vmem:[#allocation2 + $0x28] sm:$0xff] %vm427_vm0, %v1543_v13  ;;  %1551 = vst.msk [vmem:[#allocation2 + $0x30] sm:$0xff] %vm427_vm0, %v1544_v19 }
 0x12b   : > { %v1553_v56 = vld [vmem:[#allocation2 + $0x8] sm:$0x7f]  ;;  %v1554_v15 = vld [vmem:[#allocation2 + $0x10] sm:$0x7f] }
 0x12c   : > { %v1592_v62 = vadd.f32 %v1578_v9, %v1553_v56  ;;  %v1593_v29 = vadd.f32 %v1579_v44, %v1554_v15  ;;  %v1555_v53 = vld [vmem:[#allocation2 + $0x18] sm:$0x7f]  ;;  %v1556_v21 = vld [vmem:[#allocation2 + $0x20] sm:$0x7f] }
 0x12d   : > { %v1594_v23 = vadd.f32 %v1580_v59, %v1555_v53  ;;  %v1595_v55 = vadd.f32 %v1581_v47, %v1556_v21  ;;  %v1557_v54 = vld [vmem:[#allocation2 + $0x28] sm:$0x7f]  ;;  %v1558_v52 = vld [vmem:[#allocation2 + $0x30] sm:$0x7f] }
 0x12e   : > { %1599 = vst.msk [vmem:[#allocation2 + $0x8] sm:$0x7f] %vm876_vm2, %v1592_v62  ;;  %1600 = vst.msk [vmem:[#allocation2 + $0x10] sm:$0x7f] %vm876_vm2, %v1593_v29  ;;  %v1596_v31 = vadd.f32 %v1582_v48, %v1557_v54  ;;  %v1597_v18 = vadd.f32 %v1583_v49, %v1558_v52 }
 0x12f   : > { %1601 = vst.msk [vmem:[#allocation2 + $0x18] sm:$0x7f] %vm876_vm2, %v1594_v23  ;;  %1602 = vst.msk [vmem:[#allocation2 + $0x20] sm:$0x7f] %vm876_vm2, %v1595_v55 }
 0x130   : > { %1603 = vst.msk [vmem:[#allocation2 + $0x28] sm:$0x7f] %vm876_vm2, %v1596_v31  ;;  %1604 = vst.msk [vmem:[#allocation2 + $0x30] sm:$0x7f] %vm876_vm2, %v1597_v18 }
 0x131 PF: > { %v1605_v12 = vld [vmem:[#allocation2] sm:$0xff]  ;;  %vm1644_vm3 = vcmask 519168  }
 0x132   : > { %v1854_v58 = vld [vmem:[%s2919_s4] ss:$0 sm:$0xff] }
 0x133   : > { %v1620_v11 = vadd.f32 %v1854_v58, %v1605_v12 }
 0x135   : > { %v1606_v57 = vld [vmem:[#allocation2 + $0x8] sm:$0xff]  ;;  %v1607_v61 = vld [vmem:[#allocation2 + $0x10] sm:$0xff]  ;;  %v1628_v34 = vmax.f32 %v1620_v11, 0.0 }
 0x136   : > { %v1621_v27 = vadd.f32 %v1854_v58, %v1606_v57  ;;  %v1608_v28 = vld [vmem:[#allocation2 + $0x18] sm:$0xff]  ;;  %v1609_v4 = vld [vmem:[#allocation2 + $0x20] sm:$0xff]  ;;  %v1622_v60 = vadd.f32 %v1854_v58, %v1607_v61 }
 0x137   : > { %v1623_v0 = vadd.f32 %v1854_v58, %v1608_v28  ;;  %v1624_v24 = vadd.f32 %v1854_v58, %v1609_v4  ;;  %v1610_v26 = vld [vmem:[#allocation2 + $0x28] sm:$0xff]  ;;  %v1611_v8 = vld [vmem:[#allocation2 + $0x30] sm:$0xff]  ;;  %v1636_v36 = vpack.c.bf16 %v1628_v34, %v1628_v34 }
 0x138   : > { %v1612_v30 = vld [vmem:[#allocation2 + $0x38] sm:$0xff]  ;;  %v1629_v32 = vmax.f32 %v1621_v27, 0.0  ;;  %v1625_v6 = vadd.f32 %v1854_v58, %v1610_v26  ;;  %v1626_v43 = vadd.f32 %v1854_v58, %v1611_v8  ;;  %v1630_v33 = vmax.f32 %v1622_v60, 0.0 }
 0x139   : > { %v1631_v35 = vmax.f32 %v1623_v0, 0.0  ;;  %v1632_v25 = vmax.f32 %v1624_v24, 0.0  ;;  %v1627_v5 = vadd.f32 %v1854_v58, %v1612_v30  ;;  %1645 = vst.msk [vmem:[%s2165_s11] sm:$0xf] %vm1644_vm3, %v1636_v36 }
 0x13a   : > { %v1637_v37 = vpack.c.bf16 %v1629_v32, %v1629_v32  ;;  %v1633_v46 = vmax.f32 %v1625_v6, 0.0  ;;  %v1634_v1 = vmax.f32 %v1626_v43, 0.0  ;;  %v1638_v40 = vpack.c.bf16 %v1630_v33, %v1630_v33 }
 0x13b   : > { %v1639_v10 = vpack.c.bf16 %v1631_v35, %v1631_v35  ;;  %v1640_v39 = vpack.c.bf16 %v1632_v25, %v1632_v25  ;;  %v1635_v41 = vmax.f32 %v1627_v5, 0.0 }
 0x13c   : > { %1646 = vst.msk [vmem:[%s2165_s11 + $0x4] sm:$0xf] %vm1644_vm3, %v1637_v37  ;;  %v1641_v3 = vpack.c.bf16 %v1633_v46, %v1633_v46  ;;  %v1642_v2 = vpack.c.bf16 %v1634_v1, %v1634_v1  ;;  %1647 = vst.msk [vmem:[%s2165_s11 + $0x8] sm:$0xf] %vm1644_vm3, %v1638_v40 }
 0x13d   : > { %1648 = vst.msk [vmem:[%s2165_s11 + $0xc] sm:$0xf] %vm1644_vm3, %v1639_v10  ;;  %1649 = vst.msk [vmem:[%s2165_s11 + $0x10] sm:$0xf] %vm1644_vm3, %v1640_v39  ;;  %v1643_v63 = vpack.c.bf16 %v1635_v41, %v1635_v41 }
 0x13e   : > { %1650 = vst.msk [vmem:[%s2165_s11 + $0x14] sm:$0xf] %vm1644_vm3, %v1641_v3  ;;  %1651 = vst.msk [vmem:[%s2165_s11 + $0x18] sm:$0xf] %vm1644_vm3, %v1642_v2 }
 0x13f   : > { %1652 = vst.msk [vmem:[%s2165_s11 + $0x1c] sm:$0xf] %vm1644_vm3, %v1643_v63 }
 0x140 PF: > { %s15_s22 = sadd.s32 1, %s2011_s22   ;;  %s2923_s18 = smov %s2003_s20 }
 0x141   : > { %p12_p3 = scmp.ge.s32.totalorder %s15_s22, 18   ;;  %s2924_s19 = smov %s2007_s21 }
 0x142   : > { %s2925_s20 = smov %s2928_s23  ;;  %s2926_s21 = smov %s2932_s24 }
 0x143   :  { %14 = sbr.rel (!%p12_p3) target bundleno = 3 (0x3), region = 86 }

// kernel: _lambda_.3
= control target key start
LH: loop header
LB: loop body
LE: loop exit
PB: predicated region body
PF: predicated region fallthrough
CT: control target
= control target key end

     0   :  { %10 = vsyncpa [#allocation3], 0  ;;  %s5291_s0 = inlined_call_operand.hbm [shape: f32[1024,32], index: 0, kind: input, shape index: {}]   ;;  %s5292_s1 = inlined_call_operand.hbm [shape: f32[32,128], index: 1, kind: input, shape index: {}]   ;;  %s5293_s2 = inlined_call_operand.vmem [shape: f32[1,128], index: 2, kind: input, shape index: {}]   ;;  %s5294_s3 = inlined_call_operand.vmem [shape: bf16[1024,64], index: 3, kind: output, shape index: {0}]   ;;  %s5295_s4 = inlined_call_operand.vmem [shape: bf16[1024,64], index: 4, kind: output, shape index: {1}]  }
   0x1   :  { %11 = vsyncpa [#allocation5], 0  ;;  %s3347_s15 = smov [#allocation2]   ;;  %s3299_s19 = scalar_lea.hbm %s5291_s0, 16384 }
   0x2   :  { %s17_s16 = sshll.u32 %s3347_s15, 4  ;;  %p3300_p0 = scmp.ne.s32.totalorder %s5291_s0, %s3299_s19  ;;  %s18_s16 = int_to_ptr.vmem [resolvable:$true] %s17_s16 }
   0x3   :  { %p3303_p1 = scmp.lt.u32.totalorder %s3299_s19, %s5291_s0 }
   0x5   :  { %p3305_p2 = pnand %p3303_p1, %p3300_p0 }
   0x7   :  { %3308 = shalt.err (!%p3305_p2)
}
   0x8   :  { %s3309_s24 = scalar_lea.vmem %s18_s16, 16384  ;;  %p3314_p4 = scmp.lt.s32.totalorder %s18_s16, %s18_s16 }
   0x9   :  { %p3310_p3 = scmp.ne.s32.totalorder %s18_s16, %s3309_s24  ;;  %p3315_p5 = scmp.lt.s32.totalorder %s3309_s24, %s3309_s24 }
   0xb   :  { %p3316_p6 = por %p3315_p5, %p3314_p4 }
   0xd   :  { %p3317_p7 = pnand %p3316_p6, %p3310_p3 }
   0xf   :  { %3320 = shalt.err (!%p3317_p7)
}
  0x10   :  { %s3348_s25 = smov 128   ;;  %s3349_s26 = smov 8  }
  0x11   :  { %23 = dma.hbm_to_vmem [thread:$0]  %s5291_s0, 16384, %s18_s16, [#allocation3], %s3348_s25, %s3348_s25, %s3349_s26  }
  0x12   :  { %s3350_s29 = smov [#allocation4]   ;;  %s3321_s7 = scalar_lea.hbm %s5292_s1, 512 }
  0x13   :  { %s29_s30 = sshll.u32 %s3350_s29, 4  ;;  %p3322_p8 = scmp.ne.s32.totalorder %s5292_s1, %s3321_s7  ;;  %s30_s30 = int_to_ptr.vmem [resolvable:$true] %s29_s30 }
  0x14   :  { %p3325_p9 = scmp.lt.u32.totalorder %s3321_s7, %s5292_s1 }
  0x16   :  { %p3327_p10 = pnand %p3325_p9, %p3322_p8 }
  0x18   :  { %3330 = shalt.err (!%p3327_p10)
}
  0x19   :  { %s3331_s12 = scalar_lea.vmem %s30_s30, 512  ;;  %p3336_p12 = scmp.lt.s32.totalorder %s30_s30, %s30_s30 }
  0x1a   :  { %p3332_p11 = scmp.ne.s32.totalorder %s30_s30, %s3331_s12  ;;  %p3337_p13 = scmp.lt.s32.totalorder %s3331_s12, %s3331_s12 }
  0x1c   :  { %p3338_p0 = por %p3337_p13, %p3336_p12 }
  0x1e   :  { %p3339_p1 = pnand %p3338_p0, %p3332_p11 }
  0x20   :  { %3342 = shalt.err (!%p3339_p1)
}
  0x21   :  { %35 = dma.hbm_to_vmem [thread:$0]  %s5292_s1, 512, %s30_s30, [#allocation5], %s3348_s25, %s3348_s25, %s3349_s26  }
  0x22   :  { %3343 = dma.done.wait [#allocation3], 16384  }
  0x23   :  { %3344 = vsyncadd [#allocation3], 4294950912 }
  0x24   :  { %3345 = dma.done.wait [#allocation5], 512  }
  0x25   :  { %3346 = vsyncadd [#allocation5], 4294966784  ;;  %vm183_vm0 = vcmask 261120   ;;  %v172_v0 = vld [vmem:[#allocation4] sm:$0xff]  ;;  %v173_v1 = vld [vmem:[#allocation4 + $0x8] sm:$0xff]  ;;  %vm1913_vm1 = vcmask 519168  }
  0x26   :  { %v174_v2 = vld [vmem:[#allocation4 + $0x10] sm:$0xff]  ;;  %v3281_v3 = vpack.c.bf16 %v173_v1, %v172_v0  ;;  %v175_v4 = vld [vmem:[#allocation4 + $0x18] sm:$0xff]  ;;  %v44_v5 = vld [vmem:[#allocation2] sm:$0xff]  ;;  %s3351_s15 = smov 64  }
  0x27   :  { %v108_v6 = vld [vmem:[#allocation2 + $0x200] sm:$0xff]  ;;  %v3285_v7 = vpack.c.bf16 %v175_v4, %v174_v2  ;;  %3089 = vmatprep.mubr.msk.f32.mxu0 %vm183_vm0, %v44_v5  ;;  %v45_v8 = vld [vmem:[#allocation2 + $0x8] sm:$0xff]  ;;  %v46_v10 = vld [vmem:[#allocation2 + $0x10] sm:$0xff] }
  0x28   :  { %3185 = vmatprep.mubr.msk.f32.mxu1 %vm183_vm0, %v108_v6  ;;  %3282 = vmatprep.subr.bf16.mxu0 %v3281_v3  ;;  %v109_v9 = vld [vmem:[#allocation2 + $0x208] sm:$0xff]  ;;  %v110_v11 = vld [vmem:[#allocation2 + $0x210] sm:$0xff]  ;;  %v47_v12 = vld [vmem:[#allocation2 + $0x18] sm:$0xff] }
  0x29   :  { %3289 = vmatprep.subr.bf16.mxu1 %v3281_v3  ;;  %3284 = vmatpush3.bf16.msra.mxu0 %v3281_v3  ;;  %v111_v13 = vld [vmem:[#allocation2 + $0x218] sm:$0xff]  ;;  %v48_v14 = vld [vmem:[#allocation2 + $0x20] sm:$0xff]  ;;  %v49_v16 = vld [vmem:[#allocation2 + $0x28] sm:$0xff] }
  0x2a   :  { %3291 = vmatpush3.bf16.msra.mxu1 %v3281_v3  ;;  %3286 = vmatprep.subr.bf16.mxu0 %v3285_v7  ;;  %v112_v15 = vld [vmem:[#allocation2 + $0x220] sm:$0xff]  ;;  %v113_v17 = vld [vmem:[#allocation2 + $0x228] sm:$0xff]  ;;  %v50_v18 = vld [vmem:[#allocation2 + $0x30] sm:$0xff] }
  0x2b   :  { %3290 = vmatprep.subr.bf16.mxu1 %v3285_v7  ;;  %v114_v19 = vld [vmem:[#allocation2 + $0x230] sm:$0xff]  ;;  %v51_v20 = vld [vmem:[#allocation2 + $0x38] sm:$0xff]  ;;  %v52_v22 = vld [vmem:[#allocation2 + $0x40] sm:$0xff] }
  0x2c   :  { %v115_v21 = vld [vmem:[#allocation2 + $0x238] sm:$0xff]  ;;  %v116_v23 = vld [vmem:[#allocation2 + $0x240] sm:$0xff]  ;;  %v53_v24 = vld [vmem:[#allocation2 + $0x48] sm:$0xff] }
  0x2d   :  { %3288 = vmatpush3.bf16.msra.mxu0 %v3285_v7  ;;  %v117_v25 = vld [vmem:[#allocation2 + $0x248] sm:$0xff]  ;;  %v54_v26 = vld [vmem:[#allocation2 + $0x50] sm:$0xff]  ;;  %v55_v28 = vld [vmem:[#allocation2 + $0x58] sm:$0xff] }
  0x2e   :  { %3292 = vmatpush3.bf16.msra.mxu1 %v3285_v7  ;;  %v118_v27 = vld [vmem:[#allocation2 + $0x250] sm:$0xff]  ;;  %v119_v29 = vld [vmem:[#allocation2 + $0x258] sm:$0xff]  ;;  %v56_v30 = vld [vmem:[#allocation2 + $0x60] sm:$0xff] }
  0x2f   :  { %v120_v31 = vld [vmem:[#allocation2 + $0x260] sm:$0xff]  ;;  %v57_v32 = vld [vmem:[#allocation2 + $0x68] sm:$0xff]  ;;  %v58_v34 = vld [vmem:[#allocation2 + $0x70] sm:$0xff] }
  0x30   :  { %3090 = vmatmul.mubr.msk.f32.vlgmr.msra.gmra.mrb[0].mxu0 %vm183_vm0, %v45_v8  ;;  %v121_v33 = vld [vmem:[#allocation2 + $0x268] sm:$0xff]  ;;  %v122_v35 = vld [vmem:[#allocation2 + $0x270] sm:$0xff]  ;;  %v59_v36 = vld [vmem:[#allocation2 + $0x78] sm:$0xff] }
  0x31   :  { %3186 = vmatmul.mubr.msk.f32.vlgmr.msra.gmra.mrb[0].mxu1 %vm183_vm0, %v109_v9  ;;  %3092 = vmatprep.mubr.msk.f32.mxu0 %vm183_vm0, %v46_v10  ;;  %v123_v37 = vld [vmem:[#allocation2 + $0x278] sm:$0xff]  ;;  %v60_v38 = vld [vmem:[#allocation2 + $0x80] sm:$0xff]  ;;  %v61_v40 = vld [vmem:[#allocation2 + $0x88] sm:$0xff] }
  0x32   :  { %3188 = vmatprep.mubr.msk.f32.mxu1 %vm183_vm0, %v110_v11  ;;  %v124_v39 = vld [vmem:[#allocation2 + $0x280] sm:$0xff]  ;;  %v125_v41 = vld [vmem:[#allocation2 + $0x288] sm:$0xff]  ;;  %v62_v42 = vld [vmem:[#allocation2 + $0x90] sm:$0xff] }
  0x33   :  { %v126_v43 = vld [vmem:[#allocation2 + $0x290] sm:$0xff]  ;;  %v63_v44 = vld [vmem:[#allocation2 + $0x98] sm:$0xff]  ;;  %v64_v46 = vld [vmem:[#allocation2 + $0xa0] sm:$0xff] }
  0x34   :  { %3093 = vmatmul.mubr.msk.f32.gmra.mrb[2].mxu0 %vm183_vm0, %v47_v12  ;;  %v127_v45 = vld [vmem:[#allocation2 + $0x298] sm:$0xff]  ;;  %v128_v47 = vld [vmem:[#allocation2 + $0x2a0] sm:$0xff]  ;;  %v65_v48 = vld [vmem:[#allocation2 + $0xa8] sm:$0xff] }
  0x35   :  { %3189 = vmatmul.mubr.msk.f32.gmra.mrb[2].mxu1 %vm183_vm0, %v111_v13  ;;  %3095 = vmatprep.mubr.msk.f32.mxu0 %vm183_vm0, %v48_v14  ;;  %v129_v49 = vld [vmem:[#allocation2 + $0x2a8] sm:$0xff]  ;;  %v66_v50 = vld [vmem:[#allocation2 + $0xb0] sm:$0xff]  ;;  %v67_v52 = vld [vmem:[#allocation2 + $0xb8] sm:$0xff] }
  0x36   :  { %3191 = vmatprep.mubr.msk.f32.mxu1 %vm183_vm0, %v112_v15  ;;  %v130_v51 = vld [vmem:[#allocation2 + $0x2b0] sm:$0xff]  ;;  %v131_v53 = vld [vmem:[#allocation2 + $0x2b8] sm:$0xff]  ;;  %v68_v54 = vld [vmem:[#allocation2 + $0xc0] sm:$0xff] }
  0x37   :  { %v132_v55 = vld [vmem:[#allocation2 + $0x2c0] sm:$0xff]  ;;  %v69_v56 = vld [vmem:[#allocation2 + $0xc8] sm:$0xff]  ;;  %v70_v58 = vld [vmem:[#allocation2 + $0xd0] sm:$0xff] }
  0x38   :  { %3096 = vmatmul.mubr.msk.f32.gmra.mrb[4].mxu0 %vm183_vm0, %v49_v16  ;;  %v133_v57 = vld [vmem:[#allocation2 + $0x2c8] sm:$0xff]  ;;  %v134_v59 = vld [vmem:[#allocation2 + $0x2d0] sm:$0xff]  ;;  %v71_v60 = vld [vmem:[#allocation2 + $0xd8] sm:$0xff] }
  0x39   :  { %3192 = vmatmul.mubr.msk.f32.gmra.mrb[4].mxu1 %vm183_vm0, %v113_v17  ;;  %3098 = vmatprep.mubr.msk.f32.mxu0 %vm183_vm0, %v50_v18  ;;  %v135_v61 = vld [vmem:[#allocation2 + $0x2d8] sm:$0xff]  ;;  %v72_v62 = vld [vmem:[#allocation2 + $0xe0] sm:$0xff]  ;;  %v73_v0 = vld [vmem:[#allocation2 + $0xe8] sm:$0xff] }
  0x3a   :  { %3194 = vmatprep.mubr.msk.f32.mxu1 %vm183_vm0, %v114_v19  ;;  %v136_v63 = vld [vmem:[#allocation2 + $0x2e0] sm:$0xff]  ;;  %v137_v1 = vld [vmem:[#allocation2 + $0x2e8] sm:$0xff]  ;;  %v74_v2 = vld [vmem:[#allocation2 + $0xf0] sm:$0xff] }
  0x3b   :  { %v138_v3 = vld [vmem:[#allocation2 + $0x2f0] sm:$0xff]  ;;  %v75_v4 = vld [vmem:[#allocation2 + $0xf8] sm:$0xff]  ;;  %v76_v6 = vld [vmem:[#allocation2 + $0x100] sm:$0xff] }
  0x3c   :  { %3099 = vmatmul.mubr.msk.f32.gmra.mrb[6].mxu0 %vm183_vm0, %v51_v20  ;;  %v139_v5 = vld [vmem:[#allocation2 + $0x2f8] sm:$0xff]  ;;  %v140_v7 = vld [vmem:[#allocation2 + $0x300] sm:$0xff]  ;;  %v77_v8 = vld [vmem:[#allocation2 + $0x108] sm:$0xff] }
  0x3d   :  { %3195 = vmatmul.mubr.msk.f32.gmra.mrb[6].mxu1 %vm183_vm0, %v115_v21  ;;  %3101 = vmatprep.mubr.msk.f32.mxu0 %vm183_vm0, %v52_v22  ;;  %v141_v9 = vld [vmem:[#allocation2 + $0x308] sm:$0xff]  ;;  %v78_v10 = vld [vmem:[#allocation2 + $0x110] sm:$0xff]  ;;  %v79_v12 = vld [vmem:[#allocation2 + $0x118] sm:$0xff] }
  0x3e   :  { %3197 = vmatprep.mubr.msk.f32.mxu1 %vm183_vm0, %v116_v23  ;;  %v142_v11 = vld [vmem:[#allocation2 + $0x310] sm:$0xff]  ;;  %v143_v13 = vld [vmem:[#allocation2 + $0x318] sm:$0xff]  ;;  %v80_v14 = vld [vmem:[#allocation2 + $0x120] sm:$0xff] }
  0x3f   :  { %v144_v15 = vld [vmem:[#allocation2 + $0x320] sm:$0xff]  ;;  %v81_v16 = vld [vmem:[#allocation2 + $0x128] sm:$0xff]  ;;  %v82_v18 = vld [vmem:[#allocation2 + $0x130] sm:$0xff] }
  0x40   :  { %3102 = vmatmul.mubr.msk.f32.gmra.mrb[8].mxu0 %vm183_vm0, %v53_v24  ;;  %v145_v17 = vld [vmem:[#allocation2 + $0x328] sm:$0xff]  ;;  %v146_v19 = vld [vmem:[#allocation2 + $0x330] sm:$0xff]  ;;  %v83_v20 = vld [vmem:[#allocation2 + $0x138] sm:$0xff] }
  0x41   :  { %3198 = vmatmul.mubr.msk.f32.gmra.mrb[8].mxu1 %vm183_vm0, %v117_v25  ;;  %3104 = vmatprep.mubr.msk.f32.mxu0 %vm183_vm0, %v54_v26  ;;  %v147_v21 = vld [vmem:[#allocation2 + $0x338] sm:$0xff]  ;;  %v84_v22 = vld [vmem:[#allocation2 + $0x140] sm:$0xff]  ;;  %v85_v24 = vld [vmem:[#allocation2 + $0x148] sm:$0xff] }
  0x42   :  { %3200 = vmatprep.mubr.msk.f32.mxu1 %vm183_vm0, %v118_v27  ;;  %v148_v23 = vld [vmem:[#allocation2 + $0x340] sm:$0xff]  ;;  %v149_v25 = vld [vmem:[#allocation2 + $0x348] sm:$0xff]  ;;  %v86_v26 = vld [vmem:[#allocation2 + $0x150] sm:$0xff] }
  0x43   :  { %v150_v27 = vld [vmem:[#allocation2 + $0x350] sm:$0xff] }
  0x44   :  { %3105 = vmatmul.mubr.msk.f32.gmra.mrb[10].mxu0 %vm183_vm0, %v55_v28  ;;  %v87_v28 = vld [vmem:[#allocation2 + $0x158] sm:$0xff] }
  0x45   :  { %3201 = vmatmul.mubr.msk.f32.gmra.mrb[10].mxu1 %vm183_vm0, %v119_v29  ;;  %3107 = vmatprep.mubr.msk.f32.mxu0 %vm183_vm0, %v56_v30  ;;  %v151_v29 = vld [vmem:[#allocation2 + $0x358] sm:$0xff]  ;;  %v88_v30 = vld [vmem:[#allocation2 + $0x160] sm:$0xff] }
  0x46   :  { %3203 = vmatprep.mubr.msk.f32.mxu1 %vm183_vm0, %v120_v31  ;;  %v152_v31 = vld [vmem:[#allocation2 + $0x360] sm:$0xff] }
  0x48   :  { %3108 = vmatmul.mubr.msk.f32.gmra.mrb[12].mxu0 %vm183_vm0, %v57_v32  ;;  %v89_v32 = vld [vmem:[#allocation2 + $0x168] sm:$0xff] }
  0x49   :  { %3204 = vmatmul.mubr.msk.f32.gmra.mrb[12].mxu1 %vm183_vm0, %v121_v33  ;;  %3110 = vmatprep.mubr.msk.f32.mxu0 %vm183_vm0, %v58_v34  ;;  %v153_v33 = vld [vmem:[#allocation2 + $0x368] sm:$0xff]  ;;  %v90_v34 = vld [vmem:[#allocation2 + $0x170] sm:$0xff] }
  0x4a   :  { %3206 = vmatprep.mubr.msk.f32.mxu1 %vm183_vm0, %v122_v35  ;;  %v154_v35 = vld [vmem:[#allocation2 + $0x370] sm:$0xff] }
  0x4c   :  { %3111 = vmatmul.mubr.msk.f32.gmra.mrb[14].mxu0 %vm183_vm0, %v59_v36  ;;  %v91_v36 = vld [vmem:[#allocation2 + $0x178] sm:$0xff] }
  0x4d   :  { %3207 = vmatmul.mubr.msk.f32.gmra.mrb[14].mxu1 %vm183_vm0, %v123_v37  ;;  %3113 = vmatprep.mubr.msk.f32.mxu0 %vm183_vm0, %v60_v38  ;;  %v155_v37 = vld [vmem:[#allocation2 + $0x378] sm:$0xff]  ;;  %v92_v38 = vld [vmem:[#allocation2 + $0x180] sm:$0xff] }
  0x4e   :  { %3209 = vmatprep.mubr.msk.f32.mxu1 %vm183_vm0, %v124_v39  ;;  %v156_v39 = vld [vmem:[#allocation2 + $0x380] sm:$0xff] }
  0x50   :  { %3114 = vmatmul.mubr.msk.f32.gmra.mrb[16].mxu0 %vm183_vm0, %v61_v40  ;;  %v93_v40 = vld [vmem:[#allocation2 + $0x188] sm:$0xff] }
  0x51   :  { %3210 = vmatmul.mubr.msk.f32.gmra.mrb[16].mxu1 %vm183_vm0, %v125_v41  ;;  %3116 = vmatprep.mubr.msk.f32.mxu0 %vm183_vm0, %v62_v42  ;;  %v157_v41 = vld [vmem:[#allocation2 + $0x388] sm:$0xff]  ;;  %v94_v42 = vld [vmem:[#allocation2 + $0x190] sm:$0xff] }
  0x52   :  { %3212 = vmatprep.mubr.msk.f32.mxu1 %vm183_vm0, %v126_v43  ;;  %v158_v43 = vld [vmem:[#allocation2 + $0x390] sm:$0xff] }
  0x54   :  { %3117 = vmatmul.mubr.msk.f32.gmra.mrb[18].mxu0 %vm183_vm0, %v63_v44  ;;  %v95_v44 = vld [vmem:[#allocation2 + $0x198] sm:$0xff] }
  0x55   :  { %3213 = vmatmul.mubr.msk.f32.gmra.mrb[18].mxu1 %vm183_vm0, %v127_v45  ;;  %3119 = vmatprep.mubr.msk.f32.mxu0 %vm183_vm0, %v64_v46  ;;  %v159_v45 = vld [vmem:[#allocation2 + $0x398] sm:$0xff]  ;;  %v96_v46 = vld [vmem:[#allocation2 + $0x1a0] sm:$0xff] }
  0x56   :  { %3215 = vmatprep.mubr.msk.f32.mxu1 %vm183_vm0, %v128_v47  ;;  %v160_v47 = vld [vmem:[#allocation2 + $0x3a0] sm:$0xff] }
  0x58   :  { %3120 = vmatmul.mubr.msk.f32.gmra.mrb[20].mxu0 %vm183_vm0, %v65_v48  ;;  %v97_v48 = vld [vmem:[#allocation2 + $0x1a8] sm:$0xff] }
  0x59   :  { %3216 = vmatmul.mubr.msk.f32.gmra.mrb[20].mxu1 %vm183_vm0, %v129_v49  ;;  %3122 = vmatprep.mubr.msk.f32.mxu0 %vm183_vm0, %v66_v50  ;;  %v161_v49 = vld [vmem:[#allocation2 + $0x3a8] sm:$0xff]  ;;  %v98_v50 = vld [vmem:[#allocation2 + $0x1b0] sm:$0xff] }
  0x5a   :  { %3218 = vmatprep.mubr.msk.f32.mxu1 %vm183_vm0, %v130_v51  ;;  %v162_v51 = vld [vmem:[#allocation2 + $0x3b0] sm:$0xff] }
  0x5c   :  { %3123 = vmatmul.mubr.msk.f32.gmra.mrb[22].mxu0 %vm183_vm0, %v67_v52  ;;  %v99_v52 = vld [vmem:[#allocation2 + $0x1b8] sm:$0xff] }
  0x5d   :  { %3219 = vmatmul.mubr.msk.f32.gmra.mrb[22].mxu1 %vm183_vm0, %v131_v53  ;;  %3125 = vmatprep.mubr.msk.f32.mxu0 %vm183_vm0, %v68_v54  ;;  %v163_v53 = vld [vmem:[#allocation2 + $0x3b8] sm:$0xff]  ;;  %v100_v54 = vld [vmem:[#allocation2 + $0x1c0] sm:$0xff] }
  0x5e   :  { %3221 = vmatprep.mubr.msk.f32.mxu1 %vm183_vm0, %v132_v55  ;;  %v164_v55 = vld [vmem:[#allocation2 + $0x3c0] sm:$0xff] }
  0x60   :  { %3126 = vmatmul.mubr.msk.f32.gmra.mrb[24].mxu0 %vm183_vm0, %v69_v56  ;;  %v101_v56 = vld [vmem:[#allocation2 + $0x1c8] sm:$0xff] }
  0x61   :  { %3222 = vmatmul.mubr.msk.f32.gmra.mrb[24].mxu1 %vm183_vm0, %v133_v57  ;;  %3128 = vmatprep.mubr.msk.f32.mxu0 %vm183_vm0, %v70_v58  ;;  %v165_v57 = vld [vmem:[#allocation2 + $0x3c8] sm:$0xff]  ;;  %v102_v58 = vld [vmem:[#allocation2 + $0x1d0] sm:$0xff] }
  0x62   :  { %3224 = vmatprep.mubr.msk.f32.mxu1 %vm183_vm0, %v134_v59  ;;  %v166_v59 = vld [vmem:[#allocation2 + $0x3d0] sm:$0xff] }
  0x64   :  { %3129 = vmatmul.mubr.msk.f32.gmra.mrb[26].mxu0 %vm183_vm0, %v71_v60  ;;  %v103_v60 = vld [vmem:[#allocation2 + $0x1d8] sm:$0xff] }
  0x65   :  { %3225 = vmatmul.mubr.msk.f32.gmra.mrb[26].mxu1 %vm183_vm0, %v135_v61  ;;  %3131 = vmatprep.mubr.msk.f32.mxu0 %vm183_vm0, %v72_v62  ;;  %v167_v61 = vld [vmem:[#allocation2 + $0x3d8] sm:$0xff]  ;;  %v104_v62 = vld [vmem:[#allocation2 + $0x1e0] sm:$0xff] }
  0x66   :  { %3227 = vmatprep.mubr.msk.f32.mxu1 %vm183_vm0, %v136_v63  ;;  %v168_v63 = vld [vmem:[#allocation2 + $0x3e0] sm:$0xff] }
  0x68   :  { %3132 = vmatmul.mubr.msk.f32.gmra.mrb[28].mxu0 %vm183_vm0, %v73_v0  ;;  %v105_v0 = vld [vmem:[#allocation2 + $0x1e8] sm:$0xff] }
  0x69   :  { %3228 = vmatmul.mubr.msk.f32.gmra.mrb[28].mxu1 %vm183_vm0, %v137_v1  ;;  %3134 = vmatprep.mubr.msk.f32.mxu0 %vm183_vm0, %v74_v2  ;;  %v169_v1 = vld [vmem:[#allocation2 + $0x3e8] sm:$0xff]  ;;  %v106_v2 = vld [vmem:[#allocation2 + $0x1f0] sm:$0xff] }
  0x6a   :  { %3230 = vmatprep.mubr.msk.f32.mxu1 %vm183_vm0, %v138_v3  ;;  %v170_v3 = vld [vmem:[#allocation2 + $0x3f0] sm:$0xff] }
  0x6c   :  { %3135 = vmatmul.mubr.msk.f32.gmra.mrb[30].mxu0 %vm183_vm0, %v75_v4  ;;  %v107_v4 = vld [vmem:[#allocation2 + $0x1f8] sm:$0xff] }
  0x6d   :  { %3231 = vmatmul.mubr.msk.f32.gmra.mrb[30].mxu1 %vm183_vm0, %v139_v5  ;;  %3137 = vmatprep.mubr.msk.f32.mxu0 %vm183_vm0, %v76_v6  ;;  %v171_v5 = vld [vmem:[#allocation2 + $0x3f8] sm:$0xff]  ;;  %v3532_v6 = vld [vmem:[%s5293_s2] ss:$0 sm:$0xff] }
  0x6e   :  { %3233 = vmatprep.mubr.msk.f32.mxu1 %vm183_vm0, %v140_v7 }
  0x70   :  { %3138 = vmatmul.mubr.msk.f32.gmra.mrb[32].mxu0 %vm183_vm0, %v77_v8 }
  0x71   :  { %3234 = vmatmul.mubr.msk.f32.gmra.mrb[32].mxu1 %vm183_vm0, %v141_v9  ;;  %3140 = vmatprep.mubr.msk.f32.mxu0 %vm183_vm0, %v78_v10 }
  0x72   :  { %3236 = vmatprep.mubr.msk.f32.mxu1 %vm183_vm0, %v142_v11 }
  0x74   :  { %3141 = vmatmul.mubr.msk.f32.gmra.mrb[34].mxu0 %vm183_vm0, %v79_v12 }
  0x75   :  { %3237 = vmatmul.mubr.msk.f32.gmra.mrb[34].mxu1 %vm183_vm0, %v143_v13  ;;  %3143 = vmatprep.mubr.msk.f32.mxu0 %vm183_vm0, %v80_v14 }
  0x76   :  { %3239 = vmatprep.mubr.msk.f32.mxu1 %vm183_vm0, %v144_v15 }
  0x78   :  { %3144 = vmatmul.mubr.msk.f32.gmra.mrb[36].mxu0 %vm183_vm0, %v81_v16 }
  0x79   :  { %3240 = vmatmul.mubr.msk.f32.gmra.mrb[36].mxu1 %vm183_vm0, %v145_v17  ;;  %3146 = vmatprep.mubr.msk.f32.mxu0 %vm183_vm0, %v82_v18 }
  0x7a   :  { %3242 = vmatprep.mubr.msk.f32.mxu1 %vm183_vm0, %v146_v19 }
  0x7c   :  { %3147 = vmatmul.mubr.msk.f32.gmra.mrb[38].mxu0 %vm183_vm0, %v83_v20 }
  0x7d   :  { %3243 = vmatmul.mubr.msk.f32.gmra.mrb[38].mxu1 %vm183_vm0, %v147_v21  ;;  %3149 = vmatprep.mubr.msk.f32.mxu0 %vm183_vm0, %v84_v22 }
  0x7e   :  { %3245 = vmatprep.mubr.msk.f32.mxu1 %vm183_vm0, %v148_v23 }
  0x80   :  { %3150 = vmatmul.mubr.msk.f32.gmra.mrb[40].mxu0 %vm183_vm0, %v85_v24 }
  0x81   :  { %3246 = vmatmul.mubr.msk.f32.gmra.mrb[40].mxu1 %vm183_vm0, %v149_v25  ;;  %3152 = vmatprep.mubr.msk.f32.mxu0 %vm183_vm0, %v86_v26 }
  0x82   :  { %3248 = vmatprep.mubr.msk.f32.mxu1 %vm183_vm0, %v150_v27 }
  0x84   :  { %3153 = vmatmul.mubr.msk.f32.gmra.mrb[42].mxu0 %vm183_vm0, %v87_v28 }
  0x85   :  { %3249 = vmatmul.mubr.msk.f32.gmra.mrb[42].mxu1 %vm183_vm0, %v151_v29  ;;  %3155 = vmatprep.mubr.msk.f32.mxu0 %vm183_vm0, %v88_v30 }
  0x86   :  { %3251 = vmatprep.mubr.msk.f32.mxu1 %vm183_vm0, %v152_v31 }
  0x88   :  { %3156 = vmatmul.mubr.msk.f32.gmra.mrb[44].mxu0 %vm183_vm0, %v89_v32 }
  0x89   :  { %3252 = vmatmul.mubr.msk.f32.gmra.mrb[44].mxu1 %vm183_vm0, %v153_v33  ;;  %3158 = vmatprep.mubr.msk.f32.mxu0 %vm183_vm0, %v90_v34 }
  0x8a   :  { %3254 = vmatprep.mubr.msk.f32.mxu1 %vm183_vm0, %v154_v35 }
  0x8c   :  { %3159 = vmatmul.mubr.msk.f32.gmra.mrb[46].mxu0 %vm183_vm0, %v91_v36 }
  0x8d   :  { %3255 = vmatmul.mubr.msk.f32.gmra.mrb[46].mxu1 %vm183_vm0, %v155_v37  ;;  %3161 = vmatprep.mubr.msk.f32.mxu0 %vm183_vm0, %v92_v38 }
  0x8e   :  { %3257 = vmatprep.mubr.msk.f32.mxu1 %vm183_vm0, %v156_v39 }
  0x90   :  { %3162 = vmatmul.mubr.msk.f32.gmra.mrb[48].mxu0 %vm183_vm0, %v93_v40 }
  0x91   :  { %3258 = vmatmul.mubr.msk.f32.gmra.mrb[48].mxu1 %vm183_vm0, %v157_v41  ;;  %3164 = vmatprep.mubr.msk.f32.mxu0 %vm183_vm0, %v94_v42 }
  0x92   :  { %3260 = vmatprep.mubr.msk.f32.mxu1 %vm183_vm0, %v158_v43 }
  0x94   :  { %3165 = vmatmul.mubr.msk.f32.gmra.mrb[50].mxu0 %vm183_vm0, %v95_v44 }
  0x95   :  { %3261 = vmatmul.mubr.msk.f32.gmra.mrb[50].mxu1 %vm183_vm0, %v159_v45  ;;  %3167 = vmatprep.mubr.msk.f32.mxu0 %vm183_vm0, %v96_v46 }
  0x96   :  { %3263 = vmatprep.mubr.msk.f32.mxu1 %vm183_vm0, %v160_v47 }
  0x98   :  { %3168 = vmatmul.mubr.msk.f32.gmra.mrb[52].mxu0 %vm183_vm0, %v97_v48 }
  0x99   :  { %3264 = vmatmul.mubr.msk.f32.gmra.mrb[52].mxu1 %vm183_vm0, %v161_v49  ;;  %3170 = vmatprep.mubr.msk.f32.mxu0 %vm183_vm0, %v98_v50 }
  0x9a   :  { %3266 = vmatprep.mubr.msk.f32.mxu1 %vm183_vm0, %v162_v51 }
  0x9c   :  { %3171 = vmatmul.mubr.msk.f32.gmra.mrb[54].mxu0 %vm183_vm0, %v99_v52 }
  0x9d   :  { %3267 = vmatmul.mubr.msk.f32.gmra.mrb[54].mxu1 %vm183_vm0, %v163_v53  ;;  %3173 = vmatprep.mubr.msk.f32.mxu0 %vm183_vm0, %v100_v54 }
  0x9e   :  { %3269 = vmatprep.mubr.msk.f32.mxu1 %vm183_vm0, %v164_v55 }
  0xa0   :  { %3174 = vmatmul.mubr.msk.f32.gmra.mrb[56].mxu0 %vm183_vm0, %v101_v56 }
  0xa1   :  { %3270 = vmatmul.mubr.msk.f32.gmra.mrb[56].mxu1 %vm183_vm0, %v165_v57  ;;  %3176 = vmatprep.mubr.msk.f32.mxu0 %vm183_vm0, %v102_v58 }
  0xa2   :  { %3272 = vmatprep.mubr.msk.f32.mxu1 %vm183_vm0, %v166_v59 }
  0xa4   :  { %3177 = vmatmul.mubr.msk.f32.gmra.mrb[58].mxu0 %vm183_vm0, %v103_v60 }
  0xa5   :  { %3273 = vmatmul.mubr.msk.f32.gmra.mrb[58].mxu1 %vm183_vm0, %v167_v61  ;;  %3179 = vmatprep.mubr.msk.f32.mxu0 %vm183_vm0, %v104_v62 }
  0xa6   :  { %3275 = vmatprep.mubr.msk.f32.mxu1 %vm183_vm0, %v168_v63 }
  0xa8   :  { %3180 = vmatmul.mubr.msk.f32.gmra.mrb[60].mxu0 %vm183_vm0, %v105_v0 }
  0xa9   :  { %3276 = vmatmul.mubr.msk.f32.gmra.mrb[60].mxu1 %vm183_vm0, %v169_v1  ;;  %3182 = vmatprep.mubr.msk.f32.mxu0 %vm183_vm0, %v106_v2 }
  0xaa   :  { %3278 = vmatprep.mubr.msk.f32.mxu1 %vm183_vm0, %v170_v3 }
  0xac   :  { %3183 = vmatmul.mubr.msk.f32.gmra.mrb[62].mxu0 %vm183_vm0, %v107_v4 }
  0xad   :  { %3279 = vmatmul.mubr.msk.f32.gmra.mrb[62].mxu1 %vm183_vm0, %v171_v5 }
 0x103   :  { %v3091_v7 = vpop.f32.mrb[0].mxu0 }
 0x104   :  { %v3187_v8 = vpop.f32.mrb[0].mxu1  ;;  %v640_v9 = vadd.f32 %v3091_v7, %v3532_v6  ;;  %v634_v11 = vpop.f32.mrb[1].mxu0 }
 0x105   :  { %v960_v10 = vadd.f32 %v3187_v8, %v3532_v6  ;;  %v954_v12 = vpop.f32.mrb[1].mxu1  ;;  %v635_v13 = vadd.f32 %v3532_v6, %v634_v11 }
 0x106   :  { %v955_v14 = vadd.f32 %v3532_v6, %v954_v12  ;;  %v1274_v15 = vmax.f32 %v640_v9, 0.0 }
 0x107   :  { %v1338_v16 = vmax.f32 %v960_v10, 0.0  ;;  %v1273_v17 = vmax.f32 %v635_v13, 0.0  ;;  %v3094_v19 = vpop.f32.mrb[2].mxu0 }
 0x108   :  { %v1337_v18 = vmax.f32 %v955_v14, 0.0  ;;  %v3190_v20 = vpop.f32.mrb[2].mxu1  ;;  %v650_v21 = vadd.f32 %v3094_v19, %v3532_v6  ;;  %v644_v22 = vpop.f32.mrb[3].mxu0  ;;  %v2822_v25 = vpack.c.bf16 %v1274_v15, %v1274_v15 }
 0x109   :  { %v2886_v23 = vpack.c.bf16 %v1338_v16, %v1338_v16  ;;  %v970_v24 = vadd.f32 %v3190_v20, %v3532_v6  ;;  %v964_v26 = vpop.f32.mrb[3].mxu1  ;;  %v2821_v27 = vpack.c.bf16 %v1273_v17, %v1273_v17  ;;  %v645_v29 = vadd.f32 %v3532_v6, %v644_v22 }
 0x10a   :  { %v2885_v28 = vpack.c.bf16 %v1337_v18, %v1337_v18  ;;  %v965_v30 = vadd.f32 %v3532_v6, %v964_v26  ;;  %v1276_v31 = vmax.f32 %v650_v21, 0.0  ;;  %2044 = vrot.lane.b32.xlu0 %v2822_v25, %s3351_s15  ;;  %1915 = vst.msk [vmem:[%s5294_s3 + $0x4] sm:$0xf] %vm1913_vm1, %v2822_v25 }
 0x10b   :  { %2172 = vrot.lane.b32.xlu1 %v2886_v23, %s3351_s15  ;;  %1979 = vst.msk [vmem:[%s5294_s3 + $0x104] sm:$0xf] %vm1913_vm1, %v2886_v23  ;;  %v1340_v32 = vmax.f32 %v970_v24, 0.0  ;;  %1914 = vst.msk [vmem:[%s5294_s3] sm:$0xf] %vm1913_vm1, %v2821_v27  ;;  %v1275_v33 = vmax.f32 %v645_v29, 0.0 }
 0x10c   :  { %1978 = vst.msk [vmem:[%s5294_s3 + $0x100] sm:$0xf] %vm1913_vm1, %v2885_v28  ;;  %v1339_v34 = vmax.f32 %v965_v30, 0.0  ;;  %v3097_v35 = vpop.f32.mrb[4].mxu0  ;;  %v3193_v36 = vpop.f32.mrb[4].mxu1  ;;  %v2824_v37 = vpack.c.bf16 %v1276_v31, %v1276_v31 }
 0x10d   :  { %v2888_v38 = vpack.c.bf16 %v1340_v32, %v1340_v32  ;;  %v660_v39 = vadd.f32 %v3097_v35, %v3532_v6  ;;  %v654_v40 = vpop.f32.mrb[5].mxu0  ;;  %v980_v41 = vadd.f32 %v3193_v36, %v3532_v6  ;;  %v974_v42 = vpop.f32.mrb[5].mxu1  ;;  %v2823_v43 = vpack.c.bf16 %v1275_v33, %v1275_v33 }
 0x10e   :  { %v2887_v44 = vpack.c.bf16 %v1339_v34, %v1339_v34  ;;  %v655_v45 = vadd.f32 %v3532_v6, %v654_v40  ;;  %v975_v46 = vadd.f32 %v3532_v6, %v974_v42  ;;  %1917 = vst.msk [vmem:[%s5294_s3 + $0xc] sm:$0xf] %vm1913_vm1, %v2824_v37  ;;  %2042 = vrot.lane.b32.xlu0 %v2821_v27, %s3351_s15 }
 0x10f   :  { %1981 = vst.msk [vmem:[%s5294_s3 + $0x10c] sm:$0xf] %vm1913_vm1, %v2888_v38  ;;  %2048 = vrot.lane.b32.xlu1 %v2824_v37, %s3351_s15  ;;  %v1278_v47 = vmax.f32 %v660_v39, 0.0  ;;  %v1342_v48 = vmax.f32 %v980_v41, 0.0  ;;  %1916 = vst.msk [vmem:[%s5294_s3 + $0x8] sm:$0xf] %vm1913_vm1, %v2823_v43 }
 0x110   :  { %1980 = vst.msk [vmem:[%s5294_s3 + $0x108] sm:$0xf] %vm1913_vm1, %v2887_v44  ;;  %v1277_v49 = vmax.f32 %v655_v45, 0.0  ;;  %v1341_v50 = vmax.f32 %v975_v46, 0.0  ;;  %v3100_v51 = vpop.f32.mrb[6].mxu0  ;;  %v3196_v52 = vpop.f32.mrb[6].mxu1 }
 0x111   :  { %v2826_v53 = vpack.c.bf16 %v1278_v47, %v1278_v47  ;;  %v3582_v54 = vpack.c.bf16 %v1342_v48, %v1342_v48  ;;  %v670_v55 = vadd.f32 %v3100_v51, %v3532_v6  ;;  %v664_v56 = vpop.f32.mrb[7].mxu0  ;;  %v990_v57 = vadd.f32 %v3196_v52, %v3532_v6  ;;  %v984_v58 = vpop.f32.mrb[7].mxu1 }
 0x112   :  { %v2825_v59 = vpack.c.bf16 %v1277_v49, %v1277_v49  ;;  %v3586_v60 = vpack.c.bf16 %v1341_v50, %v1341_v50  ;;  %v665_v61 = vadd.f32 %v3532_v6, %v664_v56  ;;  %v985_v62 = vadd.f32 %v3532_v6, %v984_v58  ;;  %2170 = vrot.lane.b32.xlu0 %v2885_v28, %s3351_s15 }
 0x113   :  { %1919 = vst.msk [vmem:[%s5294_s3 + $0x14] sm:$0xf] %vm1913_vm1, %v2826_v53  ;;  %2176 = vrot.lane.b32.xlu1 %v2888_v38, %s3351_s15  ;;  %1983 = vst.msk [vmem:[%s5294_s3 + $0x114] sm:$0xf] %vm1913_vm1, %v3582_v54  ;;  %v1280_v63 = vmax.f32 %v670_v55, 0.0  ;;  %v1344_v0 = vmax.f32 %v990_v57, 0.0 }
 0x114   :  { %1918 = vst.msk [vmem:[%s5294_s3 + $0x10] sm:$0xf] %vm1913_vm1, %v2825_v59  ;;  %1982 = vst.msk [vmem:[%s5294_s3 + $0x110] sm:$0xf] %vm1913_vm1, %v3586_v60  ;;  %v1279_v1 = vmax.f32 %v665_v61, 0.0  ;;  %v1343_v2 = vmax.f32 %v985_v62, 0.0 }
 0x115   :  { %v3103_v3 = vpop.f32.mrb[8].mxu0  ;;  %v3199_v4 = vpop.f32.mrb[8].mxu1  ;;  %v3610_v5 = vpack.c.bf16 %v1280_v63, %v1280_v63  ;;  %v3612_v7 = vpack.c.bf16 %v1344_v0, %v1344_v0 }
 0x116   :  { %v680_v8 = vadd.f32 %v3103_v3, %v3532_v6  ;;  %v674_v9 = vpop.f32.mrb[9].mxu0  ;;  %v1000_v10 = vadd.f32 %v3199_v4, %v3532_v6  ;;  %v994_v11 = vpop.f32.mrb[9].mxu1  ;;  %v3616_v12 = vpack.c.bf16 %v1279_v1, %v1279_v1  ;;  %v3618_v13 = vpack.c.bf16 %v1343_v2, %v1343_v2  ;;  %2174 = vrot.lane.b32.xlu0 %v2887_v44, %s3351_s15 }
 0x117   :  { %v675_v14 = vadd.f32 %v3532_v6, %v674_v9  ;;  %v995_v15 = vadd.f32 %v3532_v6, %v994_v11  ;;  %2046 = vrot.lane.b32.xlu1 %v2823_v43, %s3351_s15  ;;  %1921 = vst.msk [vmem:[%s5294_s3 + $0x1c] sm:$0xf] %vm1913_vm1, %v3610_v5  ;;  %1985 = vst.msk [vmem:[%s5294_s3 + $0x11c] sm:$0xf] %vm1913_vm1, %v3612_v7  ;;  %v3106_v20 = vpop.f32.mrb[10].mxu0 }
 0x118   :  { %v1282_v16 = vmax.f32 %v680_v8, 0.0  ;;  %v1346_v17 = vmax.f32 %v1000_v10, 0.0  ;;  %1920 = vst.msk [vmem:[%s5294_s3 + $0x18] sm:$0xf] %vm1913_vm1, %v3616_v12  ;;  %1984 = vst.msk [vmem:[%s5294_s3 + $0x118] sm:$0xf] %vm1913_vm1, %v3618_v13  ;;  %v690_v24 = vadd.f32 %v3106_v20, %v3532_v6 }
 0x119   :  { %v1281_v18 = vmax.f32 %v675_v14, 0.0  ;;  %v1345_v19 = vmax.f32 %v995_v15, 0.0  ;;  %v3202_v21 = vpop.f32.mrb[10].mxu1  ;;  %v684_v25 = vpop.f32.mrb[11].mxu0 }
 0x11a   :  { %v3644_v22 = vpack.c.bf16 %v1282_v16, %v1282_v16  ;;  %v3646_v23 = vpack.c.bf16 %v1346_v17, %v1346_v17  ;;  %v1010_v26 = vadd.f32 %v3202_v21, %v3532_v6  ;;  %v1004_v27 = vpop.f32.mrb[11].mxu1  ;;  %v685_v30 = vadd.f32 %v3532_v6, %v684_v25  ;;  %2050 = vrot.lane.b32.xlu0 %v2825_v59, %s3351_s15 }
 0x11b   :  { %v3650_v28 = vpack.c.bf16 %v1281_v18, %v1281_v18  ;;  %v3652_v29 = vpack.c.bf16 %v1345_v19, %v1345_v19  ;;  %v1005_v31 = vadd.f32 %v3532_v6, %v1004_v27  ;;  %2052 = vrot.lane.b32.xlu1 %v2826_v53, %s3351_s15  ;;  %v1284_v32 = vmax.f32 %v690_v24, 0.0  ;;  %v3109_v36 = vpop.f32.mrb[12].mxu0 }
 0x11c   :  { %1923 = vst.msk [vmem:[%s5294_s3 + $0x24] sm:$0xf] %vm1913_vm1, %v3644_v22  ;;  %1987 = vst.msk [vmem:[%s5294_s3 + $0x124] sm:$0xf] %vm1913_vm1, %v3646_v23  ;;  %v1348_v33 = vmax.f32 %v1010_v26, 0.0  ;;  %v1283_v34 = vmax.f32 %v685_v30, 0.0  ;;  %v700_v40 = vadd.f32 %v3109_v36, %v3532_v6 }
 0x11d   :  { %1922 = vst.msk [vmem:[%s5294_s3 + $0x20] sm:$0xf] %vm1913_vm1, %v3650_v28  ;;  %1986 = vst.msk [vmem:[%s5294_s3 + $0x120] sm:$0xf] %vm1913_vm1, %v3652_v29  ;;  %v1347_v35 = vmax.f32 %v1005_v31, 0.0  ;;  %v3205_v37 = vpop.f32.mrb[12].mxu1  ;;  %v3678_v38 = vpack.c.bf16 %v1284_v32, %v1284_v32 }
 0x11e   :  { %v3680_v39 = vpack.c.bf16 %v1348_v33, %v1348_v33  ;;  %v694_v41 = vpop.f32.mrb[13].mxu0  ;;  %v1020_v42 = vadd.f32 %v3205_v37, %v3532_v6  ;;  %v1014_v43 = vpop.f32.mrb[13].mxu1  ;;  %v3684_v44 = vpack.c.bf16 %v1283_v34, %v1283_v34  ;;  %2178 = vrot.lane.b32.xlu0 %v3586_v60, %s3351_s15  ;;  %v1286_v48 = vmax.f32 %v700_v40, 0.0 }
 0x11f   :  { %v3686_v45 = vpack.c.bf16 %v1347_v35, %v1347_v35  ;;  %v695_v46 = vadd.f32 %v3532_v6, %v694_v41  ;;  %v1015_v47 = vadd.f32 %v3532_v6, %v1014_v43  ;;  %2180 = vrot.lane.b32.xlu1 %v3582_v54, %s3351_s15  ;;  %1925 = vst.msk [vmem:[%s5294_s3 + $0x2c] sm:$0xf] %vm1913_vm1, %v3678_v38  ;;  %v3112_v52 = vpop.f32.mrb[14].mxu0 }
 0x120   :  { %1989 = vst.msk [vmem:[%s5294_s3 + $0x12c] sm:$0xf] %vm1913_vm1, %v3680_v39  ;;  %v1350_v49 = vmax.f32 %v1020_v42, 0.0  ;;  %1924 = vst.msk [vmem:[%s5294_s3 + $0x28] sm:$0xf] %vm1913_vm1, %v3684_v44  ;;  %v3208_v53 = vpop.f32.mrb[14].mxu1  ;;  %v3714_v54 = vpack.c.bf16 %v1286_v48, %v1286_v48  ;;  %v710_v56 = vadd.f32 %v3112_v52, %v3532_v6 }
 0x121   :  { %1988 = vst.msk [vmem:[%s5294_s3 + $0x128] sm:$0xf] %vm1913_vm1, %v3686_v45  ;;  %v1285_v50 = vmax.f32 %v695_v46, 0.0  ;;  %v1349_v51 = vmax.f32 %v1015_v47, 0.0  ;;  %v704_v57 = vpop.f32.mrb[15].mxu0  ;;  %v1030_v58 = vadd.f32 %v3208_v53, %v3532_v6  ;;  %v1024_v59 = vpop.f32.mrb[15].mxu1 }
 0x122   :  { %v3716_v55 = vpack.c.bf16 %v1350_v49, %v1350_v49  ;;  %v705_v62 = vadd.f32 %v3532_v6, %v704_v57  ;;  %v1025_v63 = vadd.f32 %v3532_v6, %v1024_v59  ;;  %2054 = vrot.lane.b32.xlu0 %v3616_v12, %s3351_s15  ;;  %1927 = vst.msk [vmem:[%s5294_s3 + $0x34] sm:$0xf] %vm1913_vm1, %v3714_v54  ;;  %v1288_v0 = vmax.f32 %v710_v56, 0.0 }
 0x123   :  { %v3720_v60 = vpack.c.bf16 %v1285_v50, %v1285_v50  ;;  %v3722_v61 = vpack.c.bf16 %v1349_v51, %v1349_v51  ;;  %2056 = vrot.lane.b32.xlu1 %v3610_v5, %s3351_s15  ;;  %v1352_v1 = vmax.f32 %v1030_v58, 0.0  ;;  %v3115_v4 = vpop.f32.mrb[16].mxu0 }
 0x124   :  { %1991 = vst.msk [vmem:[%s5294_s3 + $0x134] sm:$0xf] %vm1913_vm1, %v3716_v55  ;;  %v1287_v2 = vmax.f32 %v705_v62, 0.0  ;;  %v1351_v3 = vmax.f32 %v1025_v63, 0.0  ;;  %v3211_v5 = vpop.f32.mrb[16].mxu1  ;;  %v3750_v8 = vpack.c.bf16 %v1288_v0, %v1288_v0  ;;  %v720_v10 = vadd.f32 %v3115_v4, %v3532_v6  ;;  %v714_v11 = vpop.f32.mrb[17].mxu0 }
 0x125   :  { %1926 = vst.msk [vmem:[%s5294_s3 + $0x30] sm:$0xf] %vm1913_vm1, %v3720_v60  ;;  %1990 = vst.msk [vmem:[%s5294_s3 + $0x130] sm:$0xf] %vm1913_vm1, %v3722_v61  ;;  %v3752_v9 = vpack.c.bf16 %v1352_v1, %v1352_v1  ;;  %v1040_v12 = vadd.f32 %v3211_v5, %v3532_v6  ;;  %v1034_v14 = vpop.f32.mrb[17].mxu1  ;;  %v715_v17 = vadd.f32 %v3532_v6, %v714_v11 }
 0x126   :  { %v3756_v15 = vpack.c.bf16 %v1287_v2, %v1287_v2  ;;  %v3758_v16 = vpack.c.bf16 %v1351_v3, %v1351_v3  ;;  %v1035_v18 = vadd.f32 %v3532_v6, %v1034_v14  ;;  %2182 = vrot.lane.b32.xlu0 %v3618_v13, %s3351_s15  ;;  %1929 = vst.msk [vmem:[%s5294_s3 + $0x3c] sm:$0xf] %vm1913_vm1, %v3750_v8  ;;  %v1290_v19 = vmax.f32 %v720_v10, 0.0 }
 0x127   :  { %2184 = vrot.lane.b32.xlu1 %v3612_v7, %s3351_s15  ;;  %1993 = vst.msk [vmem:[%s5294_s3 + $0x13c] sm:$0xf] %vm1913_vm1, %v3752_v9  ;;  %v1354_v20 = vmax.f32 %v1040_v12, 0.0  ;;  %v1289_v7 = vmax.f32 %v715_v17, 0.0  ;;  %v3118_v21 = vpop.f32.mrb[18].mxu0 }
 0x128   :  { %1928 = vst.msk [vmem:[%s5294_s3 + $0x38] sm:$0xf] %vm1913_vm1, %v3756_v15  ;;  %1992 = vst.msk [vmem:[%s5294_s3 + $0x138] sm:$0xf] %vm1913_vm1, %v3758_v16  ;;  %v1353_v13 = vmax.f32 %v1035_v18, 0.0  ;;  %v3214_v24 = vpop.f32.mrb[18].mxu1  ;;  %v3786_v25 = vpack.c.bf16 %v1290_v19, %v1290_v19  ;;  %v730_v27 = vadd.f32 %v3118_v21, %v3532_v6 }
 0x129   :  { %v3788_v26 = vpack.c.bf16 %v1354_v20, %v1354_v20  ;;  %v724_v30 = vpop.f32.mrb[19].mxu0  ;;  %v1050_v31 = vadd.f32 %v3214_v24, %v3532_v6  ;;  %v1044_v32 = vpop.f32.mrb[19].mxu1  ;;  %v3792_v33 = vpack.c.bf16 %v1289_v7, %v1289_v7 }
 0x12a   :  { %v3794_v34 = vpack.c.bf16 %v1353_v13, %v1353_v13  ;;  %v725_v35 = vadd.f32 %v3532_v6, %v724_v30  ;;  %v1045_v36 = vadd.f32 %v3532_v6, %v1044_v32  ;;  %2058 = vrot.lane.b32.xlu0 %v3650_v28, %s3351_s15  ;;  %1931 = vst.msk [vmem:[%s5294_s3 + $0x44] sm:$0xf] %vm1913_vm1, %v3786_v25  ;;  %v1292_v37 = vmax.f32 %v730_v27, 0.0 }
 0x12b   :  { %2060 = vrot.lane.b32.xlu1 %v3644_v22, %s3351_s15  ;;  %1995 = vst.msk [vmem:[%s5294_s3 + $0x144] sm:$0xf] %vm1913_vm1, %v3788_v26  ;;  %v1356_v40 = vmax.f32 %v1050_v31, 0.0  ;;  %1930 = vst.msk [vmem:[%s5294_s3 + $0x40] sm:$0xf] %vm1913_vm1, %v3792_v33  ;;  %v3121_v41 = vpop.f32.mrb[20].mxu0 }
 0x12c   :  { %1994 = vst.msk [vmem:[%s5294_s3 + $0x140] sm:$0xf] %vm1913_vm1, %v3794_v34  ;;  %v1291_v22 = vmax.f32 %v725_v35, 0.0  ;;  %v1355_v28 = vmax.f32 %v1045_v36, 0.0  ;;  %v3217_v42 = vpop.f32.mrb[20].mxu1  ;;  %v3822_v43 = vpack.c.bf16 %v1292_v37, %v1292_v37  ;;  %v740_v47 = vadd.f32 %v3121_v41, %v3532_v6  ;;  %v734_v48 = vpop.f32.mrb[21].mxu0 }
 0x12d   :  { %v3824_v46 = vpack.c.bf16 %v1356_v40, %v1356_v40  ;;  %v1060_v49 = vadd.f32 %v3217_v42, %v3532_v6  ;;  %v1054_v50 = vpop.f32.mrb[21].mxu1  ;;  %v735_v53 = vadd.f32 %v3532_v6, %v734_v48 }
 0x12e   :  { %v3828_v51 = vpack.c.bf16 %v1291_v22, %v1291_v22  ;;  %v3830_v52 = vpack.c.bf16 %v1355_v28, %v1355_v28  ;;  %v1055_v56 = vadd.f32 %v3532_v6, %v1054_v50  ;;  %2186 = vrot.lane.b32.xlu0 %v3652_v29, %s3351_s15  ;;  %1933 = vst.msk [vmem:[%s5294_s3 + $0x4c] sm:$0xf] %vm1913_vm1, %v3822_v43  ;;  %v1294_v57 = vmax.f32 %v740_v47, 0.0 }
 0x12f   :  { %2188 = vrot.lane.b32.xlu1 %v3646_v23, %s3351_s15  ;;  %1997 = vst.msk [vmem:[%s5294_s3 + $0x14c] sm:$0xf] %vm1913_vm1, %v3824_v46  ;;  %v1358_v58 = vmax.f32 %v1060_v49, 0.0  ;;  %v1293_v23 = vmax.f32 %v735_v53, 0.0  ;;  %v3124_v59 = vpop.f32.mrb[22].mxu0 }
 0x130   :  { %1932 = vst.msk [vmem:[%s5294_s3 + $0x48] sm:$0xf] %vm1913_vm1, %v3828_v51  ;;  %1996 = vst.msk [vmem:[%s5294_s3 + $0x148] sm:$0xf] %vm1913_vm1, %v3830_v52  ;;  %v1357_v29 = vmax.f32 %v1055_v56, 0.0  ;;  %v3220_v62 = vpop.f32.mrb[22].mxu1  ;;  %v3858_v63 = vpack.c.bf16 %v1294_v57, %v1294_v57  ;;  %v750_v1 = vadd.f32 %v3124_v59, %v3532_v6 }
 0x131   :  { %v3860_v0 = vpack.c.bf16 %v1358_v58, %v1358_v58  ;;  %v744_v2 = vpop.f32.mrb[23].mxu0  ;;  %v1070_v3 = vadd.f32 %v3220_v62, %v3532_v6  ;;  %v1064_v4 = vpop.f32.mrb[23].mxu1  ;;  %v3864_v5 = vpack.c.bf16 %v1293_v23, %v1293_v23 }
 0x132   :  { %v3866_v10 = vpack.c.bf16 %v1357_v29, %v1357_v29  ;;  %v745_v11 = vadd.f32 %v3532_v6, %v744_v2  ;;  %v1065_v12 = vadd.f32 %v3532_v6, %v1064_v4  ;;  %2062 = vrot.lane.b32.xlu0 %v3684_v44, %s3351_s15  ;;  %1935 = vst.msk [vmem:[%s5294_s3 + $0x54] sm:$0xf] %vm1913_vm1, %v3858_v63  ;;  %v1296_v14 = vmax.f32 %v750_v1, 0.0 }
 0x133   :  { %2064 = vrot.lane.b32.xlu1 %v3678_v38, %s3351_s15  ;;  %1999 = vst.msk [vmem:[%s5294_s3 + $0x154] sm:$0xf] %vm1913_vm1, %v3860_v0  ;;  %v1360_v17 = vmax.f32 %v1070_v3, 0.0  ;;  %1934 = vst.msk [vmem:[%s5294_s3 + $0x50] sm:$0xf] %vm1913_vm1, %v3864_v5  ;;  %v3127_v18 = vpop.f32.mrb[24].mxu0 }
 0x134   :  { %1998 = vst.msk [vmem:[%s5294_s3 + $0x150] sm:$0xf] %vm1913_vm1, %v3866_v10  ;;  %v1295_v38 = vmax.f32 %v745_v11, 0.0  ;;  %v1359_v44 = vmax.f32 %v1065_v12, 0.0  ;;  %v3223_v19 = vpop.f32.mrb[24].mxu1  ;;  %v3894_v20 = vpack.c.bf16 %v1296_v14, %v1296_v14  ;;  %v760_v13 = vadd.f32 %v3127_v18, %v3532_v6  ;;  %v754_v21 = vpop.f32.mrb[25].mxu0 }
 0x135   :  { %v3896_v7 = vpack.c.bf16 %v1360_v17, %v1360_v17  ;;  %v1080_v24 = vadd.f32 %v3223_v19, %v3532_v6  ;;  %v1074_v27 = vpop.f32.mrb[25].mxu1  ;;  %v755_v32 = vadd.f32 %v3532_v6, %v754_v21 }
 0x136   :  { %v3900_v30 = vpack.c.bf16 %v1295_v38, %v1295_v38  ;;  %v3902_v31 = vpack.c.bf16 %v1359_v44, %v1359_v44  ;;  %v1075_v35 = vadd.f32 %v3532_v6, %v1074_v27  ;;  %2190 = vrot.lane.b32.xlu0 %v3686_v45, %s3351_s15  ;;  %1937 = vst.msk [vmem:[%s5294_s3 + $0x5c] sm:$0xf] %vm1913_vm1, %v3894_v20  ;;  %v1298_v36 = vmax.f32 %v760_v13, 0.0 }
 0x137   :  { %2192 = vrot.lane.b32.xlu1 %v3680_v39, %s3351_s15  ;;  %2001 = vst.msk [vmem:[%s5294_s3 + $0x15c] sm:$0xf] %vm1913_vm1, %v3896_v7  ;;  %v1362_v37 = vmax.f32 %v1080_v24, 0.0  ;;  %v1297_v39 = vmax.f32 %v755_v32, 0.0  ;;  %v3130_v40 = vpop.f32.mrb[26].mxu0 }
 0x138   :  { %1936 = vst.msk [vmem:[%s5294_s3 + $0x58] sm:$0xf] %vm1913_vm1, %v3900_v30  ;;  %2000 = vst.msk [vmem:[%s5294_s3 + $0x158] sm:$0xf] %vm1913_vm1, %v3902_v31  ;;  %v1361_v45 = vmax.f32 %v1075_v35, 0.0  ;;  %v3226_v22 = vpop.f32.mrb[26].mxu1  ;;  %v3930_v28 = vpack.c.bf16 %v1298_v36, %v1298_v36  ;;  %v770_v42 = vadd.f32 %v3130_v40, %v3532_v6 }
 0x139   :  { %v3932_v41 = vpack.c.bf16 %v1362_v37, %v1362_v37  ;;  %v764_v47 = vpop.f32.mrb[27].mxu0  ;;  %v1090_v48 = vadd.f32 %v3226_v22, %v3532_v6  ;;  %v1084_v49 = vpop.f32.mrb[27].mxu1  ;;  %v3936_v50 = vpack.c.bf16 %v1297_v39, %v1297_v39 }
 0x13a   :  { %v3938_v53 = vpack.c.bf16 %v1361_v45, %v1361_v45  ;;  %v765_v56 = vadd.f32 %v3532_v6, %v764_v47  ;;  %v1085_v57 = vadd.f32 %v3532_v6, %v1084_v49  ;;  %2066 = vrot.lane.b32.xlu0 %v3720_v60, %s3351_s15  ;;  %1939 = vst.msk [vmem:[%s5294_s3 + $0x64] sm:$0xf] %vm1913_vm1, %v3930_v28  ;;  %v1300_v58 = vmax.f32 %v770_v42, 0.0 }
 0x13b   :  { %2068 = vrot.lane.b32.xlu1 %v3714_v54, %s3351_s15  ;;  %2003 = vst.msk [vmem:[%s5294_s3 + $0x164] sm:$0xf] %vm1913_vm1, %v3932_v41  ;;  %v1364_v23 = vmax.f32 %v1090_v48, 0.0  ;;  %1938 = vst.msk [vmem:[%s5294_s3 + $0x60] sm:$0xf] %vm1913_vm1, %v3936_v50  ;;  %v3133_v29 = vpop.f32.mrb[28].mxu0 }
 0x13c   :  { %2002 = vst.msk [vmem:[%s5294_s3 + $0x160] sm:$0xf] %vm1913_vm1, %v3938_v53  ;;  %v1299_v54 = vmax.f32 %v765_v56, 0.0  ;;  %v1363_v60 = vmax.f32 %v1085_v57, 0.0  ;;  %v3229_v59 = vpop.f32.mrb[28].mxu1  ;;  %v3966_v62 = vpack.c.bf16 %v1300_v58, %v1300_v58  ;;  %v780_v2 = vadd.f32 %v3133_v29, %v3532_v6  ;;  %v774_v3 = vpop.f32.mrb[29].mxu0 }
 0x13d   :  { %v3968_v1 = vpack.c.bf16 %v1364_v23, %v1364_v23  ;;  %v1100_v4 = vadd.f32 %v3229_v59, %v3532_v6  ;;  %v1094_v11 = vpop.f32.mrb[29].mxu1  ;;  %v775_v17 = vadd.f32 %v3532_v6, %v774_v3 }
 0x13e   :  { %v3972_v12 = vpack.c.bf16 %v1299_v54, %v1299_v54  ;;  %v3974_v14 = vpack.c.bf16 %v1363_v60, %v1363_v60  ;;  %v1095_v38 = vadd.f32 %v3532_v6, %v1094_v11  ;;  %2194 = vrot.lane.b32.xlu0 %v3722_v61, %s3351_s15  ;;  %1941 = vst.msk [vmem:[%s5294_s3 + $0x6c] sm:$0xf] %vm1913_vm1, %v3966_v62  ;;  %v1302_v44 = vmax.f32 %v780_v2, 0.0 }
 0x13f   :  { %2196 = vrot.lane.b32.xlu1 %v3716_v55, %s3351_s15  ;;  %2005 = vst.msk [vmem:[%s5294_s3 + $0x16c] sm:$0xf] %vm1913_vm1, %v3968_v1  ;;  %v1366_v18 = vmax.f32 %v1100_v4, 0.0  ;;  %v1301_v55 = vmax.f32 %v775_v17, 0.0  ;;  %v3136_v19 = vpop.f32.mrb[30].mxu0 }
 0x140   :  { %1940 = vst.msk [vmem:[%s5294_s3 + $0x68] sm:$0xf] %vm1913_vm1, %v3972_v12  ;;  %2004 = vst.msk [vmem:[%s5294_s3 + $0x168] sm:$0xf] %vm1913_vm1, %v3974_v14  ;;  %v1365_v61 = vmax.f32 %v1095_v38, 0.0  ;;  %v3232_v13 = vpop.f32.mrb[30].mxu1  ;;  %v4002_v21 = vpack.c.bf16 %v1302_v44, %v1302_v44  ;;  %v790_v27 = vadd.f32 %v3136_v19, %v3532_v6 }
 0x141   :  { %v4004_v24 = vpack.c.bf16 %v1366_v18, %v1366_v18  ;;  %v784_v32 = vpop.f32.mrb[31].mxu0  ;;  %v1110_v35 = vadd.f32 %v3232_v13, %v3532_v6  ;;  %v1104_v36 = vpop.f32.mrb[31].mxu1  ;;  %v4008_v37 = vpack.c.bf16 %v1301_v55, %v1301_v55 }
 0x142   :  { %v4010_v39 = vpack.c.bf16 %v1365_v61, %v1365_v61  ;;  %v785_v45 = vadd.f32 %v3532_v6, %v784_v32  ;;  %v1105_v40 = vadd.f32 %v3532_v6, %v1104_v36  ;;  %2070 = vrot.lane.b32.xlu0 %v3756_v15, %s3351_s15  ;;  %1943 = vst.msk [vmem:[%s5294_s3 + $0x74] sm:$0xf] %vm1913_vm1, %v4002_v21  ;;  %v1304_v22 = vmax.f32 %v790_v27, 0.0 }
 0x143   :  { %2072 = vrot.lane.b32.xlu1 %v3750_v8, %s3351_s15  ;;  %2007 = vst.msk [vmem:[%s5294_s3 + $0x174] sm:$0xf] %vm1913_vm1, %v4004_v24  ;;  %v1368_v42 = vmax.f32 %v1110_v35, 0.0  ;;  %1942 = vst.msk [vmem:[%s5294_s3 + $0x70] sm:$0xf] %vm1913_vm1, %v4008_v37  ;;  %v3139_v47 = vpop.f32.mrb[32].mxu0 }
 0x144   :  { %2006 = vst.msk [vmem:[%s5294_s3 + $0x170] sm:$0xf] %vm1913_vm1, %v4010_v39  ;;  %v1303_v8 = vmax.f32 %v785_v45, 0.0  ;;  %v1367_v15 = vmax.f32 %v1105_v40, 0.0  ;;  %v3235_v48 = vpop.f32.mrb[32].mxu1  ;;  %v4038_v49 = vpack.c.bf16 %v1304_v22, %v1304_v22  ;;  %v800_v57 = vadd.f32 %v3139_v47, %v3532_v6  ;;  %v794_v58 = vpop.f32.mrb[33].mxu0 }
 0x145   :  { %v4040_v56 = vpack.c.bf16 %v1368_v42, %v1368_v42  ;;  %v1120_v23 = vadd.f32 %v3235_v48, %v3532_v6  ;;  %v1114_v54 = vpop.f32.mrb[33].mxu1  ;;  %v795_v59 = vadd.f32 %v3532_v6, %v794_v58 }
 0x146   :  { %v4044_v60 = vpack.c.bf16 %v1303_v8, %v1303_v8  ;;  %v4046_v29 = vpack.c.bf16 %v1367_v15, %v1367_v15  ;;  %v1115_v2 = vadd.f32 %v3532_v6, %v1114_v54  ;;  %2198 = vrot.lane.b32.xlu0 %v3758_v16, %s3351_s15  ;;  %1945 = vst.msk [vmem:[%s5294_s3 + $0x7c] sm:$0xf] %vm1913_vm1, %v4038_v49  ;;  %v1306_v3 = vmax.f32 %v800_v57, 0.0 }
 0x147   :  { %2200 = vrot.lane.b32.xlu1 %v3752_v9, %s3351_s15  ;;  %2009 = vst.msk [vmem:[%s5294_s3 + $0x17c] sm:$0xf] %vm1913_vm1, %v4040_v56  ;;  %v1370_v4 = vmax.f32 %v1120_v23, 0.0  ;;  %v1305_v9 = vmax.f32 %v795_v59, 0.0  ;;  %v3142_v11 = vpop.f32.mrb[34].mxu0 }
 0x148   :  { %1944 = vst.msk [vmem:[%s5294_s3 + $0x78] sm:$0xf] %vm1913_vm1, %v4044_v60  ;;  %2008 = vst.msk [vmem:[%s5294_s3 + $0x178] sm:$0xf] %vm1913_vm1, %v4046_v29  ;;  %v1369_v16 = vmax.f32 %v1115_v2, 0.0  ;;  %v3238_v17 = vpop.f32.mrb[34].mxu1  ;;  %v4074_v38 = vpack.c.bf16 %v1306_v3, %v1306_v3  ;;  %v810_v18 = vadd.f32 %v3142_v11, %v3532_v6 }
 0x149   :  { %v4076_v44 = vpack.c.bf16 %v1370_v4, %v1370_v4  ;;  %v804_v55 = vpop.f32.mrb[35].mxu0  ;;  %v1130_v61 = vadd.f32 %v3238_v17, %v3532_v6  ;;  %v1124_v19 = vpop.f32.mrb[35].mxu1  ;;  %v4080_v13 = vpack.c.bf16 %v1305_v9, %v1305_v9 }
 0x14a   :  { %v4082_v27 = vpack.c.bf16 %v1369_v16, %v1369_v16  ;;  %v805_v32 = vadd.f32 %v3532_v6, %v804_v55  ;;  %v1125_v35 = vadd.f32 %v3532_v6, %v1124_v19  ;;  %2074 = vrot.lane.b32.xlu0 %v3792_v33, %s3351_s15  ;;  %1947 = vst.msk [vmem:[%s5294_s3 + $0x84] sm:$0xf] %vm1913_vm1, %v4074_v38  ;;  %v1308_v36 = vmax.f32 %v810_v18, 0.0 }
 0x14b   :  { %2076 = vrot.lane.b32.xlu1 %v3786_v25, %s3351_s15  ;;  %2011 = vst.msk [vmem:[%s5294_s3 + $0x184] sm:$0xf] %vm1913_vm1, %v4076_v44  ;;  %v1372_v45 = vmax.f32 %v1130_v61, 0.0  ;;  %1946 = vst.msk [vmem:[%s5294_s3 + $0x80] sm:$0xf] %vm1913_vm1, %v4080_v13  ;;  %v3145_v40 = vpop.f32.mrb[36].mxu0 }
 0x14c   :  { %2010 = vst.msk [vmem:[%s5294_s3 + $0x180] sm:$0xf] %vm1913_vm1, %v4082_v27  ;;  %v1307_v25 = vmax.f32 %v805_v32, 0.0  ;;  %v1371_v33 = vmax.f32 %v1125_v35, 0.0  ;;  %v3241_v22 = vpop.f32.mrb[36].mxu1  ;;  %v4110_v42 = vpack.c.bf16 %v1308_v36, %v1308_v36  ;;  %v820_v15 = vadd.f32 %v3145_v40, %v3532_v6  ;;  %v814_v47 = vpop.f32.mrb[37].mxu0 }
 0x14d   :  { %v4112_v8 = vpack.c.bf16 %v1372_v45, %v1372_v45  ;;  %v1140_v48 = vadd.f32 %v3241_v22, %v3532_v6  ;;  %v1134_v57 = vpop.f32.mrb[37].mxu1  ;;  %v815_v54 = vadd.f32 %v3532_v6, %v814_v47 }
 0x14e   :  { %v4116_v58 = vpack.c.bf16 %v1307_v25, %v1307_v25  ;;  %v4118_v23 = vpack.c.bf16 %v1371_v33, %v1371_v33  ;;  %v1135_v59 = vadd.f32 %v3532_v6, %v1134_v57  ;;  %2202 = vrot.lane.b32.xlu0 %v3794_v34, %s3351_s15  ;;  %1949 = vst.msk [vmem:[%s5294_s3 + $0x8c] sm:$0xf] %vm1913_vm1, %v4110_v42  ;;  %v1310_v2 = vmax.f32 %v820_v15, 0.0 }
 0x14f   :  { %2204 = vrot.lane.b32.xlu1 %v3788_v26, %s3351_s15  ;;  %2013 = vst.msk [vmem:[%s5294_s3 + $0x18c] sm:$0xf] %vm1913_vm1, %v4112_v8  ;;  %v1374_v3 = vmax.f32 %v1140_v48, 0.0  ;;  %v1309_v26 = vmax.f32 %v815_v54, 0.0  ;;  %v3148_v4 = vpop.f32.mrb[38].mxu0 }
 0x150   :  { %1948 = vst.msk [vmem:[%s5294_s3 + $0x88] sm:$0xf] %vm1913_vm1, %v4116_v58  ;;  %2012 = vst.msk [vmem:[%s5294_s3 + $0x188] sm:$0xf] %vm1913_vm1, %v4118_v23  ;;  %v1373_v34 = vmax.f32 %v1135_v59, 0.0  ;;  %v3244_v9 = vpop.f32.mrb[38].mxu1  ;;  %v4146_v16 = vpack.c.bf16 %v1310_v2, %v1310_v2  ;;  %v830_v17 = vadd.f32 %v3148_v4, %v3532_v6 }
 0x151   :  { %v4148_v11 = vpack.c.bf16 %v1374_v3, %v1374_v3  ;;  %v824_v18 = vpop.f32.mrb[39].mxu0  ;;  %v1150_v55 = vadd.f32 %v3244_v9, %v3532_v6  ;;  %v1144_v61 = vpop.f32.mrb[39].mxu1  ;;  %v4152_v19 = vpack.c.bf16 %v1309_v26, %v1309_v26 }
 0x152   :  { %v4154_v32 = vpack.c.bf16 %v1373_v34, %v1373_v34  ;;  %v825_v35 = vadd.f32 %v3532_v6, %v824_v18  ;;  %v1145_v36 = vadd.f32 %v3532_v6, %v1144_v61  ;;  %2078 = vrot.lane.b32.xlu0 %v3828_v51, %s3351_s15  ;;  %1951 = vst.msk [vmem:[%s5294_s3 + $0x94] sm:$0xf] %vm1913_vm1, %v4146_v16  ;;  %v1312_v45 = vmax.f32 %v830_v17, 0.0 }
 0x153   :  { %2080 = vrot.lane.b32.xlu1 %v3822_v43, %s3351_s15  ;;  %2015 = vst.msk [vmem:[%s5294_s3 + $0x194] sm:$0xf] %vm1913_vm1, %v4148_v11  ;;  %v1376_v25 = vmax.f32 %v1150_v55, 0.0  ;;  %1950 = vst.msk [vmem:[%s5294_s3 + $0x90] sm:$0xf] %vm1913_vm1, %v4152_v19  ;;  %v3151_v33 = vpop.f32.mrb[40].mxu0 }
 0x154   :  { %2014 = vst.msk [vmem:[%s5294_s3 + $0x190] sm:$0xf] %vm1913_vm1, %v4154_v32  ;;  %v1311_v43 = vmax.f32 %v825_v35, 0.0  ;;  %v1375_v51 = vmax.f32 %v1145_v36, 0.0  ;;  %v3247_v40 = vpop.f32.mrb[40].mxu1  ;;  %v4182_v22 = vpack.c.bf16 %v1312_v45, %v1312_v45  ;;  %v840_v47 = vadd.f32 %v3151_v33, %v3532_v6  ;;  %v834_v48 = vpop.f32.mrb[41].mxu0 }
 0x155   :  { %v4184_v15 = vpack.c.bf16 %v1376_v25, %v1376_v25  ;;  %v1160_v57 = vadd.f32 %v3247_v40, %v3532_v6  ;;  %v1154_v54 = vpop.f32.mrb[41].mxu1  ;;  %v835_v3 = vadd.f32 %v3532_v6, %v834_v48 }
 0x156   :  { %v4188_v59 = vpack.c.bf16 %v1311_v43, %v1311_v43  ;;  %v4190_v2 = vpack.c.bf16 %v1375_v51, %v1375_v51  ;;  %v1155_v26 = vadd.f32 %v3532_v6, %v1154_v54  ;;  %2206 = vrot.lane.b32.xlu0 %v3830_v52, %s3351_s15  ;;  %1953 = vst.msk [vmem:[%s5294_s3 + $0x9c] sm:$0xf] %vm1913_vm1, %v4182_v22  ;;  %v1314_v34 = vmax.f32 %v840_v47, 0.0 }
 0x157   :  { %2208 = vrot.lane.b32.xlu1 %v3824_v46, %s3351_s15  ;;  %2017 = vst.msk [vmem:[%s5294_s3 + $0x19c] sm:$0xf] %vm1913_vm1, %v4184_v15  ;;  %v1378_v4 = vmax.f32 %v1160_v57, 0.0  ;;  %v1313_v46 = vmax.f32 %v835_v3, 0.0  ;;  %v3154_v9 = vpop.f32.mrb[42].mxu0 }
 0x158   :  { %1952 = vst.msk [vmem:[%s5294_s3 + $0x98] sm:$0xf] %vm1913_vm1, %v4188_v59  ;;  %2016 = vst.msk [vmem:[%s5294_s3 + $0x198] sm:$0xf] %vm1913_vm1, %v4190_v2  ;;  %v1377_v52 = vmax.f32 %v1155_v26, 0.0  ;;  %v3250_v17 = vpop.f32.mrb[42].mxu1  ;;  %v4218_v18 = vpack.c.bf16 %v1314_v34, %v1314_v34  ;;  %v850_v61 = vadd.f32 %v3154_v9, %v3532_v6 }
 0x159   :  { %v4220_v55 = vpack.c.bf16 %v1378_v4, %v1378_v4  ;;  %v844_v35 = vpop.f32.mrb[43].mxu0  ;;  %v1170_v36 = vadd.f32 %v3250_v17, %v3532_v6  ;;  %v1164_v45 = vpop.f32.mrb[43].mxu1  ;;  %v4224_v25 = vpack.c.bf16 %v1313_v46, %v1313_v46 }
 0x15a   :  { %v4226_v43 = vpack.c.bf16 %v1377_v52, %v1377_v52  ;;  %v845_v51 = vadd.f32 %v3532_v6, %v844_v35  ;;  %v1165_v33 = vadd.f32 %v3532_v6, %v1164_v45  ;;  %2082 = vrot.lane.b32.xlu0 %v3864_v5, %s3351_s15  ;;  %1955 = vst.msk [vmem:[%s5294_s3 + $0xa4] sm:$0xf] %vm1913_vm1, %v4218_v18  ;;  %v1316_v40 = vmax.f32 %v850_v61, 0.0 }
 0x15b   :  { %2084 = vrot.lane.b32.xlu1 %v3858_v63, %s3351_s15  ;;  %2019 = vst.msk [vmem:[%s5294_s3 + $0x1a4] sm:$0xf] %vm1913_vm1, %v4220_v55  ;;  %v1380_v47 = vmax.f32 %v1170_v36, 0.0  ;;  %1954 = vst.msk [vmem:[%s5294_s3 + $0xa0] sm:$0xf] %vm1913_vm1, %v4224_v25  ;;  %v3157_v48 = vpop.f32.mrb[44].mxu0 }
 0x15c   :  { %2018 = vst.msk [vmem:[%s5294_s3 + $0x1a0] sm:$0xf] %vm1913_vm1, %v4226_v43  ;;  %v1315_v63 = vmax.f32 %v845_v51, 0.0  ;;  %v1379_v5 = vmax.f32 %v1165_v33, 0.0  ;;  %v3253_v57 = vpop.f32.mrb[44].mxu1  ;;  %v4254_v54 = vpack.c.bf16 %v1316_v40, %v1316_v40  ;;  %v860_v26 = vadd.f32 %v3157_v48, %v3532_v6  ;;  %v854_v34 = vpop.f32.mrb[45].mxu0 }
 0x15d   :  { %v4256_v3 = vpack.c.bf16 %v1380_v47, %v1380_v47  ;;  %v1180_v4 = vadd.f32 %v3253_v57, %v3532_v6  ;;  %v1174_v46 = vpop.f32.mrb[45].mxu1  ;;  %v855_v17 = vadd.f32 %v3532_v6, %v854_v34 }
 0x15e   :  { %v4260_v52 = vpack.c.bf16 %v1315_v63, %v1315_v63  ;;  %v4262_v9 = vpack.c.bf16 %v1379_v5, %v1379_v5  ;;  %v1175_v61 = vadd.f32 %v3532_v6, %v1174_v46  ;;  %2210 = vrot.lane.b32.xlu0 %v3866_v10, %s3351_s15  ;;  %1957 = vst.msk [vmem:[%s5294_s3 + $0xac] sm:$0xf] %vm1913_vm1, %v4254_v54  ;;  %v1318_v35 = vmax.f32 %v860_v26, 0.0 }
 0x15f   :  { %2212 = vrot.lane.b32.xlu1 %v3860_v0, %s3351_s15  ;;  %2021 = vst.msk [vmem:[%s5294_s3 + $0x1ac] sm:$0xf] %vm1913_vm1, %v4256_v3  ;;  %v1382_v36 = vmax.f32 %v1180_v4, 0.0  ;;  %v1317_v0 = vmax.f32 %v855_v17, 0.0  ;;  %v3160_v45 = vpop.f32.mrb[46].mxu0 }
 0x160   :  { %1956 = vst.msk [vmem:[%s5294_s3 + $0xa8] sm:$0xf] %vm1913_vm1, %v4260_v52  ;;  %2020 = vst.msk [vmem:[%s5294_s3 + $0x1a8] sm:$0xf] %vm1913_vm1, %v4262_v9  ;;  %v1381_v10 = vmax.f32 %v1175_v61, 0.0  ;;  %v3256_v51 = vpop.f32.mrb[46].mxu1  ;;  %v4290_v33 = vpack.c.bf16 %v1318_v35, %v1318_v35  ;;  %v870_v47 = vadd.f32 %v3160_v45, %v3532_v6 }
 0x161   :  { %v4292_v40 = vpack.c.bf16 %v1382_v36, %v1382_v36  ;;  %v864_v63 = vpop.f32.mrb[47].mxu0  ;;  %v1190_v5 = vadd.f32 %v3256_v51, %v3532_v6  ;;  %v1184_v48 = vpop.f32.mrb[47].mxu1  ;;  %v4296_v57 = vpack.c.bf16 %v1317_v0, %v1317_v0  ;;  %v4333_v0 = vld [vmem:[%s5293_s2] ss:$0 sm:$0xff] }
 0x162   :  { %v4298_v26 = vpack.c.bf16 %v1381_v10, %v1381_v10  ;;  %v865_v34 = vadd.f32 %v3532_v6, %v864_v63  ;;  %v1185_v4 = vadd.f32 %v3532_v6, %v1184_v48  ;;  %2086 = vrot.lane.b32.xlu0 %v3900_v30, %s3351_s15  ;;  %1959 = vst.msk [vmem:[%s5294_s3 + $0xb4] sm:$0xf] %vm1913_vm1, %v4290_v33  ;;  %v1320_v46 = vmax.f32 %v870_v47, 0.0 }
 0x163   :  { %2088 = vrot.lane.b32.xlu1 %v3894_v20, %s3351_s15  ;;  %2023 = vst.msk [vmem:[%s5294_s3 + $0x1b4] sm:$0xf] %vm1913_vm1, %v4292_v40  ;;  %v1384_v6 = vmax.f32 %v1190_v5, 0.0  ;;  %1958 = vst.msk [vmem:[%s5294_s3 + $0xb0] sm:$0xf] %vm1913_vm1, %v4296_v57  ;;  %v3163_v17 = vpop.f32.mrb[48].mxu0 }
 0x164   :  { %2022 = vst.msk [vmem:[%s5294_s3 + $0x1b0] sm:$0xf] %vm1913_vm1, %v4298_v26  ;;  %v1319_v20 = vmax.f32 %v865_v34, 0.0  ;;  %v1383_v30 = vmax.f32 %v1185_v4, 0.0  ;;  %v3259_v61 = vpop.f32.mrb[48].mxu1  ;;  %v4326_v35 = vpack.c.bf16 %v1320_v46, %v1320_v46  ;;  %v880_v10 = vadd.f32 %v4333_v0, %v3163_v17  ;;  %v874_v45 = vpop.f32.mrb[49].mxu0 }
 0x165   :  { %v4328_v36 = vpack.c.bf16 %v1384_v6, %v1384_v6  ;;  %v1200_v51 = vadd.f32 %v4333_v0, %v3259_v61  ;;  %v1194_v47 = vpop.f32.mrb[49].mxu1  ;;  %v875_v48 = vadd.f32 %v4333_v0, %v874_v45 }
 0x166   :  { %v4337_v63 = vpack.c.bf16 %v1319_v20, %v1319_v20  ;;  %v4339_v5 = vpack.c.bf16 %v1383_v30, %v1383_v30  ;;  %v1195_v34 = vadd.f32 %v4333_v0, %v1194_v47  ;;  %2214 = vrot.lane.b32.xlu0 %v3902_v31, %s3351_s15  ;;  %1961 = vst.msk [vmem:[%s5294_s3 + $0xbc] sm:$0xf] %vm1913_vm1, %v4326_v35  ;;  %v1322_v4 = vmax.f32 %v880_v10, 0.0 }
 0x167   :  { %5308 = vst [vmem:[#allocation8_spill] sm:$0xff] %v4328_v36  ;;  %2216 = vrot.lane.b32.xlu1 %v3896_v7, %s3351_s15  ;;  %2025 = vst.msk [vmem:[%s5294_s3 + $0x1bc] sm:$0xf] %vm1913_vm1, %v4328_v36  ;;  %v1386_v46 = vmax.f32 %v1200_v51, 0.0  ;;  %v1321_v7 = vmax.f32 %v875_v48, 0.0  ;;  %v3166_v6 = vpop.f32.mrb[50].mxu0 }
 0x168   :  { %5309 = vst [vmem:[#allocation9_spill] sm:$0xff] %v4339_v5  ;;  %1960 = vst.msk [vmem:[%s5294_s3 + $0xb8] sm:$0xf] %vm1913_vm1, %v4337_v63  ;;  %v1385_v31 = vmax.f32 %v1195_v34, 0.0  ;;  %v3262_v20 = vpop.f32.mrb[50].mxu1  ;;  %v4367_v30 = vpack.c.bf16 %v1322_v4, %v1322_v4  ;;  %v890_v61 = vadd.f32 %v4333_v0, %v3166_v6  ;;  %v884_v10 = vpop.f32.mrb[51].mxu0 }
 0x169   :  { %2024 = vst.msk [vmem:[%s5294_s3 + $0x1b8] sm:$0xf] %vm1913_vm1, %v4339_v5  ;;  %v4369_v17 = vpack.c.bf16 %v1386_v46, %v1386_v46  ;;  %v1210_v45 = vadd.f32 %v4333_v0, %v3262_v20  ;;  %v1204_v51 = vpop.f32.mrb[51].mxu1  ;;  %v4373_v47 = vpack.c.bf16 %v1321_v7, %v1321_v7  ;;  %v885_v5 = vadd.f32 %v4333_v0, %v884_v10 }
 0x16a   :  { %v4375_v36 = vpack.c.bf16 %v1385_v31, %v1385_v31  ;;  %v1205_v48 = vadd.f32 %v4333_v0, %v1204_v51  ;;  %2090 = vrot.lane.b32.xlu0 %v3936_v50, %s3351_s15  ;;  %1963 = vst.msk [vmem:[%s5294_s3 + $0xc4] sm:$0xf] %vm1913_vm1, %v4367_v30  ;;  %v1324_v34 = vmax.f32 %v890_v61, 0.0 }
 0x16b   :  { %5310 = vst [vmem:[#allocation10_spill] sm:$0xff] %v4369_v17  ;;  %2092 = vrot.lane.b32.xlu1 %v3930_v28, %s3351_s15  ;;  %2027 = vst.msk [vmem:[%s5294_s3 + $0x1c4] sm:$0xf] %vm1913_vm1, %v4369_v17  ;;  %v1388_v4 = vmax.f32 %v1210_v45, 0.0  ;;  %v1323_v28 = vmax.f32 %v885_v5, 0.0  ;;  %v3169_v46 = vpop.f32.mrb[52].mxu0 }
 0x16c   :  { %5311 = vst [vmem:[#allocation11_spill] sm:$0xff] %v4375_v36  ;;  %1962 = vst.msk [vmem:[%s5294_s3 + $0xc0] sm:$0xf] %vm1913_vm1, %v4373_v47  ;;  %v1387_v50 = vmax.f32 %v1205_v48, 0.0  ;;  %v3265_v7 = vpop.f32.mrb[52].mxu1  ;;  %v4403_v31 = vpack.c.bf16 %v1324_v34, %v1324_v34  ;;  %v900_v20 = vadd.f32 %v4333_v0, %v3169_v46  ;;  %v894_v61 = vpop.f32.mrb[53].mxu0 }
 0x16d   :  { %2026 = vst.msk [vmem:[%s5294_s3 + $0x1c0] sm:$0xf] %vm1913_vm1, %v4375_v36  ;;  %v4405_v6 = vpack.c.bf16 %v1388_v4, %v1388_v4  ;;  %v1220_v10 = vadd.f32 %v4333_v0, %v3265_v7  ;;  %v1214_v45 = vpop.f32.mrb[53].mxu1  ;;  %v4409_v51 = vpack.c.bf16 %v1323_v28, %v1323_v28  ;;  %v895_v36 = vadd.f32 %v4333_v0, %v894_v61 }
 0x16e   :  { %v4411_v17 = vpack.c.bf16 %v1387_v50, %v1387_v50  ;;  %v1215_v5 = vadd.f32 %v4333_v0, %v1214_v45  ;;  %2218 = vrot.lane.b32.xlu0 %v3938_v53, %s3351_s15  ;;  %1965 = vst.msk [vmem:[%s5294_s3 + $0xcc] sm:$0xf] %vm1913_vm1, %v4403_v31  ;;  %v1326_v48 = vmax.f32 %v900_v20, 0.0 }
 0x16f   :  { %5312 = vst [vmem:[#allocation12_spill] sm:$0xff] %v4405_v6  ;;  %2220 = vrot.lane.b32.xlu1 %v3932_v41, %s3351_s15  ;;  %2029 = vst.msk [vmem:[%s5294_s3 + $0x1cc] sm:$0xf] %vm1913_vm1, %v4405_v6  ;;  %v1390_v34 = vmax.f32 %v1220_v10, 0.0  ;;  %v1325_v41 = vmax.f32 %v895_v36, 0.0  ;;  %v3172_v4 = vpop.f32.mrb[54].mxu0 }
 0x170   :  { %5313 = vst [vmem:[#allocation13_spill] sm:$0xff] %v4411_v17  ;;  %1964 = vst.msk [vmem:[%s5294_s3 + $0xc8] sm:$0xf] %vm1913_vm1, %v4409_v51  ;;  %v1389_v53 = vmax.f32 %v1215_v5, 0.0  ;;  %v3268_v28 = vpop.f32.mrb[54].mxu1  ;;  %v4439_v50 = vpack.c.bf16 %v1326_v48, %v1326_v48  ;;  %v910_v7 = vadd.f32 %v4333_v0, %v3172_v4  ;;  %v904_v20 = vpop.f32.mrb[55].mxu0 }
 0x171   :  { %2028 = vst.msk [vmem:[%s5294_s3 + $0x1c8] sm:$0xf] %vm1913_vm1, %v4411_v17  ;;  %v4441_v46 = vpack.c.bf16 %v1390_v34, %v1390_v34  ;;  %v1230_v61 = vadd.f32 %v4333_v0, %v3268_v28  ;;  %v1224_v10 = vpop.f32.mrb[55].mxu1  ;;  %v4445_v45 = vpack.c.bf16 %v1325_v41, %v1325_v41  ;;  %v905_v17 = vadd.f32 %v4333_v0, %v904_v20 }
 0x172   :  { %v4447_v6 = vpack.c.bf16 %v1389_v53, %v1389_v53  ;;  %v1225_v36 = vadd.f32 %v4333_v0, %v1224_v10  ;;  %2094 = vrot.lane.b32.xlu0 %v3972_v12, %s3351_s15  ;;  %1967 = vst.msk [vmem:[%s5294_s3 + $0xd4] sm:$0xf] %vm1913_vm1, %v4439_v50  ;;  %v1328_v5 = vmax.f32 %v910_v7, 0.0 }
 0x173   :  { %5314 = vst [vmem:[#allocation14_spill] sm:$0xff] %v4441_v46  ;;  %2096 = vrot.lane.b32.xlu1 %v3966_v62, %s3351_s15  ;;  %2031 = vst.msk [vmem:[%s5294_s3 + $0x1d4] sm:$0xf] %vm1913_vm1, %v4441_v46  ;;  %v1392_v48 = vmax.f32 %v1230_v61, 0.0  ;;  %v1327_v62 = vmax.f32 %v905_v17, 0.0  ;;  %v3175_v34 = vpop.f32.mrb[56].mxu0 }
 0x174   :  { %5315 = vst [vmem:[#allocation15_spill] sm:$0xff] %v4447_v6  ;;  %1966 = vst.msk [vmem:[%s5294_s3 + $0xd0] sm:$0xf] %vm1913_vm1, %v4445_v45  ;;  %v1391_v12 = vmax.f32 %v1225_v36, 0.0  ;;  %v3271_v41 = vpop.f32.mrb[56].mxu1  ;;  %v4475_v53 = vpack.c.bf16 %v1328_v5, %v1328_v5  ;;  %v920_v28 = vadd.f32 %v4333_v0, %v3175_v34  ;;  %v914_v7 = vpop.f32.mrb[57].mxu0 }
 0x175   :  { %2030 = vst.msk [vmem:[%s5294_s3 + $0x1d0] sm:$0xf] %vm1913_vm1, %v4447_v6  ;;  %v4477_v4 = vpack.c.bf16 %v1392_v48, %v1392_v48  ;;  %v1240_v20 = vadd.f32 %v4333_v0, %v3271_v41  ;;  %v1234_v61 = vpop.f32.mrb[57].mxu1  ;;  %v4481_v10 = vpack.c.bf16 %v1327_v62, %v1327_v62  ;;  %v915_v6 = vadd.f32 %v4333_v0, %v914_v7 }
 0x176   :  { %v4483_v46 = vpack.c.bf16 %v1391_v12, %v1391_v12  ;;  %v1235_v17 = vadd.f32 %v4333_v0, %v1234_v61  ;;  %2222 = vrot.lane.b32.xlu0 %v3974_v14, %s3351_s15  ;;  %1969 = vst.msk [vmem:[%s5294_s3 + $0xdc] sm:$0xf] %vm1913_vm1, %v4475_v53  ;;  %v1330_v36 = vmax.f32 %v920_v28, 0.0 }
 0x177   :  { %5316 = vst [vmem:[#allocation16_spill] sm:$0xff] %v4477_v4  ;;  %2224 = vrot.lane.b32.xlu1 %v3968_v1, %s3351_s15  ;;  %2033 = vst.msk [vmem:[%s5294_s3 + $0x1dc] sm:$0xf] %vm1913_vm1, %v4477_v4  ;;  %v1394_v5 = vmax.f32 %v1240_v20, 0.0  ;;  %v1329_v1 = vmax.f32 %v915_v6, 0.0  ;;  %v3178_v48 = vpop.f32.mrb[58].mxu0 }
 0x178   :  { %5317 = vst [vmem:[#allocation17_spill] sm:$0xff] %v4483_v46  ;;  %1968 = vst.msk [vmem:[%s5294_s3 + $0xd8] sm:$0xf] %vm1913_vm1, %v4481_v10  ;;  %v1393_v14 = vmax.f32 %v1235_v17, 0.0  ;;  %v3274_v62 = vpop.f32.mrb[58].mxu1  ;;  %v4511_v12 = vpack.c.bf16 %v1330_v36, %v1330_v36  ;;  %v930_v41 = vadd.f32 %v4333_v0, %v3178_v48  ;;  %v924_v28 = vpop.f32.mrb[59].mxu0 }
 0x179   :  { %2032 = vst.msk [vmem:[%s5294_s3 + $0x1d8] sm:$0xf] %vm1913_vm1, %v4483_v46  ;;  %v4513_v34 = vpack.c.bf16 %v1394_v5, %v1394_v5  ;;  %v1250_v7 = vadd.f32 %v4333_v0, %v3274_v62  ;;  %v1244_v20 = vpop.f32.mrb[59].mxu1  ;;  %v4517_v61 = vpack.c.bf16 %v1329_v1, %v1329_v1  ;;  %v925_v46 = vadd.f32 %v4333_v0, %v924_v28 }
 0x17a   :  { %v4519_v4 = vpack.c.bf16 %v1393_v14, %v1393_v14  ;;  %v1245_v6 = vadd.f32 %v4333_v0, %v1244_v20  ;;  %2098 = vrot.lane.b32.xlu0 %v4008_v37, %s3351_s15  ;;  %1971 = vst.msk [vmem:[%s5294_s3 + $0xe4] sm:$0xf] %vm1913_vm1, %v4511_v12  ;;  %v1332_v17 = vmax.f32 %v930_v41, 0.0 }
 0x17b   :  { %2100 = vrot.lane.b32.xlu1 %v4002_v21, %s3351_s15  ;;  %2035 = vst.msk [vmem:[%s5294_s3 + $0x1e4] sm:$0xf] %vm1913_vm1, %v4513_v34  ;;  %v1396_v36 = vmax.f32 %v1250_v7, 0.0  ;;  %1970 = vst.msk [vmem:[%s5294_s3 + $0xe0] sm:$0xf] %vm1913_vm1, %v4517_v61  ;;  %v1331_v21 = vmax.f32 %v925_v46, 0.0 }
 0x17c   :  { %2034 = vst.msk [vmem:[%s5294_s3 + $0x1e0] sm:$0xf] %vm1913_vm1, %v4519_v4  ;;  %v1395_v37 = vmax.f32 %v1245_v6, 0.0  ;;  %v3181_v5 = vpop.f32.mrb[60].mxu0  ;;  %v3277_v1 = vpop.f32.mrb[60].mxu1  ;;  %v4547_v62 = vpack.c.bf16 %v1332_v17, %v1332_v17 }
 0x17d   :  { %v2173_v14 = vpop.permute.xlu1 %2172  ;;  %v2045_v48 = vpop.permute.xlu0 %2044  ;;  %v4549_v41 = vpack.c.bf16 %v1396_v36, %v1396_v36  ;;  %v940_v28 = vadd.f32 %v4333_v0, %v3181_v5  ;;  %v1260_v7 = vadd.f32 %v4333_v0, %v3277_v1  ;;  %v4561_v46 = vpack.c.bf16 %v1331_v21, %v1331_v21 }
 0x17e   :  { %2491 = vst.msk [vmem:[%s5295_s4 + $0x104] sm:$0xf] %vm1913_vm1, %v2173_v14  ;;  %2427 = vst.msk [vmem:[%s5295_s4 + $0x4] sm:$0xf] %vm1913_vm1, %v2045_v48  ;;  %v4563_v20 = vpack.c.bf16 %v1395_v37, %v1395_v37  ;;  %v934_v6 = vpop.f32.mrb[61].mxu0  ;;  %v1254_v17 = vpop.f32.mrb[61].mxu1  ;;  %2226 = vrot.lane.b32.xlu0 %v4010_v39, %s3351_s15 }
 0x17f   :  { %5318 = vst [vmem:[#allocation18_spill] sm:$0xff] %v4549_v41  ;;  %2228 = vrot.lane.b32.xlu1 %v4004_v24, %s3351_s15  ;;  %1973 = vst.msk [vmem:[%s5294_s3 + $0xec] sm:$0xf] %vm1913_vm1, %v4547_v62  ;;  %v1334_v36 = vmax.f32 %v940_v28, 0.0  ;;  %v935_v21 = vadd.f32 %v4333_v0, %v934_v6  ;;  %v1398_v37 = vmax.f32 %v1260_v7, 0.0  ;;  %v1255_v24 = vadd.f32 %v4333_v0, %v1254_v17  ;;  %v3184_v39 = vpop.f32.mrb[62].mxu0 }
 0x180   :  { %5319 = vst [vmem:[#allocation19_spill] sm:$0xff] %v4563_v20  ;;  %2037 = vst.msk [vmem:[%s5294_s3 + $0x1ec] sm:$0xf] %vm1913_vm1, %v4549_v41  ;;  %v3280_v5 = vpop.f32.mrb[62].mxu1  ;;  %v950_v17 = vadd.f32 %v4333_v0, %v3184_v39 }
 0x181   :  { %1972 = vst.msk [vmem:[%s5294_s3 + $0xe8] sm:$0xf] %vm1913_vm1, %v4561_v46  ;;  %2036 = vst.msk [vmem:[%s5294_s3 + $0x1e8] sm:$0xf] %vm1913_vm1, %v4563_v20  ;;  %v2049_v1 = vpop.permute.xlu1 %2048  ;;  %v2043_v14 = vpop.permute.xlu0 %2042  ;;  %v4591_v48 = vpack.c.bf16 %v1334_v36, %v1334_v36  ;;  %v1333_v28 = vmax.f32 %v935_v21, 0.0  ;;  %v4593_v7 = vpack.c.bf16 %v1398_v37, %v1398_v37  ;;  %v1397_v6 = vmax.f32 %v1255_v24, 0.0 }
 0x182   :  { %2429 = vst.msk [vmem:[%s5295_s4 + $0xc] sm:$0xf] %vm1913_vm1, %v2049_v1  ;;  %2426 = vst.msk [vmem:[%s5295_s4] sm:$0xf] %vm1913_vm1, %v2043_v14  ;;  %v944_v20 = vpop.f32.mrb[63].mxu0  ;;  %v1270_v36 = vadd.f32 %v4333_v0, %v3280_v5  ;;  %v1264_v41 = vpop.f32.mrb[63].mxu1  ;;  %2102 = vrot.lane.b32.xlu0 %v4044_v60, %s3351_s15 }
 0x183   :  { %2104 = vrot.lane.b32.xlu1 %v4038_v49, %s3351_s15  ;;  %1975 = vst.msk [vmem:[%s5294_s3 + $0xf4] sm:$0xf] %vm1913_vm1, %v4591_v48  ;;  %v4614_v21 = vpack.c.bf16 %v1333_v28, %v1333_v28  ;;  %2039 = vst.msk [vmem:[%s5294_s3 + $0x1f4] sm:$0xf] %vm1913_vm1, %v4593_v7  ;;  %v4621_v37 = vpack.c.bf16 %v1397_v6, %v1397_v6  ;;  %v945_v49 = vadd.f32 %v4333_v0, %v944_v20 }
 0x184   :  { %v1336_v24 = vmax.f32 %v950_v17, 0.0  ;;  %v1400_v60 = vmax.f32 %v1270_v36, 0.0  ;;  %v1265_v39 = vadd.f32 %v4333_v0, %v1264_v41 }
 0x185   :  { %v2177_v5 = vpop.permute.xlu1 %2176  ;;  %v2171_v1 = vpop.permute.xlu0 %2170  ;;  %1974 = vst.msk [vmem:[%s5294_s3 + $0xf0] sm:$0xf] %vm1913_vm1, %v4614_v21  ;;  %2038 = vst.msk [vmem:[%s5294_s3 + $0x1f0] sm:$0xf] %vm1913_vm1, %v4621_v37  ;;  %v1335_v14 = vmax.f32 %v945_v49, 0.0  ;;  %v5320_v49 = vld [vmem:[#allocation8_spill] sm:$0xff] }
 0x186   :  { %2493 = vst.msk [vmem:[%s5295_s4 + $0x10c] sm:$0xf] %vm1913_vm1, %v2177_v5  ;;  %2490 = vst.msk [vmem:[%s5295_s4 + $0x100] sm:$0xf] %vm1913_vm1, %v2171_v1  ;;  %v4643_v0 = vpack.c.bf16 %v1336_v24, %v1336_v24  ;;  %v4645_v41 = vpack.c.bf16 %v1400_v60, %v1400_v60  ;;  %v1399_v20 = vmax.f32 %v1265_v39, 0.0  ;;  %2230 = vrot.lane.b32.xlu0 %v4046_v29, %s3351_s15  ;;  %v5322_v5 = vld [vmem:[#allocation10_spill] sm:$0xff] }
 0x187   :  { %2232 = vrot.lane.b32.xlu1 %v4040_v56, %s3351_s15  ;;  %v4651_v28 = vpack.c.bf16 %v1335_v14, %v1335_v14 }
 0x188   :  { %1977 = vst.msk [vmem:[%s5294_s3 + $0xfc] sm:$0xf] %vm1913_vm1, %v4643_v0  ;;  %2041 = vst.msk [vmem:[%s5294_s3 + $0x1fc] sm:$0xf] %vm1913_vm1, %v4645_v41  ;;  %v4663_v6 = vpack.c.bf16 %v1399_v20, %v1399_v20 }
 0x189   :  { %v2047_v56 = vpop.permute.xlu1 %2046  ;;  %v2175_v17 = vpop.permute.xlu0 %2174  ;;  %1976 = vst.msk [vmem:[%s5294_s3 + $0xf8] sm:$0xf] %vm1913_vm1, %v4651_v28 }
 0x18a   :  { %2428 = vst.msk [vmem:[%s5295_s4 + $0x8] sm:$0xf] %vm1913_vm1, %v2047_v56  ;;  %2492 = vst.msk [vmem:[%s5295_s4 + $0x108] sm:$0xf] %vm1913_vm1, %v2175_v17  ;;  %2106 = vrot.lane.b32.xlu0 %v4080_v13, %s3351_s15  ;;  %v5324_v56 = vld [vmem:[#allocation12_spill] sm:$0xff] }
 0x18b   :  { %2040 = vst.msk [vmem:[%s5294_s3 + $0x1f8] sm:$0xf] %vm1913_vm1, %v4663_v6  ;;  %2108 = vrot.lane.b32.xlu1 %v4074_v38, %s3351_s15 }
 0x18d   :  { %v2053_v29 = vpop.permute.xlu1 %2052  ;;  %v2051_v36 = vpop.permute.xlu0 %2050 }
 0x18e   :  { %2431 = vst.msk [vmem:[%s5295_s4 + $0x14] sm:$0xf] %vm1913_vm1, %v2053_v29  ;;  %2430 = vst.msk [vmem:[%s5295_s4 + $0x10] sm:$0xf] %vm1913_vm1, %v2051_v36  ;;  %2234 = vrot.lane.b32.xlu0 %v4082_v27, %s3351_s15 }
 0x18f   :  { %2236 = vrot.lane.b32.xlu1 %v4076_v44, %s3351_s15 }
 0x191   :  { %v2181_v38 = vpop.permute.xlu1 %2180  ;;  %v2179_v13 = vpop.permute.xlu0 %2178 }
 0x192   :  { %2495 = vst.msk [vmem:[%s5295_s4 + $0x114] sm:$0xf] %vm1913_vm1, %v2181_v38  ;;  %2494 = vst.msk [vmem:[%s5295_s4 + $0x110] sm:$0xf] %vm1913_vm1, %v2179_v13  ;;  %2110 = vrot.lane.b32.xlu0 %v4116_v58, %s3351_s15  ;;  %v5326_v38 = vld [vmem:[#allocation14_spill] sm:$0xff] }
 0x193   :  { %2112 = vrot.lane.b32.xlu1 %v4110_v42, %s3351_s15 }
 0x195   :  { %v2057_v44 = vpop.permute.xlu1 %2056  ;;  %v2055_v27 = vpop.permute.xlu0 %2054 }
 0x196   :  { %2433 = vst.msk [vmem:[%s5295_s4 + $0x1c] sm:$0xf] %vm1913_vm1, %v2057_v44  ;;  %2432 = vst.msk [vmem:[%s5295_s4 + $0x18] sm:$0xf] %vm1913_vm1, %v2055_v27  ;;  %2238 = vrot.lane.b32.xlu0 %v4118_v23, %s3351_s15 }
 0x197   :  { %2240 = vrot.lane.b32.xlu1 %v4112_v8, %s3351_s15 }
 0x199   :  { %v2185_v42 = vpop.permute.xlu1 %2184  ;;  %v2183_v58 = vpop.permute.xlu0 %2182 }
 0x19a   :  { %2497 = vst.msk [vmem:[%s5295_s4 + $0x11c] sm:$0xf] %vm1913_vm1, %v2185_v42  ;;  %2496 = vst.msk [vmem:[%s5295_s4 + $0x118] sm:$0xf] %vm1913_vm1, %v2183_v58  ;;  %2114 = vrot.lane.b32.xlu0 %v4152_v19, %s3351_s15  ;;  %v5328_v42 = vld [vmem:[#allocation16_spill] sm:$0xff] }
 0x19b   :  { %2116 = vrot.lane.b32.xlu1 %v4146_v16, %s3351_s15 }
 0x19d   :  { %v2061_v8 = vpop.permute.xlu1 %2060  ;;  %v2059_v23 = vpop.permute.xlu0 %2058 }
 0x19e   :  { %2435 = vst.msk [vmem:[%s5295_s4 + $0x24] sm:$0xf] %vm1913_vm1, %v2061_v8  ;;  %2434 = vst.msk [vmem:[%s5295_s4 + $0x20] sm:$0xf] %vm1913_vm1, %v2059_v23  ;;  %2242 = vrot.lane.b32.xlu0 %v4154_v32, %s3351_s15 }
 0x19f   :  { %2244 = vrot.lane.b32.xlu1 %v4148_v11, %s3351_s15 }
 0x1a1   :  { %v2189_v16 = vpop.permute.xlu1 %2188  ;;  %v2187_v19 = vpop.permute.xlu0 %2186 }
 0x1a2   :  { %2499 = vst.msk [vmem:[%s5295_s4 + $0x124] sm:$0xf] %vm1913_vm1, %v2189_v16  ;;  %2498 = vst.msk [vmem:[%s5295_s4 + $0x120] sm:$0xf] %vm1913_vm1, %v2187_v19  ;;  %2118 = vrot.lane.b32.xlu0 %v4188_v59, %s3351_s15  ;;  %v5330_v16 = vld [vmem:[#allocation18_spill] sm:$0xff] }
 0x1a3   :  { %2120 = vrot.lane.b32.xlu1 %v4182_v22, %s3351_s15 }
 0x1a5   :  { %v2065_v11 = vpop.permute.xlu1 %2064  ;;  %v2063_v32 = vpop.permute.xlu0 %2062 }
 0x1a6   :  { %2437 = vst.msk [vmem:[%s5295_s4 + $0x2c] sm:$0xf] %vm1913_vm1, %v2065_v11  ;;  %2436 = vst.msk [vmem:[%s5295_s4 + $0x28] sm:$0xf] %vm1913_vm1, %v2063_v32  ;;  %2246 = vrot.lane.b32.xlu0 %v4190_v2, %s3351_s15 }
 0x1a7   :  { %2248 = vrot.lane.b32.xlu1 %v4184_v15, %s3351_s15 }
 0x1a9   :  { %v2193_v22 = vpop.permute.xlu1 %2192  ;;  %v2191_v59 = vpop.permute.xlu0 %2190 }
 0x1aa   :  { %2501 = vst.msk [vmem:[%s5295_s4 + $0x12c] sm:$0xf] %vm1913_vm1, %v2193_v22  ;;  %2500 = vst.msk [vmem:[%s5295_s4 + $0x128] sm:$0xf] %vm1913_vm1, %v2191_v59  ;;  %2122 = vrot.lane.b32.xlu0 %v4224_v25, %s3351_s15 }
 0x1ab   :  { %2124 = vrot.lane.b32.xlu1 %v4218_v18, %s3351_s15 }
 0x1ad   :  { %v2069_v15 = vpop.permute.xlu1 %2068  ;;  %v2067_v2 = vpop.permute.xlu0 %2066 }
 0x1ae   :  { %2439 = vst.msk [vmem:[%s5295_s4 + $0x34] sm:$0xf] %vm1913_vm1, %v2069_v15  ;;  %2438 = vst.msk [vmem:[%s5295_s4 + $0x30] sm:$0xf] %vm1913_vm1, %v2067_v2  ;;  %2250 = vrot.lane.b32.xlu0 %v4226_v43, %s3351_s15 }
 0x1af   :  { %2252 = vrot.lane.b32.xlu1 %v4220_v55, %s3351_s15 }
 0x1b1   :  { %v2197_v18 = vpop.permute.xlu1 %2196  ;;  %v2195_v25 = vpop.permute.xlu0 %2194 }
 0x1b2   :  { %2503 = vst.msk [vmem:[%s5295_s4 + $0x134] sm:$0xf] %vm1913_vm1, %v2197_v18  ;;  %2502 = vst.msk [vmem:[%s5295_s4 + $0x130] sm:$0xf] %vm1913_vm1, %v2195_v25  ;;  %2126 = vrot.lane.b32.xlu0 %v4260_v52, %s3351_s15 }
 0x1b3   :  { %2128 = vrot.lane.b32.xlu1 %v4254_v54, %s3351_s15 }
 0x1b5   :  { %v2073_v55 = vpop.permute.xlu1 %2072  ;;  %v2071_v43 = vpop.permute.xlu0 %2070 }
 0x1b6   :  { %2441 = vst.msk [vmem:[%s5295_s4 + $0x3c] sm:$0xf] %vm1913_vm1, %v2073_v55  ;;  %2440 = vst.msk [vmem:[%s5295_s4 + $0x38] sm:$0xf] %vm1913_vm1, %v2071_v43  ;;  %2254 = vrot.lane.b32.xlu0 %v4262_v9, %s3351_s15 }
 0x1b7   :  { %2256 = vrot.lane.b32.xlu1 %v4256_v3, %s3351_s15 }
 0x1b9   :  { %v2201_v54 = vpop.permute.xlu1 %2200  ;;  %v2199_v52 = vpop.permute.xlu0 %2198 }
 0x1ba   :  { %2505 = vst.msk [vmem:[%s5295_s4 + $0x13c] sm:$0xf] %vm1913_vm1, %v2201_v54  ;;  %2504 = vst.msk [vmem:[%s5295_s4 + $0x138] sm:$0xf] %vm1913_vm1, %v2199_v52  ;;  %2130 = vrot.lane.b32.xlu0 %v4296_v57, %s3351_s15 }
 0x1bb   :  { %2132 = vrot.lane.b32.xlu1 %v4290_v33, %s3351_s15 }
 0x1bd   :  { %v2077_v3 = vpop.permute.xlu1 %2076  ;;  %v2075_v9 = vpop.permute.xlu0 %2074 }
 0x1be   :  { %2443 = vst.msk [vmem:[%s5295_s4 + $0x44] sm:$0xf] %vm1913_vm1, %v2077_v3  ;;  %2442 = vst.msk [vmem:[%s5295_s4 + $0x40] sm:$0xf] %vm1913_vm1, %v2075_v9  ;;  %2258 = vrot.lane.b32.xlu0 %v4298_v26, %s3351_s15 }
 0x1bf   :  { %2260 = vrot.lane.b32.xlu1 %v4292_v40, %s3351_s15 }
 0x1c1   :  { %v2205_v33 = vpop.permute.xlu1 %2204  ;;  %v2203_v57 = vpop.permute.xlu0 %2202 }
 0x1c2   :  { %2507 = vst.msk [vmem:[%s5295_s4 + $0x144] sm:$0xf] %vm1913_vm1, %v2205_v33  ;;  %2506 = vst.msk [vmem:[%s5295_s4 + $0x140] sm:$0xf] %vm1913_vm1, %v2203_v57  ;;  %2134 = vrot.lane.b32.xlu0 %v4337_v63, %s3351_s15 }
 0x1c3   :  { %2136 = vrot.lane.b32.xlu1 %v4326_v35, %s3351_s15  ;;  %v5321_v35 = vld [vmem:[#allocation9_spill] sm:$0xff] }
 0x1c5   :  { %v2081_v40 = vpop.permute.xlu1 %2080  ;;  %v2079_v26 = vpop.permute.xlu0 %2078 }
 0x1c6   :  { %2445 = vst.msk [vmem:[%s5295_s4 + $0x4c] sm:$0xf] %vm1913_vm1, %v2081_v40  ;;  %2444 = vst.msk [vmem:[%s5295_s4 + $0x48] sm:$0xf] %vm1913_vm1, %v2079_v26  ;;  %2262 = vrot.lane.b32.xlu0 %v5321_v35, %s3351_s15 }
 0x1c7   :  { %2264 = vrot.lane.b32.xlu1 %v5320_v49, %s3351_s15 }
 0x1c9   :  { %v2209_v24 = vpop.permute.xlu1 %2208  ;;  %v2207_v63 = vpop.permute.xlu0 %2206 }
 0x1ca   :  { %2509 = vst.msk [vmem:[%s5295_s4 + $0x14c] sm:$0xf] %vm1913_vm1, %v2209_v24  ;;  %2508 = vst.msk [vmem:[%s5295_s4 + $0x148] sm:$0xf] %vm1913_vm1, %v2207_v63  ;;  %2138 = vrot.lane.b32.xlu0 %v4373_v47, %s3351_s15 }
 0x1cb   :  { %2140 = vrot.lane.b32.xlu1 %v4367_v30, %s3351_s15  ;;  %v5323_v30 = vld [vmem:[#allocation11_spill] sm:$0xff] }
 0x1cd   :  { %v2085_v60 = vpop.permute.xlu1 %2084  ;;  %v2083_v39 = vpop.permute.xlu0 %2082 }
 0x1ce   :  { %2447 = vst.msk [vmem:[%s5295_s4 + $0x54] sm:$0xf] %vm1913_vm1, %v2085_v60  ;;  %2446 = vst.msk [vmem:[%s5295_s4 + $0x50] sm:$0xf] %vm1913_vm1, %v2083_v39  ;;  %2266 = vrot.lane.b32.xlu0 %v5323_v30, %s3351_s15 }
 0x1cf   :  { %2268 = vrot.lane.b32.xlu1 %v5322_v5, %s3351_s15 }
 0x1d1   :  { %v2213_v1 = vpop.permute.xlu1 %2212  ;;  %v2211_v47 = vpop.permute.xlu0 %2210 }
 0x1d2   :  { %2511 = vst.msk [vmem:[%s5295_s4 + $0x154] sm:$0xf] %vm1913_vm1, %v2213_v1  ;;  %2510 = vst.msk [vmem:[%s5295_s4 + $0x150] sm:$0xf] %vm1913_vm1, %v2211_v47  ;;  %2142 = vrot.lane.b32.xlu0 %v4409_v51, %s3351_s15 }
 0x1d3   :  { %2144 = vrot.lane.b32.xlu1 %v4403_v31, %s3351_s15  ;;  %v5325_v31 = vld [vmem:[#allocation13_spill] sm:$0xff] }
 0x1d5   :  { %v2089_v14 = vpop.permute.xlu1 %2088  ;;  %v2087_v20 = vpop.permute.xlu0 %2086 }
 0x1d6   :  { %2449 = vst.msk [vmem:[%s5295_s4 + $0x5c] sm:$0xf] %vm1913_vm1, %v2089_v14  ;;  %2448 = vst.msk [vmem:[%s5295_s4 + $0x58] sm:$0xf] %vm1913_vm1, %v2087_v20  ;;  %2270 = vrot.lane.b32.xlu0 %v5325_v31, %s3351_s15 }
 0x1d7   :  { %2272 = vrot.lane.b32.xlu1 %v5324_v56, %s3351_s15 }
 0x1d9   :  { %v2217_v17 = vpop.permute.xlu1 %2216  ;;  %v2215_v51 = vpop.permute.xlu0 %2214 }
 0x1da   :  { %2513 = vst.msk [vmem:[%s5295_s4 + $0x15c] sm:$0xf] %vm1913_vm1, %v2217_v17  ;;  %2512 = vst.msk [vmem:[%s5295_s4 + $0x158] sm:$0xf] %vm1913_vm1, %v2215_v51  ;;  %2146 = vrot.lane.b32.xlu0 %v4445_v45, %s3351_s15 }
 0x1db   :  { %2148 = vrot.lane.b32.xlu1 %v4439_v50, %s3351_s15  ;;  %v5327_v50 = vld [vmem:[#allocation15_spill] sm:$0xff] }
 0x1dd   :  { %v2093_v29 = vpop.permute.xlu1 %2092  ;;  %v2091_v36 = vpop.permute.xlu0 %2090 }
 0x1de   :  { %2451 = vst.msk [vmem:[%s5295_s4 + $0x64] sm:$0xf] %vm1913_vm1, %v2093_v29  ;;  %2450 = vst.msk [vmem:[%s5295_s4 + $0x60] sm:$0xf] %vm1913_vm1, %v2091_v36  ;;  %2274 = vrot.lane.b32.xlu0 %v5327_v50, %s3351_s15 }
 0x1df   :  { %2276 = vrot.lane.b32.xlu1 %v5326_v38, %s3351_s15 }
 0x1e1   :  { %v2221_v13 = vpop.permute.xlu1 %2220  ;;  %v2219_v45 = vpop.permute.xlu0 %2218 }
 0x1e2   :  { %2515 = vst.msk [vmem:[%s5295_s4 + $0x164] sm:$0xf] %vm1913_vm1, %v2221_v13  ;;  %2514 = vst.msk [vmem:[%s5295_s4 + $0x160] sm:$0xf] %vm1913_vm1, %v2219_v45  ;;  %2150 = vrot.lane.b32.xlu0 %v4481_v10, %s3351_s15 }
 0x1e3   :  { %2152 = vrot.lane.b32.xlu1 %v4475_v53, %s3351_s15  ;;  %v5329_v53 = vld [vmem:[#allocation17_spill] sm:$0xff] }
 0x1e5   :  { %v2097_v44 = vpop.permute.xlu1 %2096  ;;  %v2095_v27 = vpop.permute.xlu0 %2094 }
 0x1e6   :  { %2453 = vst.msk [vmem:[%s5295_s4 + $0x6c] sm:$0xf] %vm1913_vm1, %v2097_v44  ;;  %2452 = vst.msk [vmem:[%s5295_s4 + $0x68] sm:$0xf] %vm1913_vm1, %v2095_v27  ;;  %2278 = vrot.lane.b32.xlu0 %v5329_v53, %s3351_s15 }
 0x1e7   :  { %2280 = vrot.lane.b32.xlu1 %v5328_v42, %s3351_s15 }
 0x1e9   :  { %v2225_v58 = vpop.permute.xlu1 %2224  ;;  %v2223_v10 = vpop.permute.xlu0 %2222 }
 0x1ea   :  { %2517 = vst.msk [vmem:[%s5295_s4 + $0x16c] sm:$0xf] %vm1913_vm1, %v2225_v58  ;;  %2516 = vst.msk [vmem:[%s5295_s4 + $0x168] sm:$0xf] %vm1913_vm1, %v2223_v10  ;;  %2154 = vrot.lane.b32.xlu0 %v4517_v61, %s3351_s15 }
 0x1eb   :  { %2156 = vrot.lane.b32.xlu1 %v4511_v12, %s3351_s15 }
 0x1ed   :  { %v2101_v8 = vpop.permute.xlu1 %2100  ;;  %v2099_v23 = vpop.permute.xlu0 %2098 }
 0x1ee   :  { %2455 = vst.msk [vmem:[%s5295_s4 + $0x74] sm:$0xf] %vm1913_vm1, %v2101_v8  ;;  %2454 = vst.msk [vmem:[%s5295_s4 + $0x70] sm:$0xf] %vm1913_vm1, %v2099_v23  ;;  %2282 = vrot.lane.b32.xlu0 %v4519_v4, %s3351_s15 }
 0x1ef   :  { %2284 = vrot.lane.b32.xlu1 %v4513_v34, %s3351_s15 }
 0x1f1   :  { %v2229_v12 = vpop.permute.xlu1 %2228  ;;  %v2227_v61 = vpop.permute.xlu0 %2226 }
 0x1f2   :  { %2519 = vst.msk [vmem:[%s5295_s4 + $0x174] sm:$0xf] %vm1913_vm1, %v2229_v12  ;;  %2518 = vst.msk [vmem:[%s5295_s4 + $0x170] sm:$0xf] %vm1913_vm1, %v2227_v61  ;;  %2158 = vrot.lane.b32.xlu0 %v4561_v46, %s3351_s15 }
 0x1f3   :  { %2160 = vrot.lane.b32.xlu1 %v4547_v62, %s3351_s15  ;;  %v5331_v62 = vld [vmem:[#allocation19_spill] sm:$0xff] }
 0x1f5   :  { %v2105_v34 = vpop.permute.xlu1 %2104  ;;  %v2103_v4 = vpop.permute.xlu0 %2102 }
 0x1f6   :  { %2457 = vst.msk [vmem:[%s5295_s4 + $0x7c] sm:$0xf] %vm1913_vm1, %v2105_v34  ;;  %2456 = vst.msk [vmem:[%s5295_s4 + $0x78] sm:$0xf] %vm1913_vm1, %v2103_v4  ;;  %2286 = vrot.lane.b32.xlu0 %v5331_v62, %s3351_s15 }
 0x1f7   :  { %2288 = vrot.lane.b32.xlu1 %v5330_v16, %s3351_s15 }
 0x1f9   :  { %v2233_v19 = vpop.permute.xlu1 %2232  ;;  %v2231_v46 = vpop.permute.xlu0 %2230 }
 0x1fa   :  { %2521 = vst.msk [vmem:[%s5295_s4 + $0x17c] sm:$0xf] %vm1913_vm1, %v2233_v19  ;;  %2520 = vst.msk [vmem:[%s5295_s4 + $0x178] sm:$0xf] %vm1913_vm1, %v2231_v46  ;;  %2162 = vrot.lane.b32.xlu0 %v4614_v21, %s3351_s15 }
 0x1fb   :  { %2164 = vrot.lane.b32.xlu1 %v4591_v48, %s3351_s15 }
 0x1fd   :  { %v2109_v11 = vpop.permute.xlu1 %2108  ;;  %v2107_v32 = vpop.permute.xlu0 %2106 }
 0x1fe   :  { %2459 = vst.msk [vmem:[%s5295_s4 + $0x84] sm:$0xf] %vm1913_vm1, %v2109_v11  ;;  %2458 = vst.msk [vmem:[%s5295_s4 + $0x80] sm:$0xf] %vm1913_vm1, %v2107_v32  ;;  %2290 = vrot.lane.b32.xlu0 %v4621_v37, %s3351_s15 }
 0x1ff   :  { %2292 = vrot.lane.b32.xlu1 %v4593_v7, %s3351_s15 }
 0x201   :  { %v2237_v48 = vpop.permute.xlu1 %2236  ;;  %v2235_v21 = vpop.permute.xlu0 %2234 }
 0x202   :  { %2523 = vst.msk [vmem:[%s5295_s4 + $0x184] sm:$0xf] %vm1913_vm1, %v2237_v48  ;;  %2522 = vst.msk [vmem:[%s5295_s4 + $0x180] sm:$0xf] %vm1913_vm1, %v2235_v21  ;;  %2166 = vrot.lane.b32.xlu0 %v4651_v28, %s3351_s15 }
 0x203   :  { %2168 = vrot.lane.b32.xlu1 %v4643_v0, %s3351_s15 }
 0x205   :  { %v2113_v7 = vpop.permute.xlu1 %2112  ;;  %v2111_v37 = vpop.permute.xlu0 %2110 }
 0x206   :  { %2461 = vst.msk [vmem:[%s5295_s4 + $0x8c] sm:$0xf] %vm1913_vm1, %v2113_v7  ;;  %2460 = vst.msk [vmem:[%s5295_s4 + $0x88] sm:$0xf] %vm1913_vm1, %v2111_v37  ;;  %2294 = vrot.lane.b32.xlu0 %v4663_v6, %s3351_s15 }
 0x207   :  { %2296 = vrot.lane.b32.xlu1 %v4645_v41, %s3351_s15 }
 0x209   :  { %v2241_v0 = vpop.permute.xlu1 %2240  ;;  %v2239_v28 = vpop.permute.xlu0 %2238 }
 0x20a   :  { %2525 = vst.msk [vmem:[%s5295_s4 + $0x18c] sm:$0xf] %vm1913_vm1, %v2241_v0  ;;  %2524 = vst.msk [vmem:[%s5295_s4 + $0x188] sm:$0xf] %vm1913_vm1, %v2239_v28 }
 0x20d   :  { %v2117_v22 = vpop.permute.xlu1 %2116  ;;  %v2115_v59 = vpop.permute.xlu0 %2114 }
 0x20e   :  { %2463 = vst.msk [vmem:[%s5295_s4 + $0x94] sm:$0xf] %vm1913_vm1, %v2117_v22  ;;  %2462 = vst.msk [vmem:[%s5295_s4 + $0x90] sm:$0xf] %vm1913_vm1, %v2115_v59 }
 0x211   :  { %v2245_v41 = vpop.permute.xlu1 %2244  ;;  %v2243_v6 = vpop.permute.xlu0 %2242 }
 0x212   :  { %2527 = vst.msk [vmem:[%s5295_s4 + $0x194] sm:$0xf] %vm1913_vm1, %v2245_v41  ;;  %2526 = vst.msk [vmem:[%s5295_s4 + $0x190] sm:$0xf] %vm1913_vm1, %v2243_v6 }
 0x215   :  { %v2121_v15 = vpop.permute.xlu1 %2120  ;;  %v2119_v2 = vpop.permute.xlu0 %2118 }
 0x216   :  { %2465 = vst.msk [vmem:[%s5295_s4 + $0x9c] sm:$0xf] %vm1913_vm1, %v2121_v15  ;;  %2464 = vst.msk [vmem:[%s5295_s4 + $0x98] sm:$0xf] %vm1913_vm1, %v2119_v2 }
 0x219   :  { %v2249_v18 = vpop.permute.xlu1 %2248  ;;  %v2247_v25 = vpop.permute.xlu0 %2246 }
 0x21a   :  { %2529 = vst.msk [vmem:[%s5295_s4 + $0x19c] sm:$0xf] %vm1913_vm1, %v2249_v18  ;;  %2528 = vst.msk [vmem:[%s5295_s4 + $0x198] sm:$0xf] %vm1913_vm1, %v2247_v25 }
 0x21d   :  { %v2125_v55 = vpop.permute.xlu1 %2124  ;;  %v2123_v43 = vpop.permute.xlu0 %2122 }
 0x21e   :  { %2467 = vst.msk [vmem:[%s5295_s4 + $0xa4] sm:$0xf] %vm1913_vm1, %v2125_v55  ;;  %2466 = vst.msk [vmem:[%s5295_s4 + $0xa0] sm:$0xf] %vm1913_vm1, %v2123_v43 }
 0x221   :  { %v2253_v54 = vpop.permute.xlu1 %2252  ;;  %v2251_v52 = vpop.permute.xlu0 %2250 }
 0x222   :  { %2531 = vst.msk [vmem:[%s5295_s4 + $0x1a4] sm:$0xf] %vm1913_vm1, %v2253_v54  ;;  %2530 = vst.msk [vmem:[%s5295_s4 + $0x1a0] sm:$0xf] %vm1913_vm1, %v2251_v52 }
 0x225   :  { %v2129_v3 = vpop.permute.xlu1 %2128  ;;  %v2127_v9 = vpop.permute.xlu0 %2126 }
 0x226   :  { %2469 = vst.msk [vmem:[%s5295_s4 + $0xac] sm:$0xf] %vm1913_vm1, %v2129_v3  ;;  %2468 = vst.msk [vmem:[%s5295_s4 + $0xa8] sm:$0xf] %vm1913_vm1, %v2127_v9 }
 0x229   :  { %v2257_v33 = vpop.permute.xlu1 %2256  ;;  %v2255_v57 = vpop.permute.xlu0 %2254 }
 0x22a   :  { %2533 = vst.msk [vmem:[%s5295_s4 + $0x1ac] sm:$0xf] %vm1913_vm1, %v2257_v33  ;;  %2532 = vst.msk [vmem:[%s5295_s4 + $0x1a8] sm:$0xf] %vm1913_vm1, %v2255_v57 }
 0x22d   :  { %v2133_v40 = vpop.permute.xlu1 %2132  ;;  %v2131_v26 = vpop.permute.xlu0 %2130 }
 0x22e   :  { %2471 = vst.msk [vmem:[%s5295_s4 + $0xb4] sm:$0xf] %vm1913_vm1, %v2133_v40  ;;  %2470 = vst.msk [vmem:[%s5295_s4 + $0xb0] sm:$0xf] %vm1913_vm1, %v2131_v26 }
 0x231   :  { %v2261_v49 = vpop.permute.xlu1 %2260  ;;  %v2259_v35 = vpop.permute.xlu0 %2258 }
 0x232   :  { %2535 = vst.msk [vmem:[%s5295_s4 + $0x1b4] sm:$0xf] %vm1913_vm1, %v2261_v49  ;;  %2534 = vst.msk [vmem:[%s5295_s4 + $0x1b0] sm:$0xf] %vm1913_vm1, %v2259_v35 }
 0x235   :  { %v2137_v24 = vpop.permute.xlu1 %2136  ;;  %v2135_v63 = vpop.permute.xlu0 %2134 }
 0x236   :  { %2473 = vst.msk [vmem:[%s5295_s4 + $0xbc] sm:$0xf] %vm1913_vm1, %v2137_v24  ;;  %2472 = vst.msk [vmem:[%s5295_s4 + $0xb8] sm:$0xf] %vm1913_vm1, %v2135_v63 }
 0x239   :  { %v2265_v60 = vpop.permute.xlu1 %2264  ;;  %v2263_v39 = vpop.permute.xlu0 %2262 }
 0x23a   :  { %2537 = vst.msk [vmem:[%s5295_s4 + $0x1bc] sm:$0xf] %vm1913_vm1, %v2265_v60  ;;  %2536 = vst.msk [vmem:[%s5295_s4 + $0x1b8] sm:$0xf] %vm1913_vm1, %v2263_v39 }
 0x23d   :  { %v2141_v5 = vpop.permute.xlu1 %2140  ;;  %v2139_v30 = vpop.permute.xlu0 %2138 }
 0x23e   :  { %2475 = vst.msk [vmem:[%s5295_s4 + $0xc4] sm:$0xf] %vm1913_vm1, %v2141_v5  ;;  %2474 = vst.msk [vmem:[%s5295_s4 + $0xc0] sm:$0xf] %vm1913_vm1, %v2139_v30 }
 0x241   :  { %v2269_v1 = vpop.permute.xlu1 %2268  ;;  %v2267_v47 = vpop.permute.xlu0 %2266 }
 0x242   :  { %2539 = vst.msk [vmem:[%s5295_s4 + $0x1c4] sm:$0xf] %vm1913_vm1, %v2269_v1  ;;  %2538 = vst.msk [vmem:[%s5295_s4 + $0x1c0] sm:$0xf] %vm1913_vm1, %v2267_v47 }
 0x245   :  { %v2145_v14 = vpop.permute.xlu1 %2144  ;;  %v2143_v20 = vpop.permute.xlu0 %2142 }
 0x246   :  { %2477 = vst.msk [vmem:[%s5295_s4 + $0xcc] sm:$0xf] %vm1913_vm1, %v2145_v14  ;;  %2476 = vst.msk [vmem:[%s5295_s4 + $0xc8] sm:$0xf] %vm1913_vm1, %v2143_v20 }
 0x249   :  { %v2273_v56 = vpop.permute.xlu1 %2272  ;;  %v2271_v31 = vpop.permute.xlu0 %2270 }
 0x24a   :  { %2541 = vst.msk [vmem:[%s5295_s4 + $0x1cc] sm:$0xf] %vm1913_vm1, %v2273_v56  ;;  %2540 = vst.msk [vmem:[%s5295_s4 + $0x1c8] sm:$0xf] %vm1913_vm1, %v2271_v31 }
 0x24d   :  { %v2149_v17 = vpop.permute.xlu1 %2148  ;;  %v2147_v51 = vpop.permute.xlu0 %2146 }
 0x24e   :  { %2479 = vst.msk [vmem:[%s5295_s4 + $0xd4] sm:$0xf] %vm1913_vm1, %v2149_v17  ;;  %2478 = vst.msk [vmem:[%s5295_s4 + $0xd0] sm:$0xf] %vm1913_vm1, %v2147_v51 }
 0x251   :  { %v2277_v29 = vpop.permute.xlu1 %2276  ;;  %v2275_v36 = vpop.permute.xlu0 %2274 }
 0x252   :  { %2543 = vst.msk [vmem:[%s5295_s4 + $0x1d4] sm:$0xf] %vm1913_vm1, %v2277_v29  ;;  %2542 = vst.msk [vmem:[%s5295_s4 + $0x1d0] sm:$0xf] %vm1913_vm1, %v2275_v36 }
 0x255   :  { %v2153_v38 = vpop.permute.xlu1 %2152  ;;  %v2151_v50 = vpop.permute.xlu0 %2150 }
 0x256   :  { %2481 = vst.msk [vmem:[%s5295_s4 + $0xdc] sm:$0xf] %vm1913_vm1, %v2153_v38  ;;  %2480 = vst.msk [vmem:[%s5295_s4 + $0xd8] sm:$0xf] %vm1913_vm1, %v2151_v50 }
 0x259   :  { %v2281_v13 = vpop.permute.xlu1 %2280  ;;  %v2279_v45 = vpop.permute.xlu0 %2278 }
 0x25a   :  { %2545 = vst.msk [vmem:[%s5295_s4 + $0x1dc] sm:$0xf] %vm1913_vm1, %v2281_v13  ;;  %2544 = vst.msk [vmem:[%s5295_s4 + $0x1d8] sm:$0xf] %vm1913_vm1, %v2279_v45 }
 0x25d   :  { %v2157_v44 = vpop.permute.xlu1 %2156  ;;  %v2155_v27 = vpop.permute.xlu0 %2154 }
 0x25e   :  { %2483 = vst.msk [vmem:[%s5295_s4 + $0xe4] sm:$0xf] %vm1913_vm1, %v2157_v44  ;;  %2482 = vst.msk [vmem:[%s5295_s4 + $0xe0] sm:$0xf] %vm1913_vm1, %v2155_v27 }
 0x261   :  { %v2285_v42 = vpop.permute.xlu1 %2284  ;;  %v2283_v53 = vpop.permute.xlu0 %2282 }
 0x262   :  { %2547 = vst.msk [vmem:[%s5295_s4 + $0x1e4] sm:$0xf] %vm1913_vm1, %v2285_v42  ;;  %2546 = vst.msk [vmem:[%s5295_s4 + $0x1e0] sm:$0xf] %vm1913_vm1, %v2283_v53 }
 0x265   :  { %v2161_v58 = vpop.permute.xlu1 %2160  ;;  %v2159_v10 = vpop.permute.xlu0 %2158 }
 0x266   :  { %2485 = vst.msk [vmem:[%s5295_s4 + $0xec] sm:$0xf] %vm1913_vm1, %v2161_v58  ;;  %2484 = vst.msk [vmem:[%s5295_s4 + $0xe8] sm:$0xf] %vm1913_vm1, %v2159_v10 }
 0x269   :  { %v2289_v8 = vpop.permute.xlu1 %2288  ;;  %v2287_v23 = vpop.permute.xlu0 %2286 }
 0x26a   :  { %2549 = vst.msk [vmem:[%s5295_s4 + $0x1ec] sm:$0xf] %vm1913_vm1, %v2289_v8  ;;  %2548 = vst.msk [vmem:[%s5295_s4 + $0x1e8] sm:$0xf] %vm1913_vm1, %v2287_v23 }
 0x26d   :  { %v2165_v12 = vpop.permute.xlu1 %2164  ;;  %v2163_v61 = vpop.permute.xlu0 %2162 }
 0x26e   :  { %2487 = vst.msk [vmem:[%s5295_s4 + $0xf4] sm:$0xf] %vm1913_vm1, %v2165_v12  ;;  %2486 = vst.msk [vmem:[%s5295_s4 + $0xf0] sm:$0xf] %vm1913_vm1, %v2163_v61 }
 0x271   :  { %v2293_v34 = vpop.permute.xlu1 %2292  ;;  %v2291_v4 = vpop.permute.xlu0 %2290 }
 0x272   :  { %2551 = vst.msk [vmem:[%s5295_s4 + $0x1f4] sm:$0xf] %vm1913_vm1, %v2293_v34  ;;  %2550 = vst.msk [vmem:[%s5295_s4 + $0x1f0] sm:$0xf] %vm1913_vm1, %v2291_v4 }
 0x275   :  { %v2169_v16 = vpop.permute.xlu1 %2168  ;;  %v2167_v62 = vpop.permute.xlu0 %2166 }
 0x276   :  { %2489 = vst.msk [vmem:[%s5295_s4 + $0xfc] sm:$0xf] %vm1913_vm1, %v2169_v16  ;;  %2488 = vst.msk [vmem:[%s5295_s4 + $0xf8] sm:$0xf] %vm1913_vm1, %v2167_v62 }
 0x279   :  { %v2297_v19 = vpop.permute.xlu1 %2296  ;;  %v2295_v46 = vpop.permute.xlu0 %2294 }
 0x27a   :  { %2553 = vst.msk [vmem:[%s5295_s4 + $0x1fc] sm:$0xf] %vm1913_vm1, %v2297_v19  ;;  %2552 = vst.msk [vmem:[%s5295_s4 + $0x1f8] sm:$0xf] %vm1913_vm1, %v2295_v46 }
 0x27b   :  { %2562 = vsyncpa [#allocation3], 1 }
 0x27c   :  { %2563 = vsyncpa [#allocation5], 1 }

// kernel: _lambda_.5
= control target key start
LH: loop header
LB: loop body
LE: loop exit
PB: predicated region body
PF: predicated region fallthrough
CT: control target
= control target key end

     0   :  { %vm552_vm0 = vcmask 523264   ;;  %s6426_s0 = inlined_call_operand.vmem [shape: bf16[1024,64], index: 0, kind: input, shape index: {}]   ;;  %s6427_s1 = inlined_call_operand.vmem [shape: bf16[1024,64], index: 1, kind: input, shape index: {}]   ;;  %s6428_s2 = inlined_call_operand.vmem [shape: f32[64,32], index: 2, kind: input, shape index: {}]   ;;  %s6429_s3 = inlined_call_operand.vmem [shape: f32[64,32], index: 3, kind: input, shape index: {}]   ;;  %s6430_s4 = inlined_call_operand.vmem [shape: f32[1,32], index: 4, kind: input, shape index: {}]   ;;  %s6431_s5 = inlined_call_operand.vmem [shape: f32[1024,32], index: 5, kind: input, shape index: {}]   ;;  %s6432_s6 = inlined_call_operand.hbm [shape: f32[1024,32], index: 6, kind: output, shape index: {}]  }
   0x1   :  { %v544_v0 = vld [vmem:[%s6429_s3] sm:$0xff]  ;;  %v545_v1 = vld [vmem:[%s6429_s3 + $0x8] sm:$0xff]  ;;  %v546_v5 = vld [vmem:[%s6429_s3 + $0x10] sm:$0xff] }
   0x2   :  { %v280_v2 = vld [vmem:[%s6428_s2] sm:$0xff]  ;;  %v4850_v3 = vpack.c.bf16 %v545_v1, %v544_v0  ;;  %v281_v4 = vld [vmem:[%s6428_s2 + $0x8] sm:$0xff]  ;;  %v547_v6 = vld [vmem:[%s6429_s3 + $0x18] sm:$0xff] }
   0x3   :  { %v4866_v7 = vpack.c.bf16 %v281_v4, %v280_v2  ;;  %v4854_v8 = vpack.c.bf16 %v547_v6, %v546_v5  ;;  %v282_v9 = vld [vmem:[%s6428_s2 + $0x10] sm:$0xff]  ;;  %v283_v10 = vld [vmem:[%s6428_s2 + $0x18] sm:$0xff]  ;;  %v548_v11 = vld [vmem:[%s6429_s3 + $0x20] sm:$0xff] }
   0x4   :  { %4851 = vmatprep.subr.bf16.mxu1 %v4850_v3  ;;  %v4870_v12 = vpack.c.bf16 %v283_v10, %v282_v9  ;;  %v549_v13 = vld [vmem:[%s6429_s3 + $0x28] sm:$0xff]  ;;  %v284_v14 = vld [vmem:[%s6428_s2 + $0x20] sm:$0xff]  ;;  %v550_v20 = vld [vmem:[%s6429_s3 + $0x30] sm:$0xff] }
   0x5   :  { %v285_v15 = vld [vmem:[%s6428_s2 + $0x28] sm:$0xff]  ;;  %4867 = vmatprep.subr.bf16.mxu0 %v4866_v7  ;;  %4853 = vmatpush3.bf16.msra.mxu1 %v4850_v3  ;;  %v4858_v16 = vpack.c.bf16 %v549_v13, %v548_v11  ;;  %v3781_v17 = vld [vmem:[%s6427_s1] sm:$0xff]   ;;  %v551_v21 = vld [vmem:[%s6429_s3 + $0x38] sm:$0xff] }
   0x6   :  { %4869 = vmatpush3.bf16.msra.mxu0 %v4866_v7  ;;  %4855 = vmatprep.subr.bf16.mxu1 %v4854_v8  ;;  %v3525_v18 = vld [vmem:[%s6426_s0] sm:$0xff]   ;;  %v4874_v19 = vpack.c.bf16 %v285_v15, %v284_v14  ;;  %v3782_v22 = vunpack.c.l.bf16 %v3781_v17  ;;  %v286_v24 = vld [vmem:[%s6428_s2 + $0x30] sm:$0xff]  ;;  %v287_v25 = vld [vmem:[%s6428_s2 + $0x38] sm:$0xff]  ;;  %v4862_v26 = vpack.c.bf16 %v551_v21, %v550_v20  ;;  %v3783_v30 = vunpack.c.h.bf16 %v3781_v17 }
   0x7   :  { %4871 = vmatprep.subr.bf16.mxu0 %v4870_v12  ;;  %v3526_v23 = vunpack.c.l.bf16 %v3525_v18  ;;  %v4878_v27 = vpack.c.bf16 %v287_v25, %v286_v24  ;;  %v4099_v28 = vld [vmem:[%s6427_s1 + $0x8] sm:$0xff]   ;;  %v3527_v31 = vunpack.c.h.bf16 %v3525_v18  ;;  %v4100_v34 = vld [vmem:[%s6427_s1 + $0x10] sm:$0xff]   ;;  %v4101_v40 = vld [vmem:[%s6427_s1 + $0x18] sm:$0xff]  }
   0x8   :  { %4450 = vmatprep.mubr.msk.f32.mxu1 %vm552_vm0, %v3782_v22  ;;  %v4036_v29 = vld [vmem:[%s6426_s0 + $0x8] sm:$0xff]   ;;  %v3786_v32 = vunpack.c.l.bf16 %v4099_v28  ;;  %v4037_v35 = vld [vmem:[%s6426_s0 + $0x10] sm:$0xff]   ;;  %v3787_v36 = vunpack.c.h.bf16 %v4099_v28  ;;  %v3790_v38 = vunpack.c.l.bf16 %v4100_v34  ;;  %v4038_v41 = vld [vmem:[%s6426_s0 + $0x18] sm:$0xff]   ;;  %v3791_v42 = vunpack.c.h.bf16 %v4100_v34 }
   0x9   :  { %4857 = vmatpush3.bf16.msra.mxu1 %v4854_v8  ;;  %4658 = vmatprep.mubr.msk.f32.mxu0 %vm552_vm0, %v3526_v23  ;;  %v3530_v33 = vunpack.c.l.bf16 %v4036_v29  ;;  %v3531_v37 = vunpack.c.h.bf16 %v4036_v29  ;;  %v3534_v39 = vunpack.c.l.bf16 %v4037_v35  ;;  %v3535_v43 = vunpack.c.h.bf16 %v4037_v35  ;;  %v4102_v46 = vld [vmem:[%s6427_s1 + $0x20] sm:$0xff]   ;;  %v4103_v52 = vld [vmem:[%s6427_s1 + $0x28] sm:$0xff]  }
   0xa   :  { %4873 = vmatpush3.bf16.msra.mxu0 %v4870_v12  ;;  %4859 = vmatprep.subr.bf16.mxu1 %v4858_v16  ;;  %v3794_v44 = vunpack.c.l.bf16 %v4101_v40  ;;  %v3538_v45 = vunpack.c.l.bf16 %v4038_v41  ;;  %v4039_v47 = vld [vmem:[%s6426_s0 + $0x20] sm:$0xff]   ;;  %v3795_v48 = vunpack.c.h.bf16 %v4101_v40  ;;  %v3539_v49 = vunpack.c.h.bf16 %v4038_v41 }
   0xb   :  { %4875 = vmatprep.subr.bf16.mxu0 %v4874_v19  ;;  %v3798_v50 = vunpack.c.l.bf16 %v4102_v46  ;;  %v3542_v51 = vunpack.c.l.bf16 %v4039_v47 }
   0xd   :  { %4861 = vmatpush3.bf16.msra.mxu1 %v4858_v16 }
   0xe   :  { %4877 = vmatpush3.bf16.msra.mxu0 %v4874_v19  ;;  %4863 = vmatprep.subr.bf16.mxu1 %v4862_v26 }
   0xf   :  { %4879 = vmatprep.subr.bf16.mxu0 %v4878_v27 }
  0x11   :  { %4865 = vmatpush3.bf16.msra.mxu1 %v4862_v26 }
  0x12   :  { %4881 = vmatpush3.bf16.msra.mxu0 %v4878_v27 }
  0x14   :  { %4451 = vmatmul.mubr.msk.f32.vlgmr.msra.gmra.mrb[0].mxu1 %vm552_vm0, %v3783_v30 }
  0x15   :  { %4659 = vmatmul.mubr.msk.f32.vlgmr.msra.gmra.mrb[0].mxu0 %vm552_vm0, %v3527_v31  ;;  %4453 = vmatprep.mubr.msk.f32.mxu1 %vm552_vm0, %v3786_v32 }
  0x16   :  { %4661 = vmatprep.mubr.msk.f32.mxu0 %vm552_vm0, %v3530_v33 }
  0x18   :  { %4454 = vmatmul.mubr.msk.f32.gmra.mrb[2].mxu1 %vm552_vm0, %v3787_v36 }
  0x19   :  { %4662 = vmatmul.mubr.msk.f32.gmra.mrb[2].mxu0 %vm552_vm0, %v3531_v37  ;;  %4456 = vmatprep.mubr.msk.f32.mxu1 %vm552_vm0, %v3790_v38 }
  0x1a   :  { %4664 = vmatprep.mubr.msk.f32.mxu0 %vm552_vm0, %v3534_v39 }
  0x1c   :  { %4457 = vmatmul.mubr.msk.f32.gmra.mrb[4].mxu1 %vm552_vm0, %v3791_v42 }
  0x1d   :  { %4665 = vmatmul.mubr.msk.f32.gmra.mrb[4].mxu0 %vm552_vm0, %v3535_v43  ;;  %4459 = vmatprep.mubr.msk.f32.mxu1 %vm552_vm0, %v3794_v44 }
  0x1e   :  { %4667 = vmatprep.mubr.msk.f32.mxu0 %vm552_vm0, %v3538_v45 }
  0x1f   :  { %11 = vsyncpa [#allocation3], 0  ;;  %v4040_v53 = vld [vmem:[%s6426_s0 + $0x28] sm:$0xff]   ;;  %v3799_v54 = vunpack.c.h.bf16 %v4102_v46  ;;  %v3543_v55 = vunpack.c.h.bf16 %v4039_v47  ;;  %v3802_v56 = vunpack.c.l.bf16 %v4103_v52  ;;  %v4104_v58 = vld [vmem:[%s6427_s1 + $0x30] sm:$0xff]   ;;  %v3803_v60 = vunpack.c.h.bf16 %v4103_v52  ;;  %s5038_s28 = smov [#allocation2]  }
  0x20   :  { %4460 = vmatmul.mubr.msk.f32.gmra.mrb[6].mxu1 %vm552_vm0, %v3795_v48  ;;  %v3546_v57 = vunpack.c.l.bf16 %v4040_v53  ;;  %v4041_v59 = vld [vmem:[%s6426_s0 + $0x30] sm:$0xff]   ;;  %v3547_v61 = vunpack.c.h.bf16 %v4040_v53  ;;  %v3806_v62 = vunpack.c.l.bf16 %v4104_v58  ;;  %v4105_v0 = vld [vmem:[%s6427_s1 + $0x38] sm:$0xff]   ;;  %v3807_v2 = vunpack.c.h.bf16 %v4104_v58  ;;  %v4106_v6 = vld [vmem:[%s6427_s1 + $0x40] sm:$0xff]   ;;  %s3256_s29 = sshll.u32 %s5038_s28, 4  ;;  %s3257_s29 = int_to_ptr.vmem [resolvable:$true] %s3256_s29 }
  0x21   :  { %4668 = vmatmul.mubr.msk.f32.gmra.mrb[6].mxu0 %vm552_vm0, %v3539_v49  ;;  %4462 = vmatprep.mubr.msk.f32.mxu1 %vm552_vm0, %v3798_v50  ;;  %v3550_v63 = vunpack.c.l.bf16 %v4041_v59  ;;  %v4042_v1 = vld [vmem:[%s6426_s0 + $0x38] sm:$0xff]   ;;  %v3551_v3 = vunpack.c.h.bf16 %v4041_v59  ;;  %v3810_v4 = vunpack.c.l.bf16 %v4105_v0  ;;  %v4043_v7 = vld [vmem:[%s6426_s0 + $0x40] sm:$0xff]   ;;  %v3811_v8 = vunpack.c.h.bf16 %v4105_v0  ;;  %v4107_v12 = vld [vmem:[%s6427_s1 + $0x48] sm:$0xff]   ;;  %s5014_s8 = scalar_lea.vmem %s3257_s29, 16384  ;;  %p5019_p1 = scmp.lt.s32.totalorder %s3257_s29, %s3257_s29 }
  0x22   :  { %4670 = vmatprep.mubr.msk.f32.mxu0 %vm552_vm0, %v3542_v51  ;;  %v3554_v5 = vunpack.c.l.bf16 %v4042_v1  ;;  %v3555_v9 = vunpack.c.h.bf16 %v4042_v1  ;;  %v3814_v10 = vunpack.c.l.bf16 %v4106_v6  ;;  %v3558_v11 = vunpack.c.l.bf16 %v4043_v7  ;;  %v4044_v13 = vld [vmem:[%s6426_s0 + $0x48] sm:$0xff]   ;;  %v4108_v18 = vld [vmem:[%s6427_s1 + $0x50] sm:$0xff]   ;;  %v4109_v24 = vld [vmem:[%s6427_s1 + $0x58] sm:$0xff]   ;;  %p5015_p0 = scmp.ne.s32.totalorder %s3257_s29, %s5014_s8  ;;  %p5020_p2 = scmp.lt.s32.totalorder %s5014_s8, %s5014_s8 }
  0x23   :  { %v3815_v14 = vunpack.c.h.bf16 %v4106_v6  ;;  %v3559_v15 = vunpack.c.h.bf16 %v4043_v7  ;;  %v3818_v16 = vunpack.c.l.bf16 %v4107_v12  ;;  %v3562_v17 = vunpack.c.l.bf16 %v4044_v13  ;;  %v4045_v19 = vld [vmem:[%s6426_s0 + $0x50] sm:$0xff]   ;;  %v4046_v25 = vld [vmem:[%s6426_s0 + $0x58] sm:$0xff]   ;;  %v4110_v30 = vld [vmem:[%s6427_s1 + $0x60] sm:$0xff]  }
  0x24   :  { %4463 = vmatmul.mubr.msk.f32.gmra.mrb[8].mxu1 %vm552_vm0, %v3799_v54  ;;  %v3819_v20 = vunpack.c.h.bf16 %v4107_v12  ;;  %v3563_v21 = vunpack.c.h.bf16 %v4044_v13  ;;  %v3822_v22 = vunpack.c.l.bf16 %v4108_v18  ;;  %v3566_v23 = vunpack.c.l.bf16 %v4045_v19  ;;  %v4047_v31 = vld [vmem:[%s6426_s0 + $0x60] sm:$0xff]   ;;  %v4111_v36 = vld [vmem:[%s6427_s1 + $0x68] sm:$0xff]   ;;  %v4112_v42 = vld [vmem:[%s6427_s1 + $0x70] sm:$0xff]   ;;  %p5021_p3 = por %p5020_p2, %p5019_p1 }
  0x25   :  { %4671 = vmatmul.mubr.msk.f32.gmra.mrb[8].mxu0 %vm552_vm0, %v3543_v55  ;;  %4465 = vmatprep.mubr.msk.f32.mxu1 %vm552_vm0, %v3802_v56  ;;  %v3823_v26 = vunpack.c.h.bf16 %v4108_v18  ;;  %v3567_v27 = vunpack.c.h.bf16 %v4045_v19  ;;  %v3826_v28 = vunpack.c.l.bf16 %v4109_v24  ;;  %v3570_v29 = vunpack.c.l.bf16 %v4046_v25  ;;  %v4048_v37 = vld [vmem:[%s6426_s0 + $0x68] sm:$0xff]   ;;  %v4049_v43 = vld [vmem:[%s6426_s0 + $0x70] sm:$0xff]   ;;  %v4113_v48 = vld [vmem:[%s6427_s1 + $0x78] sm:$0xff]  }
  0x26   :  { %4673 = vmatprep.mubr.msk.f32.mxu0 %vm552_vm0, %v3546_v57  ;;  %v3827_v32 = vunpack.c.h.bf16 %v4109_v24  ;;  %v3571_v33 = vunpack.c.h.bf16 %v4046_v25  ;;  %v3830_v34 = vunpack.c.l.bf16 %v4110_v30  ;;  %v3574_v35 = vunpack.c.l.bf16 %v4047_v31  ;;  %v4050_v49 = vld [vmem:[%s6426_s0 + $0x78] sm:$0xff]   ;;  %v4114_v54 = vld [vmem:[%s6427_s1 + $0x80] sm:$0xff]   ;;  %p5022_p4 = pnand %p5021_p3, %p5015_p0 }
  0x27   :  { %v3831_v38 = vunpack.c.h.bf16 %v4110_v30  ;;  %v3575_v39 = vunpack.c.h.bf16 %v4047_v31  ;;  %v3834_v40 = vunpack.c.l.bf16 %v4111_v36  ;;  %v3578_v41 = vunpack.c.l.bf16 %v4048_v37  ;;  %v4051_v55 = vld [vmem:[%s6426_s0 + $0x80] sm:$0xff]  }
  0x28   :  { %4466 = vmatmul.mubr.msk.f32.gmra.mrb[10].mxu1 %vm552_vm0, %v3803_v60  ;;  %v3835_v44 = vunpack.c.h.bf16 %v4111_v36  ;;  %v3579_v45 = vunpack.c.h.bf16 %v4048_v37  ;;  %v3838_v46 = vunpack.c.l.bf16 %v4112_v42  ;;  %v3582_v47 = vunpack.c.l.bf16 %v4049_v43  ;;  %v4115_v60 = vld [vmem:[%s6427_s1 + $0x88] sm:$0xff]  }
  0x29   :  { %4674 = vmatmul.mubr.msk.f32.gmra.mrb[10].mxu0 %vm552_vm0, %v3547_v61  ;;  %4468 = vmatprep.mubr.msk.f32.mxu1 %vm552_vm0, %v3806_v62  ;;  %v3839_v50 = vunpack.c.h.bf16 %v4112_v42  ;;  %v3583_v51 = vunpack.c.h.bf16 %v4049_v43  ;;  %v3842_v52 = vunpack.c.l.bf16 %v4113_v48  ;;  %v3586_v53 = vunpack.c.l.bf16 %v4050_v49  ;;  %v4052_v61 = vld [vmem:[%s6426_s0 + $0x88] sm:$0xff]  }
  0x2a   :  { %4676 = vmatprep.mubr.msk.f32.mxu0 %vm552_vm0, %v3550_v63  ;;  %v3843_v56 = vunpack.c.h.bf16 %v4113_v48  ;;  %v3587_v57 = vunpack.c.h.bf16 %v4050_v49  ;;  %v3846_v58 = vunpack.c.l.bf16 %v4114_v54  ;;  %v3590_v59 = vunpack.c.l.bf16 %v4051_v55 }
  0x2b   :  { %v3847_v62 = vunpack.c.h.bf16 %v4114_v54  ;;  %v3591_v63 = vunpack.c.h.bf16 %v4051_v55  ;;  %v3850_v0 = vunpack.c.l.bf16 %v4115_v60  ;;  %v3594_v1 = vunpack.c.l.bf16 %v4052_v61 }
  0x2c   :  { %4469 = vmatmul.mubr.msk.f32.gmra.mrb[12].mxu1 %vm552_vm0, %v3807_v2  ;;  %v4116_v2 = vld [vmem:[%s6427_s1 + $0x90] sm:$0xff]   ;;  %vm3122_vm1 = vcmask 261120  }
  0x2d   :  { %4677 = vmatmul.mubr.msk.f32.gmra.mrb[12].mxu0 %vm552_vm0, %v3551_v3  ;;  %4471 = vmatprep.mubr.msk.f32.mxu1 %vm552_vm0, %v3810_v4  ;;  %v4053_v3 = vld [vmem:[%s6426_s0 + $0x90] sm:$0xff]   ;;  %v3851_v4 = vunpack.c.h.bf16 %v4115_v60  ;;  %v3854_v6 = vunpack.c.l.bf16 %v4116_v2 }
  0x2e   :  { %4679 = vmatprep.mubr.msk.f32.mxu0 %vm552_vm0, %v3554_v5  ;;  %v3595_v5 = vunpack.c.h.bf16 %v4052_v61  ;;  %v3598_v7 = vunpack.c.l.bf16 %v4053_v3 }
  0x30   :  { %4472 = vmatmul.mubr.msk.f32.gmra.mrb[14].mxu1 %vm552_vm0, %v3811_v8  ;;  %v4117_v8 = vld [vmem:[%s6427_s1 + $0x98] sm:$0xff]  }
  0x31   :  { %4680 = vmatmul.mubr.msk.f32.gmra.mrb[14].mxu0 %vm552_vm0, %v3555_v9  ;;  %4474 = vmatprep.mubr.msk.f32.mxu1 %vm552_vm0, %v3814_v10  ;;  %v4054_v9 = vld [vmem:[%s6426_s0 + $0x98] sm:$0xff]   ;;  %v3855_v10 = vunpack.c.h.bf16 %v4116_v2  ;;  %v3858_v12 = vunpack.c.l.bf16 %v4117_v8 }
  0x32   :  { %4682 = vmatprep.mubr.msk.f32.mxu0 %vm552_vm0, %v3558_v11  ;;  %v3599_v11 = vunpack.c.h.bf16 %v4053_v3  ;;  %v3602_v13 = vunpack.c.l.bf16 %v4054_v9 }
  0x34   :  { %4475 = vmatmul.mubr.msk.f32.gmra.mrb[16].mxu1 %vm552_vm0, %v3815_v14  ;;  %v4118_v14 = vld [vmem:[%s6427_s1 + $0xa0] sm:$0xff]  }
  0x35   :  { %4683 = vmatmul.mubr.msk.f32.gmra.mrb[16].mxu0 %vm552_vm0, %v3559_v15  ;;  %4477 = vmatprep.mubr.msk.f32.mxu1 %vm552_vm0, %v3818_v16  ;;  %v4055_v15 = vld [vmem:[%s6426_s0 + $0xa0] sm:$0xff]   ;;  %v3859_v16 = vunpack.c.h.bf16 %v4117_v8  ;;  %v3862_v18 = vunpack.c.l.bf16 %v4118_v14 }
  0x36   :  { %4685 = vmatprep.mubr.msk.f32.mxu0 %vm552_vm0, %v3562_v17  ;;  %v3603_v17 = vunpack.c.h.bf16 %v4054_v9  ;;  %v3606_v19 = vunpack.c.l.bf16 %v4055_v15 }
  0x38   :  { %4478 = vmatmul.mubr.msk.f32.gmra.mrb[18].mxu1 %vm552_vm0, %v3819_v20  ;;  %v4119_v20 = vld [vmem:[%s6427_s1 + $0xa8] sm:$0xff]  }
  0x39   :  { %4686 = vmatmul.mubr.msk.f32.gmra.mrb[18].mxu0 %vm552_vm0, %v3563_v21  ;;  %4480 = vmatprep.mubr.msk.f32.mxu1 %vm552_vm0, %v3822_v22  ;;  %v4056_v21 = vld [vmem:[%s6426_s0 + $0xa8] sm:$0xff]   ;;  %v3863_v22 = vunpack.c.h.bf16 %v4118_v14  ;;  %v3866_v24 = vunpack.c.l.bf16 %v4119_v20 }
  0x3a   :  { %4688 = vmatprep.mubr.msk.f32.mxu0 %vm552_vm0, %v3566_v23  ;;  %v3607_v23 = vunpack.c.h.bf16 %v4055_v15  ;;  %v3610_v25 = vunpack.c.l.bf16 %v4056_v21 }
  0x3c   :  { %4481 = vmatmul.mubr.msk.f32.gmra.mrb[20].mxu1 %vm552_vm0, %v3823_v26  ;;  %v4120_v26 = vld [vmem:[%s6427_s1 + $0xb0] sm:$0xff]  }
  0x3d   :  { %4689 = vmatmul.mubr.msk.f32.gmra.mrb[20].mxu0 %vm552_vm0, %v3567_v27  ;;  %4483 = vmatprep.mubr.msk.f32.mxu1 %vm552_vm0, %v3826_v28  ;;  %v4057_v27 = vld [vmem:[%s6426_s0 + $0xb0] sm:$0xff]   ;;  %v3867_v28 = vunpack.c.h.bf16 %v4119_v20  ;;  %v3870_v30 = vunpack.c.l.bf16 %v4120_v26 }
  0x3e   :  { %4691 = vmatprep.mubr.msk.f32.mxu0 %vm552_vm0, %v3570_v29  ;;  %v3611_v29 = vunpack.c.h.bf16 %v4056_v21  ;;  %v3614_v31 = vunpack.c.l.bf16 %v4057_v27 }
  0x40   :  { %4484 = vmatmul.mubr.msk.f32.gmra.mrb[22].mxu1 %vm552_vm0, %v3827_v32  ;;  %v4121_v32 = vld [vmem:[%s6427_s1 + $0xb8] sm:$0xff]  }
  0x41   :  { %4692 = vmatmul.mubr.msk.f32.gmra.mrb[22].mxu0 %vm552_vm0, %v3571_v33  ;;  %4486 = vmatprep.mubr.msk.f32.mxu1 %vm552_vm0, %v3830_v34  ;;  %v4058_v33 = vld [vmem:[%s6426_s0 + $0xb8] sm:$0xff]   ;;  %v3871_v34 = vunpack.c.h.bf16 %v4120_v26  ;;  %v3874_v36 = vunpack.c.l.bf16 %v4121_v32 }
  0x42   :  { %4694 = vmatprep.mubr.msk.f32.mxu0 %vm552_vm0, %v3574_v35  ;;  %v3615_v35 = vunpack.c.h.bf16 %v4057_v27  ;;  %v3618_v37 = vunpack.c.l.bf16 %v4058_v33 }
  0x44   :  { %4487 = vmatmul.mubr.msk.f32.gmra.mrb[24].mxu1 %vm552_vm0, %v3831_v38  ;;  %v4122_v38 = vld [vmem:[%s6427_s1 + $0xc0] sm:$0xff]  }
  0x45   :  { %4695 = vmatmul.mubr.msk.f32.gmra.mrb[24].mxu0 %vm552_vm0, %v3575_v39  ;;  %4489 = vmatprep.mubr.msk.f32.mxu1 %vm552_vm0, %v3834_v40  ;;  %v4059_v39 = vld [vmem:[%s6426_s0 + $0xc0] sm:$0xff]   ;;  %v3875_v40 = vunpack.c.h.bf16 %v4121_v32  ;;  %v3878_v42 = vunpack.c.l.bf16 %v4122_v38 }
  0x46   :  { %4697 = vmatprep.mubr.msk.f32.mxu0 %vm552_vm0, %v3578_v41  ;;  %v3619_v41 = vunpack.c.h.bf16 %v4058_v33  ;;  %v3622_v43 = vunpack.c.l.bf16 %v4059_v39 }
  0x48   :  { %4490 = vmatmul.mubr.msk.f32.gmra.mrb[26].mxu1 %vm552_vm0, %v3835_v44  ;;  %v4123_v44 = vld [vmem:[%s6427_s1 + $0xc8] sm:$0xff]  }
  0x49   :  { %4698 = vmatmul.mubr.msk.f32.gmra.mrb[26].mxu0 %vm552_vm0, %v3579_v45  ;;  %4492 = vmatprep.mubr.msk.f32.mxu1 %vm552_vm0, %v3838_v46  ;;  %v4060_v45 = vld [vmem:[%s6426_s0 + $0xc8] sm:$0xff]   ;;  %v3879_v46 = vunpack.c.h.bf16 %v4122_v38  ;;  %v3882_v48 = vunpack.c.l.bf16 %v4123_v44 }
  0x4a   :  { %4700 = vmatprep.mubr.msk.f32.mxu0 %vm552_vm0, %v3582_v47  ;;  %v3623_v47 = vunpack.c.h.bf16 %v4059_v39  ;;  %v3626_v49 = vunpack.c.l.bf16 %v4060_v45 }
  0x4c   :  { %4493 = vmatmul.mubr.msk.f32.gmra.mrb[28].mxu1 %vm552_vm0, %v3839_v50  ;;  %v4124_v50 = vld [vmem:[%s6427_s1 + $0xd0] sm:$0xff]  }
  0x4d   :  { %4701 = vmatmul.mubr.msk.f32.gmra.mrb[28].mxu0 %vm552_vm0, %v3583_v51  ;;  %4495 = vmatprep.mubr.msk.f32.mxu1 %vm552_vm0, %v3842_v52  ;;  %v4061_v51 = vld [vmem:[%s6426_s0 + $0xd0] sm:$0xff]   ;;  %v3883_v52 = vunpack.c.h.bf16 %v4123_v44  ;;  %v3886_v54 = vunpack.c.l.bf16 %v4124_v50 }
  0x4e   :  { %4703 = vmatprep.mubr.msk.f32.mxu0 %vm552_vm0, %v3586_v53  ;;  %v3627_v53 = vunpack.c.h.bf16 %v4060_v45  ;;  %v3630_v55 = vunpack.c.l.bf16 %v4061_v51 }
  0x50   :  { %4496 = vmatmul.mubr.msk.f32.gmra.mrb[30].mxu1 %vm552_vm0, %v3843_v56  ;;  %v4125_v56 = vld [vmem:[%s6427_s1 + $0xd8] sm:$0xff]  }
  0x51   :  { %4704 = vmatmul.mubr.msk.f32.gmra.mrb[30].mxu0 %vm552_vm0, %v3587_v57  ;;  %4498 = vmatprep.mubr.msk.f32.mxu1 %vm552_vm0, %v3846_v58  ;;  %v4062_v57 = vld [vmem:[%s6426_s0 + $0xd8] sm:$0xff]   ;;  %v3887_v58 = vunpack.c.h.bf16 %v4124_v50  ;;  %v3890_v60 = vunpack.c.l.bf16 %v4125_v56 }
  0x52   :  { %4706 = vmatprep.mubr.msk.f32.mxu0 %vm552_vm0, %v3590_v59  ;;  %v3631_v59 = vunpack.c.h.bf16 %v4061_v51  ;;  %v3634_v61 = vunpack.c.l.bf16 %v4062_v57 }
  0x54   :  { %4499 = vmatmul.mubr.msk.f32.gmra.mrb[32].mxu1 %vm552_vm0, %v3847_v62  ;;  %v4126_v62 = vld [vmem:[%s6427_s1 + $0xe0] sm:$0xff]  }
  0x55   :  { %4707 = vmatmul.mubr.msk.f32.gmra.mrb[32].mxu0 %vm552_vm0, %v3591_v63  ;;  %4501 = vmatprep.mubr.msk.f32.mxu1 %vm552_vm0, %v3850_v0  ;;  %v4063_v63 = vld [vmem:[%s6426_s0 + $0xe0] sm:$0xff]   ;;  %v3891_v0 = vunpack.c.h.bf16 %v4125_v56  ;;  %v3894_v2 = vunpack.c.l.bf16 %v4126_v62 }
  0x56   :  { %4709 = vmatprep.mubr.msk.f32.mxu0 %vm552_vm0, %v3594_v1  ;;  %v3635_v1 = vunpack.c.h.bf16 %v4062_v57  ;;  %v3638_v3 = vunpack.c.l.bf16 %v4063_v63 }
  0x58   :  { %4502 = vmatmul.mubr.msk.f32.gmra.mrb[34].mxu1 %vm552_vm0, %v3851_v4  ;;  %v4127_v4 = vld [vmem:[%s6427_s1 + $0xe8] sm:$0xff]  }
  0x59   :  { %4710 = vmatmul.mubr.msk.f32.gmra.mrb[34].mxu0 %vm552_vm0, %v3595_v5  ;;  %4504 = vmatprep.mubr.msk.f32.mxu1 %vm552_vm0, %v3854_v6  ;;  %v4064_v5 = vld [vmem:[%s6426_s0 + $0xe8] sm:$0xff]   ;;  %v3895_v6 = vunpack.c.h.bf16 %v4126_v62  ;;  %v3898_v8 = vunpack.c.l.bf16 %v4127_v4 }
  0x5a   :  { %4712 = vmatprep.mubr.msk.f32.mxu0 %vm552_vm0, %v3598_v7  ;;  %v3639_v7 = vunpack.c.h.bf16 %v4063_v63  ;;  %v3642_v9 = vunpack.c.l.bf16 %v4064_v5 }
  0x5c   :  { %4505 = vmatmul.mubr.msk.f32.gmra.mrb[36].mxu1 %vm552_vm0, %v3855_v10  ;;  %v4128_v10 = vld [vmem:[%s6427_s1 + $0xf0] sm:$0xff]  }
  0x5d   :  { %4713 = vmatmul.mubr.msk.f32.gmra.mrb[36].mxu0 %vm552_vm0, %v3599_v11  ;;  %4507 = vmatprep.mubr.msk.f32.mxu1 %vm552_vm0, %v3858_v12  ;;  %v4065_v11 = vld [vmem:[%s6426_s0 + $0xf0] sm:$0xff]   ;;  %v3899_v12 = vunpack.c.h.bf16 %v4127_v4  ;;  %v3902_v14 = vunpack.c.l.bf16 %v4128_v10 }
  0x5e   :  { %4715 = vmatprep.mubr.msk.f32.mxu0 %vm552_vm0, %v3602_v13  ;;  %v3643_v13 = vunpack.c.h.bf16 %v4064_v5  ;;  %v3646_v15 = vunpack.c.l.bf16 %v4065_v11 }
  0x60   :  { %4508 = vmatmul.mubr.msk.f32.gmra.mrb[38].mxu1 %vm552_vm0, %v3859_v16  ;;  %v4129_v16 = vld [vmem:[%s6427_s1 + $0xf8] sm:$0xff]  }
  0x61   :  { %4716 = vmatmul.mubr.msk.f32.gmra.mrb[38].mxu0 %vm552_vm0, %v3603_v17  ;;  %4510 = vmatprep.mubr.msk.f32.mxu1 %vm552_vm0, %v3862_v18  ;;  %v4066_v17 = vld [vmem:[%s6426_s0 + $0xf8] sm:$0xff]   ;;  %v3903_v18 = vunpack.c.h.bf16 %v4128_v10  ;;  %v3906_v20 = vunpack.c.l.bf16 %v4129_v16 }
  0x62   :  { %4718 = vmatprep.mubr.msk.f32.mxu0 %vm552_vm0, %v3606_v19  ;;  %v3647_v19 = vunpack.c.h.bf16 %v4065_v11  ;;  %v3650_v21 = vunpack.c.l.bf16 %v4066_v17 }
  0x64   :  { %4511 = vmatmul.mubr.msk.f32.gmra.mrb[40].mxu1 %vm552_vm0, %v3863_v22  ;;  %v4130_v22 = vld [vmem:[%s6427_s1 + $0x100] sm:$0xff]  }
  0x65   :  { %4719 = vmatmul.mubr.msk.f32.gmra.mrb[40].mxu0 %vm552_vm0, %v3607_v23  ;;  %4513 = vmatprep.mubr.msk.f32.mxu1 %vm552_vm0, %v3866_v24  ;;  %v4067_v23 = vld [vmem:[%s6426_s0 + $0x100] sm:$0xff]   ;;  %v3907_v24 = vunpack.c.h.bf16 %v4129_v16  ;;  %v3910_v26 = vunpack.c.l.bf16 %v4130_v22 }
  0x66   :  { %4721 = vmatprep.mubr.msk.f32.mxu0 %vm552_vm0, %v3610_v25  ;;  %v3651_v25 = vunpack.c.h.bf16 %v4066_v17  ;;  %v3654_v27 = vunpack.c.l.bf16 %v4067_v23 }
  0x68   :  { %4514 = vmatmul.mubr.msk.f32.gmra.mrb[42].mxu1 %vm552_vm0, %v3867_v28  ;;  %v4131_v28 = vld [vmem:[%s6427_s1 + $0x108] sm:$0xff]  }
  0x69   :  { %4722 = vmatmul.mubr.msk.f32.gmra.mrb[42].mxu0 %vm552_vm0, %v3611_v29  ;;  %4516 = vmatprep.mubr.msk.f32.mxu1 %vm552_vm0, %v3870_v30  ;;  %v4068_v29 = vld [vmem:[%s6426_s0 + $0x108] sm:$0xff]   ;;  %v3911_v30 = vunpack.c.h.bf16 %v4130_v22  ;;  %v3914_v32 = vunpack.c.l.bf16 %v4131_v28 }
  0x6a   :  { %4724 = vmatprep.mubr.msk.f32.mxu0 %vm552_vm0, %v3614_v31  ;;  %v3655_v31 = vunpack.c.h.bf16 %v4067_v23  ;;  %v3658_v33 = vunpack.c.l.bf16 %v4068_v29 }
  0x6c   :  { %4517 = vmatmul.mubr.msk.f32.gmra.mrb[44].mxu1 %vm552_vm0, %v3871_v34  ;;  %v4132_v34 = vld [vmem:[%s6427_s1 + $0x110] sm:$0xff]  }
  0x6d   :  { %4725 = vmatmul.mubr.msk.f32.gmra.mrb[44].mxu0 %vm552_vm0, %v3615_v35  ;;  %4519 = vmatprep.mubr.msk.f32.mxu1 %vm552_vm0, %v3874_v36  ;;  %v4069_v35 = vld [vmem:[%s6426_s0 + $0x110] sm:$0xff]   ;;  %v3915_v36 = vunpack.c.h.bf16 %v4131_v28  ;;  %v3918_v38 = vunpack.c.l.bf16 %v4132_v34 }
  0x6e   :  { %4727 = vmatprep.mubr.msk.f32.mxu0 %vm552_vm0, %v3618_v37  ;;  %v3659_v37 = vunpack.c.h.bf16 %v4068_v29  ;;  %v3662_v39 = vunpack.c.l.bf16 %v4069_v35 }
  0x70   :  { %4520 = vmatmul.mubr.msk.f32.gmra.mrb[46].mxu1 %vm552_vm0, %v3875_v40  ;;  %v4133_v40 = vld [vmem:[%s6427_s1 + $0x118] sm:$0xff]  }
  0x71   :  { %4728 = vmatmul.mubr.msk.f32.gmra.mrb[46].mxu0 %vm552_vm0, %v3619_v41  ;;  %4522 = vmatprep.mubr.msk.f32.mxu1 %vm552_vm0, %v3878_v42  ;;  %v4070_v41 = vld [vmem:[%s6426_s0 + $0x118] sm:$0xff]   ;;  %v3919_v42 = vunpack.c.h.bf16 %v4132_v34  ;;  %v3922_v44 = vunpack.c.l.bf16 %v4133_v40 }
  0x72   :  { %4730 = vmatprep.mubr.msk.f32.mxu0 %vm552_vm0, %v3622_v43  ;;  %v3663_v43 = vunpack.c.h.bf16 %v4069_v35  ;;  %v3666_v45 = vunpack.c.l.bf16 %v4070_v41 }
  0x74   :  { %4523 = vmatmul.mubr.msk.f32.gmra.mrb[48].mxu1 %vm552_vm0, %v3879_v46  ;;  %v4134_v46 = vld [vmem:[%s6427_s1 + $0x120] sm:$0xff]  }
  0x75   :  { %4731 = vmatmul.mubr.msk.f32.gmra.mrb[48].mxu0 %vm552_vm0, %v3623_v47  ;;  %4525 = vmatprep.mubr.msk.f32.mxu1 %vm552_vm0, %v3882_v48  ;;  %v4071_v47 = vld [vmem:[%s6426_s0 + $0x120] sm:$0xff]   ;;  %v3923_v48 = vunpack.c.h.bf16 %v4133_v40  ;;  %v3926_v50 = vunpack.c.l.bf16 %v4134_v46 }
  0x76   :  { %4733 = vmatprep.mubr.msk.f32.mxu0 %vm552_vm0, %v3626_v49  ;;  %v3667_v49 = vunpack.c.h.bf16 %v4070_v41  ;;  %v3670_v51 = vunpack.c.l.bf16 %v4071_v47 }
  0x78   :  { %4526 = vmatmul.mubr.msk.f32.gmra.mrb[50].mxu1 %vm552_vm0, %v3883_v52  ;;  %v4135_v52 = vld [vmem:[%s6427_s1 + $0x128] sm:$0xff]  }
  0x79   :  { %4734 = vmatmul.mubr.msk.f32.gmra.mrb[50].mxu0 %vm552_vm0, %v3627_v53  ;;  %4528 = vmatprep.mubr.msk.f32.mxu1 %vm552_vm0, %v3886_v54  ;;  %v4072_v53 = vld [vmem:[%s6426_s0 + $0x128] sm:$0xff]   ;;  %v3927_v54 = vunpack.c.h.bf16 %v4134_v46  ;;  %v3930_v56 = vunpack.c.l.bf16 %v4135_v52 }
  0x7a   :  { %4736 = vmatprep.mubr.msk.f32.mxu0 %vm552_vm0, %v3630_v55  ;;  %v3671_v55 = vunpack.c.h.bf16 %v4071_v47  ;;  %v3674_v57 = vunpack.c.l.bf16 %v4072_v53 }
  0x7c   :  { %4529 = vmatmul.mubr.msk.f32.gmra.mrb[52].mxu1 %vm552_vm0, %v3887_v58  ;;  %v4136_v58 = vld [vmem:[%s6427_s1 + $0x130] sm:$0xff]  }
  0x7d   :  { %4737 = vmatmul.mubr.msk.f32.gmra.mrb[52].mxu0 %vm552_vm0, %v3631_v59  ;;  %4531 = vmatprep.mubr.msk.f32.mxu1 %vm552_vm0, %v3890_v60  ;;  %v4073_v59 = vld [vmem:[%s6426_s0 + $0x130] sm:$0xff]   ;;  %v3931_v60 = vunpack.c.h.bf16 %v4135_v52  ;;  %v3934_v62 = vunpack.c.l.bf16 %v4136_v58 }
  0x7e   :  { %4739 = vmatprep.mubr.msk.f32.mxu0 %vm552_vm0, %v3634_v61  ;;  %v3675_v61 = vunpack.c.h.bf16 %v4072_v53  ;;  %v3678_v63 = vunpack.c.l.bf16 %v4073_v59 }
  0x80   :  { %4532 = vmatmul.mubr.msk.f32.gmra.mrb[54].mxu1 %vm552_vm0, %v3891_v0  ;;  %v4137_v0 = vld [vmem:[%s6427_s1 + $0x138] sm:$0xff]  }
  0x81   :  { %4740 = vmatmul.mubr.msk.f32.gmra.mrb[54].mxu0 %vm552_vm0, %v3635_v1  ;;  %4534 = vmatprep.mubr.msk.f32.mxu1 %vm552_vm0, %v3894_v2  ;;  %v4074_v1 = vld [vmem:[%s6426_s0 + $0x138] sm:$0xff]   ;;  %v3935_v2 = vunpack.c.h.bf16 %v4136_v58  ;;  %v3938_v4 = vunpack.c.l.bf16 %v4137_v0 }
  0x82   :  { %4742 = vmatprep.mubr.msk.f32.mxu0 %vm552_vm0, %v3638_v3  ;;  %v3679_v3 = vunpack.c.h.bf16 %v4073_v59  ;;  %v3682_v5 = vunpack.c.l.bf16 %v4074_v1 }
  0x84   :  { %4535 = vmatmul.mubr.msk.f32.gmra.mrb[56].mxu1 %vm552_vm0, %v3895_v6  ;;  %v4138_v6 = vld [vmem:[%s6427_s1 + $0x140] sm:$0xff]  }
  0x85   :  { %4743 = vmatmul.mubr.msk.f32.gmra.mrb[56].mxu0 %vm552_vm0, %v3639_v7  ;;  %4537 = vmatprep.mubr.msk.f32.mxu1 %vm552_vm0, %v3898_v8  ;;  %v4075_v7 = vld [vmem:[%s6426_s0 + $0x140] sm:$0xff]   ;;  %v3939_v8 = vunpack.c.h.bf16 %v4137_v0  ;;  %v3942_v10 = vunpack.c.l.bf16 %v4138_v6 }
  0x86   :  { %4745 = vmatprep.mubr.msk.f32.mxu0 %vm552_vm0, %v3642_v9  ;;  %v3683_v9 = vunpack.c.h.bf16 %v4074_v1  ;;  %v3686_v11 = vunpack.c.l.bf16 %v4075_v7 }
  0x88   :  { %4538 = vmatmul.mubr.msk.f32.gmra.mrb[58].mxu1 %vm552_vm0, %v3899_v12  ;;  %v4139_v12 = vld [vmem:[%s6427_s1 + $0x148] sm:$0xff]  }
  0x89   :  { %4746 = vmatmul.mubr.msk.f32.gmra.mrb[58].mxu0 %vm552_vm0, %v3643_v13  ;;  %4540 = vmatprep.mubr.msk.f32.mxu1 %vm552_vm0, %v3902_v14  ;;  %v4076_v13 = vld [vmem:[%s6426_s0 + $0x148] sm:$0xff]   ;;  %v3943_v14 = vunpack.c.h.bf16 %v4138_v6  ;;  %v3946_v16 = vunpack.c.l.bf16 %v4139_v12 }
  0x8a   :  { %4748 = vmatprep.mubr.msk.f32.mxu0 %vm552_vm0, %v3646_v15  ;;  %v3687_v15 = vunpack.c.h.bf16 %v4075_v7  ;;  %v3690_v17 = vunpack.c.l.bf16 %v4076_v13 }
  0x8c   :  { %4541 = vmatmul.mubr.msk.f32.gmra.mrb[60].mxu1 %vm552_vm0, %v3903_v18  ;;  %v4140_v18 = vld [vmem:[%s6427_s1 + $0x150] sm:$0xff]  }
  0x8d   :  { %4749 = vmatmul.mubr.msk.f32.gmra.mrb[60].mxu0 %vm552_vm0, %v3647_v19  ;;  %4543 = vmatprep.mubr.msk.f32.mxu1 %vm552_vm0, %v3906_v20  ;;  %v4077_v19 = vld [vmem:[%s6426_s0 + $0x150] sm:$0xff]   ;;  %v3947_v20 = vunpack.c.h.bf16 %v4139_v12  ;;  %v3950_v22 = vunpack.c.l.bf16 %v4140_v18 }
  0x8e   :  { %4751 = vmatprep.mubr.msk.f32.mxu0 %vm552_vm0, %v3650_v21  ;;  %v3691_v21 = vunpack.c.h.bf16 %v4076_v13  ;;  %v3694_v23 = vunpack.c.l.bf16 %v4077_v19 }
  0x90   :  { %4544 = vmatmul.mubr.msk.f32.gmra.mrb[62].mxu1 %vm552_vm0, %v3907_v24  ;;  %v4141_v24 = vld [vmem:[%s6427_s1 + $0x158] sm:$0xff]  }
  0x91   :  { %4752 = vmatmul.mubr.msk.f32.gmra.mrb[62].mxu0 %vm552_vm0, %v3651_v25  ;;  %4546 = vmatprep.mubr.msk.f32.mxu1 %vm552_vm0, %v3910_v26  ;;  %v4078_v25 = vld [vmem:[%s6426_s0 + $0x158] sm:$0xff]   ;;  %v3951_v26 = vunpack.c.h.bf16 %v4140_v18  ;;  %v3954_v28 = vunpack.c.l.bf16 %v4141_v24 }
  0x92   :  { %4754 = vmatprep.mubr.msk.f32.mxu0 %vm552_vm0, %v3654_v27  ;;  %v3695_v27 = vunpack.c.h.bf16 %v4077_v19  ;;  %v3698_v29 = vunpack.c.l.bf16 %v4078_v25 }
  0x94   :  { %4547 = vmatmul.mubr.msk.f32.gmra.mrb[64].mxu1 %vm552_vm0, %v3911_v30  ;;  %v4142_v30 = vld [vmem:[%s6427_s1 + $0x160] sm:$0xff]  }
  0x95   :  { %4755 = vmatmul.mubr.msk.f32.gmra.mrb[64].mxu0 %vm552_vm0, %v3655_v31  ;;  %4549 = vmatprep.mubr.msk.f32.mxu1 %vm552_vm0, %v3914_v32  ;;  %v4079_v31 = vld [vmem:[%s6426_s0 + $0x160] sm:$0xff]   ;;  %v3955_v32 = vunpack.c.h.bf16 %v4141_v24  ;;  %v3958_v34 = vunpack.c.l.bf16 %v4142_v30 }
  0x96   :  { %4757 = vmatprep.mubr.msk.f32.mxu0 %vm552_vm0, %v3658_v33  ;;  %v3699_v33 = vunpack.c.h.bf16 %v4078_v25  ;;  %v3702_v35 = vunpack.c.l.bf16 %v4079_v31 }
  0x98   :  { %4550 = vmatmul.mubr.msk.f32.gmra.mrb[66].mxu1 %vm552_vm0, %v3915_v36  ;;  %v4143_v36 = vld [vmem:[%s6427_s1 + $0x168] sm:$0xff]  }
  0x99   :  { %4758 = vmatmul.mubr.msk.f32.gmra.mrb[66].mxu0 %vm552_vm0, %v3659_v37  ;;  %4552 = vmatprep.mubr.msk.f32.mxu1 %vm552_vm0, %v3918_v38  ;;  %v4080_v37 = vld [vmem:[%s6426_s0 + $0x168] sm:$0xff]   ;;  %v3959_v38 = vunpack.c.h.bf16 %v4142_v30  ;;  %v3962_v40 = vunpack.c.l.bf16 %v4143_v36 }
  0x9a   :  { %4760 = vmatprep.mubr.msk.f32.mxu0 %vm552_vm0, %v3662_v39  ;;  %v3703_v39 = vunpack.c.h.bf16 %v4079_v31  ;;  %v3706_v41 = vunpack.c.l.bf16 %v4080_v37 }
  0x9c   :  { %4553 = vmatmul.mubr.msk.f32.gmra.mrb[68].mxu1 %vm552_vm0, %v3919_v42  ;;  %v4144_v42 = vld [vmem:[%s6427_s1 + $0x170] sm:$0xff]  }
  0x9d   :  { %4761 = vmatmul.mubr.msk.f32.gmra.mrb[68].mxu0 %vm552_vm0, %v3663_v43  ;;  %4555 = vmatprep.mubr.msk.f32.mxu1 %vm552_vm0, %v3922_v44  ;;  %v4081_v43 = vld [vmem:[%s6426_s0 + $0x170] sm:$0xff]   ;;  %v3963_v44 = vunpack.c.h.bf16 %v4143_v36  ;;  %v3966_v46 = vunpack.c.l.bf16 %v4144_v42  ;;  %v5677_v36 = vld [vmem:[%s6430_s4] ss:$0 sm:$0xff] }
  0x9e   :  { %4763 = vmatprep.mubr.msk.f32.mxu0 %vm552_vm0, %v3666_v45  ;;  %v3707_v45 = vunpack.c.h.bf16 %v4080_v37  ;;  %v3710_v47 = vunpack.c.l.bf16 %v4081_v43 }
  0xa0   :  { %4556 = vmatmul.mubr.msk.f32.gmra.mrb[70].mxu1 %vm552_vm0, %v3923_v48  ;;  %v4145_v48 = vld [vmem:[%s6427_s1 + $0x178] sm:$0xff]  }
  0xa1   :  { %4764 = vmatmul.mubr.msk.f32.gmra.mrb[70].mxu0 %vm552_vm0, %v3667_v49  ;;  %4558 = vmatprep.mubr.msk.f32.mxu1 %vm552_vm0, %v3926_v50  ;;  %v4082_v49 = vld [vmem:[%s6426_s0 + $0x178] sm:$0xff]   ;;  %v3967_v50 = vunpack.c.h.bf16 %v4144_v42  ;;  %v3970_v52 = vunpack.c.l.bf16 %v4145_v48 }
  0xa2   :  { %4766 = vmatprep.mubr.msk.f32.mxu0 %vm552_vm0, %v3670_v51  ;;  %v3711_v51 = vunpack.c.h.bf16 %v4081_v43  ;;  %v3714_v53 = vunpack.c.l.bf16 %v4082_v49  ;;  %v2867_v43 = vld [vmem:[%s6431_s5 + $0x8] sm:$0xff] }
  0xa4   :  { %4559 = vmatmul.mubr.msk.f32.gmra.mrb[72].mxu1 %vm552_vm0, %v3927_v54  ;;  %v4146_v54 = vld [vmem:[%s6427_s1 + $0x180] sm:$0xff]  }
  0xa5   :  { %4767 = vmatmul.mubr.msk.f32.gmra.mrb[72].mxu0 %vm552_vm0, %v3671_v55  ;;  %4561 = vmatprep.mubr.msk.f32.mxu1 %vm552_vm0, %v3930_v56  ;;  %v4083_v55 = vld [vmem:[%s6426_s0 + $0x180] sm:$0xff]   ;;  %v3971_v56 = vunpack.c.h.bf16 %v4145_v48  ;;  %v3974_v58 = vunpack.c.l.bf16 %v4146_v54 }
  0xa6   :  { %4769 = vmatprep.mubr.msk.f32.mxu0 %vm552_vm0, %v3674_v57  ;;  %v3715_v57 = vunpack.c.h.bf16 %v4082_v49  ;;  %v3718_v59 = vunpack.c.l.bf16 %v4083_v55  ;;  %v2866_v48 = vld [vmem:[%s6431_s5] sm:$0xff] }
  0xa8   :  { %4562 = vmatmul.mubr.msk.f32.gmra.mrb[74].mxu1 %vm552_vm0, %v3931_v60  ;;  %v4147_v60 = vld [vmem:[%s6427_s1 + $0x188] sm:$0xff]  }
  0xa9   :  { %4770 = vmatmul.mubr.msk.f32.gmra.mrb[74].mxu0 %vm552_vm0, %v3675_v61  ;;  %4564 = vmatprep.mubr.msk.f32.mxu1 %vm552_vm0, %v3934_v62  ;;  %v4084_v61 = vld [vmem:[%s6426_s0 + $0x188] sm:$0xff]   ;;  %v3975_v62 = vunpack.c.h.bf16 %v4146_v54  ;;  %v3978_v0 = vunpack.c.l.bf16 %v4147_v60 }
  0xaa   :  { %4772 = vmatprep.mubr.msk.f32.mxu0 %vm552_vm0, %v3678_v63  ;;  %v3719_v63 = vunpack.c.h.bf16 %v4083_v55  ;;  %v3722_v1 = vunpack.c.l.bf16 %v4084_v61 }
  0xac   :  { %4565 = vmatmul.mubr.msk.f32.gmra.mrb[76].mxu1 %vm552_vm0, %v3935_v2  ;;  %v4148_v2 = vld [vmem:[%s6427_s1 + $0x190] sm:$0xff]  }
  0xad   :  { %4773 = vmatmul.mubr.msk.f32.gmra.mrb[76].mxu0 %vm552_vm0, %v3679_v3  ;;  %4567 = vmatprep.mubr.msk.f32.mxu1 %vm552_vm0, %v3938_v4  ;;  %v4085_v3 = vld [vmem:[%s6426_s0 + $0x190] sm:$0xff]   ;;  %v3979_v4 = vunpack.c.h.bf16 %v4147_v60  ;;  %v3982_v6 = vunpack.c.l.bf16 %v4148_v2 }
  0xae   :  { %4775 = vmatprep.mubr.msk.f32.mxu0 %vm552_vm0, %v3682_v5  ;;  %v3723_v5 = vunpack.c.h.bf16 %v4084_v61  ;;  %v3726_v7 = vunpack.c.l.bf16 %v4085_v3  ;;  %v2869_v61 = vld [vmem:[%s6431_s5 + $0x18] sm:$0xff] }
  0xb0   :  { %4568 = vmatmul.mubr.msk.f32.gmra.mrb[78].mxu1 %vm552_vm0, %v3939_v8  ;;  %v4149_v8 = vld [vmem:[%s6427_s1 + $0x198] sm:$0xff]  }
  0xb1   :  { %4776 = vmatmul.mubr.msk.f32.gmra.mrb[78].mxu0 %vm552_vm0, %v3683_v9  ;;  %4570 = vmatprep.mubr.msk.f32.mxu1 %vm552_vm0, %v3942_v10  ;;  %v4086_v9 = vld [vmem:[%s6426_s0 + $0x198] sm:$0xff]   ;;  %v3983_v10 = vunpack.c.h.bf16 %v4148_v2  ;;  %v3986_v12 = vunpack.c.l.bf16 %v4149_v8  ;;  %v2868_v2 = vld [vmem:[%s6431_s5 + $0x10] sm:$0xff] }
  0xb2   :  { %4778 = vmatprep.mubr.msk.f32.mxu0 %vm552_vm0, %v3686_v11  ;;  %v3727_v11 = vunpack.c.h.bf16 %v4085_v3  ;;  %v3730_v13 = vunpack.c.l.bf16 %v4086_v9 }
  0xb4   :  { %4571 = vmatmul.mubr.msk.f32.gmra.mrb[80].mxu1 %vm552_vm0, %v3943_v14  ;;  %v4150_v14 = vld [vmem:[%s6427_s1 + $0x1a0] sm:$0xff]  }
  0xb5   :  { %4779 = vmatmul.mubr.msk.f32.gmra.mrb[80].mxu0 %vm552_vm0, %v3687_v15  ;;  %4573 = vmatprep.mubr.msk.f32.mxu1 %vm552_vm0, %v3946_v16  ;;  %v4087_v15 = vld [vmem:[%s6426_s0 + $0x1a0] sm:$0xff]   ;;  %v3987_v16 = vunpack.c.h.bf16 %v4149_v8  ;;  %v3990_v18 = vunpack.c.l.bf16 %v4150_v14 }
  0xb6   :  { %4781 = vmatprep.mubr.msk.f32.mxu0 %vm552_vm0, %v3690_v17  ;;  %v3731_v17 = vunpack.c.h.bf16 %v4086_v9  ;;  %v3734_v19 = vunpack.c.l.bf16 %v4087_v15 }
  0xb8   :  { %4574 = vmatmul.mubr.msk.f32.gmra.mrb[82].mxu1 %vm552_vm0, %v3947_v20  ;;  %v4151_v20 = vld [vmem:[%s6427_s1 + $0x1a8] sm:$0xff]  }
  0xb9   :  { %4782 = vmatmul.mubr.msk.f32.gmra.mrb[82].mxu0 %vm552_vm0, %v3691_v21  ;;  %4576 = vmatprep.mubr.msk.f32.mxu1 %vm552_vm0, %v3950_v22  ;;  %v4088_v21 = vld [vmem:[%s6426_s0 + $0x1a8] sm:$0xff]   ;;  %v3991_v22 = vunpack.c.h.bf16 %v4150_v14  ;;  %v3994_v24 = vunpack.c.l.bf16 %v4151_v20 }
  0xba   :  { %4784 = vmatprep.mubr.msk.f32.mxu0 %vm552_vm0, %v3694_v23  ;;  %v3735_v23 = vunpack.c.h.bf16 %v4087_v15  ;;  %v3738_v25 = vunpack.c.l.bf16 %v4088_v21  ;;  %v2871_v15 = vld [vmem:[%s6431_s5 + $0x28] sm:$0xff] }
  0xbc   :  { %4577 = vmatmul.mubr.msk.f32.gmra.mrb[84].mxu1 %vm552_vm0, %v3951_v26  ;;  %v4152_v26 = vld [vmem:[%s6427_s1 + $0x1b0] sm:$0xff]  }
  0xbd   :  { %4785 = vmatmul.mubr.msk.f32.gmra.mrb[84].mxu0 %vm552_vm0, %v3695_v27  ;;  %4579 = vmatprep.mubr.msk.f32.mxu1 %vm552_vm0, %v3954_v28  ;;  %v4089_v27 = vld [vmem:[%s6426_s0 + $0x1b0] sm:$0xff]   ;;  %v3995_v28 = vunpack.c.h.bf16 %v4151_v20  ;;  %v3998_v30 = vunpack.c.l.bf16 %v4152_v26  ;;  %v2870_v20 = vld [vmem:[%s6431_s5 + $0x20] sm:$0xff] }
  0xbe   :  { %4787 = vmatprep.mubr.msk.f32.mxu0 %vm552_vm0, %v3698_v29  ;;  %v3739_v29 = vunpack.c.h.bf16 %v4088_v21  ;;  %v3742_v31 = vunpack.c.l.bf16 %v4089_v27 }
  0xc0   :  { %4580 = vmatmul.mubr.msk.f32.gmra.mrb[86].mxu1 %vm552_vm0, %v3955_v32  ;;  %v4153_v32 = vld [vmem:[%s6427_s1 + $0x1b8] sm:$0xff]  }
  0xc1   :  { %4788 = vmatmul.mubr.msk.f32.gmra.mrb[86].mxu0 %vm552_vm0, %v3699_v33  ;;  %4582 = vmatprep.mubr.msk.f32.mxu1 %vm552_vm0, %v3958_v34  ;;  %v4090_v34 = vld [vmem:[%s6426_s0 + $0x1b8] sm:$0xff]   ;;  %v4002_v42 = vunpack.c.l.bf16 %v4153_v32  ;;  %v4003_v54 = vunpack.c.h.bf16 %v4153_v32 }
  0xc2   :  { %4790 = vmatprep.mubr.msk.f32.mxu0 %vm552_vm0, %v3702_v35 }
  0xc4   :  { %4583 = vmatmul.mubr.msk.f32.gmra.mrb[88].mxu1 %vm552_vm0, %v3959_v38  ;;  %v3999_v38 = vunpack.c.h.bf16 %v4152_v26 }
  0xc5   :  { %4791 = vmatmul.mubr.msk.f32.gmra.mrb[88].mxu0 %vm552_vm0, %v3703_v39  ;;  %4585 = vmatprep.mubr.msk.f32.mxu1 %vm552_vm0, %v3962_v40 }
  0xc6   :  { %4793 = vmatprep.mubr.msk.f32.mxu0 %vm552_vm0, %v3706_v41  ;;  %v3743_v41 = vunpack.c.h.bf16 %v4089_v27 }
  0xc8   :  { %4586 = vmatmul.mubr.msk.f32.gmra.mrb[90].mxu1 %vm552_vm0, %v3963_v44 }
  0xc9   :  { %4794 = vmatmul.mubr.msk.f32.gmra.mrb[90].mxu0 %vm552_vm0, %v3707_v45  ;;  %4588 = vmatprep.mubr.msk.f32.mxu1 %vm552_vm0, %v3966_v46  ;;  %v3746_v45 = vunpack.c.l.bf16 %v4090_v34  ;;  %v4154_v46 = vld [vmem:[%s6427_s1 + $0x1c0] sm:$0xff]  }
  0xca   :  { %4796 = vmatprep.mubr.msk.f32.mxu0 %vm552_vm0, %v3710_v47  ;;  %v4007_v8 = vunpack.c.h.bf16 %v4154_v46 }
  0xcc   :  { %4589 = vmatmul.mubr.msk.f32.gmra.mrb[92].mxu1 %vm552_vm0, %v3967_v50  ;;  %v4091_v50 = vld [vmem:[%s6426_s0 + $0x1c0] sm:$0xff]  }
  0xcd   :  { %4797 = vmatmul.mubr.msk.f32.gmra.mrb[92].mxu0 %vm552_vm0, %v3711_v51  ;;  %4591 = vmatprep.mubr.msk.f32.mxu1 %vm552_vm0, %v3970_v52 }
  0xce   :  { %4799 = vmatprep.mubr.msk.f32.mxu0 %vm552_vm0, %v3714_v53 }
  0xd0   :  { %4592 = vmatmul.mubr.msk.f32.gmra.mrb[94].mxu1 %vm552_vm0, %v3971_v56 }
  0xd1   :  { %4800 = vmatmul.mubr.msk.f32.gmra.mrb[94].mxu0 %vm552_vm0, %v3715_v57  ;;  %4594 = vmatprep.mubr.msk.f32.mxu1 %vm552_vm0, %v3974_v58  ;;  %v3747_v58 = vunpack.c.h.bf16 %v4090_v34 }
  0xd2   :  { %4802 = vmatprep.mubr.msk.f32.mxu0 %vm552_vm0, %v3718_v59  ;;  %v4006_v59 = vunpack.c.l.bf16 %v4154_v46 }
  0xd4   :  { %4595 = vmatmul.mubr.msk.f32.gmra.mrb[96].mxu1 %vm552_vm0, %v3975_v62 }
  0xd5   :  { %4803 = vmatmul.mubr.msk.f32.gmra.mrb[96].mxu0 %vm552_vm0, %v3719_v63  ;;  %4597 = vmatprep.mubr.msk.f32.mxu1 %vm552_vm0, %v3978_v0  ;;  %v3750_v63 = vunpack.c.l.bf16 %v4091_v50  ;;  %v4155_v0 = vld [vmem:[%s6427_s1 + $0x1c8] sm:$0xff]  }
  0xd6   :  { %4805 = vmatprep.mubr.msk.f32.mxu0 %vm552_vm0, %v3722_v1  ;;  %v4011_v26 = vunpack.c.h.bf16 %v4155_v0 }
  0xd8   :  { %4598 = vmatmul.mubr.msk.f32.gmra.mrb[98].mxu1 %vm552_vm0, %v3979_v4  ;;  %v4092_v4 = vld [vmem:[%s6426_s0 + $0x1c8] sm:$0xff]  }
  0xd9   :  { %4806 = vmatmul.mubr.msk.f32.gmra.mrb[98].mxu0 %vm552_vm0, %v3723_v5  ;;  %4600 = vmatprep.mubr.msk.f32.mxu1 %vm552_vm0, %v3982_v6 }
  0xda   :  { %4808 = vmatprep.mubr.msk.f32.mxu0 %vm552_vm0, %v3726_v7 }
  0xdc   :  { %4601 = vmatmul.mubr.msk.f32.gmra.mrb[100].mxu1 %vm552_vm0, %v3983_v10 }
  0xdd   :  { %4809 = vmatmul.mubr.msk.f32.gmra.mrb[100].mxu0 %vm552_vm0, %v3727_v11  ;;  %4603 = vmatprep.mubr.msk.f32.mxu1 %vm552_vm0, %v3986_v12  ;;  %v3751_v12 = vunpack.c.h.bf16 %v4091_v50 }
  0xde   :  { %4811 = vmatprep.mubr.msk.f32.mxu0 %vm552_vm0, %v3730_v13  ;;  %v4010_v13 = vunpack.c.l.bf16 %v4155_v0 }
  0xe0   :  { %4604 = vmatmul.mubr.msk.f32.gmra.mrb[102].mxu1 %vm552_vm0, %v3987_v16 }
  0xe1   :  { %4812 = vmatmul.mubr.msk.f32.gmra.mrb[102].mxu0 %vm552_vm0, %v3731_v17  ;;  %4606 = vmatprep.mubr.msk.f32.mxu1 %vm552_vm0, %v3990_v18  ;;  %v3754_v17 = vunpack.c.l.bf16 %v4092_v4  ;;  %v4156_v18 = vld [vmem:[%s6427_s1 + $0x1d0] sm:$0xff]  }
  0xe2   :  { %4814 = vmatprep.mubr.msk.f32.mxu0 %vm552_vm0, %v3734_v19 }
  0xe4   :  { %4607 = vmatmul.mubr.msk.f32.gmra.mrb[104].mxu1 %vm552_vm0, %v3991_v22  ;;  %v4093_v22 = vld [vmem:[%s6426_s0 + $0x1d0] sm:$0xff]  }
  0xe5   :  { %4815 = vmatmul.mubr.msk.f32.gmra.mrb[104].mxu0 %vm552_vm0, %v3735_v23  ;;  %4609 = vmatprep.mubr.msk.f32.mxu1 %vm552_vm0, %v3994_v24 }
  0xe6   :  { %4817 = vmatprep.mubr.msk.f32.mxu0 %vm552_vm0, %v3738_v25 }
  0xe7   :  { %v4452_v33 = vpop.f32.mrb[0].mxu1 }
  0xe8   :  { %v4660_v35 = vpop.f32.mrb[0].mxu0  ;;  %v1003_v37 = vpop.f32.mrb[1].mxu1  ;;  %4610 = vmatmul.mubr.msk.f32.gmra.mrb[106].mxu1 %vm552_vm0, %v3995_v28 }
  0xe9   :  { %v2098_v39 = vadd.f32 %v4660_v35, %v4452_v33  ;;  %v2092_v40 = vpop.f32.mrb[1].mxu0  ;;  %4818 = vmatmul.mubr.msk.f32.gmra.mrb[106].mxu0 %vm552_vm0, %v3739_v29  ;;  %4612 = vmatprep.mubr.msk.f32.mxu1 %vm552_vm0, %v3998_v30  ;;  %v3755_v30 = vunpack.c.h.bf16 %v4092_v4  ;;  %v2873_v33 = vld [vmem:[%s6431_s5 + $0x38] sm:$0xff]  ;;  %v3758_v35 = vunpack.c.l.bf16 %v4093_v22 }
  0xea   :  { %v2093_v44 = vadd.f32 %v2092_v40, %v1003_v37  ;;  %4820 = vmatprep.mubr.msk.f32.mxu0 %vm552_vm0, %v3742_v31  ;;  %v4014_v31 = vunpack.c.l.bf16 %v4156_v18  ;;  %v4157_v37 = vld [vmem:[%s6427_s1 + $0x1d8] sm:$0xff]  }
  0xeb   :  { %v2739_v47 = vadd.f32 %v5677_v36, %v2098_v39  ;;  %v4455_v49 = vpop.f32.mrb[2].mxu1  ;;  %v2872_v39 = vld [vmem:[%s6431_s5 + $0x30] sm:$0xff]  ;;  %v4018_v50 = vunpack.c.l.bf16 %v4157_v37 }
  0xec   :  { %v2738_v51 = vadd.f32 %v5677_v36, %v2093_v44  ;;  %v4663_v52 = vpop.f32.mrb[2].mxu0  ;;  %v1013_v53 = vpop.f32.mrb[3].mxu1  ;;  %4613 = vmatmul.mubr.msk.f32.gmra.mrb[108].mxu1 %vm552_vm0, %v3999_v38 }
  0xed   :  { %v2995_v55 = vadd.f32 %v2867_v43, %v2739_v47  ;;  %v2108_v56 = vadd.f32 %v4663_v52, %v4455_v49  ;;  %v2102_v57 = vpop.f32.mrb[3].mxu0  ;;  %4821 = vmatmul.mubr.msk.f32.gmra.mrb[108].mxu0 %vm552_vm0, %v3743_v41  ;;  %4615 = vmatprep.mubr.msk.f32.mxu1 %vm552_vm0, %v4002_v42  ;;  %v4094_v41 = vld [vmem:[%s6426_s0 + $0x1d8] sm:$0xff]   ;;  %v3759_v49 = vunpack.c.h.bf16 %v4093_v22  ;;  %v2875_v52 = vld [vmem:[%s6431_s5 + $0x48] sm:$0xff] }
  0xee   :  { %v2994_v60 = vadd.f32 %v2866_v48, %v2738_v51  ;;  %v2103_v62 = vadd.f32 %v2102_v57, %v1013_v53  ;;  %4823 = vmatprep.mubr.msk.f32.mxu0 %vm552_vm0, %v3746_v45  ;;  %v4015_v45 = vunpack.c.h.bf16 %v4156_v18  ;;  %v2874_v57 = vld [vmem:[%s6431_s5 + $0x40] sm:$0xff] }
  0xef   :  { %3124 = vst.msk [vmem:[#allocation2 + $0x8] sm:$0xff] %vm3122_vm1, %v2995_v55  ;;  %v2741_v1 = vadd.f32 %v5677_v36, %v2108_v56  ;;  %v4458_v3 = vpop.f32.mrb[4].mxu1  ;;  %v4158_v55 = vld [vmem:[%s6427_s1 + $0x1e0] sm:$0xff]  }
  0xf0   :  { %3123 = vst.msk [vmem:[#allocation2] sm:$0xff] %vm3122_vm1, %v2994_v60  ;;  %v2740_v5 = vadd.f32 %v5677_v36, %v2103_v62  ;;  %v4666_v6 = vpop.f32.mrb[4].mxu0  ;;  %v1023_v7 = vpop.f32.mrb[5].mxu1  ;;  %4616 = vmatmul.mubr.msk.f32.gmra.mrb[110].mxu1 %vm552_vm0, %v4003_v54  ;;  %v3762_v54 = vunpack.c.l.bf16 %v4094_v41  ;;  %v4022_v4 = vunpack.c.l.bf16 %v4158_v55 }
  0xf1   :  { %v2997_v9 = vadd.f32 %v2869_v61, %v2741_v1  ;;  %v2118_v10 = vadd.f32 %v4666_v6, %v4458_v3  ;;  %v2112_v11 = vpop.f32.mrb[5].mxu0  ;;  %4824 = vmatmul.mubr.msk.f32.gmra.mrb[110].mxu0 %vm552_vm0, %v3747_v58  ;;  %4618 = vmatprep.mubr.msk.f32.mxu1 %vm552_vm0, %v4006_v59  ;;  %v4095_v59 = vld [vmem:[%s6426_s0 + $0x1e0] sm:$0xff]   ;;  %v3763_v3 = vunpack.c.h.bf16 %v4094_v41  ;;  %v2877_v6 = vld [vmem:[%s6431_s5 + $0x58] sm:$0xff] }
  0xf2   :  { %v2996_v14 = vadd.f32 %v2868_v2, %v2740_v5  ;;  %v2113_v16 = vadd.f32 %v2112_v11, %v1023_v7  ;;  %4826 = vmatprep.mubr.msk.f32.mxu0 %vm552_vm0, %v3750_v63  ;;  %v4019_v63 = vunpack.c.h.bf16 %v4157_v37  ;;  %v2876_v11 = vld [vmem:[%s6431_s5 + $0x50] sm:$0xff] }
  0xf3   :  { %3126 = vst.msk [vmem:[#allocation2 + $0x18] sm:$0xff] %vm3122_vm1, %v2997_v9  ;;  %v2743_v19 = vadd.f32 %v5677_v36, %v2118_v10  ;;  %v4461_v21 = vpop.f32.mrb[6].mxu1  ;;  %v4159_v9 = vld [vmem:[%s6427_s1 + $0x1e8] sm:$0xff]  }
  0xf4   :  { %3125 = vst.msk [vmem:[#allocation2 + $0x10] sm:$0xff] %vm3122_vm1, %v2996_v14  ;;  %v2742_v23 = vadd.f32 %v5677_v36, %v2113_v16  ;;  %v4669_v24 = vpop.f32.mrb[6].mxu0  ;;  %v1033_v25 = vpop.f32.mrb[7].mxu1  ;;  %4619 = vmatmul.mubr.msk.f32.gmra.mrb[112].mxu1 %vm552_vm0, %v4007_v8  ;;  %v3766_v8 = vunpack.c.l.bf16 %v4095_v59  ;;  %v4026_v22 = vunpack.c.l.bf16 %v4159_v9 }
  0xf5   :  { %v2999_v27 = vadd.f32 %v2871_v15, %v2743_v19  ;;  %v2128_v28 = vadd.f32 %v4669_v24, %v4461_v21  ;;  %v2122_v29 = vpop.f32.mrb[7].mxu0  ;;  %4827 = vmatmul.mubr.msk.f32.gmra.mrb[112].mxu0 %vm552_vm0, %v3751_v12  ;;  %4621 = vmatprep.mubr.msk.f32.mxu1 %vm552_vm0, %v4010_v13  ;;  %v4096_v13 = vld [vmem:[%s6426_s0 + $0x1e8] sm:$0xff]   ;;  %v3767_v21 = vunpack.c.h.bf16 %v4095_v59 }
  0xf6   :  { %v2998_v32 = vadd.f32 %v2870_v20, %v2742_v23  ;;  %v2123_v34 = vadd.f32 %v2122_v29, %v1033_v25  ;;  %4829 = vmatprep.mubr.msk.f32.mxu0 %vm552_vm0, %v3754_v17  ;;  %v4023_v17 = vunpack.c.h.bf16 %v4158_v55  ;;  %v2879_v24 = vld [vmem:[%s6431_s5 + $0x68] sm:$0xff]  ;;  %v2878_v29 = vld [vmem:[%s6431_s5 + $0x60] sm:$0xff] }
  0xf7   :  { %3128 = vst.msk [vmem:[#allocation2 + $0x28] sm:$0xff] %vm3122_vm1, %v2999_v27  ;;  %v2745_v38 = vadd.f32 %v5677_v36, %v2128_v28  ;;  %v4464_v40 = vpop.f32.mrb[8].mxu1  ;;  %v4160_v27 = vld [vmem:[%s6427_s1 + $0x1f0] sm:$0xff]  }
  0xf8   :  { %3127 = vst.msk [vmem:[#allocation2 + $0x20] sm:$0xff] %vm3122_vm1, %v2998_v32  ;;  %v2744_v42 = vadd.f32 %v5677_v36, %v2123_v34  ;;  %v4672_v43 = vpop.f32.mrb[8].mxu0  ;;  %v1043_v44 = vpop.f32.mrb[9].mxu1  ;;  %4622 = vmatmul.mubr.msk.f32.gmra.mrb[114].mxu1 %vm552_vm0, %v4011_v26  ;;  %v3770_v26 = vunpack.c.l.bf16 %v4096_v13  ;;  %v4030_v41 = vunpack.c.l.bf16 %v4160_v27 }
  0xf9   :  { %v3001_v46 = vadd.f32 %v2873_v33, %v2745_v38  ;;  %v2138_v47 = vadd.f32 %v4672_v43, %v4464_v40  ;;  %v2132_v48 = vpop.f32.mrb[9].mxu0  ;;  %4830 = vmatmul.mubr.msk.f32.gmra.mrb[114].mxu0 %vm552_vm0, %v3755_v30  ;;  %4624 = vmatprep.mubr.msk.f32.mxu1 %vm552_vm0, %v4014_v31  ;;  %v4097_v31 = vld [vmem:[%s6426_s0 + $0x1f0] sm:$0xff]   ;;  %v3771_v40 = vunpack.c.h.bf16 %v4096_v13  ;;  %v2881_v43 = vld [vmem:[%s6431_s5 + $0x78] sm:$0xff] }
  0xfa   :  { %v3000_v51 = vadd.f32 %v2872_v39, %v2744_v42  ;;  %v2133_v53 = vadd.f32 %v2132_v48, %v1043_v44  ;;  %4832 = vmatprep.mubr.msk.f32.mxu0 %vm552_vm0, %v3758_v35  ;;  %v4027_v35 = vunpack.c.h.bf16 %v4159_v9  ;;  %v2880_v48 = vld [vmem:[%s6431_s5 + $0x70] sm:$0xff] }
  0xfb   :  { %3130 = vst.msk [vmem:[#allocation2 + $0x38] sm:$0xff] %vm3122_vm1, %v3001_v46  ;;  %v2747_v56 = vadd.f32 %v5677_v36, %v2138_v47  ;;  %v4467_v58 = vpop.f32.mrb[10].mxu1  ;;  %v4161_v46 = vld [vmem:[%s6427_s1 + $0x1f8] sm:$0xff]  }
  0xfc   :  { %3129 = vst.msk [vmem:[#allocation2 + $0x30] sm:$0xff] %vm3122_vm1, %v3000_v51  ;;  %v2746_v60 = vadd.f32 %v5677_v36, %v2133_v53  ;;  %v4675_v61 = vpop.f32.mrb[10].mxu0  ;;  %v1053_v62 = vpop.f32.mrb[11].mxu1  ;;  %4625 = vmatmul.mubr.msk.f32.gmra.mrb[116].mxu1 %vm552_vm0, %v4015_v45  ;;  %v3774_v45 = vunpack.c.l.bf16 %v4097_v31  ;;  %v4034_v59 = vunpack.c.l.bf16 %v4161_v46 }
  0xfd   :  { %v3003_v0 = vadd.f32 %v2875_v52, %v2747_v56  ;;  %v2148_v1 = vadd.f32 %v4675_v61, %v4467_v58  ;;  %v2142_v2 = vpop.f32.mrb[11].mxu0  ;;  %4833 = vmatmul.mubr.msk.f32.gmra.mrb[116].mxu0 %vm552_vm0, %v3759_v49  ;;  %4627 = vmatprep.mubr.msk.f32.mxu1 %vm552_vm0, %v4018_v50  ;;  %v4098_v50 = vld [vmem:[%s6426_s0 + $0x1f8] sm:$0xff]   ;;  %v3775_v58 = vunpack.c.h.bf16 %v4097_v31  ;;  %v2883_v61 = vld [vmem:[%s6431_s5 + $0x88] sm:$0xff] }
  0xfe   :  { %v3002_v5 = vadd.f32 %v2874_v57, %v2746_v60  ;;  %v2143_v7 = vadd.f32 %v2142_v2, %v1053_v62  ;;  %4835 = vmatprep.mubr.msk.f32.mxu0 %vm552_vm0, %v3762_v54  ;;  %v4031_v54 = vunpack.c.h.bf16 %v4160_v27  ;;  %v2886_v27 = vld [vmem:[%s6431_s5 + $0xa0] sm:$0xff] }
  0xff   :  { %3132 = vst.msk [vmem:[#allocation2 + $0x48] sm:$0xff] %vm3122_vm1, %v3003_v0  ;;  %v2749_v10 = vadd.f32 %v5677_v36, %v2148_v1  ;;  %v4470_v12 = vpop.f32.mrb[12].mxu1  ;;  %v2882_v1 = vld [vmem:[%s6431_s5 + $0x80] sm:$0xff] }
 0x100   :  { %3131 = vst.msk [vmem:[#allocation2 + $0x40] sm:$0xff] %vm3122_vm1, %v3002_v5  ;;  %v2748_v14 = vadd.f32 %v5677_v36, %v2143_v7  ;;  %v4678_v15 = vpop.f32.mrb[12].mxu0  ;;  %v1063_v16 = vpop.f32.mrb[13].mxu1  ;;  %4628 = vmatmul.mubr.msk.f32.gmra.mrb[118].mxu1 %vm552_vm0, %v4019_v63  ;;  %v3778_v63 = vunpack.c.l.bf16 %v4098_v50 }
 0x101   :  { %v3005_v18 = vadd.f32 %v2877_v6, %v2749_v10  ;;  %v2158_v19 = vadd.f32 %v4678_v15, %v4470_v12  ;;  %v2152_v20 = vpop.f32.mrb[13].mxu0  ;;  %4836 = vmatmul.mubr.msk.f32.gmra.mrb[118].mxu0 %vm552_vm0, %v3763_v3  ;;  %4630 = vmatprep.mubr.msk.f32.mxu1 %vm552_vm0, %v4022_v4  ;;  %v4035_v6 = vunpack.c.h.bf16 %v4161_v46  ;;  %v3779_v10 = vunpack.c.h.bf16 %v4098_v50  ;;  %v2885_v12 = vld [vmem:[%s6431_s5 + $0x98] sm:$0xff]  ;;  %v2884_v15 = vld [vmem:[%s6431_s5 + $0x90] sm:$0xff] }
 0x102   :  { %v3004_v23 = vadd.f32 %v2876_v11, %v2748_v14  ;;  %v2153_v25 = vadd.f32 %v2152_v20, %v1063_v16  ;;  %4838 = vmatprep.mubr.msk.f32.mxu0 %vm552_vm0, %v3766_v8 }
 0x103   :  { %3134 = vst.msk [vmem:[#allocation2 + $0x58] sm:$0xff] %vm3122_vm1, %v3005_v18  ;;  %v2751_v28 = vadd.f32 %v5677_v36, %v2158_v19  ;;  %v4473_v30 = vpop.f32.mrb[14].mxu1 }
 0x104   :  { %3133 = vst.msk [vmem:[#allocation2 + $0x50] sm:$0xff] %vm3122_vm1, %v3004_v23  ;;  %v2750_v32 = vadd.f32 %v5677_v36, %v2153_v25  ;;  %v4681_v33 = vpop.f32.mrb[14].mxu0  ;;  %v1073_v34 = vpop.f32.mrb[15].mxu1  ;;  %4631 = vmatmul.mubr.msk.f32.gmra.mrb[120].mxu1 %vm552_vm0, %v4023_v17 }
 0x105   :  { %v3007_v37 = vadd.f32 %v2879_v24, %v2751_v28  ;;  %v2168_v38 = vadd.f32 %v4681_v33, %v4473_v30  ;;  %v2162_v39 = vpop.f32.mrb[15].mxu0  ;;  %4839 = vmatmul.mubr.msk.f32.gmra.mrb[120].mxu0 %vm552_vm0, %v3767_v21  ;;  %4633 = vmatprep.mubr.msk.f32.mxu1 %vm552_vm0, %v4026_v22  ;;  %v2887_v24 = vld [vmem:[%s6431_s5 + $0xa8] sm:$0xff] }
 0x106   :  { %v3006_v42 = vadd.f32 %v2878_v29, %v2750_v32  ;;  %v2163_v44 = vadd.f32 %v2162_v39, %v1073_v34  ;;  %4841 = vmatprep.mubr.msk.f32.mxu0 %vm552_vm0, %v3770_v26 }
 0x107   :  { %3136 = vst.msk [vmem:[#allocation2 + $0x68] sm:$0xff] %vm3122_vm1, %v3007_v37  ;;  %v2753_v47 = vadd.f32 %v5677_v36, %v2168_v38  ;;  %v4476_v49 = vpop.f32.mrb[16].mxu1  ;;  %v2889_v37 = vld [vmem:[%s6431_s5 + $0xb8] sm:$0xff] }
 0x108   :  { %3135 = vst.msk [vmem:[#allocation2 + $0x60] sm:$0xff] %vm3122_vm1, %v3006_v42  ;;  %v2752_v51 = vadd.f32 %v5677_v36, %v2163_v44  ;;  %v4684_v52 = vpop.f32.mrb[16].mxu0  ;;  %v1083_v53 = vpop.f32.mrb[17].mxu1  ;;  %4634 = vmatmul.mubr.msk.f32.gmra.mrb[122].mxu1 %vm552_vm0, %v4027_v35 }
 0x109   :  { %v3009_v55 = vadd.f32 %v2881_v43, %v2753_v47  ;;  %v2178_v56 = vadd.f32 %v4684_v52, %v4476_v49  ;;  %v2172_v57 = vpop.f32.mrb[17].mxu0  ;;  %4842 = vmatmul.mubr.msk.f32.gmra.mrb[122].mxu0 %vm552_vm0, %v3771_v40  ;;  %4636 = vmatprep.mubr.msk.f32.mxu1 %vm552_vm0, %v4030_v41  ;;  %v2888_v40 = vld [vmem:[%s6431_s5 + $0xb0] sm:$0xff]  ;;  %v2891_v49 = vld [vmem:[%s6431_s5 + $0xc8] sm:$0xff]  ;;  %v2890_v52 = vld [vmem:[%s6431_s5 + $0xc0] sm:$0xff] }
 0x10a   :  { %v3008_v60 = vadd.f32 %v2880_v48, %v2752_v51  ;;  %v2173_v62 = vadd.f32 %v2172_v57, %v1083_v53  ;;  %4844 = vmatprep.mubr.msk.f32.mxu0 %vm552_vm0, %v3774_v45 }
 0x10b   :  { %3138 = vst.msk [vmem:[#allocation2 + $0x78] sm:$0xff] %vm3122_vm1, %v3009_v55  ;;  %v2755_v0 = vadd.f32 %v5677_v36, %v2178_v56  ;;  %v4479_v2 = vpop.f32.mrb[18].mxu1 }
 0x10c   :  { %3137 = vst.msk [vmem:[#allocation2 + $0x70] sm:$0xff] %vm3122_vm1, %v3008_v60  ;;  %v2754_v3 = vadd.f32 %v5677_v36, %v2173_v62  ;;  %v4687_v4 = vpop.f32.mrb[18].mxu0  ;;  %v1093_v5 = vpop.f32.mrb[19].mxu1  ;;  %4637 = vmatmul.mubr.msk.f32.gmra.mrb[124].mxu1 %vm552_vm0, %v4031_v54 }
 0x10d   :  { %v3011_v7 = vadd.f32 %v2883_v61, %v2755_v0  ;;  %v2188_v8 = vadd.f32 %v4687_v4, %v4479_v2  ;;  %v2182_v9 = vpop.f32.mrb[19].mxu0  ;;  %4845 = vmatmul.mubr.msk.f32.gmra.mrb[124].mxu0 %vm552_vm0, %v3775_v58  ;;  %4639 = vmatprep.mubr.msk.f32.mxu1 %vm552_vm0, %v4034_v59  ;;  %v2893_v61 = vld [vmem:[%s6431_s5 + $0xd8] sm:$0xff]  ;;  %v2892_v0 = vld [vmem:[%s6431_s5 + $0xd0] sm:$0xff] }
 0x10e   :  { %v3010_v11 = vadd.f32 %v2882_v1, %v2754_v3  ;;  %v2183_v13 = vadd.f32 %v2182_v9, %v1093_v5  ;;  %4847 = vmatprep.mubr.msk.f32.mxu0 %vm552_vm0, %v3778_v63  ;;  %v2895_v9 = vld [vmem:[%s6431_s5 + $0xe8] sm:$0xff] }
 0x10f   :  { %3140 = vst.msk [vmem:[#allocation2 + $0x88] sm:$0xff] %vm3122_vm1, %v3011_v7  ;;  %v2757_v14 = vadd.f32 %v5677_v36, %v2188_v8  ;;  %v4482_v16 = vpop.f32.mrb[20].mxu1 }
 0x110   :  { %3139 = vst.msk [vmem:[#allocation2 + $0x80] sm:$0xff] %vm3122_vm1, %v3010_v11  ;;  %v2756_v17 = vadd.f32 %v5677_v36, %v2183_v13  ;;  %v4690_v18 = vpop.f32.mrb[20].mxu0  ;;  %v1103_v19 = vpop.f32.mrb[21].mxu1  ;;  %4640 = vmatmul.mubr.msk.f32.gmra.mrb[126].mxu1 %vm552_vm0, %v4035_v6 }
 0x111   :  { %v3013_v20 = vadd.f32 %v2885_v12, %v2757_v14  ;;  %v2198_v21 = vadd.f32 %v4690_v18, %v4482_v16  ;;  %v2192_v22 = vpop.f32.mrb[21].mxu0  ;;  %4848 = vmatmul.mubr.msk.f32.gmra.mrb[126].mxu0 %vm552_vm0, %v3779_v10  ;;  %v2894_v12 = vld [vmem:[%s6431_s5 + $0xe0] sm:$0xff] }
 0x112   :  { %v3012_v23 = vadd.f32 %v2884_v15, %v2756_v17  ;;  %v2193_v25 = vadd.f32 %v2192_v22, %v1103_v19 }
 0x113   :  { %3142 = vst.msk [vmem:[#allocation2 + $0x98] sm:$0xff] %vm3122_vm1, %v3013_v20  ;;  %v2759_v26 = vadd.f32 %v5677_v36, %v2198_v21  ;;  %v4485_v28 = vpop.f32.mrb[22].mxu1  ;;  %v2897_v21 = vld [vmem:[%s6431_s5 + $0xf8] sm:$0xff] }
 0x114   :  { %3141 = vst.msk [vmem:[#allocation2 + $0x90] sm:$0xff] %vm3122_vm1, %v3012_v23  ;;  %v2758_v29 = vadd.f32 %v5677_v36, %v2193_v25  ;;  %v4693_v30 = vpop.f32.mrb[22].mxu0  ;;  %v1113_v31 = vpop.f32.mrb[23].mxu1 }
 0x115   :  { %v3015_v32 = vadd.f32 %v2887_v24, %v2759_v26  ;;  %v2208_v33 = vadd.f32 %v4693_v30, %v4485_v28  ;;  %v2202_v34 = vpop.f32.mrb[23].mxu0  ;;  %v2896_v24 = vld [vmem:[%s6431_s5 + $0xf0] sm:$0xff] }
 0x116   :  { %v3014_v35 = vadd.f32 %v2886_v27, %v2758_v29  ;;  %v2203_v38 = vadd.f32 %v2202_v34, %v1113_v31 }
 0x117   :  { %3144 = vst.msk [vmem:[#allocation2 + $0xa8] sm:$0xff] %vm3122_vm1, %v3015_v32  ;;  %v2761_v39 = vadd.f32 %v5677_v36, %v2208_v33  ;;  %v4488_v41 = vpop.f32.mrb[24].mxu1  ;;  %v2899_v33 = vld [vmem:[%s6431_s5 + $0x108] sm:$0xff] }
 0x118   :  { %3143 = vst.msk [vmem:[#allocation2 + $0xa0] sm:$0xff] %vm3122_vm1, %v3014_v35  ;;  %v2760_v42 = vadd.f32 %v5677_v36, %v2203_v38  ;;  %v4696_v43 = vpop.f32.mrb[24].mxu0  ;;  %v1123_v44 = vpop.f32.mrb[25].mxu1 }
 0x119   :  { %v3017_v45 = vadd.f32 %v2889_v37, %v2761_v39  ;;  %v2218_v46 = vadd.f32 %v4696_v43, %v4488_v41  ;;  %v2212_v47 = vpop.f32.mrb[25].mxu0  ;;  %v2898_v37 = vld [vmem:[%s6431_s5 + $0x100] sm:$0xff] }
 0x11a   :  { %v3016_v48 = vadd.f32 %v2888_v40, %v2760_v42  ;;  %v2213_v50 = vadd.f32 %v2212_v47, %v1123_v44 }
 0x11b   :  { %3146 = vst.msk [vmem:[#allocation2 + $0xb8] sm:$0xff] %vm3122_vm1, %v3017_v45  ;;  %v2763_v51 = vadd.f32 %v5677_v36, %v2218_v46  ;;  %v4491_v53 = vpop.f32.mrb[26].mxu1  ;;  %v2901_v46 = vld [vmem:[%s6431_s5 + $0x118] sm:$0xff] }
 0x11c   :  { %3145 = vst.msk [vmem:[#allocation2 + $0xb0] sm:$0xff] %vm3122_vm1, %v3016_v48  ;;  %v2762_v54 = vadd.f32 %v5677_v36, %v2213_v50  ;;  %v4699_v55 = vpop.f32.mrb[26].mxu0  ;;  %v1133_v56 = vpop.f32.mrb[27].mxu1 }
 0x11d   :  { %v3019_v57 = vadd.f32 %v2891_v49, %v2763_v51  ;;  %v2228_v58 = vadd.f32 %v4699_v55, %v4491_v53  ;;  %v2222_v59 = vpop.f32.mrb[27].mxu0  ;;  %v2900_v49 = vld [vmem:[%s6431_s5 + $0x110] sm:$0xff] }
 0x11e   :  { %v3018_v60 = vadd.f32 %v2890_v52, %v2762_v54  ;;  %v2223_v62 = vadd.f32 %v2222_v59, %v1133_v56 }
 0x11f   :  { %3148 = vst.msk [vmem:[#allocation2 + $0xc8] sm:$0xff] %vm3122_vm1, %v3019_v57  ;;  %v2765_v63 = vadd.f32 %v5677_v36, %v2228_v58  ;;  %v4494_v1 = vpop.f32.mrb[28].mxu1  ;;  %v2903_v58 = vld [vmem:[%s6431_s5 + $0x128] sm:$0xff] }
 0x120   :  { %3147 = vst.msk [vmem:[#allocation2 + $0xc0] sm:$0xff] %vm3122_vm1, %v3018_v60  ;;  %v2764_v2 = vadd.f32 %v5677_v36, %v2223_v62  ;;  %v4702_v3 = vpop.f32.mrb[28].mxu0  ;;  %v1143_v4 = vpop.f32.mrb[29].mxu1 }
 0x121   :  { %v3021_v5 = vadd.f32 %v2893_v61, %v2765_v63  ;;  %v2238_v6 = vadd.f32 %v4702_v3, %v4494_v1  ;;  %v2232_v7 = vpop.f32.mrb[29].mxu0  ;;  %v2902_v61 = vld [vmem:[%s6431_s5 + $0x120] sm:$0xff] }
 0x122   :  { %v3020_v8 = vadd.f32 %v2892_v0, %v2764_v2  ;;  %v2233_v10 = vadd.f32 %v2232_v7, %v1143_v4 }
 0x123   :  { %3150 = vst.msk [vmem:[#allocation2 + $0xd8] sm:$0xff] %vm3122_vm1, %v3021_v5  ;;  %v2767_v11 = vadd.f32 %v5677_v36, %v2238_v6  ;;  %v4497_v13 = vpop.f32.mrb[30].mxu1  ;;  %v2905_v6 = vld [vmem:[%s6431_s5 + $0x138] sm:$0xff] }
 0x124   :  { %3149 = vst.msk [vmem:[#allocation2 + $0xd0] sm:$0xff] %vm3122_vm1, %v3020_v8  ;;  %v2766_v14 = vadd.f32 %v5677_v36, %v2233_v10  ;;  %v4705_v15 = vpop.f32.mrb[30].mxu0  ;;  %v1153_v16 = vpop.f32.mrb[31].mxu1 }
 0x125   :  { %v3023_v17 = vadd.f32 %v2895_v9, %v2767_v11  ;;  %v2248_v18 = vadd.f32 %v4705_v15, %v4497_v13  ;;  %v2242_v19 = vpop.f32.mrb[31].mxu0  ;;  %v2904_v9 = vld [vmem:[%s6431_s5 + $0x130] sm:$0xff] }
 0x126   :  { %v3022_v20 = vadd.f32 %v2894_v12, %v2766_v14  ;;  %v2243_v22 = vadd.f32 %v2242_v19, %v1153_v16 }
 0x127   :  { %3152 = vst.msk [vmem:[#allocation2 + $0xe8] sm:$0xff] %vm3122_vm1, %v3023_v17  ;;  %v2769_v23 = vadd.f32 %v5677_v36, %v2248_v18  ;;  %v4500_v25 = vpop.f32.mrb[32].mxu1  ;;  %v2907_v18 = vld [vmem:[%s6431_s5 + $0x148] sm:$0xff] }
 0x128   :  { %3151 = vst.msk [vmem:[#allocation2 + $0xe0] sm:$0xff] %vm3122_vm1, %v3022_v20  ;;  %v2768_v26 = vadd.f32 %v5677_v36, %v2243_v22  ;;  %v4708_v27 = vpop.f32.mrb[32].mxu0  ;;  %v1163_v28 = vpop.f32.mrb[33].mxu1 }
 0x129   :  { %v3025_v29 = vadd.f32 %v2897_v21, %v2769_v23  ;;  %v2258_v30 = vadd.f32 %v4708_v27, %v4500_v25  ;;  %v2252_v31 = vpop.f32.mrb[33].mxu0  ;;  %v2906_v21 = vld [vmem:[%s6431_s5 + $0x140] sm:$0xff] }
 0x12a   :  { %v3024_v32 = vadd.f32 %v2896_v24, %v2768_v26  ;;  %v2253_v34 = vadd.f32 %v2252_v31, %v1163_v28 }
 0x12b   :  { %3154 = vst.msk [vmem:[#allocation2 + $0xf8] sm:$0xff] %vm3122_vm1, %v3025_v29  ;;  %v2771_v35 = vadd.f32 %v5677_v36, %v2258_v30  ;;  %v4503_v38 = vpop.f32.mrb[34].mxu1  ;;  %v2909_v30 = vld [vmem:[%s6431_s5 + $0x158] sm:$0xff] }
 0x12c   :  { %3153 = vst.msk [vmem:[#allocation2 + $0xf0] sm:$0xff] %vm3122_vm1, %v3024_v32  ;;  %v2770_v39 = vadd.f32 %v5677_v36, %v2253_v34  ;;  %v4711_v40 = vpop.f32.mrb[34].mxu0  ;;  %v1173_v41 = vpop.f32.mrb[35].mxu1 }
 0x12d   :  { %v3027_v42 = vadd.f32 %v2899_v33, %v2771_v35  ;;  %v2268_v43 = vadd.f32 %v4711_v40, %v4503_v38  ;;  %v2262_v44 = vpop.f32.mrb[35].mxu0  ;;  %v2908_v33 = vld [vmem:[%s6431_s5 + $0x150] sm:$0xff] }
 0x12e   :  { %v3026_v45 = vadd.f32 %v2898_v37, %v2770_v39  ;;  %v2263_v47 = vadd.f32 %v2262_v44, %v1173_v41 }
 0x12f   :  { %3156 = vst.msk [vmem:[#allocation2 + $0x108] sm:$0xff] %vm3122_vm1, %v3027_v42  ;;  %v2773_v48 = vadd.f32 %v5677_v36, %v2268_v43  ;;  %v4506_v50 = vpop.f32.mrb[36].mxu1  ;;  %v2911_v43 = vld [vmem:[%s6431_s5 + $0x168] sm:$0xff] }
 0x130   :  { %3155 = vst.msk [vmem:[#allocation2 + $0x100] sm:$0xff] %vm3122_vm1, %v3026_v45  ;;  %v2772_v51 = vadd.f32 %v5677_v36, %v2263_v47  ;;  %v4714_v52 = vpop.f32.mrb[36].mxu0  ;;  %v1183_v53 = vpop.f32.mrb[37].mxu1 }
 0x131   :  { %v3029_v54 = vadd.f32 %v2901_v46, %v2773_v48  ;;  %v2278_v55 = vadd.f32 %v4714_v52, %v4506_v50  ;;  %v2272_v56 = vpop.f32.mrb[37].mxu0  ;;  %v2910_v46 = vld [vmem:[%s6431_s5 + $0x160] sm:$0xff] }
 0x132   :  { %v3028_v57 = vadd.f32 %v2900_v49, %v2772_v51  ;;  %v2273_v59 = vadd.f32 %v2272_v56, %v1183_v53 }
 0x133   :  { %3158 = vst.msk [vmem:[#allocation2 + $0x118] sm:$0xff] %vm3122_vm1, %v3029_v54  ;;  %v2775_v60 = vadd.f32 %v5677_v36, %v2278_v55  ;;  %v4509_v62 = vpop.f32.mrb[38].mxu1  ;;  %v2913_v55 = vld [vmem:[%s6431_s5 + $0x178] sm:$0xff] }
 0x134   :  { %3157 = vst.msk [vmem:[#allocation2 + $0x110] sm:$0xff] %vm3122_vm1, %v3028_v57  ;;  %v2774_v63 = vadd.f32 %v5677_v36, %v2273_v59  ;;  %v4717_v0 = vpop.f32.mrb[38].mxu0  ;;  %v1193_v1 = vpop.f32.mrb[39].mxu1 }
 0x135   :  { %v3031_v2 = vadd.f32 %v2903_v58, %v2775_v60  ;;  %v2288_v3 = vadd.f32 %v4717_v0, %v4509_v62  ;;  %v2282_v4 = vpop.f32.mrb[39].mxu0  ;;  %v2912_v58 = vld [vmem:[%s6431_s5 + $0x170] sm:$0xff] }
 0x136   :  { %v3030_v5 = vadd.f32 %v2902_v61, %v2774_v63  ;;  %v2283_v7 = vadd.f32 %v2282_v4, %v1193_v1 }
 0x137   :  { %3160 = vst.msk [vmem:[#allocation2 + $0x128] sm:$0xff] %vm3122_vm1, %v3031_v2  ;;  %v2777_v8 = vadd.f32 %v5677_v36, %v2288_v3  ;;  %v4512_v10 = vpop.f32.mrb[40].mxu1  ;;  %v2915_v3 = vld [vmem:[%s6431_s5 + $0x188] sm:$0xff] }
 0x138   :  { %3159 = vst.msk [vmem:[#allocation2 + $0x120] sm:$0xff] %vm3122_vm1, %v3030_v5  ;;  %v2776_v11 = vadd.f32 %v5677_v36, %v2283_v7  ;;  %v4720_v12 = vpop.f32.mrb[40].mxu0  ;;  %v1203_v13 = vpop.f32.mrb[41].mxu1 }
 0x139   :  { %v3033_v14 = vadd.f32 %v2905_v6, %v2777_v8  ;;  %v2298_v15 = vadd.f32 %v4720_v12, %v4512_v10  ;;  %v2292_v16 = vpop.f32.mrb[41].mxu0  ;;  %v2914_v6 = vld [vmem:[%s6431_s5 + $0x180] sm:$0xff] }
 0x13a   :  { %v3032_v17 = vadd.f32 %v2904_v9, %v2776_v11  ;;  %v2293_v19 = vadd.f32 %v2292_v16, %v1203_v13 }
 0x13b   :  { %3162 = vst.msk [vmem:[#allocation2 + $0x138] sm:$0xff] %vm3122_vm1, %v3033_v14  ;;  %v2779_v20 = vadd.f32 %v5677_v36, %v2298_v15  ;;  %v4515_v22 = vpop.f32.mrb[42].mxu1  ;;  %v2917_v15 = vld [vmem:[%s6431_s5 + $0x198] sm:$0xff] }
 0x13c   :  { %3161 = vst.msk [vmem:[#allocation2 + $0x130] sm:$0xff] %vm3122_vm1, %v3032_v17  ;;  %v2778_v23 = vadd.f32 %v5677_v36, %v2293_v19  ;;  %v4723_v24 = vpop.f32.mrb[42].mxu0  ;;  %v1213_v25 = vpop.f32.mrb[43].mxu1 }
 0x13d   :  { %v3035_v26 = vadd.f32 %v2907_v18, %v2779_v20  ;;  %v2308_v27 = vadd.f32 %v4723_v24, %v4515_v22  ;;  %v2302_v28 = vpop.f32.mrb[43].mxu0  ;;  %v2916_v18 = vld [vmem:[%s6431_s5 + $0x190] sm:$0xff] }
 0x13e   :  { %v3034_v29 = vadd.f32 %v2906_v21, %v2778_v23  ;;  %v2303_v31 = vadd.f32 %v2302_v28, %v1213_v25 }
 0x13f   :  { %3164 = vst.msk [vmem:[#allocation2 + $0x148] sm:$0xff] %vm3122_vm1, %v3035_v26  ;;  %v2781_v32 = vadd.f32 %v5677_v36, %v2308_v27  ;;  %v4518_v34 = vpop.f32.mrb[44].mxu1  ;;  %v2919_v27 = vld [vmem:[%s6431_s5 + $0x1a8] sm:$0xff] }
 0x140   :  { %3163 = vst.msk [vmem:[#allocation2 + $0x140] sm:$0xff] %vm3122_vm1, %v3034_v29  ;;  %v2780_v35 = vadd.f32 %v5677_v36, %v2303_v31  ;;  %v4726_v37 = vpop.f32.mrb[44].mxu0  ;;  %v1223_v38 = vpop.f32.mrb[45].mxu1 }
 0x141   :  { %v3037_v39 = vadd.f32 %v2909_v30, %v2781_v32  ;;  %v2318_v40 = vadd.f32 %v4726_v37, %v4518_v34  ;;  %v2312_v41 = vpop.f32.mrb[45].mxu0  ;;  %v2918_v30 = vld [vmem:[%s6431_s5 + $0x1a0] sm:$0xff] }
 0x142   :  { %v3036_v42 = vadd.f32 %v2908_v33, %v2780_v35  ;;  %v2313_v44 = vadd.f32 %v2312_v41, %v1223_v38 }
 0x143   :  { %3166 = vst.msk [vmem:[#allocation2 + $0x158] sm:$0xff] %vm3122_vm1, %v3037_v39  ;;  %v2783_v45 = vadd.f32 %v5677_v36, %v2318_v40  ;;  %v4521_v47 = vpop.f32.mrb[46].mxu1  ;;  %v2921_v40 = vld [vmem:[%s6431_s5 + $0x1b8] sm:$0xff] }
 0x144   :  { %3165 = vst.msk [vmem:[#allocation2 + $0x150] sm:$0xff] %vm3122_vm1, %v3036_v42  ;;  %v2782_v48 = vadd.f32 %v5677_v36, %v2313_v44  ;;  %v4729_v49 = vpop.f32.mrb[46].mxu0  ;;  %v1233_v50 = vpop.f32.mrb[47].mxu1 }
 0x145   :  { %v3039_v51 = vadd.f32 %v2911_v43, %v2783_v45  ;;  %v2328_v52 = vadd.f32 %v4729_v49, %v4521_v47  ;;  %v2322_v53 = vpop.f32.mrb[47].mxu0  ;;  %v2920_v43 = vld [vmem:[%s6431_s5 + $0x1b0] sm:$0xff] }
 0x146   :  { %v3038_v54 = vadd.f32 %v2910_v46, %v2782_v48  ;;  %v2323_v56 = vadd.f32 %v2322_v53, %v1233_v50 }
 0x147   :  { %3168 = vst.msk [vmem:[#allocation2 + $0x168] sm:$0xff] %vm3122_vm1, %v3039_v51  ;;  %v2785_v57 = vadd.f32 %v5677_v36, %v2328_v52  ;;  %v4524_v59 = vpop.f32.mrb[48].mxu1  ;;  %v2923_v52 = vld [vmem:[%s6431_s5 + $0x1c8] sm:$0xff] }
 0x148   :  { %3167 = vst.msk [vmem:[#allocation2 + $0x160] sm:$0xff] %vm3122_vm1, %v3038_v54  ;;  %v2784_v60 = vadd.f32 %v5677_v36, %v2323_v56  ;;  %v4732_v61 = vpop.f32.mrb[48].mxu0  ;;  %v1243_v62 = vpop.f32.mrb[49].mxu1 }
 0x149   :  { %v3041_v63 = vadd.f32 %v2913_v55, %v2785_v57  ;;  %v2338_v0 = vadd.f32 %v4732_v61, %v4524_v59  ;;  %v2332_v1 = vpop.f32.mrb[49].mxu0  ;;  %v2922_v55 = vld [vmem:[%s6431_s5 + $0x1c0] sm:$0xff] }
 0x14a   :  { %v3040_v2 = vadd.f32 %v2912_v58, %v2784_v60  ;;  %v2333_v4 = vadd.f32 %v2332_v1, %v1243_v62 }
 0x14b   :  { %3170 = vst.msk [vmem:[#allocation2 + $0x178] sm:$0xff] %vm3122_vm1, %v3041_v63  ;;  %v2787_v5 = vadd.f32 %v5677_v36, %v2338_v0  ;;  %v4527_v7 = vpop.f32.mrb[50].mxu1  ;;  %v2925_v0 = vld [vmem:[%s6431_s5 + $0x1d8] sm:$0xff] }
 0x14c   :  { %3169 = vst.msk [vmem:[#allocation2 + $0x170] sm:$0xff] %vm3122_vm1, %v3040_v2  ;;  %v2786_v8 = vadd.f32 %v5677_v36, %v2333_v4  ;;  %v4735_v9 = vpop.f32.mrb[50].mxu0  ;;  %v1253_v10 = vpop.f32.mrb[51].mxu1 }
 0x14d   :  { %v3043_v11 = vadd.f32 %v2915_v3, %v2787_v5  ;;  %v2348_v12 = vadd.f32 %v4735_v9, %v4527_v7  ;;  %v2342_v13 = vpop.f32.mrb[51].mxu0  ;;  %v2924_v3 = vld [vmem:[%s6431_s5 + $0x1d0] sm:$0xff]  ;;  %v6069_v5 = vld [vmem:[%s6430_s4] ss:$0 sm:$0xff] }
 0x14e   :  { %v3042_v14 = vadd.f32 %v2914_v6, %v2786_v8  ;;  %v2343_v16 = vadd.f32 %v2342_v13, %v1253_v10 }
 0x14f   :  { %3172 = vst.msk [vmem:[#allocation2 + $0x188] sm:$0xff] %vm3122_vm1, %v3043_v11  ;;  %v2789_v17 = vadd.f32 %v5677_v36, %v2348_v12  ;;  %v4530_v19 = vpop.f32.mrb[52].mxu1  ;;  %v2927_v12 = vld [vmem:[%s6431_s5 + $0x1e8] sm:$0xff] }
 0x150   :  { %3171 = vst.msk [vmem:[#allocation2 + $0x180] sm:$0xff] %vm3122_vm1, %v3042_v14  ;;  %v2788_v20 = vadd.f32 %v5677_v36, %v2343_v16  ;;  %v4738_v21 = vpop.f32.mrb[52].mxu0  ;;  %v1263_v22 = vpop.f32.mrb[53].mxu1 }
 0x151   :  { %v3045_v23 = vadd.f32 %v2917_v15, %v2789_v17  ;;  %v2358_v24 = vadd.f32 %v4738_v21, %v4530_v19  ;;  %v2352_v25 = vpop.f32.mrb[53].mxu0  ;;  %v2926_v15 = vld [vmem:[%s6431_s5 + $0x1e0] sm:$0xff] }
 0x152   :  { %v3044_v26 = vadd.f32 %v2916_v18, %v2788_v20  ;;  %v2353_v28 = vadd.f32 %v2352_v25, %v1263_v22 }
 0x153   :  { %3174 = vst.msk [vmem:[#allocation2 + $0x198] sm:$0xff] %vm3122_vm1, %v3045_v23  ;;  %v2791_v29 = vadd.f32 %v5677_v36, %v2358_v24  ;;  %v4533_v31 = vpop.f32.mrb[54].mxu1  ;;  %v2929_v24 = vld [vmem:[%s6431_s5 + $0x1f8] sm:$0xff] }
 0x154   :  { %3173 = vst.msk [vmem:[#allocation2 + $0x190] sm:$0xff] %vm3122_vm1, %v3044_v26  ;;  %v2790_v32 = vadd.f32 %v5677_v36, %v2353_v28  ;;  %v4741_v33 = vpop.f32.mrb[54].mxu0  ;;  %v1273_v34 = vpop.f32.mrb[55].mxu1 }
 0x155   :  { %v3047_v35 = vadd.f32 %v2919_v27, %v2791_v29  ;;  %v2368_v37 = vadd.f32 %v4741_v33, %v4533_v31  ;;  %v2362_v38 = vpop.f32.mrb[55].mxu0  ;;  %v2928_v27 = vld [vmem:[%s6431_s5 + $0x1f0] sm:$0xff] }
 0x156   :  { %v3046_v39 = vadd.f32 %v2918_v30, %v2790_v32  ;;  %v2363_v41 = vadd.f32 %v2362_v38, %v1273_v34 }
 0x157   :  { %3176 = vst.msk [vmem:[#allocation2 + $0x1a8] sm:$0xff] %vm3122_vm1, %v3047_v35  ;;  %v2793_v42 = vadd.f32 %v5677_v36, %v2368_v37  ;;  %v4536_v44 = vpop.f32.mrb[56].mxu1  ;;  %v2931_v37 = vld [vmem:[%s6431_s5 + $0x208] sm:$0xff] }
 0x158   :  { %3175 = vst.msk [vmem:[#allocation2 + $0x1a0] sm:$0xff] %vm3122_vm1, %v3046_v39  ;;  %v2792_v45 = vadd.f32 %v5677_v36, %v2363_v41  ;;  %v4744_v46 = vpop.f32.mrb[56].mxu0  ;;  %v1283_v47 = vpop.f32.mrb[57].mxu1 }
 0x159   :  { %v3049_v48 = vadd.f32 %v2921_v40, %v2793_v42  ;;  %v2378_v49 = vadd.f32 %v4744_v46, %v4536_v44  ;;  %v2372_v50 = vpop.f32.mrb[57].mxu0  ;;  %v2930_v40 = vld [vmem:[%s6431_s5 + $0x200] sm:$0xff] }
 0x15a   :  { %v3048_v51 = vadd.f32 %v2920_v43, %v2792_v45  ;;  %v2373_v53 = vadd.f32 %v2372_v50, %v1283_v47 }
 0x15b   :  { %3178 = vst.msk [vmem:[#allocation2 + $0x1b8] sm:$0xff] %vm3122_vm1, %v3049_v48  ;;  %v2795_v54 = vadd.f32 %v5677_v36, %v2378_v49  ;;  %v4539_v56 = vpop.f32.mrb[58].mxu1  ;;  %v2933_v49 = vld [vmem:[%s6431_s5 + $0x218] sm:$0xff] }
 0x15c   :  { %3177 = vst.msk [vmem:[#allocation2 + $0x1b0] sm:$0xff] %vm3122_vm1, %v3048_v51  ;;  %v2794_v57 = vadd.f32 %v5677_v36, %v2373_v53  ;;  %v4747_v58 = vpop.f32.mrb[58].mxu0  ;;  %v1293_v59 = vpop.f32.mrb[59].mxu1 }
 0x15d   :  { %v3051_v60 = vadd.f32 %v2923_v52, %v2795_v54  ;;  %v2388_v61 = vadd.f32 %v4747_v58, %v4539_v56  ;;  %v2382_v62 = vpop.f32.mrb[59].mxu0  ;;  %v2932_v52 = vld [vmem:[%s6431_s5 + $0x210] sm:$0xff] }
 0x15e   :  { %v3050_v63 = vadd.f32 %v2922_v55, %v2794_v57  ;;  %v2383_v1 = vadd.f32 %v2382_v62, %v1293_v59 }
 0x15f   :  { %3180 = vst.msk [vmem:[#allocation2 + $0x1c8] sm:$0xff] %vm3122_vm1, %v3051_v60  ;;  %v2797_v2 = vadd.f32 %v5677_v36, %v2388_v61  ;;  %v4542_v4 = vpop.f32.mrb[60].mxu1  ;;  %v2935_v61 = vld [vmem:[%s6431_s5 + $0x228] sm:$0xff] }
 0x160   :  { %3179 = vst.msk [vmem:[#allocation2 + $0x1c0] sm:$0xff] %vm3122_vm1, %v3050_v63  ;;  %v2796_v6 = vadd.f32 %v6069_v5, %v2383_v1  ;;  %v4750_v7 = vpop.f32.mrb[60].mxu0  ;;  %v1303_v8 = vpop.f32.mrb[61].mxu1 }
 0x161   :  { %v3053_v9 = vadd.f32 %v2925_v0, %v2797_v2  ;;  %v2398_v10 = vadd.f32 %v4750_v7, %v4542_v4  ;;  %v2392_v11 = vpop.f32.mrb[61].mxu0  ;;  %v2934_v0 = vld [vmem:[%s6431_s5 + $0x220] sm:$0xff] }
 0x162   :  { %v3052_v36 = vadd.f32 %v2924_v3, %v2796_v6  ;;  %v2393_v13 = vadd.f32 %v2392_v11, %v1303_v8 }
 0x163   :  { %3182 = vst.msk [vmem:[#allocation2 + $0x1d8] sm:$0xff] %vm3122_vm1, %v3053_v9  ;;  %v2799_v14 = vadd.f32 %v6069_v5, %v2398_v10  ;;  %v4545_v16 = vpop.f32.mrb[62].mxu1  ;;  %v2937_v10 = vld [vmem:[%s6431_s5 + $0x238] sm:$0xff] }
 0x164   :  { %3181 = vst.msk [vmem:[#allocation2 + $0x1d0] sm:$0xff] %vm3122_vm1, %v3052_v36  ;;  %v2798_v17 = vadd.f32 %v6069_v5, %v2393_v13  ;;  %v4753_v18 = vpop.f32.mrb[62].mxu0  ;;  %v1313_v19 = vpop.f32.mrb[63].mxu1 }
 0x165   :  { %v3055_v20 = vadd.f32 %v2927_v12, %v2799_v14  ;;  %v2408_v21 = vadd.f32 %v4753_v18, %v4545_v16  ;;  %v2402_v22 = vpop.f32.mrb[63].mxu0  ;;  %v2936_v12 = vld [vmem:[%s6431_s5 + $0x230] sm:$0xff] }
 0x166   :  { %v3054_v23 = vadd.f32 %v2926_v15, %v2798_v17  ;;  %v2403_v25 = vadd.f32 %v2402_v22, %v1313_v19 }
 0x167   :  { %3184 = vst.msk [vmem:[#allocation2 + $0x1e8] sm:$0xff] %vm3122_vm1, %v3055_v20  ;;  %v2801_v26 = vadd.f32 %v6069_v5, %v2408_v21  ;;  %v4548_v28 = vpop.f32.mrb[64].mxu1  ;;  %v2939_v21 = vld [vmem:[%s6431_s5 + $0x248] sm:$0xff] }
 0x168   :  { %3183 = vst.msk [vmem:[#allocation2 + $0x1e0] sm:$0xff] %vm3122_vm1, %v3054_v23  ;;  %v2800_v29 = vadd.f32 %v6069_v5, %v2403_v25  ;;  %v4756_v30 = vpop.f32.mrb[64].mxu0  ;;  %v1323_v31 = vpop.f32.mrb[65].mxu1 }
 0x169   :  { %v3057_v32 = vadd.f32 %v2929_v24, %v2801_v26  ;;  %v2418_v33 = vadd.f32 %v4756_v30, %v4548_v28  ;;  %v2412_v34 = vpop.f32.mrb[65].mxu0  ;;  %v2938_v24 = vld [vmem:[%s6431_s5 + $0x240] sm:$0xff] }
 0x16a   :  { %v3056_v35 = vadd.f32 %v2928_v27, %v2800_v29  ;;  %v2413_v38 = vadd.f32 %v2412_v34, %v1323_v31 }
 0x16b   :  { %3186 = vst.msk [vmem:[#allocation2 + $0x1f8] sm:$0xff] %vm3122_vm1, %v3057_v32  ;;  %v2803_v39 = vadd.f32 %v6069_v5, %v2418_v33  ;;  %v4551_v41 = vpop.f32.mrb[66].mxu1  ;;  %v2941_v33 = vld [vmem:[%s6431_s5 + $0x258] sm:$0xff] }
 0x16c   :  { %3185 = vst.msk [vmem:[#allocation2 + $0x1f0] sm:$0xff] %vm3122_vm1, %v3056_v35  ;;  %v2802_v42 = vadd.f32 %v6069_v5, %v2413_v38  ;;  %v4759_v43 = vpop.f32.mrb[66].mxu0  ;;  %v1333_v44 = vpop.f32.mrb[67].mxu1 }
 0x16d   :  { %v3059_v45 = vadd.f32 %v2931_v37, %v2803_v39  ;;  %v2428_v46 = vadd.f32 %v4759_v43, %v4551_v41  ;;  %v2422_v47 = vpop.f32.mrb[67].mxu0  ;;  %v2940_v37 = vld [vmem:[%s6431_s5 + $0x250] sm:$0xff] }
 0x16e   :  { %v3058_v48 = vadd.f32 %v2930_v40, %v2802_v42  ;;  %v2423_v50 = vadd.f32 %v2422_v47, %v1333_v44 }
 0x16f   :  { %3188 = vst.msk [vmem:[#allocation2 + $0x208] sm:$0xff] %vm3122_vm1, %v3059_v45  ;;  %v2805_v51 = vadd.f32 %v6069_v5, %v2428_v46  ;;  %v4554_v53 = vpop.f32.mrb[68].mxu1  ;;  %v2943_v46 = vld [vmem:[%s6431_s5 + $0x268] sm:$0xff] }
 0x170   :  { %3187 = vst.msk [vmem:[#allocation2 + $0x200] sm:$0xff] %vm3122_vm1, %v3058_v48  ;;  %v2804_v54 = vadd.f32 %v6069_v5, %v2423_v50  ;;  %v4762_v55 = vpop.f32.mrb[68].mxu0  ;;  %v1343_v56 = vpop.f32.mrb[69].mxu1 }
 0x171   :  { %v3061_v57 = vadd.f32 %v2933_v49, %v2805_v51  ;;  %v2438_v58 = vadd.f32 %v4762_v55, %v4554_v53  ;;  %v2432_v59 = vpop.f32.mrb[69].mxu0  ;;  %v2942_v49 = vld [vmem:[%s6431_s5 + $0x260] sm:$0xff] }
 0x172   :  { %v3060_v60 = vadd.f32 %v2932_v52, %v2804_v54  ;;  %v2433_v62 = vadd.f32 %v2432_v59, %v1343_v56 }
 0x173   :  { %3190 = vst.msk [vmem:[#allocation2 + $0x218] sm:$0xff] %vm3122_vm1, %v3061_v57  ;;  %v2807_v63 = vadd.f32 %v6069_v5, %v2438_v58  ;;  %v4557_v1 = vpop.f32.mrb[70].mxu1  ;;  %v2945_v58 = vld [vmem:[%s6431_s5 + $0x278] sm:$0xff] }
 0x174   :  { %3189 = vst.msk [vmem:[#allocation2 + $0x210] sm:$0xff] %vm3122_vm1, %v3060_v60  ;;  %v2806_v2 = vadd.f32 %v6069_v5, %v2433_v62  ;;  %v4765_v3 = vpop.f32.mrb[70].mxu0  ;;  %v1353_v4 = vpop.f32.mrb[71].mxu1 }
 0x175   :  { %v3063_v6 = vadd.f32 %v2935_v61, %v2807_v63  ;;  %v2448_v7 = vadd.f32 %v4765_v3, %v4557_v1  ;;  %v2442_v8 = vpop.f32.mrb[71].mxu0  ;;  %v2944_v61 = vld [vmem:[%s6431_s5 + $0x270] sm:$0xff] }
 0x176   :  { %v3062_v9 = vadd.f32 %v2934_v0, %v2806_v2  ;;  %v2443_v11 = vadd.f32 %v2442_v8, %v1353_v4 }
 0x177   :  { %3192 = vst.msk [vmem:[#allocation2 + $0x228] sm:$0xff] %vm3122_vm1, %v3063_v6  ;;  %v2809_v36 = vadd.f32 %v6069_v5, %v2448_v7  ;;  %v4560_v13 = vpop.f32.mrb[72].mxu1  ;;  %v2947_v7 = vld [vmem:[%s6431_s5 + $0x288] sm:$0xff] }
 0x178   :  { %3191 = vst.msk [vmem:[#allocation2 + $0x220] sm:$0xff] %vm3122_vm1, %v3062_v9  ;;  %v2808_v14 = vadd.f32 %v6069_v5, %v2443_v11  ;;  %v4768_v15 = vpop.f32.mrb[72].mxu0  ;;  %v1363_v16 = vpop.f32.mrb[73].mxu1 }
 0x179   :  { %v3065_v17 = vadd.f32 %v2937_v10, %v2809_v36  ;;  %v2458_v18 = vadd.f32 %v4768_v15, %v4560_v13  ;;  %v2452_v19 = vpop.f32.mrb[73].mxu0  ;;  %v2946_v10 = vld [vmem:[%s6431_s5 + $0x280] sm:$0xff] }
 0x17a   :  { %v3064_v20 = vadd.f32 %v2936_v12, %v2808_v14  ;;  %v2453_v22 = vadd.f32 %v2452_v19, %v1363_v16 }
 0x17b   :  { %3194 = vst.msk [vmem:[#allocation2 + $0x238] sm:$0xff] %vm3122_vm1, %v3065_v17  ;;  %v2811_v23 = vadd.f32 %v6069_v5, %v2458_v18  ;;  %v4563_v25 = vpop.f32.mrb[74].mxu1  ;;  %v2949_v18 = vld [vmem:[%s6431_s5 + $0x298] sm:$0xff] }
 0x17c   :  { %3193 = vst.msk [vmem:[#allocation2 + $0x230] sm:$0xff] %vm3122_vm1, %v3064_v20  ;;  %v2810_v26 = vadd.f32 %v6069_v5, %v2453_v22  ;;  %v4771_v27 = vpop.f32.mrb[74].mxu0  ;;  %v1373_v28 = vpop.f32.mrb[75].mxu1 }
 0x17d   :  { %v3067_v29 = vadd.f32 %v2939_v21, %v2811_v23  ;;  %v2468_v30 = vadd.f32 %v4771_v27, %v4563_v25  ;;  %v2462_v31 = vpop.f32.mrb[75].mxu0  ;;  %v2948_v21 = vld [vmem:[%s6431_s5 + $0x290] sm:$0xff] }
 0x17e   :  { %v3066_v32 = vadd.f32 %v2938_v24, %v2810_v26  ;;  %v2463_v34 = vadd.f32 %v2462_v31, %v1373_v28 }
 0x17f   :  { %3196 = vst.msk [vmem:[#allocation2 + $0x248] sm:$0xff] %vm3122_vm1, %v3067_v29  ;;  %v2813_v35 = vadd.f32 %v6069_v5, %v2468_v30  ;;  %v4566_v38 = vpop.f32.mrb[76].mxu1  ;;  %v2951_v30 = vld [vmem:[%s6431_s5 + $0x2a8] sm:$0xff] }
 0x180   :  { %3195 = vst.msk [vmem:[#allocation2 + $0x240] sm:$0xff] %vm3122_vm1, %v3066_v32  ;;  %v2812_v39 = vadd.f32 %v6069_v5, %v2463_v34  ;;  %v4774_v40 = vpop.f32.mrb[76].mxu0  ;;  %v1383_v41 = vpop.f32.mrb[77].mxu1 }
 0x181   :  { %v3069_v42 = vadd.f32 %v2941_v33, %v2813_v35  ;;  %v2478_v43 = vadd.f32 %v4774_v40, %v4566_v38  ;;  %v2472_v44 = vpop.f32.mrb[77].mxu0  ;;  %v2950_v33 = vld [vmem:[%s6431_s5 + $0x2a0] sm:$0xff] }
 0x182   :  { %v3068_v45 = vadd.f32 %v2940_v37, %v2812_v39  ;;  %v2473_v47 = vadd.f32 %v2472_v44, %v1383_v41 }
 0x183   :  { %3198 = vst.msk [vmem:[#allocation2 + $0x258] sm:$0xff] %vm3122_vm1, %v3069_v42  ;;  %v2815_v48 = vadd.f32 %v6069_v5, %v2478_v43  ;;  %v4569_v50 = vpop.f32.mrb[78].mxu1  ;;  %v2953_v43 = vld [vmem:[%s6431_s5 + $0x2b8] sm:$0xff] }
 0x184   :  { %3197 = vst.msk [vmem:[#allocation2 + $0x250] sm:$0xff] %vm3122_vm1, %v3068_v45  ;;  %v2814_v51 = vadd.f32 %v6069_v5, %v2473_v47  ;;  %v4777_v52 = vpop.f32.mrb[78].mxu0  ;;  %v1393_v53 = vpop.f32.mrb[79].mxu1 }
 0x185   :  { %v3071_v54 = vadd.f32 %v2943_v46, %v2815_v48  ;;  %v2488_v55 = vadd.f32 %v4777_v52, %v4569_v50  ;;  %v2482_v56 = vpop.f32.mrb[79].mxu0  ;;  %v2952_v46 = vld [vmem:[%s6431_s5 + $0x2b0] sm:$0xff] }
 0x186   :  { %v3070_v57 = vadd.f32 %v2942_v49, %v2814_v51  ;;  %v2483_v59 = vadd.f32 %v2482_v56, %v1393_v53 }
 0x187   :  { %3200 = vst.msk [vmem:[#allocation2 + $0x268] sm:$0xff] %vm3122_vm1, %v3071_v54  ;;  %v2817_v60 = vadd.f32 %v6069_v5, %v2488_v55  ;;  %v4572_v62 = vpop.f32.mrb[80].mxu1  ;;  %v2955_v55 = vld [vmem:[%s6431_s5 + $0x2c8] sm:$0xff] }
 0x188   :  { %3199 = vst.msk [vmem:[#allocation2 + $0x260] sm:$0xff] %vm3122_vm1, %v3070_v57  ;;  %v2816_v63 = vadd.f32 %v6069_v5, %v2483_v59  ;;  %v4780_v0 = vpop.f32.mrb[80].mxu0  ;;  %v1403_v1 = vpop.f32.mrb[81].mxu1 }
 0x189   :  { %v3073_v2 = vadd.f32 %v2945_v58, %v2817_v60  ;;  %v2498_v3 = vadd.f32 %v4780_v0, %v4572_v62  ;;  %v2492_v4 = vpop.f32.mrb[81].mxu0  ;;  %v2954_v58 = vld [vmem:[%s6431_s5 + $0x2c0] sm:$0xff] }
 0x18a   :  { %v3072_v6 = vadd.f32 %v2944_v61, %v2816_v63  ;;  %v2493_v8 = vadd.f32 %v2492_v4, %v1403_v1 }
 0x18b   :  { %3202 = vst.msk [vmem:[#allocation2 + $0x278] sm:$0xff] %vm3122_vm1, %v3073_v2  ;;  %v2819_v9 = vadd.f32 %v6069_v5, %v2498_v3  ;;  %v4575_v11 = vpop.f32.mrb[82].mxu1  ;;  %v2957_v3 = vld [vmem:[%s6431_s5 + $0x2d8] sm:$0xff] }
 0x18c   :  { %3201 = vst.msk [vmem:[#allocation2 + $0x270] sm:$0xff] %vm3122_vm1, %v3072_v6  ;;  %v2818_v36 = vadd.f32 %v6069_v5, %v2493_v8  ;;  %v4783_v12 = vpop.f32.mrb[82].mxu0  ;;  %v1413_v13 = vpop.f32.mrb[83].mxu1 }
 0x18d   :  { %v3075_v14 = vadd.f32 %v2947_v7, %v2819_v9  ;;  %v2508_v15 = vadd.f32 %v4783_v12, %v4575_v11  ;;  %v2502_v16 = vpop.f32.mrb[83].mxu0  ;;  %v2956_v7 = vld [vmem:[%s6431_s5 + $0x2d0] sm:$0xff] }
 0x18e   :  { %v3074_v17 = vadd.f32 %v2946_v10, %v2818_v36  ;;  %v2503_v19 = vadd.f32 %v2502_v16, %v1413_v13 }
 0x18f   :  { %3204 = vst.msk [vmem:[#allocation2 + $0x288] sm:$0xff] %vm3122_vm1, %v3075_v14  ;;  %v2821_v20 = vadd.f32 %v6069_v5, %v2508_v15  ;;  %v4578_v22 = vpop.f32.mrb[84].mxu1  ;;  %v2959_v15 = vld [vmem:[%s6431_s5 + $0x2e8] sm:$0xff] }
 0x190   :  { %3203 = vst.msk [vmem:[#allocation2 + $0x280] sm:$0xff] %vm3122_vm1, %v3074_v17  ;;  %v2820_v23 = vadd.f32 %v6069_v5, %v2503_v19  ;;  %v4786_v24 = vpop.f32.mrb[84].mxu0  ;;  %v1423_v25 = vpop.f32.mrb[85].mxu1 }
 0x191   :  { %v3077_v26 = vadd.f32 %v2949_v18, %v2821_v20  ;;  %v2518_v27 = vadd.f32 %v4786_v24, %v4578_v22  ;;  %v2512_v28 = vpop.f32.mrb[85].mxu0  ;;  %v2958_v18 = vld [vmem:[%s6431_s5 + $0x2e0] sm:$0xff] }
 0x192   :  { %v3076_v29 = vadd.f32 %v2948_v21, %v2820_v23  ;;  %v2513_v31 = vadd.f32 %v2512_v28, %v1423_v25 }
 0x193   :  { %3206 = vst.msk [vmem:[#allocation2 + $0x298] sm:$0xff] %vm3122_vm1, %v3077_v26  ;;  %v2823_v32 = vadd.f32 %v6069_v5, %v2518_v27  ;;  %v4581_v34 = vpop.f32.mrb[86].mxu1  ;;  %v2961_v27 = vld [vmem:[%s6431_s5 + $0x2f8] sm:$0xff] }
 0x194   :  { %3205 = vst.msk [vmem:[#allocation2 + $0x290] sm:$0xff] %vm3122_vm1, %v3076_v29  ;;  %v2822_v35 = vadd.f32 %v6069_v5, %v2513_v31  ;;  %v4789_v37 = vpop.f32.mrb[86].mxu0  ;;  %v1433_v38 = vpop.f32.mrb[87].mxu1 }
 0x195   :  { %v3079_v39 = vadd.f32 %v2951_v30, %v2823_v32  ;;  %v2528_v40 = vadd.f32 %v4789_v37, %v4581_v34  ;;  %v2522_v41 = vpop.f32.mrb[87].mxu0  ;;  %v2960_v30 = vld [vmem:[%s6431_s5 + $0x2f0] sm:$0xff] }
 0x196   :  { %v3078_v42 = vadd.f32 %v2950_v33, %v2822_v35  ;;  %v2523_v44 = vadd.f32 %v2522_v41, %v1433_v38 }
 0x197   :  { %3208 = vst.msk [vmem:[#allocation2 + $0x2a8] sm:$0xff] %vm3122_vm1, %v3079_v39  ;;  %v2825_v45 = vadd.f32 %v6069_v5, %v2528_v40  ;;  %v4584_v47 = vpop.f32.mrb[88].mxu1  ;;  %v2963_v40 = vld [vmem:[%s6431_s5 + $0x308] sm:$0xff] }
 0x198   :  { %3207 = vst.msk [vmem:[#allocation2 + $0x2a0] sm:$0xff] %vm3122_vm1, %v3078_v42  ;;  %v2824_v48 = vadd.f32 %v6069_v5, %v2523_v44  ;;  %v4792_v49 = vpop.f32.mrb[88].mxu0  ;;  %v1443_v50 = vpop.f32.mrb[89].mxu1 }
 0x199   :  { %v3081_v51 = vadd.f32 %v2953_v43, %v2825_v45  ;;  %v2538_v52 = vadd.f32 %v4792_v49, %v4584_v47  ;;  %v2532_v53 = vpop.f32.mrb[89].mxu0  ;;  %v2962_v43 = vld [vmem:[%s6431_s5 + $0x300] sm:$0xff] }
 0x19a   :  { %v3080_v54 = vadd.f32 %v2952_v46, %v2824_v48  ;;  %v2533_v56 = vadd.f32 %v2532_v53, %v1443_v50 }
 0x19b   :  { %3210 = vst.msk [vmem:[#allocation2 + $0x2b8] sm:$0xff] %vm3122_vm1, %v3081_v51  ;;  %v2827_v57 = vadd.f32 %v6069_v5, %v2538_v52  ;;  %v4587_v59 = vpop.f32.mrb[90].mxu1  ;;  %v2965_v52 = vld [vmem:[%s6431_s5 + $0x318] sm:$0xff] }
 0x19c   :  { %3209 = vst.msk [vmem:[#allocation2 + $0x2b0] sm:$0xff] %vm3122_vm1, %v3080_v54  ;;  %v2826_v60 = vadd.f32 %v6069_v5, %v2533_v56  ;;  %v4795_v61 = vpop.f32.mrb[90].mxu0  ;;  %v1453_v62 = vpop.f32.mrb[91].mxu1 }
 0x19d   :  { %v3083_v63 = vadd.f32 %v2955_v55, %v2827_v57  ;;  %v2548_v0 = vadd.f32 %v4795_v61, %v4587_v59  ;;  %v2542_v1 = vpop.f32.mrb[91].mxu0  ;;  %v2964_v55 = vld [vmem:[%s6431_s5 + $0x310] sm:$0xff] }
 0x19e   :  { %v3082_v2 = vadd.f32 %v2954_v58, %v2826_v60  ;;  %v2543_v4 = vadd.f32 %v2542_v1, %v1453_v62 }
 0x19f   :  { %3212 = vst.msk [vmem:[#allocation2 + $0x2c8] sm:$0xff] %vm3122_vm1, %v3083_v63  ;;  %v2829_v6 = vadd.f32 %v6069_v5, %v2548_v0  ;;  %v4590_v8 = vpop.f32.mrb[92].mxu1  ;;  %v2967_v0 = vld [vmem:[%s6431_s5 + $0x328] sm:$0xff] }
 0x1a0   :  { %3211 = vst.msk [vmem:[#allocation2 + $0x2c0] sm:$0xff] %vm3122_vm1, %v3082_v2  ;;  %v2828_v9 = vadd.f32 %v6069_v5, %v2543_v4  ;;  %v4798_v10 = vpop.f32.mrb[92].mxu0  ;;  %v1463_v11 = vpop.f32.mrb[93].mxu1 }
 0x1a1   :  { %v3085_v36 = vadd.f32 %v2957_v3, %v2829_v6  ;;  %v2558_v12 = vadd.f32 %v4798_v10, %v4590_v8  ;;  %v2552_v13 = vpop.f32.mrb[93].mxu0  ;;  %v2966_v3 = vld [vmem:[%s6431_s5 + $0x320] sm:$0xff] }
 0x1a2   :  { %v3084_v14 = vadd.f32 %v2956_v7, %v2828_v9  ;;  %v2553_v16 = vadd.f32 %v2552_v13, %v1463_v11 }
 0x1a3   :  { %3214 = vst.msk [vmem:[#allocation2 + $0x2d8] sm:$0xff] %vm3122_vm1, %v3085_v36  ;;  %v2831_v17 = vadd.f32 %v6069_v5, %v2558_v12  ;;  %v4593_v19 = vpop.f32.mrb[94].mxu1  ;;  %v2969_v12 = vld [vmem:[%s6431_s5 + $0x338] sm:$0xff] }
 0x1a4   :  { %3213 = vst.msk [vmem:[#allocation2 + $0x2d0] sm:$0xff] %vm3122_vm1, %v3084_v14  ;;  %v2830_v20 = vadd.f32 %v6069_v5, %v2553_v16  ;;  %v4801_v21 = vpop.f32.mrb[94].mxu0  ;;  %v1473_v22 = vpop.f32.mrb[95].mxu1 }
 0x1a5   :  { %v3087_v23 = vadd.f32 %v2959_v15, %v2831_v17  ;;  %v2568_v24 = vadd.f32 %v4801_v21, %v4593_v19  ;;  %v2562_v25 = vpop.f32.mrb[95].mxu0  ;;  %v2968_v15 = vld [vmem:[%s6431_s5 + $0x330] sm:$0xff] }
 0x1a6   :  { %v3086_v26 = vadd.f32 %v2958_v18, %v2830_v20  ;;  %v2563_v28 = vadd.f32 %v2562_v25, %v1473_v22 }
 0x1a7   :  { %3216 = vst.msk [vmem:[#allocation2 + $0x2e8] sm:$0xff] %vm3122_vm1, %v3087_v23  ;;  %v2833_v29 = vadd.f32 %v6069_v5, %v2568_v24  ;;  %v4596_v31 = vpop.f32.mrb[96].mxu1  ;;  %v2971_v24 = vld [vmem:[%s6431_s5 + $0x348] sm:$0xff] }
 0x1a8   :  { %3215 = vst.msk [vmem:[#allocation2 + $0x2e0] sm:$0xff] %vm3122_vm1, %v3086_v26  ;;  %v2832_v32 = vadd.f32 %v6069_v5, %v2563_v28  ;;  %v4804_v33 = vpop.f32.mrb[96].mxu0  ;;  %v1483_v34 = vpop.f32.mrb[97].mxu1 }
 0x1a9   :  { %v3089_v35 = vadd.f32 %v2961_v27, %v2833_v29  ;;  %v2578_v37 = vadd.f32 %v4804_v33, %v4596_v31  ;;  %v2572_v38 = vpop.f32.mrb[97].mxu0  ;;  %v2970_v27 = vld [vmem:[%s6431_s5 + $0x340] sm:$0xff] }
 0x1aa   :  { %v3088_v39 = vadd.f32 %v2960_v30, %v2832_v32  ;;  %v2573_v41 = vadd.f32 %v2572_v38, %v1483_v34 }
 0x1ab   :  { %3218 = vst.msk [vmem:[#allocation2 + $0x2f8] sm:$0xff] %vm3122_vm1, %v3089_v35  ;;  %v2835_v42 = vadd.f32 %v6069_v5, %v2578_v37  ;;  %v4599_v44 = vpop.f32.mrb[98].mxu1  ;;  %v2973_v37 = vld [vmem:[%s6431_s5 + $0x358] sm:$0xff] }
 0x1ac   :  { %3217 = vst.msk [vmem:[#allocation2 + $0x2f0] sm:$0xff] %vm3122_vm1, %v3088_v39  ;;  %v2834_v45 = vadd.f32 %v6069_v5, %v2573_v41  ;;  %v4807_v46 = vpop.f32.mrb[98].mxu0  ;;  %v1493_v47 = vpop.f32.mrb[99].mxu1 }
 0x1ad   :  { %v3091_v48 = vadd.f32 %v2963_v40, %v2835_v42  ;;  %v2588_v49 = vadd.f32 %v4807_v46, %v4599_v44  ;;  %v2582_v50 = vpop.f32.mrb[99].mxu0  ;;  %v2972_v40 = vld [vmem:[%s6431_s5 + $0x350] sm:$0xff] }
 0x1ae   :  { %v3090_v51 = vadd.f32 %v2962_v43, %v2834_v45  ;;  %v2583_v53 = vadd.f32 %v2582_v50, %v1493_v47 }
 0x1af   :  { %3220 = vst.msk [vmem:[#allocation2 + $0x308] sm:$0xff] %vm3122_vm1, %v3091_v48  ;;  %v2837_v54 = vadd.f32 %v6069_v5, %v2588_v49  ;;  %v4602_v56 = vpop.f32.mrb[100].mxu1  ;;  %v2975_v49 = vld [vmem:[%s6431_s5 + $0x368] sm:$0xff] }
 0x1b0   :  { %3219 = vst.msk [vmem:[#allocation2 + $0x300] sm:$0xff] %vm3122_vm1, %v3090_v51  ;;  %v2836_v57 = vadd.f32 %v6069_v5, %v2583_v53  ;;  %v4810_v58 = vpop.f32.mrb[100].mxu0  ;;  %v1503_v59 = vpop.f32.mrb[101].mxu1 }
 0x1b1   :  { %v3093_v60 = vadd.f32 %v2965_v52, %v2837_v54  ;;  %v2598_v61 = vadd.f32 %v4810_v58, %v4602_v56  ;;  %v2592_v62 = vpop.f32.mrb[101].mxu0  ;;  %v2974_v52 = vld [vmem:[%s6431_s5 + $0x360] sm:$0xff] }
 0x1b2   :  { %v3092_v63 = vadd.f32 %v2964_v55, %v2836_v57  ;;  %v2593_v1 = vadd.f32 %v2592_v62, %v1503_v59 }
 0x1b3   :  { %3222 = vst.msk [vmem:[#allocation2 + $0x318] sm:$0xff] %vm3122_vm1, %v3093_v60  ;;  %v2839_v2 = vadd.f32 %v6069_v5, %v2598_v61  ;;  %v4605_v4 = vpop.f32.mrb[102].mxu1  ;;  %v2977_v61 = vld [vmem:[%s6431_s5 + $0x378] sm:$0xff] }
 0x1b4   :  { %3221 = vst.msk [vmem:[#allocation2 + $0x310] sm:$0xff] %vm3122_vm1, %v3092_v63  ;;  %v2838_v6 = vadd.f32 %v6069_v5, %v2593_v1  ;;  %v4813_v7 = vpop.f32.mrb[102].mxu0  ;;  %v1513_v8 = vpop.f32.mrb[103].mxu1 }
 0x1b5   :  { %v3095_v9 = vadd.f32 %v2967_v0, %v2839_v2  ;;  %v2608_v10 = vadd.f32 %v4813_v7, %v4605_v4  ;;  %v2602_v11 = vpop.f32.mrb[103].mxu0  ;;  %v2976_v0 = vld [vmem:[%s6431_s5 + $0x370] sm:$0xff] }
 0x1b6   :  { %v3094_v36 = vadd.f32 %v2966_v3, %v2838_v6  ;;  %v2603_v13 = vadd.f32 %v2602_v11, %v1513_v8 }
 0x1b7   :  { %3224 = vst.msk [vmem:[#allocation2 + $0x328] sm:$0xff] %vm3122_vm1, %v3095_v9  ;;  %v2841_v14 = vadd.f32 %v6069_v5, %v2608_v10  ;;  %v4608_v16 = vpop.f32.mrb[104].mxu1  ;;  %v2979_v10 = vld [vmem:[%s6431_s5 + $0x388] sm:$0xff] }
 0x1b8   :  { %3223 = vst.msk [vmem:[#allocation2 + $0x320] sm:$0xff] %vm3122_vm1, %v3094_v36  ;;  %v2840_v17 = vadd.f32 %v6069_v5, %v2603_v13  ;;  %v4816_v18 = vpop.f32.mrb[104].mxu0  ;;  %v1523_v19 = vpop.f32.mrb[105].mxu1 }
 0x1b9   :  { %v3097_v20 = vadd.f32 %v2969_v12, %v2841_v14  ;;  %v2618_v21 = vadd.f32 %v4816_v18, %v4608_v16  ;;  %v2612_v22 = vpop.f32.mrb[105].mxu0  ;;  %v2978_v12 = vld [vmem:[%s6431_s5 + $0x380] sm:$0xff] }
 0x1ba   :  { %v3096_v23 = vadd.f32 %v2968_v15, %v2840_v17  ;;  %v2613_v25 = vadd.f32 %v2612_v22, %v1523_v19 }
 0x1bb   :  { %3226 = vst.msk [vmem:[#allocation2 + $0x338] sm:$0xff] %vm3122_vm1, %v3097_v20  ;;  %v2843_v26 = vadd.f32 %v6069_v5, %v2618_v21  ;;  %v4611_v28 = vpop.f32.mrb[106].mxu1  ;;  %v2981_v21 = vld [vmem:[%s6431_s5 + $0x398] sm:$0xff] }
 0x1bc   :  { %3225 = vst.msk [vmem:[#allocation2 + $0x330] sm:$0xff] %vm3122_vm1, %v3096_v23  ;;  %v2842_v29 = vadd.f32 %v6069_v5, %v2613_v25  ;;  %v4819_v30 = vpop.f32.mrb[106].mxu0  ;;  %v1533_v31 = vpop.f32.mrb[107].mxu1 }
 0x1bd   :  { %v3099_v32 = vadd.f32 %v2971_v24, %v2843_v26  ;;  %v2628_v33 = vadd.f32 %v4819_v30, %v4611_v28  ;;  %v2622_v34 = vpop.f32.mrb[107].mxu0  ;;  %v2980_v24 = vld [vmem:[%s6431_s5 + $0x390] sm:$0xff] }
 0x1be   :  { %v3098_v35 = vadd.f32 %v2970_v27, %v2842_v29  ;;  %v2623_v38 = vadd.f32 %v2622_v34, %v1533_v31 }
 0x1bf   :  { %3228 = vst.msk [vmem:[#allocation2 + $0x348] sm:$0xff] %vm3122_vm1, %v3099_v32  ;;  %v2845_v39 = vadd.f32 %v6069_v5, %v2628_v33  ;;  %v4614_v41 = vpop.f32.mrb[108].mxu1  ;;  %v2983_v33 = vld [vmem:[%s6431_s5 + $0x3a8] sm:$0xff] }
 0x1c0   :  { %3227 = vst.msk [vmem:[#allocation2 + $0x340] sm:$0xff] %vm3122_vm1, %v3098_v35  ;;  %v2844_v42 = vadd.f32 %v6069_v5, %v2623_v38  ;;  %v4822_v43 = vpop.f32.mrb[108].mxu0  ;;  %v1543_v44 = vpop.f32.mrb[109].mxu1 }
 0x1c1   :  { %v3101_v45 = vadd.f32 %v2973_v37, %v2845_v39  ;;  %v2638_v46 = vadd.f32 %v4822_v43, %v4614_v41  ;;  %v2632_v47 = vpop.f32.mrb[109].mxu0  ;;  %v2982_v37 = vld [vmem:[%s6431_s5 + $0x3a0] sm:$0xff] }
 0x1c2   :  { %v3100_v48 = vadd.f32 %v2972_v40, %v2844_v42  ;;  %v2633_v50 = vadd.f32 %v2632_v47, %v1543_v44 }
 0x1c3   :  { %3230 = vst.msk [vmem:[#allocation2 + $0x358] sm:$0xff] %vm3122_vm1, %v3101_v45  ;;  %v2847_v51 = vadd.f32 %v6069_v5, %v2638_v46  ;;  %v4617_v53 = vpop.f32.mrb[110].mxu1  ;;  %v2985_v46 = vld [vmem:[%s6431_s5 + $0x3b8] sm:$0xff] }
 0x1c4   :  { %3229 = vst.msk [vmem:[#allocation2 + $0x350] sm:$0xff] %vm3122_vm1, %v3100_v48  ;;  %v2846_v54 = vadd.f32 %v6069_v5, %v2633_v50  ;;  %v4825_v55 = vpop.f32.mrb[110].mxu0  ;;  %v1553_v56 = vpop.f32.mrb[111].mxu1 }
 0x1c5   :  { %v3103_v57 = vadd.f32 %v2975_v49, %v2847_v51  ;;  %v2648_v58 = vadd.f32 %v4825_v55, %v4617_v53  ;;  %v2642_v59 = vpop.f32.mrb[111].mxu0  ;;  %v2984_v49 = vld [vmem:[%s6431_s5 + $0x3b0] sm:$0xff] }
 0x1c6   :  { %v3102_v60 = vadd.f32 %v2974_v52, %v2846_v54  ;;  %v2643_v62 = vadd.f32 %v2642_v59, %v1553_v56 }
 0x1c7   :  { %3232 = vst.msk [vmem:[#allocation2 + $0x368] sm:$0xff] %vm3122_vm1, %v3103_v57  ;;  %v2849_v63 = vadd.f32 %v6069_v5, %v2648_v58  ;;  %v4620_v1 = vpop.f32.mrb[112].mxu1  ;;  %v2987_v58 = vld [vmem:[%s6431_s5 + $0x3c8] sm:$0xff] }
 0x1c8   :  { %3231 = vst.msk [vmem:[#allocation2 + $0x360] sm:$0xff] %vm3122_vm1, %v3102_v60  ;;  %v2848_v2 = vadd.f32 %v6069_v5, %v2643_v62  ;;  %v4828_v3 = vpop.f32.mrb[112].mxu0  ;;  %v1563_v4 = vpop.f32.mrb[113].mxu1 }
 0x1c9   :  { %v3105_v6 = vadd.f32 %v2977_v61, %v2849_v63  ;;  %v2658_v7 = vadd.f32 %v4828_v3, %v4620_v1  ;;  %v2652_v8 = vpop.f32.mrb[113].mxu0  ;;  %v2986_v61 = vld [vmem:[%s6431_s5 + $0x3c0] sm:$0xff] }
 0x1ca   :  { %v3104_v9 = vadd.f32 %v2976_v0, %v2848_v2  ;;  %v2653_v11 = vadd.f32 %v2652_v8, %v1563_v4 }
 0x1cb   :  { %3234 = vst.msk [vmem:[#allocation2 + $0x378] sm:$0xff] %vm3122_vm1, %v3105_v6  ;;  %v2851_v36 = vadd.f32 %v6069_v5, %v2658_v7  ;;  %v4623_v13 = vpop.f32.mrb[114].mxu1  ;;  %v2989_v7 = vld [vmem:[%s6431_s5 + $0x3d8] sm:$0xff] }
 0x1cc   :  { %3233 = vst.msk [vmem:[#allocation2 + $0x370] sm:$0xff] %vm3122_vm1, %v3104_v9  ;;  %v2850_v14 = vadd.f32 %v6069_v5, %v2653_v11  ;;  %v4831_v15 = vpop.f32.mrb[114].mxu0  ;;  %v1573_v16 = vpop.f32.mrb[115].mxu1 }
 0x1cd   :  { %v3107_v17 = vadd.f32 %v2979_v10, %v2851_v36  ;;  %v2668_v18 = vadd.f32 %v4831_v15, %v4623_v13  ;;  %v2662_v19 = vpop.f32.mrb[115].mxu0  ;;  %v2988_v10 = vld [vmem:[%s6431_s5 + $0x3d0] sm:$0xff] }
 0x1ce   :  { %v3106_v20 = vadd.f32 %v2978_v12, %v2850_v14  ;;  %v2663_v22 = vadd.f32 %v2662_v19, %v1573_v16 }
 0x1cf   :  { %3236 = vst.msk [vmem:[#allocation2 + $0x388] sm:$0xff] %vm3122_vm1, %v3107_v17  ;;  %v2853_v23 = vadd.f32 %v6069_v5, %v2668_v18  ;;  %v4626_v25 = vpop.f32.mrb[116].mxu1  ;;  %v2991_v18 = vld [vmem:[%s6431_s5 + $0x3e8] sm:$0xff] }
 0x1d0   :  { %3235 = vst.msk [vmem:[#allocation2 + $0x380] sm:$0xff] %vm3122_vm1, %v3106_v20  ;;  %v2852_v26 = vadd.f32 %v6069_v5, %v2663_v22  ;;  %v4834_v27 = vpop.f32.mrb[116].mxu0  ;;  %v1583_v28 = vpop.f32.mrb[117].mxu1 }
 0x1d1   :  { %v3109_v29 = vadd.f32 %v2981_v21, %v2853_v23  ;;  %v2678_v30 = vadd.f32 %v4834_v27, %v4626_v25  ;;  %v2672_v31 = vpop.f32.mrb[117].mxu0  ;;  %v2990_v21 = vld [vmem:[%s6431_s5 + $0x3e0] sm:$0xff] }
 0x1d2   :  { %v3108_v32 = vadd.f32 %v2980_v24, %v2852_v26  ;;  %v2673_v34 = vadd.f32 %v2672_v31, %v1583_v28 }
 0x1d3   :  { %3238 = vst.msk [vmem:[#allocation2 + $0x398] sm:$0xff] %vm3122_vm1, %v3109_v29  ;;  %v2855_v35 = vadd.f32 %v6069_v5, %v2678_v30  ;;  %v4629_v38 = vpop.f32.mrb[118].mxu1  ;;  %v2993_v30 = vld [vmem:[%s6431_s5 + $0x3f8] sm:$0xff] }
 0x1d4   :  { %3237 = vst.msk [vmem:[#allocation2 + $0x390] sm:$0xff] %vm3122_vm1, %v3108_v32  ;;  %v2854_v39 = vadd.f32 %v6069_v5, %v2673_v34  ;;  %v4837_v40 = vpop.f32.mrb[118].mxu0  ;;  %v1593_v41 = vpop.f32.mrb[119].mxu1 }
 0x1d5   :  { %v3111_v42 = vadd.f32 %v2983_v33, %v2855_v35  ;;  %v2688_v43 = vadd.f32 %v4837_v40, %v4629_v38  ;;  %v2682_v44 = vpop.f32.mrb[119].mxu0  ;;  %v2992_v33 = vld [vmem:[%s6431_s5 + $0x3f0] sm:$0xff] }
 0x1d6   :  { %v3110_v45 = vadd.f32 %v2982_v37, %v2854_v39  ;;  %v2683_v47 = vadd.f32 %v2682_v44, %v1593_v41 }
 0x1d7   :  { %3240 = vst.msk [vmem:[#allocation2 + $0x3a8] sm:$0xff] %vm3122_vm1, %v3111_v42  ;;  %v2857_v48 = vadd.f32 %v6069_v5, %v2688_v43  ;;  %v4632_v50 = vpop.f32.mrb[120].mxu1 }
 0x1d8   :  { %3239 = vst.msk [vmem:[#allocation2 + $0x3a0] sm:$0xff] %vm3122_vm1, %v3110_v45  ;;  %v2856_v51 = vadd.f32 %v6069_v5, %v2683_v47  ;;  %v4840_v52 = vpop.f32.mrb[120].mxu0  ;;  %v1603_v53 = vpop.f32.mrb[121].mxu1 }
 0x1d9   :  { %v3113_v54 = vadd.f32 %v2985_v46, %v2857_v48  ;;  %v2698_v55 = vadd.f32 %v4840_v52, %v4632_v50  ;;  %v2692_v56 = vpop.f32.mrb[121].mxu0 }
 0x1da   :  { %v3112_v57 = vadd.f32 %v2984_v49, %v2856_v51  ;;  %v2693_v59 = vadd.f32 %v2692_v56, %v1603_v53 }
 0x1db   :  { %3242 = vst.msk [vmem:[#allocation2 + $0x3b8] sm:$0xff] %vm3122_vm1, %v3113_v54  ;;  %v2859_v60 = vadd.f32 %v6069_v5, %v2698_v55  ;;  %v4635_v62 = vpop.f32.mrb[122].mxu1 }
 0x1dc   :  { %3241 = vst.msk [vmem:[#allocation2 + $0x3b0] sm:$0xff] %vm3122_vm1, %v3112_v57  ;;  %v2858_v63 = vadd.f32 %v6069_v5, %v2693_v59  ;;  %v4843_v0 = vpop.f32.mrb[122].mxu0  ;;  %v1613_v1 = vpop.f32.mrb[123].mxu1 }
 0x1dd   :  { %v3115_v2 = vadd.f32 %v2987_v58, %v2859_v60  ;;  %v2708_v3 = vadd.f32 %v4843_v0, %v4635_v62  ;;  %v2702_v4 = vpop.f32.mrb[123].mxu0 }
 0x1de   :  { %v3114_v6 = vadd.f32 %v2986_v61, %v2858_v63  ;;  %v2703_v8 = vadd.f32 %v2702_v4, %v1613_v1 }
 0x1df   :  { %3244 = vst.msk [vmem:[#allocation2 + $0x3c8] sm:$0xff] %vm3122_vm1, %v3115_v2  ;;  %v2861_v9 = vadd.f32 %v6069_v5, %v2708_v3  ;;  %v4638_v11 = vpop.f32.mrb[124].mxu1 }
 0x1e0   :  { %3243 = vst.msk [vmem:[#allocation2 + $0x3c0] sm:$0xff] %vm3122_vm1, %v3114_v6  ;;  %v2860_v36 = vadd.f32 %v6069_v5, %v2703_v8  ;;  %v4846_v12 = vpop.f32.mrb[124].mxu0  ;;  %v1623_v13 = vpop.f32.mrb[125].mxu1 }
 0x1e1   :  { %v3117_v14 = vadd.f32 %v2989_v7, %v2861_v9  ;;  %v2718_v15 = vadd.f32 %v4846_v12, %v4638_v11  ;;  %v2712_v16 = vpop.f32.mrb[125].mxu0 }
 0x1e2   :  { %v3116_v17 = vadd.f32 %v2988_v10, %v2860_v36  ;;  %v2713_v19 = vadd.f32 %v2712_v16, %v1623_v13 }
 0x1e3   :  { %3246 = vst.msk [vmem:[#allocation2 + $0x3d8] sm:$0xff] %vm3122_vm1, %v3117_v14  ;;  %v2863_v20 = vadd.f32 %v6069_v5, %v2718_v15  ;;  %v4641_v22 = vpop.f32.mrb[126].mxu1 }
 0x1e4   :  { %3245 = vst.msk [vmem:[#allocation2 + $0x3d0] sm:$0xff] %vm3122_vm1, %v3116_v17  ;;  %v2862_v23 = vadd.f32 %v6069_v5, %v2713_v19  ;;  %v4849_v24 = vpop.f32.mrb[126].mxu0  ;;  %v1633_v25 = vpop.f32.mrb[127].mxu1 }
 0x1e5   :  { %v3119_v26 = vadd.f32 %v2991_v18, %v2863_v20  ;;  %v2728_v27 = vadd.f32 %v4849_v24, %v4641_v22  ;;  %v2722_v28 = vpop.f32.mrb[127].mxu0 }
 0x1e6   :  { %v3118_v29 = vadd.f32 %v2990_v21, %v2862_v23  ;;  %v2723_v31 = vadd.f32 %v2722_v28, %v1633_v25 }
 0x1e7   :  { %3248 = vst.msk [vmem:[#allocation2 + $0x3e8] sm:$0xff] %vm3122_vm1, %v3119_v26  ;;  %v2865_v32 = vadd.f32 %v6069_v5, %v2728_v27 }
 0x1e8   :  { %3247 = vst.msk [vmem:[#allocation2 + $0x3e0] sm:$0xff] %vm3122_vm1, %v3118_v29  ;;  %v2864_v34 = vadd.f32 %v6069_v5, %v2723_v31 }
 0x1e9   :  { %v3121_v35 = vadd.f32 %v2993_v30, %v2865_v32 }
 0x1ea   :  { %v3120_v37 = vadd.f32 %v2992_v33, %v2864_v34 }
 0x1eb   :  { %3250 = vst.msk [vmem:[#allocation2 + $0x3f8] sm:$0xff] %vm3122_vm1, %v3121_v35 }
 0x1ec   :  { %3249 = vst.msk [vmem:[#allocation2 + $0x3f0] sm:$0xff] %vm3122_vm1, %v3120_v37 }
 0x1ed   :  { %5025 = shalt.err (!%p5022_p4)
}
 0x1ee   :  { %s5026_s1 = scalar_lea.hbm %s6432_s6, 16384 }
 0x1ef   :  { %p5027_p5 = scmp.ne.s32.totalorder %s6432_s6, %s5026_s1  ;;  %p5030_p6 = scmp.lt.u32.totalorder %s5026_s1, %s6432_s6 }
 0x1f1   :  { %p5032_p7 = pnand %p5030_p6, %p5027_p5 }
 0x1f3   :  { %5035 = shalt.err (!%p5032_p7)
}
 0x1f4   :  { %s5039_s11 = smov 128   ;;  %s5040_s12 = smov 8  }
 0x1f5   :  { %3262 = dma.vmem_to_hbm [thread:$0]  %s3257_s29, 16384, %s6432_s6, [#allocation3], %s5039_s11, %s5039_s11, %s5040_s12  }
 0x1f6   :  { %5036 = dma.done.wait [#allocation3], 16384  }
 0x1f7   :  { %5037 = vsyncadd [#allocation3], 4294950912 }
 0x1f8   :  { %3266 = vsyncpa [#allocation3], 1 }

</bundles_post_ra>
